<compile_context>
chip_gen: v7x
topology: tpu7x:2x2x1
jax: 0.10.0
libtpu: 0.0.40
codegen_flags: <defaults>
</compile_context>

<pallas_src>
import functools

import numpy as np
import jax
import jax.numpy as jnp
from jax.experimental import pallas as pl
from jax.experimental.pallas import tpu as pltpu

# ----------------------------------------------------------------------------
# Model hyper-parameters (consistent with the module's __init__)
# ----------------------------------------------------------------------------
HIDDEN_DIM = 32           # self.hidden_dim
EMBED_DIM = 32            # self.embed_dim
NUM_LAYERS = 2            # self.num_layers (hard-wired in the fused recurrence)
HALF = HIDDEN_DIM // 2    # per-direction LSTM hidden size (16)
N_AGG = 6                 # len(self.agg_ops)
N_COND_NUM = 5            # number-of-conditions classes
N_COND_OP = 3             # condition operators (=, >, <)
VOCAB = 100

NQ = 3                    # question-encoder streams: [agg, sel, cond]
NC = 2                    # column-encoder streams:  [sel, cond]
Q_NH = NQ * 2 * HALF      # merged question hidden width  = 96
Q_NG = 4 * Q_NH           # merged question gate width    = 384
C_NH = NC * 2 * HALF      # merged column hidden width    = 64
C_NG = 4 * C_NH           # merged column gate width      = 256

Q_AGG, Q_SEL, Q_COND = 0, 1, 2
C_SEL, C_COND = 0, 1

NEG_INF = -1e9
VMEM = pl.BlockSpec(memory_space=pltpu.MemorySpace.VMEM)


# ----------------------------------------------------------------------------
# The single fused kernel
# ----------------------------------------------------------------------------
def sqlnet_fused_kernel(
    emb_ref, qids_ref, qlen_ref, cids_ref,
    qw1f_ref, qw1b_ref, qwhh1_ref, qb1_ref, qw2f_ref, qw2b_ref, qwhh2_ref, qb2_ref,
    cw1f_ref, cw1b_ref, cwhh1_ref, cb1_ref, cw2f_ref, cw2b_ref, cwhh2_ref, cb2_ref,
    attq_ref,
    agg_w1_ref, agg_b1_ref, agg_w2_ref, agg_b2_ref,
    num_w1_ref, num_b1_ref, num_w2_ref, num_b2_ref,
    sel_wk_ref, sel_wc_ref, sel_wo_ref, sel_bo_ref,
    ccol_wk_ref, ccol_wc_ref, ccol_wo_ref, ccol_bo_ref,
    cop_wk_ref, cop_wc_ref, cop_wo_ref, cop_bo_ref,
    cstr_wp_ref,
    agg_out, num_out, sel_out, ccol_out, cop_out, cstr_out,
):
    f32 = jnp.float32
    V, E = emb_ref.shape
    B = qlen_ref.shape[0]
    T = qids_ref.shape[0] // B
    C = cstr_out.shape[1]
    BC = B * C
    L = cids_ref.shape[0] // BC

    emb = emb_ref[...]                                    # (V, E) resident in VMEM

    # ---- embedding lookup as a one-hot matmul (MXU gather, no dynamic slices)
    def embed(ids):                                       # ids: (S, 1) int32
        S = ids.shape[0]
        onehot = (ids == jax.lax.broadcasted_iota(jnp.int32, (S, V), 1)).astype(f32)
        return jnp.dot(onehot, emb, preferred_element_type=f32)   # (S, E)

    xq = embed(qids_ref[...])                             # (T*B, E)  time-major rows
    xc = embed(cids_ref[...])                             # (L*BC, E) time-major rows

    # ---- merged 2-layer bidirectional LSTM encoder ---------------------------
    # All streams and both directions advance in lock-step; the only serial work
    # per step is one (bb, nh) @ (nh, 4*nh) matmul on the block-diagonal Whh.
    # TODO(synk): pack_padded_sequence semantics approximated -- the recurrence
    # runs over padded positions; padding is masked at attention time instead.
    def bidir_encode(x_flat, steps, bb, nh,
                     w1f, w1b, whh1, b1, w2f, w2b, whh2, b2):
        half = nh // 2
        fwd_lane = jax.lax.broadcasted_iota(jnp.int32, (bb, nh), 1) < half

        def run(gxf, gxb, whh, bias):
            # gxf/gxb: (steps*bb, 4*nh) hoisted fwd/bwd input projections.
            h = jnp.zeros((bb, nh), f32)
            c = jnp.zeros((bb, nh), f32)
            outs = []
            for k in range(steps):                        # fully unrolled (small T)
                g = (gxf[k * bb:(k + 1) * bb, :]
                     + gxb[(steps - 1 - k) * bb:(steps - k) * bb, :]
                     + bias
                     + jnp.dot(h, whh, preferred_element_type=f32))
                i_g = jax.nn.sigmoid(g[:, 0 * nh:1 * nh])
                f_g = jax.nn.sigmoid(g[:, 1 * nh:2 * nh])
                g_g = jnp.tanh(g[:, 2 * nh:3 * nh])
                o_g = jax.nn.sigmoid(g[:, 3 * nh:4 * nh])
                c = f_g * c + i_g * g_g
                h = o_g * jnp.tanh(c)
                outs.append(h)
            # bidirectional output at time t: fwd half from step t,
            # bwd half from step steps-1-t (bwd unit consumed x[steps-1-k] at step k)
            return [jnp.where(fwd_lane, outs[t], outs[steps - 1 - t])
                    for t in range(steps)]

        m1 = run(jnp.dot(x_flat, w1f, preferred_element_type=f32),
                 jnp.dot(x_flat, w1b, preferred_element_type=f32), whh1, b1)
        m1_flat = jnp.concatenate(m1, axis=0)             # (steps*bb, nh)
        m2 = run(jnp.dot(m1_flat, w2f, preferred_element_type=f32),
                 jnp.dot(m1_flat, w2b, preferred_element_type=f32), whh2, b2)
        return m2                                          # list of (bb, nh)

    m2q = bidir_encode(xq, T, B, Q_NH,
                       qw1f_ref[...], qw1b_ref[...], qwhh1_ref[...], qb1_ref[...],
                       qw2f_ref[...], qw2b_ref[...], qwhh2_ref[...], qb2_ref[...])
    m2c = bidir_encode(xc, L, BC, C_NH,
                       cw1f_ref[...], cw1b_ref[...], cwhh1_ref[...], cb1_ref[...],
                       cw2f_ref[...], cw2b_ref[...], cwhh2_ref[...], cb2_ref[...])

    hq3 = jnp.stack(m2q, axis=0)                          # (T, B, Q_NH)
    # Column encoding = output at the last name-token position (both directions),
    # matching col_name_encode's index-at-(length-1) convention.
    # TODO(synk): column-name padding inside L is not masked.
    e_col = m2c[L - 1]                                    # (BC, C_NH)

    # ---- all four attention poolings share one merged projection -------------
    qlen = qlen_ref[...]                                  # (B, 1) int32
    attq = attq_ref[...]                                  # (Q_NH, 4)
    scores = jnp.stack(
        [jnp.dot(m2q[t], attq, preferred_element_type=f32) for t in range(T)],
        axis=0)                                           # (T, B, 4)
    tmask = jax.lax.broadcasted_iota(jnp.int32, (T, B, 1), 0) < qlen[None, :, :]
    probs = jax.nn.softmax(jnp.where(tmask, scores, NEG_INF), axis=0)   # (T, B, 4)

    def pool(j):                                          # -> (B, Q_NH)
        return jnp.sum(probs[:, :, j:j + 1] * hq3, axis=0)

    k_agg, k_num, k_col, k_sel = pool(0), pool(1), pool(2), pool(3)

    # ---- Agg / cond-number MLP heads ------------------------------------------
    def mlp(k, w1, b1, w2, b2):
        hdn = jnp.tanh(jnp.dot(k, w1, preferred_element_type=f32) + b1)
        return jnp.dot(hdn, w2, preferred_element_type=f32) + b2

    agg_out[...] = mlp(k_agg, agg_w1_ref[...], agg_b1_ref[...],
                       agg_w2_ref[...], agg_b2_ref[...])                 # (B, 6)
    num_out[...] = mlp(k_num, num_w1_ref[...], num_b1_ref[...],
                       num_w2_ref[...], num_b2_ref[...])                 # (B, 5)

    # ---- column-conditioned heads: flattened (B*C, .) 2-D dots ----------------
    def col_head(kq, wk, wc, wo, bo):
        kp = jnp.dot(kq, wk, preferred_element_type=f32)                 # (B, H)
        kp_rep = jnp.concatenate(
            [jnp.broadcast_to(kp[b:b + 1, :], (C, HIDDEN_DIM)) for b in range(B)],
            axis=0)                                                      # (BC, H)
        cp = jnp.dot(e_col, wc, preferred_element_type=f32)              # (BC, H)
        comb = jnp.tanh(cp + kp_rep)
        return jnp.dot(comb, wo, preferred_element_type=f32) + bo        # (BC, o)

    sel_out[...] = col_head(k_sel, sel_wk_ref[...], sel_wc_ref[...],
                            sel_wo_ref[...], sel_bo_ref[...])            # (BC, 1)
    ccol_out[...] = col_head(k_col, ccol_wk_ref[...], ccol_wc_ref[...],
                             ccol_wo_ref[...], ccol_bo_ref[...])         # (BC, 1)
    cop_out[...] = col_head(k_col, cop_wk_ref[...], cop_wc_ref[...],
                            cop_wo_ref[...], cop_bo_ref[...])            # (BC, 3)

    # ---- condition-string pointer scores ---------------------------------------
    # TODO(synk): teacher-forced gt_where LSTM decoder has no clean static-shape
    # equivalent; replaced by a bilinear pointer score over question positions.
    proj = jnp.dot(e_col, cstr_wp_ref[...], preferred_element_type=f32)  # (BC, Q_NH)
    hq_b = [jnp.concatenate([m2q[t][b:b + 1, :] for t in range(T)], axis=0)
            for b in range(B)]                                           # B x (T, Q_NH)
    sc = jnp.stack(
        [jax.lax.dot_general(proj[b * C:(b + 1) * C, :], hq_b[b],
                             (((1,), (1,)), ((), ())),
                             preferred_element_type=f32)
         for b in range(B)], axis=0)                                     # (B, C, T)
    mask_bt = jax.lax.broadcasted_iota(jnp.int32, (B, T), 1) < qlen      # (B, T)
    cstr_out[...] = jnp.where(mask_bt[:, None, :], sc, NEG_INF)


# ----------------------------------------------------------------------------
# Parameter init: raw per-stream weights -> merged block-diagonal / padded mats
# ----------------------------------------------------------------------------
def _randn(key, shape, scale=0.1):
    return scale * jax.random.normal(key, shape, dtype=jnp.float32)


def _init_raw_bilstm(key, n_streams, in_dim):
    ks = jax.random.split(key, 6)
    g = 4 * HALF
    return {
        'wih1': np.asarray(_randn(ks[0], (n_streams, 2, in_dim, g))),
        'whh1': np.asarray(_randn(ks[1], (n_streams, 2, HALF, g))),
        'b1':   np.asarray(_randn(ks[2], (n_streams, 2, g))),
        'wih2': np.asarray(_randn(ks[3], (n_streams, 2, HIDDEN_DIM, g))),
        'whh2': np.asarray(_randn(ks[4], (n_streams, 2, HALF, g))),
        'b2':   np.asarray(_randn(ks[5], (n_streams, 2, g))),
    }


def _merge_bilstm(raw, n, in_dim):
    """Lane-merged block-diagonal weights for n independent biLSTMs in lock-step.
    Hidden layout: [fwd s0..s_{n-1} | bwd s0..s_{n-1}], 16 lanes each.
    Gate layout:   [i | f | g | o], each block laid out like the hidden."""
    nh = n * 2 * HALF
    ng = 4 * nh
    half = n * HALF

    def gcols(u, g):
        return slice(g * nh + u * HALF, g * nh + (u + 1) * HALF)

    w1 = [np.zeros((in_dim, ng), np.float32) for _ in range(2)]
    whh1 = np.zeros((nh, ng), np.float32)
    b1 = np.zeros((1, ng), np.float32)
    w2 = [np.zeros((nh, ng), np.float32) for _ in range(2)]
    whh2 = np.zeros((nh, ng), np.float32)
    b2 = np.zeros((1, ng), np.float32)

    for s in range(n):
        for d in range(2):
            u = d * n + s
            rows_u = slice(u * HALF, (u + 1) * HALF)
            rows_f = slice(s * HALF, (s + 1) * HALF)
            rows_b = slice(half + s * HALF, half + (s + 1) * HALF)
            for g in range(4):
                gc = slice(g * HALF, (g + 1) * HALF)
                w1[d][:, gcols(u, g)] = raw['wih1'][s, d][:, gc]
                whh1[rows_u, gcols(u, g)] = raw['whh1'][s, d][:, gc]
                b1[0, gcols(u, g)] = raw['b1'][s, d][gc]
                w2[d][rows_f, gcols(u, g)] = raw['wih2'][s, d][0:HALF, gc]
                w2[d][rows_b, gcols(u, g)] = raw['wih2'][s, d][HALF:2 * HALF, gc]
                whh2[rows_u, gcols(u, g)] = raw['whh2'][s, d][:, gc]
                b2[0, gcols(u, g)] = raw['b2'][s, d][gc]
    return w1[0], w1[1], whh1, b1, w2[0], w2[1], whh2, b2


def _pad_q_rows(w, stream):
    """Place per-stream (H, out) rows into merged question-hidden lanes."""
    out = np.zeros((Q_NH, w.shape[1]), np.float32)
    out[stream * HALF:(stream + 1) * HALF] = w[0:HALF]
    out[NQ * HALF + stream * HALF:NQ * HALF + (stream + 1) * HALF] = w[HALF:2 * HALF]
    return out


def _pad_c_rows(w, stream):
    out = np.zeros((C_NH, w.shape[1]), np.float32)
    out[stream * HALF:(stream + 1) * HALF] = w[0:HALF]
    out[NC * HALF + stream * HALF:NC * HALF + (stream + 1) * HALF] = w[HALF:2 * HALF]
    return out


def _pad_q_cols(w, stream):
    out = np.zeros((w.shape[0], Q_NH), np.float32)
    out[:, stream * HALF:(stream + 1) * HALF] = w[:, 0:HALF]
    out[:, NQ * HALF + stream * HALF:NQ * HALF + (stream + 1) * HALF] = w[:, HALF:2 * HALF]
    return out


def init_params(key):
    ks = jax.random.split(key, 28)
    H = HIDDEN_DIM
    emb = _randn(ks[0], (VOCAB, EMBED_DIM), scale=0.5)

    qm = _merge_bilstm(_init_raw_bilstm(ks[1], NQ, EMBED_DIM), NQ, EMBED_DIM)
    cm = _merge_bilstm(_init_raw_bilstm(ks[2], NC, EMBED_DIM), NC, EMBED_DIM)

    def nrm(i, shape, scale=0.1):
        return np.asarray(_randn(ks[i], shape, scale))

    agg_att = nrm(3, (H, 1)); agg_w1 = nrm(4, (H, H)); agg_b1 = nrm(5, (1, H))
    agg_w2 = nrm(6, (H, N_AGG)); agg_b2 = nrm(7, (1, N_AGG))
    sel_att = nrm(8, (H, 1)); sel_wk = nrm(9, (H, H)); sel_wc = nrm(10, (H, H))
    sel_wo = nrm(11, (H, 1)); sel_bo = nrm(12, (1, 1))
    num_att = nrm(13, (H, 1)); num_w1 = nrm(14, (H, H)); num_b1 = nrm(15, (1, H))
    num_w2 = nrm(16, (H, N_COND_NUM)); num_b2 = nrm(17, (1, N_COND_NUM))
    ccol_att = nrm(18, (H, 1)); ccol_wk = nrm(19, (H, H)); ccol_wc = nrm(20, (H, H))
    ccol_wo = nrm(21, (H, 1)); ccol_bo = nrm(22, (1, 1))
    cop_wk = nrm(23, (H, H)); cop_wc = nrm(24, (H, H))
    cop_wo = nrm(25, (H, N_COND_OP)); cop_bo = nrm(26, (1, N_COND_OP))
    cstr_wp = nrm(27, (H, H))

    att_q = np.concatenate([_pad_q_rows(agg_att, Q_AGG),
                            _pad_q_rows(num_att, Q_COND),
                            _pad_q_rows(ccol_att, Q_COND),
                            _pad_q_rows(sel_att, Q_SEL)], axis=1)         # (Q_NH, 4)

    p = {
        'emb': np.asarray(emb),
        'qw1f': qm[0], 'qw1b': qm[1], 'qwhh1': qm[2], 'qb1': qm[3],
        'qw2f': qm[4], 'qw2b': qm[5], 'qwhh2': qm[6], 'qb2': qm[7],
        'cw1f': cm[0], 'cw1b': cm[1], 'cwhh1': cm[2], 'cb1': cm[3],
        'cw2f': cm[4], 'cw2b': cm[5], 'cwhh2': cm[6], 'cb2': cm[7],
        'att_q': att_q,
        'agg_w1': _pad_q_rows(agg_w1, Q_AGG), 'agg_b1': agg_b1,
        'agg_w2': agg_w2, 'agg_b2': agg_b2,
        'num_w1': _pad_q_rows(num_w1, Q_COND), 'num_b1': num_b1,
        'num_w2': num_w2, 'num_b2': num_b2,
        'sel_wk': _pad_q_rows(sel_wk, Q_SEL), 'sel_wc': _pad_c_rows(sel_wc, C_SEL),
        'sel_wo': sel_wo, 'sel_bo': sel_bo,
        'ccol_wk': _pad_q_rows(ccol_wk, Q_COND), 'ccol_wc': _pad_c_rows(ccol_wc, C_COND),
        'ccol_wo': ccol_wo, 'ccol_bo': ccol_bo,
        'cop_wk': _pad_q_rows(cop_wk, Q_COND), 'cop_wc': _pad_c_rows(cop_wc, C_COND),
        'cop_wo': cop_wo, 'cop_bo': cop_bo,
        'cstr_wp': _pad_q_cols(_pad_c_rows(cstr_wp, C_COND), Q_COND),
    }
    return {k: jnp.asarray(v) for k, v in p.items()}


# ----------------------------------------------------------------------------
# Forward pass (agg_score, sel_score, cond_score) -- ONE pallas_call total
# ----------------------------------------------------------------------------
@functools.partial(jax.jit, static_argnames=('pred_entry',))
def model_forward(params, q_ids, q_lengths, col_ids, pred_entry=(True, True, True)):
    pred_agg, pred_sel, pred_cond = pred_entry
    B, T = q_ids.shape
    _, C, L = col_ids.shape

    if not (pred_agg or pred_sel or pred_cond):
        return None, None, None

    # Tiny index-only glue (ints); all activations live inside the kernel.
    q_ids_flat = q_ids.astype(jnp.int32).T.reshape(T * B, 1)               # time-major
    col_ids_flat = col_ids.astype(jnp.int32).reshape(B * C, L).T.reshape(L * B * C, 1)
    qlen = q_lengths.astype(jnp.int32)[:, None]                            # (B, 1)

    flops = 4 * (T * B * (EMBED_DIM + Q_NH + Q_NH) * Q_NG
                 + L * B * C * (EMBED_DIM + C_NH + C_NH) * C_NG
                 + (T * B + L * B * C) * VOCAB * EMBED_DIM)
    bytes_accessed = 4 * (VOCAB * EMBED_DIM
                          + 2 * (EMBED_DIM + 2 * Q_NH) * Q_NG
                          + 2 * (EMBED_DIM + 2 * C_NH) * C_NG
                          + 12 * Q_NH * HIDDEN_DIM)

    outs = pl.pallas_call(
        sqlnet_fused_kernel,
        out_shape=(
            jax.ShapeDtypeStruct((B, N_AGG), jnp.float32),
            jax.ShapeDtypeStruct((B, N_COND_NUM), jnp.float32),
            jax.ShapeDtypeStruct((B * C, 1), jnp.float32),
            jax.ShapeDtypeStruct((B * C, 1), jnp.float32),
            jax.ShapeDtypeStruct((B * C, N_COND_OP), jnp.float32),
            jax.ShapeDtypeStruct((B, C, T), jnp.float32),
        ),
        in_specs=[VMEM] * 42,
        out_specs=(VMEM,) * 6,
        cost_estimate=pl.CostEstimate(flops=int(flops),
                                      transcendentals=int(12 * T * B * Q_NH),
                                      bytes_accessed=int(bytes_accessed)),
    )(params['emb'], q_ids_flat, qlen, col_ids_flat,
      params['qw1f'], params['qw1b'], params['qwhh1'], params['qb1'],
      params['qw2f'], params['qw2b'], params['qwhh2'], params['qb2'],
      params['cw1f'], params['cw1b'], params['cwhh1'], params['cb1'],
      params['cw2f'], params['cw2b'], params['cwhh2'], params['cb2'],
      params['att_q'],
      params['agg_w1'], params['agg_b1'], params['agg_w2'], params['agg_b2'],
      params['num_w1'], params['num_b1'], params['num_w2'], params['num_b2'],
      params['sel_wk'], params['sel_wc'], params['sel_wo'], params['sel_bo'],
      params['ccol_wk'], params['ccol_wc'], params['ccol_wo'], params['ccol_bo'],
      params['cop_wk'], params['cop_wc'], params['cop_wo'], params['cop_bo'],
      params['cstr_wp'])

    agg, num, sel_f, ccol_f, cop_f, cstr = outs
    agg_score = agg if pred_agg else None
    sel_score = sel_f.reshape(B, C) if pred_sel else None
    cond_score = ((num, ccol_f.reshape(B, C), cop_f.reshape(B, C, N_COND_OP), cstr)
                  if pred_cond else None)
    return agg_score, sel_score, cond_score


# ----------------------------------------------------------------------------
if __name__ == "__main__":
    key = jax.random.PRNGKey(0)
    k_param, k_q, k_c = jax.random.split(key, 3)

    params = init_params(k_param)

    B, T, C, L = 2, 8, 4, 3
    q_ids = jax.random.randint(k_q, (B, T), 0, VOCAB)
    q_lengths = jnp.array([8, 6], dtype=jnp.int32)
    col_ids = jax.random.randint(k_c, (B, C, L), 0, VOCAB)

    agg_score, sel_score, cond_score = model_forward(
        params, q_ids, q_lengths, col_ids, pred_entry=(True, True, True))

    jax.block_until_ready(agg_score)
    jax.block_until_ready(sel_score)
    jax.block_until_ready(cond_score)

    assert agg_score.shape == (B, N_AGG)
    assert sel_score.shape == (B, C)
    assert cond_score[0].shape == (B, N_COND_NUM)
    assert cond_score[1].shape == (B, C)
    assert cond_score[2].shape == (B, C, N_COND_OP)
    assert cond_score[3].shape == (B, C, T)
    assert bool(jnp.all(jnp.isfinite(agg_score)))

    print("KERNEL_OK")
</pallas_src>

<mosaic_0001>
module attributes {stable_mosaic.version = 11 : i64} {
  func.func @sqlnet_fused_kernel(%arg0: memref<100x32xf32, #tpu.memory_space<vmem>>, %arg1: memref<16x1xi32, #tpu.memory_space<vmem>>, %arg2: memref<2x1xi32, #tpu.memory_space<vmem>>, %arg3: memref<24x1xi32, #tpu.memory_space<vmem>>, %arg4: memref<32x384xf32, #tpu.memory_space<vmem>>, %arg5: memref<32x384xf32, #tpu.memory_space<vmem>>, %arg6: memref<96x384xf32, #tpu.memory_space<vmem>>, %arg7: memref<1x384xf32, #tpu.memory_space<vmem>>, %arg8: memref<96x384xf32, #tpu.memory_space<vmem>>, %arg9: memref<96x384xf32, #tpu.memory_space<vmem>>, %arg10: memref<96x384xf32, #tpu.memory_space<vmem>>, %arg11: memref<1x384xf32, #tpu.memory_space<vmem>>, %arg12: memref<32x256xf32, #tpu.memory_space<vmem>>, %arg13: memref<32x256xf32, #tpu.memory_space<vmem>>, %arg14: memref<64x256xf32, #tpu.memory_space<vmem>>, %arg15: memref<1x256xf32, #tpu.memory_space<vmem>>, %arg16: memref<64x256xf32, #tpu.memory_space<vmem>>, %arg17: memref<64x256xf32, #tpu.memory_space<vmem>>, %arg18: memref<64x256xf32, #tpu.memory_space<vmem>>, %arg19: memref<1x256xf32, #tpu.memory_space<vmem>>, %arg20: memref<96x4xf32, #tpu.memory_space<vmem>>, %arg21: memref<96x32xf32, #tpu.memory_space<vmem>>, %arg22: memref<1x32xf32, #tpu.memory_space<vmem>>, %arg23: memref<32x6xf32, #tpu.memory_space<vmem>>, %arg24: memref<1x6xf32, #tpu.memory_space<vmem>>, %arg25: memref<96x32xf32, #tpu.memory_space<vmem>>, %arg26: memref<1x32xf32, #tpu.memory_space<vmem>>, %arg27: memref<32x5xf32, #tpu.memory_space<vmem>>, %arg28: memref<1x5xf32, #tpu.memory_space<vmem>>, %arg29: memref<96x32xf32, #tpu.memory_space<vmem>>, %arg30: memref<64x32xf32, #tpu.memory_space<vmem>>, %arg31: memref<32x1xf32, #tpu.memory_space<vmem>>, %arg32: memref<1x1xf32, #tpu.memory_space<vmem>>, %arg33: memref<96x32xf32, #tpu.memory_space<vmem>>, %arg34: memref<64x32xf32, #tpu.memory_space<vmem>>, %arg35: memref<32x1xf32, #tpu.memory_space<vmem>>, %arg36: memref<1x1xf32, #tpu.memory_space<vmem>>, %arg37: memref<96x32xf32, #tpu.memory_space<vmem>>, %arg38: memref<64x32xf32, #tpu.memory_space<vmem>>, %arg39: memref<32x3xf32, #tpu.memory_space<vmem>>, %arg40: memref<1x3xf32, #tpu.memory_space<vmem>>, %arg41: memref<64x96xf32, #tpu.memory_space<vmem>>, %arg42: memref<2x6xf32, #tpu.memory_space<vmem>>, %arg43: memref<2x5xf32, #tpu.memory_space<vmem>>, %arg44: memref<8x1xf32, #tpu.memory_space<vmem>>, %arg45: memref<8x1xf32, #tpu.memory_space<vmem>>, %arg46: memref<8x3xf32, #tpu.memory_space<vmem>>, %arg47: memref<2x4x8xf32, #tpu.memory_space<vmem>>) attributes {dimension_semantics = [], scalar_prefetch = 0 : i64, scratch_operands = 0 : i64, tpu.core_type = #tpu.core_type<tc>} {
    %c0 = arith.constant 0 : index
    %c0_0 = arith.constant 0 : index
    %0 = vector.load %arg0[%c0, %c0_0] : memref<100x32xf32, #tpu.memory_space<vmem>>, vector<100x32xf32>
    %c0_1 = arith.constant 0 : index
    %c0_2 = arith.constant 0 : index
    %1 = vector.load %arg1[%c0_1, %c0_2] : memref<16x1xi32, #tpu.memory_space<vmem>>, vector<16x1xi32>
    %2 = tpu.iota {dimensions = array<i32: 1>} : vector<16x100xi32>
    %3 = vector.broadcast %1 : vector<16x1xi32> to vector<16x100xi32>
    %4 = arith.cmpi eq, %3, %2 : vector<16x100xi32>
    %5 = arith.extui %4 : vector<16x100xi1> to vector<16x100xi32>
    %6 = arith.sitofp %5 : vector<16x100xi32> to vector<16x100xf32>
    %cst = arith.constant dense<0.000000e+00> : vector<16x32xf32>
    %7 = tpu.matmul %6, %0, %cst {dimension_numbers = #tpu.dot_dimension_numbers<[1], [0], [0], [1], [0, 0, 1, 1], [], []>} : vector<16x100xf32>, vector<100x32xf32>, vector<16x32xf32> -> vector<16x32xf32>
    %c0_3 = arith.constant 0 : index
    %c0_4 = arith.constant 0 : index
    %8 = vector.load %arg3[%c0_3, %c0_4] : memref<24x1xi32, #tpu.memory_space<vmem>>, vector<24x1xi32>
    %9 = tpu.iota {dimensions = array<i32: 1>} : vector<24x100xi32>
    %10 = vector.broadcast %8 : vector<24x1xi32> to vector<24x100xi32>
    %11 = arith.cmpi eq, %10, %9 : vector<24x100xi32>
    %12 = arith.extui %11 : vector<24x100xi1> to vector<24x100xi32>
    %13 = arith.sitofp %12 : vector<24x100xi32> to vector<24x100xf32>
    %cst_5 = arith.constant dense<0.000000e+00> : vector<24x32xf32>
    %14 = tpu.matmul %13, %0, %cst_5 {dimension_numbers = #tpu.dot_dimension_numbers<[1], [0], [0], [1], [0, 0, 1, 1], [], []>} : vector<24x100xf32>, vector<100x32xf32>, vector<24x32xf32> -> vector<24x32xf32>
    %c0_6 = arith.constant 0 : index
    %c0_7 = arith.constant 0 : index
    %15 = vector.load %arg4[%c0_6, %c0_7] : memref<32x384xf32, #tpu.memory_space<vmem>>, vector<32x384xf32>
    %c0_8 = arith.constant 0 : index
    %c0_9 = arith.constant 0 : index
    %16 = vector.load %arg5[%c0_8, %c0_9] : memref<32x384xf32, #tpu.memory_space<vmem>>, vector<32x384xf32>
    %c0_10 = arith.constant 0 : index
    %c0_11 = arith.constant 0 : index
    %17 = vector.load %arg6[%c0_10, %c0_11] : memref<96x384xf32, #tpu.memory_space<vmem>>, vector<96x384xf32>
    %c0_12 = arith.constant 0 : index
    %c0_13 = arith.constant 0 : index
    %18 = vector.load %arg7[%c0_12, %c0_13] : memref<1x384xf32, #tpu.memory_space<vmem>>, vector<1x384xf32>
    %c0_14 = arith.constant 0 : index
    %c0_15 = arith.constant 0 : index
    %19 = vector.load %arg8[%c0_14, %c0_15] : memref<96x384xf32, #tpu.memory_space<vmem>>, vector<96x384xf32>
    %c0_16 = arith.constant 0 : index
    %c0_17 = arith.constant 0 : index
    %20 = vector.load %arg9[%c0_16, %c0_17] : memref<96x384xf32, #tpu.memory_space<vmem>>, vector<96x384xf32>
    %c0_18 = arith.constant 0 : index
    %c0_19 = arith.constant 0 : index
    %21 = vector.load %arg10[%c0_18, %c0_19] : memref<96x384xf32, #tpu.memory_space<vmem>>, vector<96x384xf32>
    %c0_20 = arith.constant 0 : index
    %c0_21 = arith.constant 0 : index
    %22 = vector.load %arg11[%c0_20, %c0_21] : memref<1x384xf32, #tpu.memory_space<vmem>>, vector<1x384xf32>
    %23 = tpu.iota {dimensions = array<i32: 1>} : vector<2x96xi32>
    %c48_i32 = arith.constant 48 : i32
    %24 = vector.broadcast %c48_i32 : i32 to vector<2x96xi32>
    %25 = arith.cmpi slt, %23, %24 : vector<2x96xi32>
    %cst_22 = arith.constant dense<0.000000e+00> : vector<16x384xf32>
    %26 = tpu.matmul %7, %15, %cst_22 {dimension_numbers = #tpu.dot_dimension_numbers<[1], [0], [0], [1], [0, 0, 1, 1], [], []>} : vector<16x32xf32>, vector<32x384xf32>, vector<16x384xf32> -> vector<16x384xf32>
    %cst_23 = arith.constant dense<0.000000e+00> : vector<16x384xf32>
    %27 = tpu.matmul %7, %16, %cst_23 {dimension_numbers = #tpu.dot_dimension_numbers<[1], [0], [0], [1], [0, 0, 1, 1], [], []>} : vector<16x32xf32>, vector<32x384xf32>, vector<16x384xf32> -> vector<16x384xf32>
    %cst_24 = arith.constant 0.000000e+00 : f32
    %28 = vector.broadcast %cst_24 : f32 to vector<2x96xf32>
    %cst_25 = arith.constant 0.000000e+00 : f32
    %29 = vector.broadcast %cst_25 : f32 to vector<2x96xf32>
    %30 = vector.extract_strided_slice %26 {offsets = [0, 0], sizes = [2, 384], strides = [1, 1]} : vector<16x384xf32> to vector<2x384xf32>
    %31 = vector.extract_strided_slice %27 {offsets = [14, 0], sizes = [2, 384], strides = [1, 1]} : vector<16x384xf32> to vector<2x384xf32>
    %32 = arith.addf %30, %31 : vector<2x384xf32>
    %33 = vector.broadcast %18 : vector<1x384xf32> to vector<2x384xf32>
    %34 = arith.addf %32, %33 : vector<2x384xf32>
    %cst_26 = arith.constant dense<0.000000e+00> : vector<2x384xf32>
    %35 = tpu.matmul %28, %17, %cst_26 {dimension_numbers = #tpu.dot_dimension_numbers<[1], [0], [0], [1], [0, 0, 1, 1], [], []>} : vector<2x96xf32>, vector<96x384xf32>, vector<2x384xf32> -> vector<2x384xf32>
    %36 = arith.addf %34, %35 : vector<2x384xf32>
    %37 = vector.extract_strided_slice %36 {offsets = [0, 0], sizes = [2, 96], strides = [1, 1]} : vector<2x384xf32> to vector<2x96xf32>
    %38 = arith.negf %37 : vector<2x96xf32>
    %39 = math.exp %38 : vector<2x96xf32>
    %cst_27 = arith.constant 1.000000e+00 : f32
    %40 = vector.broadcast %cst_27 : f32 to vector<2x96xf32>
    %41 = arith.addf %40, %39 : vector<2x96xf32>
    %42 = arith.divf %40, %41 : vector<2x96xf32>
    %43 = vector.extract_strided_slice %36 {offsets = [0, 96], sizes = [2, 96], strides = [1, 1]} : vector<2x384xf32> to vector<2x96xf32>
    %44 = arith.negf %43 : vector<2x96xf32>
    %45 = math.exp %44 : vector<2x96xf32>
    %cst_28 = arith.constant 1.000000e+00 : f32
    %46 = vector.broadcast %cst_28 : f32 to vector<2x96xf32>
    %47 = arith.addf %46, %45 : vector<2x96xf32>
    %48 = arith.divf %46, %47 : vector<2x96xf32>
    %49 = vector.extract_strided_slice %36 {offsets = [0, 192], sizes = [2, 96], strides = [1, 1]} : vector<2x384xf32> to vector<2x96xf32>
    %50 = math.tanh %49 : vector<2x96xf32>
    %51 = vector.extract_strided_slice %36 {offsets = [0, 288], sizes = [2, 96], strides = [1, 1]} : vector<2x384xf32> to vector<2x96xf32>
    %52 = arith.negf %51 : vector<2x96xf32>
    %53 = math.exp %52 : vector<2x96xf32>
    %cst_29 = arith.constant 1.000000e+00 : f32
    %54 = vector.broadcast %cst_29 : f32 to vector<2x96xf32>
    %55 = arith.addf %54, %53 : vector<2x96xf32>
    %56 = arith.divf %54, %55 : vector<2x96xf32>
    %57 = arith.mulf %48, %29 : vector<2x96xf32>
    %58 = arith.mulf %42, %50 : vector<2x96xf32>
    %59 = arith.addf %57, %58 : vector<2x96xf32>
    %60 = math.tanh %59 : vector<2x96xf32>
    %61 = arith.mulf %56, %60 : vector<2x96xf32>
    %62 = vector.extract_strided_slice %26 {offsets = [2, 0], sizes = [2, 384], strides = [1, 1]} : vector<16x384xf32> to vector<2x384xf32>
    %63 = vector.extract_strided_slice %27 {offsets = [12, 0], sizes = [2, 384], strides = [1, 1]} : vector<16x384xf32> to vector<2x384xf32>
    %64 = arith.addf %62, %63 : vector<2x384xf32>
    %65 = vector.broadcast %18 : vector<1x384xf32> to vector<2x384xf32>
    %66 = arith.addf %64, %65 : vector<2x384xf32>
    %cst_30 = arith.constant dense<0.000000e+00> : vector<2x384xf32>
    %67 = tpu.matmul %61, %17, %cst_30 {dimension_numbers = #tpu.dot_dimension_numbers<[1], [0], [0], [1], [0, 0, 1, 1], [], []>} : vector<2x96xf32>, vector<96x384xf32>, vector<2x384xf32> -> vector<2x384xf32>
    %68 = arith.addf %66, %67 : vector<2x384xf32>
    %69 = vector.extract_strided_slice %68 {offsets = [0, 0], sizes = [2, 96], strides = [1, 1]} : vector<2x384xf32> to vector<2x96xf32>
    %70 = arith.negf %69 : vector<2x96xf32>
    %71 = math.exp %70 : vector<2x96xf32>
    %cst_31 = arith.constant 1.000000e+00 : f32
    %72 = vector.broadcast %cst_31 : f32 to vector<2x96xf32>
    %73 = arith.addf %72, %71 : vector<2x96xf32>
    %74 = arith.divf %72, %73 : vector<2x96xf32>
    %75 = vector.extract_strided_slice %68 {offsets = [0, 96], sizes = [2, 96], strides = [1, 1]} : vector<2x384xf32> to vector<2x96xf32>
    %76 = arith.negf %75 : vector<2x96xf32>
    %77 = math.exp %76 : vector<2x96xf32>
    %cst_32 = arith.constant 1.000000e+00 : f32
    %78 = vector.broadcast %cst_32 : f32 to vector<2x96xf32>
    %79 = arith.addf %78, %77 : vector<2x96xf32>
    %80 = arith.divf %78, %79 : vector<2x96xf32>
    %81 = vector.extract_strided_slice %68 {offsets = [0, 192], sizes = [2, 96], strides = [1, 1]} : vector<2x384xf32> to vector<2x96xf32>
    %82 = math.tanh %81 : vector<2x96xf32>
    %83 = vector.extract_strided_slice %68 {offsets = [0, 288], sizes = [2, 96], strides = [1, 1]} : vector<2x384xf32> to vector<2x96xf32>
    %84 = arith.negf %83 : vector<2x96xf32>
    %85 = math.exp %84 : vector<2x96xf32>
    %cst_33 = arith.constant 1.000000e+00 : f32
    %86 = vector.broadcast %cst_33 : f32 to vector<2x96xf32>
    %87 = arith.addf %86, %85 : vector<2x96xf32>
    %88 = arith.divf %86, %87 : vector<2x96xf32>
    %89 = arith.mulf %80, %59 : vector<2x96xf32>
    %90 = arith.mulf %74, %82 : vector<2x96xf32>
    %91 = arith.addf %89, %90 : vector<2x96xf32>
    %92 = math.tanh %91 : vector<2x96xf32>
    %93 = arith.mulf %88, %92 : vector<2x96xf32>
    %94 = vector.extract_strided_slice %26 {offsets = [4, 0], sizes = [2, 384], strides = [1, 1]} : vector<16x384xf32> to vector<2x384xf32>
    %95 = vector.extract_strided_slice %27 {offsets = [10, 0], sizes = [2, 384], strides = [1, 1]} : vector<16x384xf32> to vector<2x384xf32>
    %96 = arith.addf %94, %95 : vector<2x384xf32>
    %97 = vector.broadcast %18 : vector<1x384xf32> to vector<2x384xf32>
    %98 = arith.addf %96, %97 : vector<2x384xf32>
    %cst_34 = arith.constant dense<0.000000e+00> : vector<2x384xf32>
    %99 = tpu.matmul %93, %17, %cst_34 {dimension_numbers = #tpu.dot_dimension_numbers<[1], [0], [0], [1], [0, 0, 1, 1], [], []>} : vector<2x96xf32>, vector<96x384xf32>, vector<2x384xf32> -> vector<2x384xf32>
    %100 = arith.addf %98, %99 : vector<2x384xf32>
    %101 = vector.extract_strided_slice %100 {offsets = [0, 0], sizes = [2, 96], strides = [1, 1]} : vector<2x384xf32> to vector<2x96xf32>
    %102 = arith.negf %101 : vector<2x96xf32>
    %103 = math.exp %102 : vector<2x96xf32>
    %cst_35 = arith.constant 1.000000e+00 : f32
    %104 = vector.broadcast %cst_35 : f32 to vector<2x96xf32>
    %105 = arith.addf %104, %103 : vector<2x96xf32>
    %106 = arith.divf %104, %105 : vector<2x96xf32>
    %107 = vector.extract_strided_slice %100 {offsets = [0, 96], sizes = [2, 96], strides = [1, 1]} : vector<2x384xf32> to vector<2x96xf32>
    %108 = arith.negf %107 : vector<2x96xf32>
    %109 = math.exp %108 : vector<2x96xf32>
    %cst_36 = arith.constant 1.000000e+00 : f32
    %110 = vector.broadcast %cst_36 : f32 to vector<2x96xf32>
    %111 = arith.addf %110, %109 : vector<2x96xf32>
    %112 = arith.divf %110, %111 : vector<2x96xf32>
    %113 = vector.extract_strided_slice %100 {offsets = [0, 192], sizes = [2, 96], strides = [1, 1]} : vector<2x384xf32> to vector<2x96xf32>
    %114 = math.tanh %113 : vector<2x96xf32>
    %115 = vector.extract_strided_slice %100 {offsets = [0, 288], sizes = [2, 96], strides = [1, 1]} : vector<2x384xf32> to vector<2x96xf32>
    %116 = arith.negf %115 : vector<2x96xf32>
    %117 = math.exp %116 : vector<2x96xf32>
    %cst_37 = arith.constant 1.000000e+00 : f32
    %118 = vector.broadcast %cst_37 : f32 to vector<2x96xf32>
    %119 = arith.addf %118, %117 : vector<2x96xf32>
    %120 = arith.divf %118, %119 : vector<2x96xf32>
    %121 = arith.mulf %112, %91 : vector<2x96xf32>
    %122 = arith.mulf %106, %114 : vector<2x96xf32>
    %123 = arith.addf %121, %122 : vector<2x96xf32>
    %124 = math.tanh %123 : vector<2x96xf32>
    %125 = arith.mulf %120, %124 : vector<2x96xf32>
    %126 = vector.extract_strided_slice %26 {offsets = [6, 0], sizes = [2, 384], strides = [1, 1]} : vector<16x384xf32> to vector<2x384xf32>
    %127 = vector.extract_strided_slice %27 {offsets = [8, 0], sizes = [2, 384], strides = [1, 1]} : vector<16x384xf32> to vector<2x384xf32>
    %128 = arith.addf %126, %127 : vector<2x384xf32>
    %129 = vector.broadcast %18 : vector<1x384xf32> to vector<2x384xf32>
    %130 = arith.addf %128, %129 : vector<2x384xf32>
    %cst_38 = arith.constant dense<0.000000e+00> : vector<2x384xf32>
    %131 = tpu.matmul %125, %17, %cst_38 {dimension_numbers = #tpu.dot_dimension_numbers<[1], [0], [0], [1], [0, 0, 1, 1], [], []>} : vector<2x96xf32>, vector<96x384xf32>, vector<2x384xf32> -> vector<2x384xf32>
    %132 = arith.addf %130, %131 : vector<2x384xf32>
    %133 = vector.extract_strided_slice %132 {offsets = [0, 0], sizes = [2, 96], strides = [1, 1]} : vector<2x384xf32> to vector<2x96xf32>
    %134 = arith.negf %133 : vector<2x96xf32>
    %135 = math.exp %134 : vector<2x96xf32>
    %cst_39 = arith.constant 1.000000e+00 : f32
    %136 = vector.broadcast %cst_39 : f32 to vector<2x96xf32>
    %137 = arith.addf %136, %135 : vector<2x96xf32>
    %138 = arith.divf %136, %137 : vector<2x96xf32>
    %139 = vector.extract_strided_slice %132 {offsets = [0, 96], sizes = [2, 96], strides = [1, 1]} : vector<2x384xf32> to vector<2x96xf32>
    %140 = arith.negf %139 : vector<2x96xf32>
    %141 = math.exp %140 : vector<2x96xf32>
    %cst_40 = arith.constant 1.000000e+00 : f32
    %142 = vector.broadcast %cst_40 : f32 to vector<2x96xf32>
    %143 = arith.addf %142, %141 : vector<2x96xf32>
    %144 = arith.divf %142, %143 : vector<2x96xf32>
    %145 = vector.extract_strided_slice %132 {offsets = [0, 192], sizes = [2, 96], strides = [1, 1]} : vector<2x384xf32> to vector<2x96xf32>
    %146 = math.tanh %145 : vector<2x96xf32>
    %147 = vector.extract_strided_slice %132 {offsets = [0, 288], sizes = [2, 96], strides = [1, 1]} : vector<2x384xf32> to vector<2x96xf32>
    %148 = arith.negf %147 : vector<2x96xf32>
    %149 = math.exp %148 : vector<2x96xf32>
    %cst_41 = arith.constant 1.000000e+00 : f32
    %150 = vector.broadcast %cst_41 : f32 to vector<2x96xf32>
    %151 = arith.addf %150, %149 : vector<2x96xf32>
    %152 = arith.divf %150, %151 : vector<2x96xf32>
    %153 = arith.mulf %144, %123 : vector<2x96xf32>
    %154 = arith.mulf %138, %146 : vector<2x96xf32>
    %155 = arith.addf %153, %154 : vector<2x96xf32>
    %156 = math.tanh %155 : vector<2x96xf32>
    %157 = arith.mulf %152, %156 : vector<2x96xf32>
    %158 = vector.extract_strided_slice %26 {offsets = [8, 0], sizes = [2, 384], strides = [1, 1]} : vector<16x384xf32> to vector<2x384xf32>
    %159 = vector.extract_strided_slice %27 {offsets = [6, 0], sizes = [2, 384], strides = [1, 1]} : vector<16x384xf32> to vector<2x384xf32>
    %160 = arith.addf %158, %159 : vector<2x384xf32>
    %161 = vector.broadcast %18 : vector<1x384xf32> to vector<2x384xf32>
    %162 = arith.addf %160, %161 : vector<2x384xf32>
    %cst_42 = arith.constant dense<0.000000e+00> : vector<2x384xf32>
    %163 = tpu.matmul %157, %17, %cst_42 {dimension_numbers = #tpu.dot_dimension_numbers<[1], [0], [0], [1], [0, 0, 1, 1], [], []>} : vector<2x96xf32>, vector<96x384xf32>, vector<2x384xf32> -> vector<2x384xf32>
    %164 = arith.addf %162, %163 : vector<2x384xf32>
    %165 = vector.extract_strided_slice %164 {offsets = [0, 0], sizes = [2, 96], strides = [1, 1]} : vector<2x384xf32> to vector<2x96xf32>
    %166 = arith.negf %165 : vector<2x96xf32>
    %167 = math.exp %166 : vector<2x96xf32>
    %cst_43 = arith.constant 1.000000e+00 : f32
    %168 = vector.broadcast %cst_43 : f32 to vector<2x96xf32>
    %169 = arith.addf %168, %167 : vector<2x96xf32>
    %170 = arith.divf %168, %169 : vector<2x96xf32>
    %171 = vector.extract_strided_slice %164 {offsets = [0, 96], sizes = [2, 96], strides = [1, 1]} : vector<2x384xf32> to vector<2x96xf32>
    %172 = arith.negf %171 : vector<2x96xf32>
    %173 = math.exp %172 : vector<2x96xf32>
    %cst_44 = arith.constant 1.000000e+00 : f32
    %174 = vector.broadcast %cst_44 : f32 to vector<2x96xf32>
    %175 = arith.addf %174, %173 : vector<2x96xf32>
    %176 = arith.divf %174, %175 : vector<2x96xf32>
    %177 = vector.extract_strided_slice %164 {offsets = [0, 192], sizes = [2, 96], strides = [1, 1]} : vector<2x384xf32> to vector<2x96xf32>
    %178 = math.tanh %177 : vector<2x96xf32>
    %179 = vector.extract_strided_slice %164 {offsets = [0, 288], sizes = [2, 96], strides = [1, 1]} : vector<2x384xf32> to vector<2x96xf32>
    %180 = arith.negf %179 : vector<2x96xf32>
    %181 = math.exp %180 : vector<2x96xf32>
    %cst_45 = arith.constant 1.000000e+00 : f32
    %182 = vector.broadcast %cst_45 : f32 to vector<2x96xf32>
    %183 = arith.addf %182, %181 : vector<2x96xf32>
    %184 = arith.divf %182, %183 : vector<2x96xf32>
    %185 = arith.mulf %176, %155 : vector<2x96xf32>
    %186 = arith.mulf %170, %178 : vector<2x96xf32>
    %187 = arith.addf %185, %186 : vector<2x96xf32>
    %188 = math.tanh %187 : vector<2x96xf32>
    %189 = arith.mulf %184, %188 : vector<2x96xf32>
    %190 = vector.extract_strided_slice %26 {offsets = [10, 0], sizes = [2, 384], strides = [1, 1]} : vector<16x384xf32> to vector<2x384xf32>
    %191 = vector.extract_strided_slice %27 {offsets = [4, 0], sizes = [2, 384], strides = [1, 1]} : vector<16x384xf32> to vector<2x384xf32>
    %192 = arith.addf %190, %191 : vector<2x384xf32>
    %193 = vector.broadcast %18 : vector<1x384xf32> to vector<2x384xf32>
    %194 = arith.addf %192, %193 : vector<2x384xf32>
    %cst_46 = arith.constant dense<0.000000e+00> : vector<2x384xf32>
    %195 = tpu.matmul %189, %17, %cst_46 {dimension_numbers = #tpu.dot_dimension_numbers<[1], [0], [0], [1], [0, 0, 1, 1], [], []>} : vector<2x96xf32>, vector<96x384xf32>, vector<2x384xf32> -> vector<2x384xf32>
    %196 = arith.addf %194, %195 : vector<2x384xf32>
    %197 = vector.extract_strided_slice %196 {offsets = [0, 0], sizes = [2, 96], strides = [1, 1]} : vector<2x384xf32> to vector<2x96xf32>
    %198 = arith.negf %197 : vector<2x96xf32>
    %199 = math.exp %198 : vector<2x96xf32>
    %cst_47 = arith.constant 1.000000e+00 : f32
    %200 = vector.broadcast %cst_47 : f32 to vector<2x96xf32>
    %201 = arith.addf %200, %199 : vector<2x96xf32>
    %202 = arith.divf %200, %201 : vector<2x96xf32>
    %203 = vector.extract_strided_slice %196 {offsets = [0, 96], sizes = [2, 96], strides = [1, 1]} : vector<2x384xf32> to vector<2x96xf32>
    %204 = arith.negf %203 : vector<2x96xf32>
    %205 = math.exp %204 : vector<2x96xf32>
    %cst_48 = arith.constant 1.000000e+00 : f32
    %206 = vector.broadcast %cst_48 : f32 to vector<2x96xf32>
    %207 = arith.addf %206, %205 : vector<2x96xf32>
    %208 = arith.divf %206, %207 : vector<2x96xf32>
    %209 = vector.extract_strided_slice %196 {offsets = [0, 192], sizes = [2, 96], strides = [1, 1]} : vector<2x384xf32> to vector<2x96xf32>
    %210 = math.tanh %209 : vector<2x96xf32>
    %211 = vector.extract_strided_slice %196 {offsets = [0, 288], sizes = [2, 96], strides = [1, 1]} : vector<2x384xf32> to vector<2x96xf32>
    %212 = arith.negf %211 : vector<2x96xf32>
    %213 = math.exp %212 : vector<2x96xf32>
    %cst_49 = arith.constant 1.000000e+00 : f32
    %214 = vector.broadcast %cst_49 : f32 to vector<2x96xf32>
    %215 = arith.addf %214, %213 : vector<2x96xf32>
    %216 = arith.divf %214, %215 : vector<2x96xf32>
    %217 = arith.mulf %208, %187 : vector<2x96xf32>
    %218 = arith.mulf %202, %210 : vector<2x96xf32>
    %219 = arith.addf %217, %218 : vector<2x96xf32>
    %220 = math.tanh %219 : vector<2x96xf32>
    %221 = arith.mulf %216, %220 : vector<2x96xf32>
    %222 = vector.extract_strided_slice %26 {offsets = [12, 0], sizes = [2, 384], strides = [1, 1]} : vector<16x384xf32> to vector<2x384xf32>
    %223 = vector.extract_strided_slice %27 {offsets = [2, 0], sizes = [2, 384], strides = [1, 1]} : vector<16x384xf32> to vector<2x384xf32>
    %224 = arith.addf %222, %223 : vector<2x384xf32>
    %225 = vector.broadcast %18 : vector<1x384xf32> to vector<2x384xf32>
    %226 = arith.addf %224, %225 : vector<2x384xf32>
    %cst_50 = arith.constant dense<0.000000e+00> : vector<2x384xf32>
    %227 = tpu.matmul %221, %17, %cst_50 {dimension_numbers = #tpu.dot_dimension_numbers<[1], [0], [0], [1], [0, 0, 1, 1], [], []>} : vector<2x96xf32>, vector<96x384xf32>, vector<2x384xf32> -> vector<2x384xf32>
    %228 = arith.addf %226, %227 : vector<2x384xf32>
    %229 = vector.extract_strided_slice %228 {offsets = [0, 0], sizes = [2, 96], strides = [1, 1]} : vector<2x384xf32> to vector<2x96xf32>
    %230 = arith.negf %229 : vector<2x96xf32>
    %231 = math.exp %230 : vector<2x96xf32>
    %cst_51 = arith.constant 1.000000e+00 : f32
    %232 = vector.broadcast %cst_51 : f32 to vector<2x96xf32>
    %233 = arith.addf %232, %231 : vector<2x96xf32>
    %234 = arith.divf %232, %233 : vector<2x96xf32>
    %235 = vector.extract_strided_slice %228 {offsets = [0, 96], sizes = [2, 96], strides = [1, 1]} : vector<2x384xf32> to vector<2x96xf32>
    %236 = arith.negf %235 : vector<2x96xf32>
    %237 = math.exp %236 : vector<2x96xf32>
    %cst_52 = arith.constant 1.000000e+00 : f32
    %238 = vector.broadcast %cst_52 : f32 to vector<2x96xf32>
    %239 = arith.addf %238, %237 : vector<2x96xf32>
    %240 = arith.divf %238, %239 : vector<2x96xf32>
    %241 = vector.extract_strided_slice %228 {offsets = [0, 192], sizes = [2, 96], strides = [1, 1]} : vector<2x384xf32> to vector<2x96xf32>
    %242 = math.tanh %241 : vector<2x96xf32>
    %243 = vector.extract_strided_slice %228 {offsets = [0, 288], sizes = [2, 96], strides = [1, 1]} : vector<2x384xf32> to vector<2x96xf32>
    %244 = arith.negf %243 : vector<2x96xf32>
    %245 = math.exp %244 : vector<2x96xf32>
    %cst_53 = arith.constant 1.000000e+00 : f32
    %246 = vector.broadcast %cst_53 : f32 to vector<2x96xf32>
    %247 = arith.addf %246, %245 : vector<2x96xf32>
    %248 = arith.divf %246, %247 : vector<2x96xf32>
    %249 = arith.mulf %240, %219 : vector<2x96xf32>
    %250 = arith.mulf %234, %242 : vector<2x96xf32>
    %251 = arith.addf %249, %250 : vector<2x96xf32>
    %252 = math.tanh %251 : vector<2x96xf32>
    %253 = arith.mulf %248, %252 : vector<2x96xf32>
    %254 = vector.extract_strided_slice %26 {offsets = [14, 0], sizes = [2, 384], strides = [1, 1]} : vector<16x384xf32> to vector<2x384xf32>
    %255 = vector.extract_strided_slice %27 {offsets = [0, 0], sizes = [2, 384], strides = [1, 1]} : vector<16x384xf32> to vector<2x384xf32>
    %256 = arith.addf %254, %255 : vector<2x384xf32>
    %257 = vector.broadcast %18 : vector<1x384xf32> to vector<2x384xf32>
    %258 = arith.addf %256, %257 : vector<2x384xf32>
    %cst_54 = arith.constant dense<0.000000e+00> : vector<2x384xf32>
    %259 = tpu.matmul %253, %17, %cst_54 {dimension_numbers = #tpu.dot_dimension_numbers<[1], [0], [0], [1], [0, 0, 1, 1], [], []>} : vector<2x96xf32>, vector<96x384xf32>, vector<2x384xf32> -> vector<2x384xf32>
    %260 = arith.addf %258, %259 : vector<2x384xf32>
    %261 = vector.extract_strided_slice %260 {offsets = [0, 0], sizes = [2, 96], strides = [1, 1]} : vector<2x384xf32> to vector<2x96xf32>
    %262 = arith.negf %261 : vector<2x96xf32>
    %263 = math.exp %262 : vector<2x96xf32>
    %cst_55 = arith.constant 1.000000e+00 : f32
    %264 = vector.broadcast %cst_55 : f32 to vector<2x96xf32>
    %265 = arith.addf %264, %263 : vector<2x96xf32>
    %266 = arith.divf %264, %265 : vector<2x96xf32>
    %267 = vector.extract_strided_slice %260 {offsets = [0, 96], sizes = [2, 96], strides = [1, 1]} : vector<2x384xf32> to vector<2x96xf32>
    %268 = arith.negf %267 : vector<2x96xf32>
    %269 = math.exp %268 : vector<2x96xf32>
    %cst_56 = arith.constant 1.000000e+00 : f32
    %270 = vector.broadcast %cst_56 : f32 to vector<2x96xf32>
    %271 = arith.addf %270, %269 : vector<2x96xf32>
    %272 = arith.divf %270, %271 : vector<2x96xf32>
    %273 = vector.extract_strided_slice %260 {offsets = [0, 192], sizes = [2, 96], strides = [1, 1]} : vector<2x384xf32> to vector<2x96xf32>
    %274 = math.tanh %273 : vector<2x96xf32>
    %275 = vector.extract_strided_slice %260 {offsets = [0, 288], sizes = [2, 96], strides = [1, 1]} : vector<2x384xf32> to vector<2x96xf32>
    %276 = arith.negf %275 : vector<2x96xf32>
    %277 = math.exp %276 : vector<2x96xf32>
    %cst_57 = arith.constant 1.000000e+00 : f32
    %278 = vector.broadcast %cst_57 : f32 to vector<2x96xf32>
    %279 = arith.addf %278, %277 : vector<2x96xf32>
    %280 = arith.divf %278, %279 : vector<2x96xf32>
    %281 = arith.mulf %272, %251 : vector<2x96xf32>
    %282 = arith.mulf %266, %274 : vector<2x96xf32>
    %283 = arith.addf %281, %282 : vector<2x96xf32>
    %284 = math.tanh %283 : vector<2x96xf32>
    %285 = arith.mulf %280, %284 : vector<2x96xf32>
    %286 = arith.select %25, %61, %285 : vector<2x96xi1>, vector<2x96xf32>
    %287 = arith.select %25, %93, %253 : vector<2x96xi1>, vector<2x96xf32>
    %288 = arith.select %25, %125, %221 : vector<2x96xi1>, vector<2x96xf32>
    %289 = arith.select %25, %157, %189 : vector<2x96xi1>, vector<2x96xf32>
    %290 = arith.select %25, %189, %157 : vector<2x96xi1>, vector<2x96xf32>
    %291 = arith.select %25, %221, %125 : vector<2x96xi1>, vector<2x96xf32>
    %292 = arith.select %25, %253, %93 : vector<2x96xi1>, vector<2x96xf32>
    %293 = arith.select %25, %285, %61 : vector<2x96xi1>, vector<2x96xf32>
    %294 = tpu.concatenate %286, %287, %288, %289, %290, %291, %292, %293 in 0 : vector<2x96xf32>, vector<2x96xf32>, vector<2x96xf32>, vector<2x96xf32>, vector<2x96xf32>, vector<2x96xf32>, vector<2x96xf32>, vector<2x96xf32> -> vector<16x96xf32>
    %cst_58 = arith.constant dense<0.000000e+00> : vector<16x384xf32>
    %295 = tpu.matmul %294, %19, %cst_58 {dimension_numbers = #tpu.dot_dimension_numbers<[1], [0], [0], [1], [0, 0, 1, 1], [], []>} : vector<16x96xf32>, vector<96x384xf32>, vector<16x384xf32> -> vector<16x384xf32>
    %cst_59 = arith.constant dense<0.000000e+00> : vector<16x384xf32>
    %296 = tpu.matmul %294, %20, %cst_59 {dimension_numbers = #tpu.dot_dimension_numbers<[1], [0], [0], [1], [0, 0, 1, 1], [], []>} : vector<16x96xf32>, vector<96x384xf32>, vector<16x384xf32> -> vector<16x384xf32>
    %cst_60 = arith.constant 0.000000e+00 : f32
    %297 = vector.broadcast %cst_60 : f32 to vector<2x96xf32>
    %cst_61 = arith.constant 0.000000e+00 : f32
    %298 = vector.broadcast %cst_61 : f32 to vector<2x96xf32>
    %299 = vector.extract_strided_slice %295 {offsets = [0, 0], sizes = [2, 384], strides = [1, 1]} : vector<16x384xf32> to vector<2x384xf32>
    %300 = vector.extract_strided_slice %296 {offsets = [14, 0], sizes = [2, 384], strides = [1, 1]} : vector<16x384xf32> to vector<2x384xf32>
    %301 = arith.addf %299, %300 : vector<2x384xf32>
    %302 = vector.broadcast %22 : vector<1x384xf32> to vector<2x384xf32>
    %303 = arith.addf %301, %302 : vector<2x384xf32>
    %cst_62 = arith.constant dense<0.000000e+00> : vector<2x384xf32>
    %304 = tpu.matmul %297, %21, %cst_62 {dimension_numbers = #tpu.dot_dimension_numbers<[1], [0], [0], [1], [0, 0, 1, 1], [], []>} : vector<2x96xf32>, vector<96x384xf32>, vector<2x384xf32> -> vector<2x384xf32>
    %305 = arith.addf %303, %304 : vector<2x384xf32>
    %306 = vector.extract_strided_slice %305 {offsets = [0, 0], sizes = [2, 96], strides = [1, 1]} : vector<2x384xf32> to vector<2x96xf32>
    %307 = arith.negf %306 : vector<2x96xf32>
    %308 = math.exp %307 : vector<2x96xf32>
    %cst_63 = arith.constant 1.000000e+00 : f32
    %309 = vector.broadcast %cst_63 : f32 to vector<2x96xf32>
    %310 = arith.addf %309, %308 : vector<2x96xf32>
    %311 = arith.divf %309, %310 : vector<2x96xf32>
    %312 = vector.extract_strided_slice %305 {offsets = [0, 96], sizes = [2, 96], strides = [1, 1]} : vector<2x384xf32> to vector<2x96xf32>
    %313 = arith.negf %312 : vector<2x96xf32>
    %314 = math.exp %313 : vector<2x96xf32>
    %cst_64 = arith.constant 1.000000e+00 : f32
    %315 = vector.broadcast %cst_64 : f32 to vector<2x96xf32>
    %316 = arith.addf %315, %314 : vector<2x96xf32>
    %317 = arith.divf %315, %316 : vector<2x96xf32>
    %318 = vector.extract_strided_slice %305 {offsets = [0, 192], sizes = [2, 96], strides = [1, 1]} : vector<2x384xf32> to vector<2x96xf32>
    %319 = math.tanh %318 : vector<2x96xf32>
    %320 = vector.extract_strided_slice %305 {offsets = [0, 288], sizes = [2, 96], strides = [1, 1]} : vector<2x384xf32> to vector<2x96xf32>
    %321 = arith.negf %320 : vector<2x96xf32>
    %322 = math.exp %321 : vector<2x96xf32>
    %cst_65 = arith.constant 1.000000e+00 : f32
    %323 = vector.broadcast %cst_65 : f32 to vector<2x96xf32>
    %324 = arith.addf %323, %322 : vector<2x96xf32>
    %325 = arith.divf %323, %324 : vector<2x96xf32>
    %326 = arith.mulf %317, %298 : vector<2x96xf32>
    %327 = arith.mulf %311, %319 : vector<2x96xf32>
    %328 = arith.addf %326, %327 : vector<2x96xf32>
    %329 = math.tanh %328 : vector<2x96xf32>
    %330 = arith.mulf %325, %329 : vector<2x96xf32>
    %331 = vector.extract_strided_slice %295 {offsets = [2, 0], sizes = [2, 384], strides = [1, 1]} : vector<16x384xf32> to vector<2x384xf32>
    %332 = vector.extract_strided_slice %296 {offsets = [12, 0], sizes = [2, 384], strides = [1, 1]} : vector<16x384xf32> to vector<2x384xf32>
    %333 = arith.addf %331, %332 : vector<2x384xf32>
    %334 = vector.broadcast %22 : vector<1x384xf32> to vector<2x384xf32>
    %335 = arith.addf %333, %334 : vector<2x384xf32>
    %cst_66 = arith.constant dense<0.000000e+00> : vector<2x384xf32>
    %336 = tpu.matmul %330, %21, %cst_66 {dimension_numbers = #tpu.dot_dimension_numbers<[1], [0], [0], [1], [0, 0, 1, 1], [], []>} : vector<2x96xf32>, vector<96x384xf32>, vector<2x384xf32> -> vector<2x384xf32>
    %337 = arith.addf %335, %336 : vector<2x384xf32>
    %338 = vector.extract_strided_slice %337 {offsets = [0, 0], sizes = [2, 96], strides = [1, 1]} : vector<2x384xf32> to vector<2x96xf32>
    %339 = arith.negf %338 : vector<2x96xf32>
    %340 = math.exp %339 : vector<2x96xf32>
    %cst_67 = arith.constant 1.000000e+00 : f32
    %341 = vector.broadcast %cst_67 : f32 to vector<2x96xf32>
    %342 = arith.addf %341, %340 : vector<2x96xf32>
    %343 = arith.divf %341, %342 : vector<2x96xf32>
    %344 = vector.extract_strided_slice %337 {offsets = [0, 96], sizes = [2, 96], strides = [1, 1]} : vector<2x384xf32> to vector<2x96xf32>
    %345 = arith.negf %344 : vector<2x96xf32>
    %346 = math.exp %345 : vector<2x96xf32>
    %cst_68 = arith.constant 1.000000e+00 : f32
    %347 = vector.broadcast %cst_68 : f32 to vector<2x96xf32>
    %348 = arith.addf %347, %346 : vector<2x96xf32>
    %349 = arith.divf %347, %348 : vector<2x96xf32>
    %350 = vector.extract_strided_slice %337 {offsets = [0, 192], sizes = [2, 96], strides = [1, 1]} : vector<2x384xf32> to vector<2x96xf32>
    %351 = math.tanh %350 : vector<2x96xf32>
    %352 = vector.extract_strided_slice %337 {offsets = [0, 288], sizes = [2, 96], strides = [1, 1]} : vector<2x384xf32> to vector<2x96xf32>
    %353 = arith.negf %352 : vector<2x96xf32>
    %354 = math.exp %353 : vector<2x96xf32>
    %cst_69 = arith.constant 1.000000e+00 : f32
    %355 = vector.broadcast %cst_69 : f32 to vector<2x96xf32>
    %356 = arith.addf %355, %354 : vector<2x96xf32>
    %357 = arith.divf %355, %356 : vector<2x96xf32>
    %358 = arith.mulf %349, %328 : vector<2x96xf32>
    %359 = arith.mulf %343, %351 : vector<2x96xf32>
    %360 = arith.addf %358, %359 : vector<2x96xf32>
    %361 = math.tanh %360 : vector<2x96xf32>
    %362 = arith.mulf %357, %361 : vector<2x96xf32>
    %363 = vector.extract_strided_slice %295 {offsets = [4, 0], sizes = [2, 384], strides = [1, 1]} : vector<16x384xf32> to vector<2x384xf32>
    %364 = vector.extract_strided_slice %296 {offsets = [10, 0], sizes = [2, 384], strides = [1, 1]} : vector<16x384xf32> to vector<2x384xf32>
    %365 = arith.addf %363, %364 : vector<2x384xf32>
    %366 = vector.broadcast %22 : vector<1x384xf32> to vector<2x384xf32>
    %367 = arith.addf %365, %366 : vector<2x384xf32>
    %cst_70 = arith.constant dense<0.000000e+00> : vector<2x384xf32>
    %368 = tpu.matmul %362, %21, %cst_70 {dimension_numbers = #tpu.dot_dimension_numbers<[1], [0], [0], [1], [0, 0, 1, 1], [], []>} : vector<2x96xf32>, vector<96x384xf32>, vector<2x384xf32> -> vector<2x384xf32>
    %369 = arith.addf %367, %368 : vector<2x384xf32>
    %370 = vector.extract_strided_slice %369 {offsets = [0, 0], sizes = [2, 96], strides = [1, 1]} : vector<2x384xf32> to vector<2x96xf32>
    %371 = arith.negf %370 : vector<2x96xf32>
    %372 = math.exp %371 : vector<2x96xf32>
    %cst_71 = arith.constant 1.000000e+00 : f32
    %373 = vector.broadcast %cst_71 : f32 to vector<2x96xf32>
    %374 = arith.addf %373, %372 : vector<2x96xf32>
    %375 = arith.divf %373, %374 : vector<2x96xf32>
    %376 = vector.extract_strided_slice %369 {offsets = [0, 96], sizes = [2, 96], strides = [1, 1]} : vector<2x384xf32> to vector<2x96xf32>
    %377 = arith.negf %376 : vector<2x96xf32>
    %378 = math.exp %377 : vector<2x96xf32>
    %cst_72 = arith.constant 1.000000e+00 : f32
    %379 = vector.broadcast %cst_72 : f32 to vector<2x96xf32>
    %380 = arith.addf %379, %378 : vector<2x96xf32>
    %381 = arith.divf %379, %380 : vector<2x96xf32>
    %382 = vector.extract_strided_slice %369 {offsets = [0, 192], sizes = [2, 96], strides = [1, 1]} : vector<2x384xf32> to vector<2x96xf32>
    %383 = math.tanh %382 : vector<2x96xf32>
    %384 = vector.extract_strided_slice %369 {offsets = [0, 288], sizes = [2, 96], strides = [1, 1]} : vector<2x384xf32> to vector<2x96xf32>
    %385 = arith.negf %384 : vector<2x96xf32>
    %386 = math.exp %385 : vector<2x96xf32>
    %cst_73 = arith.constant 1.000000e+00 : f32
    %387 = vector.broadcast %cst_73 : f32 to vector<2x96xf32>
    %388 = arith.addf %387, %386 : vector<2x96xf32>
    %389 = arith.divf %387, %388 : vector<2x96xf32>
    %390 = arith.mulf %381, %360 : vector<2x96xf32>
    %391 = arith.mulf %375, %383 : vector<2x96xf32>
    %392 = arith.addf %390, %391 : vector<2x96xf32>
    %393 = math.tanh %392 : vector<2x96xf32>
    %394 = arith.mulf %389, %393 : vector<2x96xf32>
    %395 = vector.extract_strided_slice %295 {offsets = [6, 0], sizes = [2, 384], strides = [1, 1]} : vector<16x384xf32> to vector<2x384xf32>
    %396 = vector.extract_strided_slice %296 {offsets = [8, 0], sizes = [2, 384], strides = [1, 1]} : vector<16x384xf32> to vector<2x384xf32>
    %397 = arith.addf %395, %396 : vector<2x384xf32>
    %398 = vector.broadcast %22 : vector<1x384xf32> to vector<2x384xf32>
    %399 = arith.addf %397, %398 : vector<2x384xf32>
    %cst_74 = arith.constant dense<0.000000e+00> : vector<2x384xf32>
    %400 = tpu.matmul %394, %21, %cst_74 {dimension_numbers = #tpu.dot_dimension_numbers<[1], [0], [0], [1], [0, 0, 1, 1], [], []>} : vector<2x96xf32>, vector<96x384xf32>, vector<2x384xf32> -> vector<2x384xf32>
    %401 = arith.addf %399, %400 : vector<2x384xf32>
    %402 = vector.extract_strided_slice %401 {offsets = [0, 0], sizes = [2, 96], strides = [1, 1]} : vector<2x384xf32> to vector<2x96xf32>
    %403 = arith.negf %402 : vector<2x96xf32>
    %404 = math.exp %403 : vector<2x96xf32>
    %cst_75 = arith.constant 1.000000e+00 : f32
    %405 = vector.broadcast %cst_75 : f32 to vector<2x96xf32>
    %406 = arith.addf %405, %404 : vector<2x96xf32>
    %407 = arith.divf %405, %406 : vector<2x96xf32>
    %408 = vector.extract_strided_slice %401 {offsets = [0, 96], sizes = [2, 96], strides = [1, 1]} : vector<2x384xf32> to vector<2x96xf32>
    %409 = arith.negf %408 : vector<2x96xf32>
    %410 = math.exp %409 : vector<2x96xf32>
    %cst_76 = arith.constant 1.000000e+00 : f32
    %411 = vector.broadcast %cst_76 : f32 to vector<2x96xf32>
    %412 = arith.addf %411, %410 : vector<2x96xf32>
    %413 = arith.divf %411, %412 : vector<2x96xf32>
    %414 = vector.extract_strided_slice %401 {offsets = [0, 192], sizes = [2, 96], strides = [1, 1]} : vector<2x384xf32> to vector<2x96xf32>
    %415 = math.tanh %414 : vector<2x96xf32>
    %416 = vector.extract_strided_slice %401 {offsets = [0, 288], sizes = [2, 96], strides = [1, 1]} : vector<2x384xf32> to vector<2x96xf32>
    %417 = arith.negf %416 : vector<2x96xf32>
    %418 = math.exp %417 : vector<2x96xf32>
    %cst_77 = arith.constant 1.000000e+00 : f32
    %419 = vector.broadcast %cst_77 : f32 to vector<2x96xf32>
    %420 = arith.addf %419, %418 : vector<2x96xf32>
    %421 = arith.divf %419, %420 : vector<2x96xf32>
    %422 = arith.mulf %413, %392 : vector<2x96xf32>
    %423 = arith.mulf %407, %415 : vector<2x96xf32>
    %424 = arith.addf %422, %423 : vector<2x96xf32>
    %425 = math.tanh %424 : vector<2x96xf32>
    %426 = arith.mulf %421, %425 : vector<2x96xf32>
    %427 = vector.extract_strided_slice %295 {offsets = [8, 0], sizes = [2, 384], strides = [1, 1]} : vector<16x384xf32> to vector<2x384xf32>
    %428 = vector.extract_strided_slice %296 {offsets = [6, 0], sizes = [2, 384], strides = [1, 1]} : vector<16x384xf32> to vector<2x384xf32>
    %429 = arith.addf %427, %428 : vector<2x384xf32>
    %430 = vector.broadcast %22 : vector<1x384xf32> to vector<2x384xf32>
    %431 = arith.addf %429, %430 : vector<2x384xf32>
    %cst_78 = arith.constant dense<0.000000e+00> : vector<2x384xf32>
    %432 = tpu.matmul %426, %21, %cst_78 {dimension_numbers = #tpu.dot_dimension_numbers<[1], [0], [0], [1], [0, 0, 1, 1], [], []>} : vector<2x96xf32>, vector<96x384xf32>, vector<2x384xf32> -> vector<2x384xf32>
    %433 = arith.addf %431, %432 : vector<2x384xf32>
    %434 = vector.extract_strided_slice %433 {offsets = [0, 0], sizes = [2, 96], strides = [1, 1]} : vector<2x384xf32> to vector<2x96xf32>
    %435 = arith.negf %434 : vector<2x96xf32>
    %436 = math.exp %435 : vector<2x96xf32>
    %cst_79 = arith.constant 1.000000e+00 : f32
    %437 = vector.broadcast %cst_79 : f32 to vector<2x96xf32>
    %438 = arith.addf %437, %436 : vector<2x96xf32>
    %439 = arith.divf %437, %438 : vector<2x96xf32>
    %440 = vector.extract_strided_slice %433 {offsets = [0, 96], sizes = [2, 96], strides = [1, 1]} : vector<2x384xf32> to vector<2x96xf32>
    %441 = arith.negf %440 : vector<2x96xf32>
    %442 = math.exp %441 : vector<2x96xf32>
    %cst_80 = arith.constant 1.000000e+00 : f32
    %443 = vector.broadcast %cst_80 : f32 to vector<2x96xf32>
    %444 = arith.addf %443, %442 : vector<2x96xf32>
    %445 = arith.divf %443, %444 : vector<2x96xf32>
    %446 = vector.extract_strided_slice %433 {offsets = [0, 192], sizes = [2, 96], strides = [1, 1]} : vector<2x384xf32> to vector<2x96xf32>
    %447 = math.tanh %446 : vector<2x96xf32>
    %448 = vector.extract_strided_slice %433 {offsets = [0, 288], sizes = [2, 96], strides = [1, 1]} : vector<2x384xf32> to vector<2x96xf32>
    %449 = arith.negf %448 : vector<2x96xf32>
    %450 = math.exp %449 : vector<2x96xf32>
    %cst_81 = arith.constant 1.000000e+00 : f32
    %451 = vector.broadcast %cst_81 : f32 to vector<2x96xf32>
    %452 = arith.addf %451, %450 : vector<2x96xf32>
    %453 = arith.divf %451, %452 : vector<2x96xf32>
    %454 = arith.mulf %445, %424 : vector<2x96xf32>
    %455 = arith.mulf %439, %447 : vector<2x96xf32>
    %456 = arith.addf %454, %455 : vector<2x96xf32>
    %457 = math.tanh %456 : vector<2x96xf32>
    %458 = arith.mulf %453, %457 : vector<2x96xf32>
    %459 = vector.extract_strided_slice %295 {offsets = [10, 0], sizes = [2, 384], strides = [1, 1]} : vector<16x384xf32> to vector<2x384xf32>
    %460 = vector.extract_strided_slice %296 {offsets = [4, 0], sizes = [2, 384], strides = [1, 1]} : vector<16x384xf32> to vector<2x384xf32>
    %461 = arith.addf %459, %460 : vector<2x384xf32>
    %462 = vector.broadcast %22 : vector<1x384xf32> to vector<2x384xf32>
    %463 = arith.addf %461, %462 : vector<2x384xf32>
    %cst_82 = arith.constant dense<0.000000e+00> : vector<2x384xf32>
    %464 = tpu.matmul %458, %21, %cst_82 {dimension_numbers = #tpu.dot_dimension_numbers<[1], [0], [0], [1], [0, 0, 1, 1], [], []>} : vector<2x96xf32>, vector<96x384xf32>, vector<2x384xf32> -> vector<2x384xf32>
    %465 = arith.addf %463, %464 : vector<2x384xf32>
    %466 = vector.extract_strided_slice %465 {offsets = [0, 0], sizes = [2, 96], strides = [1, 1]} : vector<2x384xf32> to vector<2x96xf32>
    %467 = arith.negf %466 : vector<2x96xf32>
    %468 = math.exp %467 : vector<2x96xf32>
    %cst_83 = arith.constant 1.000000e+00 : f32
    %469 = vector.broadcast %cst_83 : f32 to vector<2x96xf32>
    %470 = arith.addf %469, %468 : vector<2x96xf32>
    %471 = arith.divf %469, %470 : vector<2x96xf32>
    %472 = vector.extract_strided_slice %465 {offsets = [0, 96], sizes = [2, 96], strides = [1, 1]} : vector<2x384xf32> to vector<2x96xf32>
    %473 = arith.negf %472 : vector<2x96xf32>
    %474 = math.exp %473 : vector<2x96xf32>
    %cst_84 = arith.constant 1.000000e+00 : f32
    %475 = vector.broadcast %cst_84 : f32 to vector<2x96xf32>
    %476 = arith.addf %475, %474 : vector<2x96xf32>
    %477 = arith.divf %475, %476 : vector<2x96xf32>
    %478 = vector.extract_strided_slice %465 {offsets = [0, 192], sizes = [2, 96], strides = [1, 1]} : vector<2x384xf32> to vector<2x96xf32>
    %479 = math.tanh %478 : vector<2x96xf32>
    %480 = vector.extract_strided_slice %465 {offsets = [0, 288], sizes = [2, 96], strides = [1, 1]} : vector<2x384xf32> to vector<2x96xf32>
    %481 = arith.negf %480 : vector<2x96xf32>
    %482 = math.exp %481 : vector<2x96xf32>
    %cst_85 = arith.constant 1.000000e+00 : f32
    %483 = vector.broadcast %cst_85 : f32 to vector<2x96xf32>
    %484 = arith.addf %483, %482 : vector<2x96xf32>
    %485 = arith.divf %483, %484 : vector<2x96xf32>
    %486 = arith.mulf %477, %456 : vector<2x96xf32>
    %487 = arith.mulf %471, %479 : vector<2x96xf32>
    %488 = arith.addf %486, %487 : vector<2x96xf32>
    %489 = math.tanh %488 : vector<2x96xf32>
    %490 = arith.mulf %485, %489 : vector<2x96xf32>
    %491 = vector.extract_strided_slice %295 {offsets = [12, 0], sizes = [2, 384], strides = [1, 1]} : vector<16x384xf32> to vector<2x384xf32>
    %492 = vector.extract_strided_slice %296 {offsets = [2, 0], sizes = [2, 384], strides = [1, 1]} : vector<16x384xf32> to vector<2x384xf32>
    %493 = arith.addf %491, %492 : vector<2x384xf32>
    %494 = vector.broadcast %22 : vector<1x384xf32> to vector<2x384xf32>
    %495 = arith.addf %493, %494 : vector<2x384xf32>
    %cst_86 = arith.constant dense<0.000000e+00> : vector<2x384xf32>
    %496 = tpu.matmul %490, %21, %cst_86 {dimension_numbers = #tpu.dot_dimension_numbers<[1], [0], [0], [1], [0, 0, 1, 1], [], []>} : vector<2x96xf32>, vector<96x384xf32>, vector<2x384xf32> -> vector<2x384xf32>
    %497 = arith.addf %495, %496 : vector<2x384xf32>
    %498 = vector.extract_strided_slice %497 {offsets = [0, 0], sizes = [2, 96], strides = [1, 1]} : vector<2x384xf32> to vector<2x96xf32>
    %499 = arith.negf %498 : vector<2x96xf32>
    %500 = math.exp %499 : vector<2x96xf32>
    %cst_87 = arith.constant 1.000000e+00 : f32
    %501 = vector.broadcast %cst_87 : f32 to vector<2x96xf32>
    %502 = arith.addf %501, %500 : vector<2x96xf32>
    %503 = arith.divf %501, %502 : vector<2x96xf32>
    %504 = vector.extract_strided_slice %497 {offsets = [0, 96], sizes = [2, 96], strides = [1, 1]} : vector<2x384xf32> to vector<2x96xf32>
    %505 = arith.negf %504 : vector<2x96xf32>
    %506 = math.exp %505 : vector<2x96xf32>
    %cst_88 = arith.constant 1.000000e+00 : f32
    %507 = vector.broadcast %cst_88 : f32 to vector<2x96xf32>
    %508 = arith.addf %507, %506 : vector<2x96xf32>
    %509 = arith.divf %507, %508 : vector<2x96xf32>
    %510 = vector.extract_strided_slice %497 {offsets = [0, 192], sizes = [2, 96], strides = [1, 1]} : vector<2x384xf32> to vector<2x96xf32>
    %511 = math.tanh %510 : vector<2x96xf32>
    %512 = vector.extract_strided_slice %497 {offsets = [0, 288], sizes = [2, 96], strides = [1, 1]} : vector<2x384xf32> to vector<2x96xf32>
    %513 = arith.negf %512 : vector<2x96xf32>
    %514 = math.exp %513 : vector<2x96xf32>
    %cst_89 = arith.constant 1.000000e+00 : f32
    %515 = vector.broadcast %cst_89 : f32 to vector<2x96xf32>
    %516 = arith.addf %515, %514 : vector<2x96xf32>
    %517 = arith.divf %515, %516 : vector<2x96xf32>
    %518 = arith.mulf %509, %488 : vector<2x96xf32>
    %519 = arith.mulf %503, %511 : vector<2x96xf32>
    %520 = arith.addf %518, %519 : vector<2x96xf32>
    %521 = math.tanh %520 : vector<2x96xf32>
    %522 = arith.mulf %517, %521 : vector<2x96xf32>
    %523 = vector.extract_strided_slice %295 {offsets = [14, 0], sizes = [2, 384], strides = [1, 1]} : vector<16x384xf32> to vector<2x384xf32>
    %524 = vector.extract_strided_slice %296 {offsets = [0, 0], sizes = [2, 384], strides = [1, 1]} : vector<16x384xf32> to vector<2x384xf32>
    %525 = arith.addf %523, %524 : vector<2x384xf32>
    %526 = vector.broadcast %22 : vector<1x384xf32> to vector<2x384xf32>
    %527 = arith.addf %525, %526 : vector<2x384xf32>
    %cst_90 = arith.constant dense<0.000000e+00> : vector<2x384xf32>
    %528 = tpu.matmul %522, %21, %cst_90 {dimension_numbers = #tpu.dot_dimension_numbers<[1], [0], [0], [1], [0, 0, 1, 1], [], []>} : vector<2x96xf32>, vector<96x384xf32>, vector<2x384xf32> -> vector<2x384xf32>
    %529 = arith.addf %527, %528 : vector<2x384xf32>
    %530 = vector.extract_strided_slice %529 {offsets = [0, 0], sizes = [2, 96], strides = [1, 1]} : vector<2x384xf32> to vector<2x96xf32>
    %531 = arith.negf %530 : vector<2x96xf32>
    %532 = math.exp %531 : vector<2x96xf32>
    %cst_91 = arith.constant 1.000000e+00 : f32
    %533 = vector.broadcast %cst_91 : f32 to vector<2x96xf32>
    %534 = arith.addf %533, %532 : vector<2x96xf32>
    %535 = arith.divf %533, %534 : vector<2x96xf32>
    %536 = vector.extract_strided_slice %529 {offsets = [0, 96], sizes = [2, 96], strides = [1, 1]} : vector<2x384xf32> to vector<2x96xf32>
    %537 = arith.negf %536 : vector<2x96xf32>
    %538 = math.exp %537 : vector<2x96xf32>
    %cst_92 = arith.constant 1.000000e+00 : f32
    %539 = vector.broadcast %cst_92 : f32 to vector<2x96xf32>
    %540 = arith.addf %539, %538 : vector<2x96xf32>
    %541 = arith.divf %539, %540 : vector<2x96xf32>
    %542 = vector.extract_strided_slice %529 {offsets = [0, 192], sizes = [2, 96], strides = [1, 1]} : vector<2x384xf32> to vector<2x96xf32>
    %543 = math.tanh %542 : vector<2x96xf32>
    %544 = vector.extract_strided_slice %529 {offsets = [0, 288], sizes = [2, 96], strides = [1, 1]} : vector<2x384xf32> to vector<2x96xf32>
    %545 = arith.negf %544 : vector<2x96xf32>
    %546 = math.exp %545 : vector<2x96xf32>
    %cst_93 = arith.constant 1.000000e+00 : f32
    %547 = vector.broadcast %cst_93 : f32 to vector<2x96xf32>
    %548 = arith.addf %547, %546 : vector<2x96xf32>
    %549 = arith.divf %547, %548 : vector<2x96xf32>
    %550 = arith.mulf %541, %520 : vector<2x96xf32>
    %551 = arith.mulf %535, %543 : vector<2x96xf32>
    %552 = arith.addf %550, %551 : vector<2x96xf32>
    %553 = math.tanh %552 : vector<2x96xf32>
    %554 = arith.mulf %549, %553 : vector<2x96xf32>
    %555 = arith.select %25, %330, %554 : vector<2x96xi1>, vector<2x96xf32>
    %556 = arith.select %25, %362, %522 : vector<2x96xi1>, vector<2x96xf32>
    %557 = arith.select %25, %394, %490 : vector<2x96xi1>, vector<2x96xf32>
    %558 = arith.select %25, %426, %458 : vector<2x96xi1>, vector<2x96xf32>
    %559 = arith.select %25, %458, %426 : vector<2x96xi1>, vector<2x96xf32>
    %560 = arith.select %25, %490, %394 : vector<2x96xi1>, vector<2x96xf32>
    %561 = arith.select %25, %522, %362 : vector<2x96xi1>, vector<2x96xf32>
    %562 = arith.select %25, %554, %330 : vector<2x96xi1>, vector<2x96xf32>
    %c0_94 = arith.constant 0 : index
    %c0_95 = arith.constant 0 : index
    %563 = vector.load %arg12[%c0_94, %c0_95] : memref<32x256xf32, #tpu.memory_space<vmem>>, vector<32x256xf32>
    %c0_96 = arith.constant 0 : index
    %c0_97 = arith.constant 0 : index
    %564 = vector.load %arg13[%c0_96, %c0_97] : memref<32x256xf32, #tpu.memory_space<vmem>>, vector<32x256xf32>
    %c0_98 = arith.constant 0 : index
    %c0_99 = arith.constant 0 : index
    %565 = vector.load %arg14[%c0_98, %c0_99] : memref<64x256xf32, #tpu.memory_space<vmem>>, vector<64x256xf32>
    %c0_100 = arith.constant 0 : index
    %c0_101 = arith.constant 0 : index
    %566 = vector.load %arg15[%c0_100, %c0_101] : memref<1x256xf32, #tpu.memory_space<vmem>>, vector<1x256xf32>
    %c0_102 = arith.constant 0 : index
    %c0_103 = arith.constant 0 : index
    %567 = vector.load %arg16[%c0_102, %c0_103] : memref<64x256xf32, #tpu.memory_space<vmem>>, vector<64x256xf32>
    %c0_104 = arith.constant 0 : index
    %c0_105 = arith.constant 0 : index
    %568 = vector.load %arg17[%c0_104, %c0_105] : memref<64x256xf32, #tpu.memory_space<vmem>>, vector<64x256xf32>
    %c0_106 = arith.constant 0 : index
    %c0_107 = arith.constant 0 : index
    %569 = vector.load %arg18[%c0_106, %c0_107] : memref<64x256xf32, #tpu.memory_space<vmem>>, vector<64x256xf32>
    %c0_108 = arith.constant 0 : index
    %c0_109 = arith.constant 0 : index
    %570 = vector.load %arg19[%c0_108, %c0_109] : memref<1x256xf32, #tpu.memory_space<vmem>>, vector<1x256xf32>
    %571 = tpu.iota {dimensions = array<i32: 1>} : vector<8x64xi32>
    %c32_i32 = arith.constant 32 : i32
    %572 = vector.broadcast %c32_i32 : i32 to vector<8x64xi32>
    %573 = arith.cmpi slt, %571, %572 : vector<8x64xi32>
    %cst_110 = arith.constant dense<0.000000e+00> : vector<24x256xf32>
    %574 = tpu.matmul %14, %563, %cst_110 {dimension_numbers = #tpu.dot_dimension_numbers<[1], [0], [0], [1], [0, 0, 1, 1], [], []>} : vector<24x32xf32>, vector<32x256xf32>, vector<24x256xf32> -> vector<24x256xf32>
    %cst_111 = arith.constant dense<0.000000e+00> : vector<24x256xf32>
    %575 = tpu.matmul %14, %564, %cst_111 {dimension_numbers = #tpu.dot_dimension_numbers<[1], [0], [0], [1], [0, 0, 1, 1], [], []>} : vector<24x32xf32>, vector<32x256xf32>, vector<24x256xf32> -> vector<24x256xf32>
    %cst_112 = arith.constant 0.000000e+00 : f32
    %576 = vector.broadcast %cst_112 : f32 to vector<8x64xf32>
    %cst_113 = arith.constant 0.000000e+00 : f32
    %577 = vector.broadcast %cst_113 : f32 to vector<8x64xf32>
    %578 = vector.extract_strided_slice %574 {offsets = [0, 0], sizes = [8, 256], strides = [1, 1]} : vector<24x256xf32> to vector<8x256xf32>
    %579 = vector.extract_strided_slice %575 {offsets = [16, 0], sizes = [8, 256], strides = [1, 1]} : vector<24x256xf32> to vector<8x256xf32>
    %580 = arith.addf %578, %579 : vector<8x256xf32>
    %581 = vector.broadcast %566 : vector<1x256xf32> to vector<8x256xf32>
    %582 = arith.addf %580, %581 : vector<8x256xf32>
    %cst_114 = arith.constant dense<0.000000e+00> : vector<8x256xf32>
    %583 = tpu.matmul %576, %565, %cst_114 {dimension_numbers = #tpu.dot_dimension_numbers<[1], [0], [0], [1], [0, 0, 1, 1], [], []>} : vector<8x64xf32>, vector<64x256xf32>, vector<8x256xf32> -> vector<8x256xf32>
    %584 = arith.addf %582, %583 : vector<8x256xf32>
    %585 = vector.extract_strided_slice %584 {offsets = [0, 0], sizes = [8, 64], strides = [1, 1]} : vector<8x256xf32> to vector<8x64xf32>
    %586 = arith.negf %585 : vector<8x64xf32>
    %587 = math.exp %586 : vector<8x64xf32>
    %cst_115 = arith.constant 1.000000e+00 : f32
    %588 = vector.broadcast %cst_115 : f32 to vector<8x64xf32>
    %589 = arith.addf %588, %587 : vector<8x64xf32>
    %590 = arith.divf %588, %589 : vector<8x64xf32>
    %591 = vector.extract_strided_slice %584 {offsets = [0, 64], sizes = [8, 64], strides = [1, 1]} : vector<8x256xf32> to vector<8x64xf32>
    %592 = arith.negf %591 : vector<8x64xf32>
    %593 = math.exp %592 : vector<8x64xf32>
    %cst_116 = arith.constant 1.000000e+00 : f32
    %594 = vector.broadcast %cst_116 : f32 to vector<8x64xf32>
    %595 = arith.addf %594, %593 : vector<8x64xf32>
    %596 = arith.divf %594, %595 : vector<8x64xf32>
    %597 = vector.extract_strided_slice %584 {offsets = [0, 128], sizes = [8, 64], strides = [1, 1]} : vector<8x256xf32> to vector<8x64xf32>
    %598 = math.tanh %597 : vector<8x64xf32>
    %599 = vector.extract_strided_slice %584 {offsets = [0, 192], sizes = [8, 64], strides = [1, 1]} : vector<8x256xf32> to vector<8x64xf32>
    %600 = arith.negf %599 : vector<8x64xf32>
    %601 = math.exp %600 : vector<8x64xf32>
    %cst_117 = arith.constant 1.000000e+00 : f32
    %602 = vector.broadcast %cst_117 : f32 to vector<8x64xf32>
    %603 = arith.addf %602, %601 : vector<8x64xf32>
    %604 = arith.divf %602, %603 : vector<8x64xf32>
    %605 = arith.mulf %596, %577 : vector<8x64xf32>
    %606 = arith.mulf %590, %598 : vector<8x64xf32>
    %607 = arith.addf %605, %606 : vector<8x64xf32>
    %608 = math.tanh %607 : vector<8x64xf32>
    %609 = arith.mulf %604, %608 : vector<8x64xf32>
    %610 = vector.extract_strided_slice %574 {offsets = [8, 0], sizes = [8, 256], strides = [1, 1]} : vector<24x256xf32> to vector<8x256xf32>
    %611 = vector.extract_strided_slice %575 {offsets = [8, 0], sizes = [8, 256], strides = [1, 1]} : vector<24x256xf32> to vector<8x256xf32>
    %612 = arith.addf %610, %611 : vector<8x256xf32>
    %613 = vector.broadcast %566 : vector<1x256xf32> to vector<8x256xf32>
    %614 = arith.addf %612, %613 : vector<8x256xf32>
    %cst_118 = arith.constant dense<0.000000e+00> : vector<8x256xf32>
    %615 = tpu.matmul %609, %565, %cst_118 {dimension_numbers = #tpu.dot_dimension_numbers<[1], [0], [0], [1], [0, 0, 1, 1], [], []>} : vector<8x64xf32>, vector<64x256xf32>, vector<8x256xf32> -> vector<8x256xf32>
    %616 = arith.addf %614, %615 : vector<8x256xf32>
    %617 = vector.extract_strided_slice %616 {offsets = [0, 0], sizes = [8, 64], strides = [1, 1]} : vector<8x256xf32> to vector<8x64xf32>
    %618 = arith.negf %617 : vector<8x64xf32>
    %619 = math.exp %618 : vector<8x64xf32>
    %cst_119 = arith.constant 1.000000e+00 : f32
    %620 = vector.broadcast %cst_119 : f32 to vector<8x64xf32>
    %621 = arith.addf %620, %619 : vector<8x64xf32>
    %622 = arith.divf %620, %621 : vector<8x64xf32>
    %623 = vector.extract_strided_slice %616 {offsets = [0, 64], sizes = [8, 64], strides = [1, 1]} : vector<8x256xf32> to vector<8x64xf32>
    %624 = arith.negf %623 : vector<8x64xf32>
    %625 = math.exp %624 : vector<8x64xf32>
    %cst_120 = arith.constant 1.000000e+00 : f32
    %626 = vector.broadcast %cst_120 : f32 to vector<8x64xf32>
    %627 = arith.addf %626, %625 : vector<8x64xf32>
    %628 = arith.divf %626, %627 : vector<8x64xf32>
    %629 = vector.extract_strided_slice %616 {offsets = [0, 128], sizes = [8, 64], strides = [1, 1]} : vector<8x256xf32> to vector<8x64xf32>
    %630 = math.tanh %629 : vector<8x64xf32>
    %631 = vector.extract_strided_slice %616 {offsets = [0, 192], sizes = [8, 64], strides = [1, 1]} : vector<8x256xf32> to vector<8x64xf32>
    %632 = arith.negf %631 : vector<8x64xf32>
    %633 = math.exp %632 : vector<8x64xf32>
    %cst_121 = arith.constant 1.000000e+00 : f32
    %634 = vector.broadcast %cst_121 : f32 to vector<8x64xf32>
    %635 = arith.addf %634, %633 : vector<8x64xf32>
    %636 = arith.divf %634, %635 : vector<8x64xf32>
    %637 = arith.mulf %628, %607 : vector<8x64xf32>
    %638 = arith.mulf %622, %630 : vector<8x64xf32>
    %639 = arith.addf %637, %638 : vector<8x64xf32>
    %640 = math.tanh %639 : vector<8x64xf32>
    %641 = arith.mulf %636, %640 : vector<8x64xf32>
    %642 = vector.extract_strided_slice %574 {offsets = [16, 0], sizes = [8, 256], strides = [1, 1]} : vector<24x256xf32> to vector<8x256xf32>
    %643 = vector.extract_strided_slice %575 {offsets = [0, 0], sizes = [8, 256], strides = [1, 1]} : vector<24x256xf32> to vector<8x256xf32>
    %644 = arith.addf %642, %643 : vector<8x256xf32>
    %645 = vector.broadcast %566 : vector<1x256xf32> to vector<8x256xf32>
    %646 = arith.addf %644, %645 : vector<8x256xf32>
    %cst_122 = arith.constant dense<0.000000e+00> : vector<8x256xf32>
    %647 = tpu.matmul %641, %565, %cst_122 {dimension_numbers = #tpu.dot_dimension_numbers<[1], [0], [0], [1], [0, 0, 1, 1], [], []>} : vector<8x64xf32>, vector<64x256xf32>, vector<8x256xf32> -> vector<8x256xf32>
    %648 = arith.addf %646, %647 : vector<8x256xf32>
    %649 = vector.extract_strided_slice %648 {offsets = [0, 0], sizes = [8, 64], strides = [1, 1]} : vector<8x256xf32> to vector<8x64xf32>
    %650 = arith.negf %649 : vector<8x64xf32>
    %651 = math.exp %650 : vector<8x64xf32>
    %cst_123 = arith.constant 1.000000e+00 : f32
    %652 = vector.broadcast %cst_123 : f32 to vector<8x64xf32>
    %653 = arith.addf %652, %651 : vector<8x64xf32>
    %654 = arith.divf %652, %653 : vector<8x64xf32>
    %655 = vector.extract_strided_slice %648 {offsets = [0, 64], sizes = [8, 64], strides = [1, 1]} : vector<8x256xf32> to vector<8x64xf32>
    %656 = arith.negf %655 : vector<8x64xf32>
    %657 = math.exp %656 : vector<8x64xf32>
    %cst_124 = arith.constant 1.000000e+00 : f32
    %658 = vector.broadcast %cst_124 : f32 to vector<8x64xf32>
    %659 = arith.addf %658, %657 : vector<8x64xf32>
    %660 = arith.divf %658, %659 : vector<8x64xf32>
    %661 = vector.extract_strided_slice %648 {offsets = [0, 128], sizes = [8, 64], strides = [1, 1]} : vector<8x256xf32> to vector<8x64xf32>
    %662 = math.tanh %661 : vector<8x64xf32>
    %663 = vector.extract_strided_slice %648 {offsets = [0, 192], sizes = [8, 64], strides = [1, 1]} : vector<8x256xf32> to vector<8x64xf32>
    %664 = arith.negf %663 : vector<8x64xf32>
    %665 = math.exp %664 : vector<8x64xf32>
    %cst_125 = arith.constant 1.000000e+00 : f32
    %666 = vector.broadcast %cst_125 : f32 to vector<8x64xf32>
    %667 = arith.addf %666, %665 : vector<8x64xf32>
    %668 = arith.divf %666, %667 : vector<8x64xf32>
    %669 = arith.mulf %660, %639 : vector<8x64xf32>
    %670 = arith.mulf %654, %662 : vector<8x64xf32>
    %671 = arith.addf %669, %670 : vector<8x64xf32>
    %672 = math.tanh %671 : vector<8x64xf32>
    %673 = arith.mulf %668, %672 : vector<8x64xf32>
    %674 = arith.select %573, %609, %673 : vector<8x64xi1>, vector<8x64xf32>
    %675 = arith.select %573, %641, %641 : vector<8x64xi1>, vector<8x64xf32>
    %676 = arith.select %573, %673, %609 : vector<8x64xi1>, vector<8x64xf32>
    %677 = tpu.concatenate %674, %675, %676 in 0 : vector<8x64xf32>, vector<8x64xf32>, vector<8x64xf32> -> vector<24x64xf32>
    %cst_126 = arith.constant dense<0.000000e+00> : vector<24x256xf32>
    %678 = tpu.matmul %677, %567, %cst_126 {dimension_numbers = #tpu.dot_dimension_numbers<[1], [0], [0], [1], [0, 0, 1, 1], [], []>} : vector<24x64xf32>, vector<64x256xf32>, vector<24x256xf32> -> vector<24x256xf32>
    %cst_127 = arith.constant dense<0.000000e+00> : vector<24x256xf32>
    %679 = tpu.matmul %677, %568, %cst_127 {dimension_numbers = #tpu.dot_dimension_numbers<[1], [0], [0], [1], [0, 0, 1, 1], [], []>} : vector<24x64xf32>, vector<64x256xf32>, vector<24x256xf32> -> vector<24x256xf32>
    %cst_128 = arith.constant 0.000000e+00 : f32
    %680 = vector.broadcast %cst_128 : f32 to vector<8x64xf32>
    %cst_129 = arith.constant 0.000000e+00 : f32
    %681 = vector.broadcast %cst_129 : f32 to vector<8x64xf32>
    %682 = vector.extract_strided_slice %678 {offsets = [0, 0], sizes = [8, 256], strides = [1, 1]} : vector<24x256xf32> to vector<8x256xf32>
    %683 = vector.extract_strided_slice %679 {offsets = [16, 0], sizes = [8, 256], strides = [1, 1]} : vector<24x256xf32> to vector<8x256xf32>
    %684 = arith.addf %682, %683 : vector<8x256xf32>
    %685 = vector.broadcast %570 : vector<1x256xf32> to vector<8x256xf32>
    %686 = arith.addf %684, %685 : vector<8x256xf32>
    %cst_130 = arith.constant dense<0.000000e+00> : vector<8x256xf32>
    %687 = tpu.matmul %680, %569, %cst_130 {dimension_numbers = #tpu.dot_dimension_numbers<[1], [0], [0], [1], [0, 0, 1, 1], [], []>} : vector<8x64xf32>, vector<64x256xf32>, vector<8x256xf32> -> vector<8x256xf32>
    %688 = arith.addf %686, %687 : vector<8x256xf32>
    %689 = vector.extract_strided_slice %688 {offsets = [0, 0], sizes = [8, 64], strides = [1, 1]} : vector<8x256xf32> to vector<8x64xf32>
    %690 = arith.negf %689 : vector<8x64xf32>
    %691 = math.exp %690 : vector<8x64xf32>
    %cst_131 = arith.constant 1.000000e+00 : f32
    %692 = vector.broadcast %cst_131 : f32 to vector<8x64xf32>
    %693 = arith.addf %692, %691 : vector<8x64xf32>
    %694 = arith.divf %692, %693 : vector<8x64xf32>
    %695 = vector.extract_strided_slice %688 {offsets = [0, 64], sizes = [8, 64], strides = [1, 1]} : vector<8x256xf32> to vector<8x64xf32>
    %696 = arith.negf %695 : vector<8x64xf32>
    %697 = math.exp %696 : vector<8x64xf32>
    %cst_132 = arith.constant 1.000000e+00 : f32
    %698 = vector.broadcast %cst_132 : f32 to vector<8x64xf32>
    %699 = arith.addf %698, %697 : vector<8x64xf32>
    %700 = arith.divf %698, %699 : vector<8x64xf32>
    %701 = vector.extract_strided_slice %688 {offsets = [0, 128], sizes = [8, 64], strides = [1, 1]} : vector<8x256xf32> to vector<8x64xf32>
    %702 = math.tanh %701 : vector<8x64xf32>
    %703 = vector.extract_strided_slice %688 {offsets = [0, 192], sizes = [8, 64], strides = [1, 1]} : vector<8x256xf32> to vector<8x64xf32>
    %704 = arith.negf %703 : vector<8x64xf32>
    %705 = math.exp %704 : vector<8x64xf32>
    %cst_133 = arith.constant 1.000000e+00 : f32
    %706 = vector.broadcast %cst_133 : f32 to vector<8x64xf32>
    %707 = arith.addf %706, %705 : vector<8x64xf32>
    %708 = arith.divf %706, %707 : vector<8x64xf32>
    %709 = arith.mulf %700, %681 : vector<8x64xf32>
    %710 = arith.mulf %694, %702 : vector<8x64xf32>
    %711 = arith.addf %709, %710 : vector<8x64xf32>
    %712 = math.tanh %711 : vector<8x64xf32>
    %713 = arith.mulf %708, %712 : vector<8x64xf32>
    %714 = vector.extract_strided_slice %678 {offsets = [8, 0], sizes = [8, 256], strides = [1, 1]} : vector<24x256xf32> to vector<8x256xf32>
    %715 = vector.extract_strided_slice %679 {offsets = [8, 0], sizes = [8, 256], strides = [1, 1]} : vector<24x256xf32> to vector<8x256xf32>
    %716 = arith.addf %714, %715 : vector<8x256xf32>
    %717 = vector.broadcast %570 : vector<1x256xf32> to vector<8x256xf32>
    %718 = arith.addf %716, %717 : vector<8x256xf32>
    %cst_134 = arith.constant dense<0.000000e+00> : vector<8x256xf32>
    %719 = tpu.matmul %713, %569, %cst_134 {dimension_numbers = #tpu.dot_dimension_numbers<[1], [0], [0], [1], [0, 0, 1, 1], [], []>} : vector<8x64xf32>, vector<64x256xf32>, vector<8x256xf32> -> vector<8x256xf32>
    %720 = arith.addf %718, %719 : vector<8x256xf32>
    %721 = vector.extract_strided_slice %720 {offsets = [0, 0], sizes = [8, 64], strides = [1, 1]} : vector<8x256xf32> to vector<8x64xf32>
    %722 = arith.negf %721 : vector<8x64xf32>
    %723 = math.exp %722 : vector<8x64xf32>
    %cst_135 = arith.constant 1.000000e+00 : f32
    %724 = vector.broadcast %cst_135 : f32 to vector<8x64xf32>
    %725 = arith.addf %724, %723 : vector<8x64xf32>
    %726 = arith.divf %724, %725 : vector<8x64xf32>
    %727 = vector.extract_strided_slice %720 {offsets = [0, 64], sizes = [8, 64], strides = [1, 1]} : vector<8x256xf32> to vector<8x64xf32>
    %728 = arith.negf %727 : vector<8x64xf32>
    %729 = math.exp %728 : vector<8x64xf32>
    %cst_136 = arith.constant 1.000000e+00 : f32
    %730 = vector.broadcast %cst_136 : f32 to vector<8x64xf32>
    %731 = arith.addf %730, %729 : vector<8x64xf32>
    %732 = arith.divf %730, %731 : vector<8x64xf32>
    %733 = vector.extract_strided_slice %720 {offsets = [0, 128], sizes = [8, 64], strides = [1, 1]} : vector<8x256xf32> to vector<8x64xf32>
    %734 = math.tanh %733 : vector<8x64xf32>
    %735 = vector.extract_strided_slice %720 {offsets = [0, 192], sizes = [8, 64], strides = [1, 1]} : vector<8x256xf32> to vector<8x64xf32>
    %736 = arith.negf %735 : vector<8x64xf32>
    %737 = math.exp %736 : vector<8x64xf32>
    %cst_137 = arith.constant 1.000000e+00 : f32
    %738 = vector.broadcast %cst_137 : f32 to vector<8x64xf32>
    %739 = arith.addf %738, %737 : vector<8x64xf32>
    %740 = arith.divf %738, %739 : vector<8x64xf32>
    %741 = arith.mulf %732, %711 : vector<8x64xf32>
    %742 = arith.mulf %726, %734 : vector<8x64xf32>
    %743 = arith.addf %741, %742 : vector<8x64xf32>
    %744 = math.tanh %743 : vector<8x64xf32>
    %745 = arith.mulf %740, %744 : vector<8x64xf32>
    %746 = vector.extract_strided_slice %678 {offsets = [16, 0], sizes = [8, 256], strides = [1, 1]} : vector<24x256xf32> to vector<8x256xf32>
    %747 = vector.extract_strided_slice %679 {offsets = [0, 0], sizes = [8, 256], strides = [1, 1]} : vector<24x256xf32> to vector<8x256xf32>
    %748 = arith.addf %746, %747 : vector<8x256xf32>
    %749 = vector.broadcast %570 : vector<1x256xf32> to vector<8x256xf32>
    %750 = arith.addf %748, %749 : vector<8x256xf32>
    %cst_138 = arith.constant dense<0.000000e+00> : vector<8x256xf32>
    %751 = tpu.matmul %745, %569, %cst_138 {dimension_numbers = #tpu.dot_dimension_numbers<[1], [0], [0], [1], [0, 0, 1, 1], [], []>} : vector<8x64xf32>, vector<64x256xf32>, vector<8x256xf32> -> vector<8x256xf32>
    %752 = arith.addf %750, %751 : vector<8x256xf32>
    %753 = vector.extract_strided_slice %752 {offsets = [0, 0], sizes = [8, 64], strides = [1, 1]} : vector<8x256xf32> to vector<8x64xf32>
    %754 = arith.negf %753 : vector<8x64xf32>
    %755 = math.exp %754 : vector<8x64xf32>
    %cst_139 = arith.constant 1.000000e+00 : f32
    %756 = vector.broadcast %cst_139 : f32 to vector<8x64xf32>
    %757 = arith.addf %756, %755 : vector<8x64xf32>
    %758 = arith.divf %756, %757 : vector<8x64xf32>
    %759 = vector.extract_strided_slice %752 {offsets = [0, 64], sizes = [8, 64], strides = [1, 1]} : vector<8x256xf32> to vector<8x64xf32>
    %760 = arith.negf %759 : vector<8x64xf32>
    %761 = math.exp %760 : vector<8x64xf32>
    %cst_140 = arith.constant 1.000000e+00 : f32
    %762 = vector.broadcast %cst_140 : f32 to vector<8x64xf32>
    %763 = arith.addf %762, %761 : vector<8x64xf32>
    %764 = arith.divf %762, %763 : vector<8x64xf32>
    %765 = vector.extract_strided_slice %752 {offsets = [0, 128], sizes = [8, 64], strides = [1, 1]} : vector<8x256xf32> to vector<8x64xf32>
    %766 = math.tanh %765 : vector<8x64xf32>
    %767 = vector.extract_strided_slice %752 {offsets = [0, 192], sizes = [8, 64], strides = [1, 1]} : vector<8x256xf32> to vector<8x64xf32>
    %768 = arith.negf %767 : vector<8x64xf32>
    %769 = math.exp %768 : vector<8x64xf32>
    %cst_141 = arith.constant 1.000000e+00 : f32
    %770 = vector.broadcast %cst_141 : f32 to vector<8x64xf32>
    %771 = arith.addf %770, %769 : vector<8x64xf32>
    %772 = arith.divf %770, %771 : vector<8x64xf32>
    %773 = arith.mulf %764, %743 : vector<8x64xf32>
    %774 = arith.mulf %758, %766 : vector<8x64xf32>
    %775 = arith.addf %773, %774 : vector<8x64xf32>
    %776 = math.tanh %775 : vector<8x64xf32>
    %777 = arith.mulf %772, %776 : vector<8x64xf32>
    %778 = arith.select %573, %777, %713 : vector<8x64xi1>, vector<8x64xf32>
    %779 = vector.shape_cast %555 : vector<2x96xf32> to vector<1x2x96xf32>
    %780 = vector.shape_cast %556 : vector<2x96xf32> to vector<1x2x96xf32>
    %781 = vector.shape_cast %557 : vector<2x96xf32> to vector<1x2x96xf32>
    %782 = vector.shape_cast %558 : vector<2x96xf32> to vector<1x2x96xf32>
    %783 = vector.shape_cast %559 : vector<2x96xf32> to vector<1x2x96xf32>
    %784 = vector.shape_cast %560 : vector<2x96xf32> to vector<1x2x96xf32>
    %785 = vector.shape_cast %561 : vector<2x96xf32> to vector<1x2x96xf32>
    %786 = vector.shape_cast %562 : vector<2x96xf32> to vector<1x2x96xf32>
    %787 = tpu.concatenate %779, %780, %781, %782, %783, %784, %785, %786 in 0 : vector<1x2x96xf32>, vector<1x2x96xf32>, vector<1x2x96xf32>, vector<1x2x96xf32>, vector<1x2x96xf32>, vector<1x2x96xf32>, vector<1x2x96xf32>, vector<1x2x96xf32> -> vector<8x2x96xf32>
    %c0_142 = arith.constant 0 : index
    %c0_143 = arith.constant 0 : index
    %788 = vector.load %arg2[%c0_142, %c0_143] : memref<2x1xi32, #tpu.memory_space<vmem>>, vector<2x1xi32>
    %c0_144 = arith.constant 0 : index
    %c0_145 = arith.constant 0 : index
    %789 = vector.load %arg20[%c0_144, %c0_145] : memref<96x4xf32, #tpu.memory_space<vmem>>, vector<96x4xf32>
    %cst_146 = arith.constant dense<0.000000e+00> : vector<2x4xf32>
    %790 = tpu.matmul %555, %789, %cst_146 {dimension_numbers = #tpu.dot_dimension_numbers<[1], [0], [0], [1], [0, 0, 1, 1], [], []>} : vector<2x96xf32>, vector<96x4xf32>, vector<2x4xf32> -> vector<2x4xf32>
    %cst_147 = arith.constant dense<0.000000e+00> : vector<2x4xf32>
    %791 = tpu.matmul %556, %789, %cst_147 {dimension_numbers = #tpu.dot_dimension_numbers<[1], [0], [0], [1], [0, 0, 1, 1], [], []>} : vector<2x96xf32>, vector<96x4xf32>, vector<2x4xf32> -> vector<2x4xf32>
    %cst_148 = arith.constant dense<0.000000e+00> : vector<2x4xf32>
    %792 = tpu.matmul %557, %789, %cst_148 {dimension_numbers = #tpu.dot_dimension_numbers<[1], [0], [0], [1], [0, 0, 1, 1], [], []>} : vector<2x96xf32>, vector<96x4xf32>, vector<2x4xf32> -> vector<2x4xf32>
    %cst_149 = arith.constant dense<0.000000e+00> : vector<2x4xf32>
    %793 = tpu.matmul %558, %789, %cst_149 {dimension_numbers = #tpu.dot_dimension_numbers<[1], [0], [0], [1], [0, 0, 1, 1], [], []>} : vector<2x96xf32>, vector<96x4xf32>, vector<2x4xf32> -> vector<2x4xf32>
    %cst_150 = arith.constant dense<0.000000e+00> : vector<2x4xf32>
    %794 = tpu.matmul %559, %789, %cst_150 {dimension_numbers = #tpu.dot_dimension_numbers<[1], [0], [0], [1], [0, 0, 1, 1], [], []>} : vector<2x96xf32>, vector<96x4xf32>, vector<2x4xf32> -> vector<2x4xf32>
    %cst_151 = arith.constant dense<0.000000e+00> : vector<2x4xf32>
    %795 = tpu.matmul %560, %789, %cst_151 {dimension_numbers = #tpu.dot_dimension_numbers<[1], [0], [0], [1], [0, 0, 1, 1], [], []>} : vector<2x96xf32>, vector<96x4xf32>, vector<2x4xf32> -> vector<2x4xf32>
    %cst_152 = arith.constant dense<0.000000e+00> : vector<2x4xf32>
    %796 = tpu.matmul %561, %789, %cst_152 {dimension_numbers = #tpu.dot_dimension_numbers<[1], [0], [0], [1], [0, 0, 1, 1], [], []>} : vector<2x96xf32>, vector<96x4xf32>, vector<2x4xf32> -> vector<2x4xf32>
    %cst_153 = arith.constant dense<0.000000e+00> : vector<2x4xf32>
    %797 = tpu.matmul %562, %789, %cst_153 {dimension_numbers = #tpu.dot_dimension_numbers<[1], [0], [0], [1], [0, 0, 1, 1], [], []>} : vector<2x96xf32>, vector<96x4xf32>, vector<2x4xf32> -> vector<2x4xf32>
    %798 = vector.shape_cast %790 : vector<2x4xf32> to vector<1x2x4xf32>
    %799 = vector.shape_cast %791 : vector<2x4xf32> to vector<1x2x4xf32>
    %800 = vector.shape_cast %792 : vector<2x4xf32> to vector<1x2x4xf32>
    %801 = vector.shape_cast %793 : vector<2x4xf32> to vector<1x2x4xf32>
    %802 = vector.shape_cast %794 : vector<2x4xf32> to vector<1x2x4xf32>
    %803 = vector.shape_cast %795 : vector<2x4xf32> to vector<1x2x4xf32>
    %804 = vector.shape_cast %796 : vector<2x4xf32> to vector<1x2x4xf32>
    %805 = vector.shape_cast %797 : vector<2x4xf32> to vector<1x2x4xf32>
    %806 = tpu.concatenate %798, %799, %800, %801, %802, %803, %804, %805 in 0 : vector<1x2x4xf32>, vector<1x2x4xf32>, vector<1x2x4xf32>, vector<1x2x4xf32>, vector<1x2x4xf32>, vector<1x2x4xf32>, vector<1x2x4xf32>, vector<1x2x4xf32> -> vector<8x2x4xf32>
    %807 = tpu.iota {dimensions = array<i32: 0>} : vector<8x2x1xi32>
    %808 = vector.shape_cast %788 : vector<2x1xi32> to vector<1x2x1xi32>
    %809 = vector.broadcast %808 : vector<1x2x1xi32> to vector<8x2x1xi32>
    %810 = arith.cmpi slt, %807, %809 : vector<8x2x1xi32>
    %cst_154 = arith.constant -1.000000e+09 : f32
    %811 = vector.shape_cast %810 : vector<8x2x1xi1> to vector<8x2x1xi1>
    %812 = vector.broadcast %811 : vector<8x2x1xi1> to vector<8x2x4xi1>
    %813 = vector.broadcast %cst_154 : f32 to vector<8x2x4xf32>
    %814 = arith.select %812, %806, %813 : vector<8x2x4xi1>, vector<8x2x4xf32>
    %cst_155 = arith.constant dense<0xFF800000> : vector<2x4xf32>
    %815 = vector.multi_reduction <maximumf>, %814, %cst_155 [0] : vector<8x2x4xf32> to vector<2x4xf32>
    %cst_156 = arith.constant 0xFF800000 : f32
    %816 = vector.broadcast %cst_156 : f32 to vector<2x4xf32>
    %817 = arith.maximumf %816, %815 : vector<2x4xf32>
    %818 = vector.shape_cast %817 : vector<2x4xf32> to vector<1x2x4xf32>
    %819 = vector.broadcast %818 : vector<1x2x4xf32> to vector<8x2x4xf32>
    %820 = arith.subf %814, %819 : vector<8x2x4xf32>
    %821 = math.exp %820 : vector<8x2x4xf32>
    %cst_157 = arith.constant dense<0.000000e+00> : vector<2x4xf32>
    %822 = vector.multi_reduction <add>, %821, %cst_157 [0] : vector<8x2x4xf32> to vector<2x4xf32>
    %823 = vector.shape_cast %822 : vector<2x4xf32> to vector<1x2x4xf32>
    %824 = vector.broadcast %823 : vector<1x2x4xf32> to vector<8x2x4xf32>
    %825 = arith.divf %821, %824 : vector<8x2x4xf32>
    %826 = vector.extract_strided_slice %825 {offsets = [0, 0, 0], sizes = [8, 2, 1], strides = [1, 1, 1]} : vector<8x2x4xf32> to vector<8x2x1xf32>
    %827 = vector.broadcast %826 : vector<8x2x1xf32> to vector<8x2x96xf32>
    %828 = arith.mulf %827, %787 : vector<8x2x96xf32>
    %cst_158 = arith.constant dense<0.000000e+00> : vector<2x96xf32>
    %829 = vector.multi_reduction <add>, %828, %cst_158 [0] : vector<8x2x96xf32> to vector<2x96xf32>
    %830 = vector.extract_strided_slice %825 {offsets = [0, 0, 1], sizes = [8, 2, 1], strides = [1, 1, 1]} : vector<8x2x4xf32> to vector<8x2x1xf32>
    %831 = vector.broadcast %830 : vector<8x2x1xf32> to vector<8x2x96xf32>
    %832 = arith.mulf %831, %787 : vector<8x2x96xf32>
    %cst_159 = arith.constant dense<0.000000e+00> : vector<2x96xf32>
    %833 = vector.multi_reduction <add>, %832, %cst_159 [0] : vector<8x2x96xf32> to vector<2x96xf32>
    %834 = vector.extract_strided_slice %825 {offsets = [0, 0, 2], sizes = [8, 2, 1], strides = [1, 1, 1]} : vector<8x2x4xf32> to vector<8x2x1xf32>
    %835 = vector.broadcast %834 : vector<8x2x1xf32> to vector<8x2x96xf32>
    %836 = arith.mulf %835, %787 : vector<8x2x96xf32>
    %cst_160 = arith.constant dense<0.000000e+00> : vector<2x96xf32>
    %837 = vector.multi_reduction <add>, %836, %cst_160 [0] : vector<8x2x96xf32> to vector<2x96xf32>
    %838 = vector.extract_strided_slice %825 {offsets = [0, 0, 3], sizes = [8, 2, 1], strides = [1, 1, 1]} : vector<8x2x4xf32> to vector<8x2x1xf32>
    %839 = vector.broadcast %838 : vector<8x2x1xf32> to vector<8x2x96xf32>
    %840 = arith.mulf %839, %787 : vector<8x2x96xf32>
    %cst_161 = arith.constant dense<0.000000e+00> : vector<2x96xf32>
    %841 = vector.multi_reduction <add>, %840, %cst_161 [0] : vector<8x2x96xf32> to vector<2x96xf32>
    %c0_162 = arith.constant 0 : index
    %c0_163 = arith.constant 0 : index
    %842 = vector.load %arg21[%c0_162, %c0_163] : memref<96x32xf32, #tpu.memory_space<vmem>>, vector<96x32xf32>
    %c0_164 = arith.constant 0 : index
    %c0_165 = arith.constant 0 : index
    %843 = vector.load %arg22[%c0_164, %c0_165] : memref<1x32xf32, #tpu.memory_space<vmem>>, vector<1x32xf32>
    %c0_166 = arith.constant 0 : index
    %c0_167 = arith.constant 0 : index
    %844 = vector.load %arg23[%c0_166, %c0_167] : memref<32x6xf32, #tpu.memory_space<vmem>>, vector<32x6xf32>
    %c0_168 = arith.constant 0 : index
    %c0_169 = arith.constant 0 : index
    %845 = vector.load %arg24[%c0_168, %c0_169] : memref<1x6xf32, #tpu.memory_space<vmem>>, vector<1x6xf32>
    %cst_170 = arith.constant dense<0.000000e+00> : vector<2x32xf32>
    %846 = tpu.matmul %829, %842, %cst_170 {dimension_numbers = #tpu.dot_dimension_numbers<[1], [0], [0], [1], [0, 0, 1, 1], [], []>} : vector<2x96xf32>, vector<96x32xf32>, vector<2x32xf32> -> vector<2x32xf32>
    %847 = vector.broadcast %843 : vector<1x32xf32> to vector<2x32xf32>
    %848 = arith.addf %846, %847 : vector<2x32xf32>
    %849 = math.tanh %848 : vector<2x32xf32>
    %cst_171 = arith.constant dense<0.000000e+00> : vector<2x6xf32>
    %850 = tpu.matmul %849, %844, %cst_171 {dimension_numbers = #tpu.dot_dimension_numbers<[1], [0], [0], [1], [0, 0, 1, 1], [], []>} : vector<2x32xf32>, vector<32x6xf32>, vector<2x6xf32> -> vector<2x6xf32>
    %851 = vector.broadcast %845 : vector<1x6xf32> to vector<2x6xf32>
    %852 = arith.addf %850, %851 : vector<2x6xf32>
    %c0_172 = arith.constant 0 : index
    %c0_173 = arith.constant 0 : index
    %853 = vector.load %arg42[%c0_172, %c0_173] : memref<2x6xf32, #tpu.memory_space<vmem>>, vector<2x6xf32>
    tpu.vector_store %arg42[%c0_172, %c0_173], %852 {strides = array<i32>} : memref<2x6xf32, #tpu.memory_space<vmem>>, vector<2x6xf32>,
    %c0_174 = arith.constant 0 : index
    %c0_175 = arith.constant 0 : index
    %854 = vector.load %arg25[%c0_174, %c0_175] : memref<96x32xf32, #tpu.memory_space<vmem>>, vector<96x32xf32>
    %c0_176 = arith.constant 0 : index
    %c0_177 = arith.constant 0 : index
    %855 = vector.load %arg26[%c0_176, %c0_177] : memref<1x32xf32, #tpu.memory_space<vmem>>, vector<1x32xf32>
    %c0_178 = arith.constant 0 : index
    %c0_179 = arith.constant 0 : index
    %856 = vector.load %arg27[%c0_178, %c0_179] : memref<32x5xf32, #tpu.memory_space<vmem>>, vector<32x5xf32>
    %c0_180 = arith.constant 0 : index
    %c0_181 = arith.constant 0 : index
    %857 = vector.load %arg28[%c0_180, %c0_181] : memref<1x5xf32, #tpu.memory_space<vmem>>, vector<1x5xf32>
    %cst_182 = arith.constant dense<0.000000e+00> : vector<2x32xf32>
    %858 = tpu.matmul %833, %854, %cst_182 {dimension_numbers = #tpu.dot_dimension_numbers<[1], [0], [0], [1], [0, 0, 1, 1], [], []>} : vector<2x96xf32>, vector<96x32xf32>, vector<2x32xf32> -> vector<2x32xf32>
    %859 = vector.broadcast %855 : vector<1x32xf32> to vector<2x32xf32>
    %860 = arith.addf %858, %859 : vector<2x32xf32>
    %861 = math.tanh %860 : vector<2x32xf32>
    %cst_183 = arith.constant dense<0.000000e+00> : vector<2x5xf32>
    %862 = tpu.matmul %861, %856, %cst_183 {dimension_numbers = #tpu.dot_dimension_numbers<[1], [0], [0], [1], [0, 0, 1, 1], [], []>} : vector<2x32xf32>, vector<32x5xf32>, vector<2x5xf32> -> vector<2x5xf32>
    %863 = vector.broadcast %857 : vector<1x5xf32> to vector<2x5xf32>
    %864 = arith.addf %862, %863 : vector<2x5xf32>
    %c0_184 = arith.constant 0 : index
    %c0_185 = arith.constant 0 : index
    %865 = vector.load %arg43[%c0_184, %c0_185] : memref<2x5xf32, #tpu.memory_space<vmem>>, vector<2x5xf32>
    tpu.vector_store %arg43[%c0_184, %c0_185], %864 {strides = array<i32>} : memref<2x5xf32, #tpu.memory_space<vmem>>, vector<2x5xf32>,
    %c0_186 = arith.constant 0 : index
    %c0_187 = arith.constant 0 : index
    %866 = vector.load %arg29[%c0_186, %c0_187] : memref<96x32xf32, #tpu.memory_space<vmem>>, vector<96x32xf32>
    %c0_188 = arith.constant 0 : index
    %c0_189 = arith.constant 0 : index
    %867 = vector.load %arg30[%c0_188, %c0_189] : memref<64x32xf32, #tpu.memory_space<vmem>>, vector<64x32xf32>
    %c0_190 = arith.constant 0 : index
    %c0_191 = arith.constant 0 : index
    %868 = vector.load %arg31[%c0_190, %c0_191] : memref<32x1xf32, #tpu.memory_space<vmem>>, vector<32x1xf32>
    %c0_192 = arith.constant 0 : index
    %c0_193 = arith.constant 0 : index
    %869 = vector.load %arg32[%c0_192, %c0_193] : memref<1x1xf32, #tpu.memory_space<vmem>>, vector<1x1xf32>
    %cst_194 = arith.constant dense<0.000000e+00> : vector<2x32xf32>
    %870 = tpu.matmul %841, %866, %cst_194 {dimension_numbers = #tpu.dot_dimension_numbers<[1], [0], [0], [1], [0, 0, 1, 1], [], []>} : vector<2x96xf32>, vector<96x32xf32>, vector<2x32xf32> -> vector<2x32xf32>
    %871 = vector.extract_strided_slice %870 {offsets = [0, 0], sizes = [1, 32], strides = [1, 1]} : vector<2x32xf32> to vector<1x32xf32>
    %872 = vector.shape_cast %871 : vector<1x32xf32> to vector<1x32xf32>
    %873 = vector.broadcast %872 : vector<1x32xf32> to vector<4x32xf32>
    %874 = vector.extract_strided_slice %870 {offsets = [1, 0], sizes = [1, 32], strides = [1, 1]} : vector<2x32xf32> to vector<1x32xf32>
    %875 = vector.shape_cast %874 : vector<1x32xf32> to vector<1x32xf32>
    %876 = vector.broadcast %875 : vector<1x32xf32> to vector<4x32xf32>
    %877 = tpu.concatenate %873, %876 in 0 : vector<4x32xf32>, vector<4x32xf32> -> vector<8x32xf32>
    %cst_195 = arith.constant dense<0.000000e+00> : vector<8x32xf32>
    %878 = tpu.matmul %778, %867, %cst_195 {dimension_numbers = #tpu.dot_dimension_numbers<[1], [0], [0], [1], [0, 0, 1, 1], [], []>} : vector<8x64xf32>, vector<64x32xf32>, vector<8x32xf32> -> vector<8x32xf32>
    %879 = arith.addf %878, %877 : vector<8x32xf32>
    %880 = math.tanh %879 : vector<8x32xf32>
    %cst_196 = arith.constant dense<0.000000e+00> : vector<8x1xf32>
    %881 = tpu.matmul %880, %868, %cst_196 {dimension_numbers = #tpu.dot_dimension_numbers<[1], [0], [0], [1], [0, 0, 1, 1], [], []>} : vector<8x32xf32>, vector<32x1xf32>, vector<8x1xf32> -> vector<8x1xf32>
    %882 = vector.broadcast %869 : vector<1x1xf32> to vector<8x1xf32>
    %883 = arith.addf %881, %882 : vector<8x1xf32>
    %c0_197 = arith.constant 0 : index
    %c0_198 = arith.constant 0 : index
    %884 = vector.load %arg44[%c0_197, %c0_198] : memref<8x1xf32, #tpu.memory_space<vmem>>, vector<8x1xf32>
    tpu.vector_store %arg44[%c0_197, %c0_198], %883 {strides = array<i32>} : memref<8x1xf32, #tpu.memory_space<vmem>>, vector<8x1xf32>,
    %c0_199 = arith.constant 0 : index
    %c0_200 = arith.constant 0 : index
    %885 = vector.load %arg33[%c0_199, %c0_200] : memref<96x32xf32, #tpu.memory_space<vmem>>, vector<96x32xf32>
    %c0_201 = arith.constant 0 : index
    %c0_202 = arith.constant 0 : index
    %886 = vector.load %arg34[%c0_201, %c0_202] : memref<64x32xf32, #tpu.memory_space<vmem>>, vector<64x32xf32>
    %c0_203 = arith.constant 0 : index
    %c0_204 = arith.constant 0 : index
    %887 = vector.load %arg35[%c0_203, %c0_204] : memref<32x1xf32, #tpu.memory_space<vmem>>, vector<32x1xf32>
    %c0_205 = arith.constant 0 : index
    %c0_206 = arith.constant 0 : index
    %888 = vector.load %arg36[%c0_205, %c0_206] : memref<1x1xf32, #tpu.memory_space<vmem>>, vector<1x1xf32>
    %cst_207 = arith.constant dense<0.000000e+00> : vector<2x32xf32>
    %889 = tpu.matmul %837, %885, %cst_207 {dimension_numbers = #tpu.dot_dimension_numbers<[1], [0], [0], [1], [0, 0, 1, 1], [], []>} : vector<2x96xf32>, vector<96x32xf32>, vector<2x32xf32> -> vector<2x32xf32>
    %890 = vector.extract_strided_slice %889 {offsets = [0, 0], sizes = [1, 32], strides = [1, 1]} : vector<2x32xf32> to vector<1x32xf32>
    %891 = vector.shape_cast %890 : vector<1x32xf32> to vector<1x32xf32>
    %892 = vector.broadcast %891 : vector<1x32xf32> to vector<4x32xf32>
    %893 = vector.extract_strided_slice %889 {offsets = [1, 0], sizes = [1, 32], strides = [1, 1]} : vector<2x32xf32> to vector<1x32xf32>
    %894 = vector.shape_cast %893 : vector<1x32xf32> to vector<1x32xf32>
    %895 = vector.broadcast %894 : vector<1x32xf32> to vector<4x32xf32>
    %896 = tpu.concatenate %892, %895 in 0 : vector<4x32xf32>, vector<4x32xf32> -> vector<8x32xf32>
    %cst_208 = arith.constant dense<0.000000e+00> : vector<8x32xf32>
    %897 = tpu.matmul %778, %886, %cst_208 {dimension_numbers = #tpu.dot_dimension_numbers<[1], [0], [0], [1], [0, 0, 1, 1], [], []>} : vector<8x64xf32>, vector<64x32xf32>, vector<8x32xf32> -> vector<8x32xf32>
    %898 = arith.addf %897, %896 : vector<8x32xf32>
    %899 = math.tanh %898 : vector<8x32xf32>
    %cst_209 = arith.constant dense<0.000000e+00> : vector<8x1xf32>
    %900 = tpu.matmul %899, %887, %cst_209 {dimension_numbers = #tpu.dot_dimension_numbers<[1], [0], [0], [1], [0, 0, 1, 1], [], []>} : vector<8x32xf32>, vector<32x1xf32>, vector<8x1xf32> -> vector<8x1xf32>
    %901 = vector.broadcast %888 : vector<1x1xf32> to vector<8x1xf32>
    %902 = arith.addf %900, %901 : vector<8x1xf32>
    %c0_210 = arith.constant 0 : index
    %c0_211 = arith.constant 0 : index
    %903 = vector.load %arg45[%c0_210, %c0_211] : memref<8x1xf32, #tpu.memory_space<vmem>>, vector<8x1xf32>
    tpu.vector_store %arg45[%c0_210, %c0_211], %902 {strides = array<i32>} : memref<8x1xf32, #tpu.memory_space<vmem>>, vector<8x1xf32>,
    %c0_212 = arith.constant 0 : index
    %c0_213 = arith.constant 0 : index
    %904 = vector.load %arg37[%c0_212, %c0_213] : memref<96x32xf32, #tpu.memory_space<vmem>>, vector<96x32xf32>
    %c0_214 = arith.constant 0 : index
    %c0_215 = arith.constant 0 : index
    %905 = vector.load %arg38[%c0_214, %c0_215] : memref<64x32xf32, #tpu.memory_space<vmem>>, vector<64x32xf32>
    %c0_216 = arith.constant 0 : index
    %c0_217 = arith.constant 0 : index
    %906 = vector.load %arg39[%c0_216, %c0_217] : memref<32x3xf32, #tpu.memory_space<vmem>>, vector<32x3xf32>
    %c0_218 = arith.constant 0 : index
    %c0_219 = arith.constant 0 : index
    %907 = vector.load %arg40[%c0_218, %c0_219] : memref<1x3xf32, #tpu.memory_space<vmem>>, vector<1x3xf32>
    %cst_220 = arith.constant dense<0.000000e+00> : vector<2x32xf32>
    %908 = tpu.matmul %837, %904, %cst_220 {dimension_numbers = #tpu.dot_dimension_numbers<[1], [0], [0], [1], [0, 0, 1, 1], [], []>} : vector<2x96xf32>, vector<96x32xf32>, vector<2x32xf32> -> vector<2x32xf32>
    %909 = vector.extract_strided_slice %908 {offsets = [0, 0], sizes = [1, 32], strides = [1, 1]} : vector<2x32xf32> to vector<1x32xf32>
    %910 = vector.shape_cast %909 : vector<1x32xf32> to vector<1x32xf32>
    %911 = vector.broadcast %910 : vector<1x32xf32> to vector<4x32xf32>
    %912 = vector.extract_strided_slice %908 {offsets = [1, 0], sizes = [1, 32], strides = [1, 1]} : vector<2x32xf32> to vector<1x32xf32>
    %913 = vector.shape_cast %912 : vector<1x32xf32> to vector<1x32xf32>
    %914 = vector.broadcast %913 : vector<1x32xf32> to vector<4x32xf32>
    %915 = tpu.concatenate %911, %914 in 0 : vector<4x32xf32>, vector<4x32xf32> -> vector<8x32xf32>
    %cst_221 = arith.constant dense<0.000000e+00> : vector<8x32xf32>
    %916 = tpu.matmul %778, %905, %cst_221 {dimension_numbers = #tpu.dot_dimension_numbers<[1], [0], [0], [1], [0, 0, 1, 1], [], []>} : vector<8x64xf32>, vector<64x32xf32>, vector<8x32xf32> -> vector<8x32xf32>
    %917 = arith.addf %916, %915 : vector<8x32xf32>
    %918 = math.tanh %917 : vector<8x32xf32>
    %cst_222 = arith.constant dense<0.000000e+00> : vector<8x3xf32>
    %919 = tpu.matmul %918, %906, %cst_222 {dimension_numbers = #tpu.dot_dimension_numbers<[1], [0], [0], [1], [0, 0, 1, 1], [], []>} : vector<8x32xf32>, vector<32x3xf32>, vector<8x3xf32> -> vector<8x3xf32>
    %920 = vector.broadcast %907 : vector<1x3xf32> to vector<8x3xf32>
    %921 = arith.addf %919, %920 : vector<8x3xf32>
    %c0_223 = arith.constant 0 : index
    %c0_224 = arith.constant 0 : index
    %922 = vector.load %arg46[%c0_223, %c0_224] : memref<8x3xf32, #tpu.memory_space<vmem>>, vector<8x3xf32>
    tpu.vector_store %arg46[%c0_223, %c0_224], %921 {strides = array<i32>} : memref<8x3xf32, #tpu.memory_space<vmem>>, vector<8x3xf32>,
    %c0_225 = arith.constant 0 : index
    %c0_226 = arith.constant 0 : index
    %923 = vector.load %arg41[%c0_225, %c0_226] : memref<64x96xf32, #tpu.memory_space<vmem>>, vector<64x96xf32>
    %cst_227 = arith.constant dense<0.000000e+00> : vector<8x96xf32>
    %924 = tpu.matmul %778, %923, %cst_227 {dimension_numbers = #tpu.dot_dimension_numbers<[1], [0], [0], [1], [0, 0, 1, 1], [], []>} : vector<8x64xf32>, vector<64x96xf32>, vector<8x96xf32> -> vector<8x96xf32>
    %925 = vector.extract_strided_slice %555 {offsets = [0, 0], sizes = [1, 96], strides = [1, 1]} : vector<2x96xf32> to vector<1x96xf32>
    %926 = vector.extract_strided_slice %556 {offsets = [0, 0], sizes = [1, 96], strides = [1, 1]} : vector<2x96xf32> to vector<1x96xf32>
    %927 = vector.extract_strided_slice %557 {offsets = [0, 0], sizes = [1, 96], strides = [1, 1]} : vector<2x96xf32> to vector<1x96xf32>
    %928 = vector.extract_strided_slice %558 {offsets = [0, 0], sizes = [1, 96], strides = [1, 1]} : vector<2x96xf32> to vector<1x96xf32>
    %929 = vector.extract_strided_slice %559 {offsets = [0, 0], sizes = [1, 96], strides = [1, 1]} : vector<2x96xf32> to vector<1x96xf32>
    %930 = vector.extract_strided_slice %560 {offsets = [0, 0], sizes = [1, 96], strides = [1, 1]} : vector<2x96xf32> to vector<1x96xf32>
    %931 = vector.extract_strided_slice %561 {offsets = [0, 0], sizes = [1, 96], strides = [1, 1]} : vector<2x96xf32> to vector<1x96xf32>
    %932 = vector.extract_strided_slice %562 {offsets = [0, 0], sizes = [1, 96], strides = [1, 1]} : vector<2x96xf32> to vector<1x96xf32>
    %933 = tpu.concatenate %925, %926, %927, %928, %929, %930, %931, %932 in 0 : vector<1x96xf32>, vector<1x96xf32>, vector<1x96xf32>, vector<1x96xf32>, vector<1x96xf32>, vector<1x96xf32>, vector<1x96xf32>, vector<1x96xf32> -> vector<8x96xf32>
    %934 = vector.extract_strided_slice %555 {offsets = [1, 0], sizes = [1, 96], strides = [1, 1]} : vector<2x96xf32> to vector<1x96xf32>
    %935 = vector.extract_strided_slice %556 {offsets = [1, 0], sizes = [1, 96], strides = [1, 1]} : vector<2x96xf32> to vector<1x96xf32>
    %936 = vector.extract_strided_slice %557 {offsets = [1, 0], sizes = [1, 96], strides = [1, 1]} : vector<2x96xf32> to vector<1x96xf32>
    %937 = vector.extract_strided_slice %558 {offsets = [1, 0], sizes = [1, 96], strides = [1, 1]} : vector<2x96xf32> to vector<1x96xf32>
    %938 = vector.extract_strided_slice %559 {offsets = [1, 0], sizes = [1, 96], strides = [1, 1]} : vector<2x96xf32> to vector<1x96xf32>
    %939 = vector.extract_strided_slice %560 {offsets = [1, 0], sizes = [1, 96], strides = [1, 1]} : vector<2x96xf32> to vector<1x96xf32>
    %940 = vector.extract_strided_slice %561 {offsets = [1, 0], sizes = [1, 96], strides = [1, 1]} : vector<2x96xf32> to vector<1x96xf32>
    %941 = vector.extract_strided_slice %562 {offsets = [1, 0], sizes = [1, 96], strides = [1, 1]} : vector<2x96xf32> to vector<1x96xf32>
    %942 = tpu.concatenate %934, %935, %936, %937, %938, %939, %940, %941 in 0 : vector<1x96xf32>, vector<1x96xf32>, vector<1x96xf32>, vector<1x96xf32>, vector<1x96xf32>, vector<1x96xf32>, vector<1x96xf32>, vector<1x96xf32> -> vector<8x96xf32>
    %943 = vector.extract_strided_slice %924 {offsets = [0, 0], sizes = [4, 96], strides = [1, 1]} : vector<8x96xf32> to vector<4x96xf32>
    %cst_228 = arith.constant dense<0.000000e+00> : vector<4x8xf32>
    %944 = tpu.matmul %943, %933, %cst_228 {dimension_numbers = #tpu.dot_dimension_numbers<[1], [1], [0], [0], [0, 0, 1, 0], [], []>} : vector<4x96xf32>, vector<8x96xf32>, vector<4x8xf32> -> vector<4x8xf32>
    %945 = vector.extract_strided_slice %924 {offsets = [4, 0], sizes = [4, 96], strides = [1, 1]} : vector<8x96xf32> to vector<4x96xf32>
    %cst_229 = arith.constant dense<0.000000e+00> : vector<4x8xf32>
    %946 = tpu.matmul %945, %942, %cst_229 {dimension_numbers = #tpu.dot_dimension_numbers<[1], [1], [0], [0], [0, 0, 1, 0], [], []>} : vector<4x96xf32>, vector<8x96xf32>, vector<4x8xf32> -> vector<4x8xf32>
    %947 = vector.shape_cast %944 : vector<4x8xf32> to vector<1x4x8xf32>
    %948 = vector.shape_cast %946 : vector<4x8xf32> to vector<1x4x8xf32>
    %949 = tpu.concatenate %947, %948 in 0 : vector<1x4x8xf32>, vector<1x4x8xf32> -> vector<2x4x8xf32>
    %950 = tpu.iota {dimensions = array<i32: 1>} : vector<2x8xi32>
    %951 = vector.broadcast %788 : vector<2x1xi32> to vector<2x8xi32>
    %952 = arith.cmpi slt, %950, %951 : vector<2x8xi32>
    %953 = vector.shape_cast %952 : vector<2x8xi1> to vector<2x1x8xi1>
    %cst_230 = arith.constant -1.000000e+09 : f32
    %954 = vector.shape_cast %953 : vector<2x1x8xi1> to vector<2x1x8xi1>
    %955 = vector.broadcast %954 : vector<2x1x8xi1> to vector<2x4x8xi1>
    %956 = vector.broadcast %cst_230 : f32 to vector<2x4x8xf32>
    %957 = arith.select %955, %949, %956 : vector<2x4x8xi1>, vector<2x4x8xf32>
    %c0_231 = arith.constant 0 : index
    %c0_232 = arith.constant 0 : index
    %c0_233 = arith.constant 0 : index
    %958 = vector.load %arg47[%c0_231, %c0_232, %c0_233] : memref<2x4x8xf32, #tpu.memory_space<vmem>>, vector<2x4x8xf32>
    tpu.vector_store %arg47[%c0_231, %c0_232, %c0_233], %957 {strides = array<i32>} : memref<2x4x8xf32, #tpu.memory_space<vmem>>, vector<2x4x8xf32>,
    return
  }
}

</mosaic_0001>

<bundles_post_ra>
// kernel: model_forward.1
= control target key start
LH: loop header
LB: loop body
LE: loop exit
PB: predicated region body
PF: predicated region fallthrough
CT: control target
= control target key end

     0   :  { %s12544_s6 = smov 1   ;;  %s12545_s10 = smov 2   ;;  %s15056_s0 = inlined_call_operand.smem [shape: u32[48], index: -1, kind: input, shape index: {}] }
   0x1   :  { %s12634_s5 = sld [smem:[%s15056_s0]]   ;;  %s12546_s14 = smov 3  }
   0x2   :  { %s12639_s9 = sld [smem:[%s15056_s0 + %s12544_s6]]   ;;  %s12547_s18 = smov 4  }
   0x3   :  { %s12644_s13 = sld [smem:[%s15056_s0 + %s12545_s10]]   ;;  %s12548_s22 = smov 5  }
   0x4   :  { %s12649_s17 = sld [smem:[%s15056_s0 + %s12546_s14]]   ;;  %s12549_s26 = smov 6  }
   0x5   :  { %s12654_s21 = sld [smem:[%s15056_s0 + %s12547_s18]]   ;;  %s12550_s30 = smov 7  }
   0x6   :  { %s12659_s25 = sld [smem:[%s15056_s0 + %s12548_s22]]   ;;  %s12551_s4 = smov 8  }
   0x7   :  { %15084 = sst [smem:[#allocation42_spill]] %s12634_s5  ;;  %s12552_s10 = smov 9  }
   0x8   :  { %15085 = sst [smem:[#allocation43_spill]] %s12639_s9  ;;  %s12553_s15 = smov 10  }
   0x9   :  { %15086 = sst [smem:[#allocation44_spill]] %s12644_s13  ;;  %s12554_s20 = smov 11  }
   0xa   :  { %15087 = sst [smem:[#allocation45_spill]] %s12649_s17  ;;  %s12556_s1 = smov 13  }
   0xb   :  { %15088 = sst [smem:[#allocation46_spill]] %s12654_s21  ;;  %s12557_s7 = smov 14  }
   0xc   :  { %s12664_s29 = sld [smem:[%s15056_s0 + %s12549_s26]]   ;;  %s12555_s26 = smov 12  }
   0xd   :  { %s12669_s3 = sld [smem:[%s15056_s0 + %s12550_s30]]   ;;  %s12559_s22 = smov 16  }
   0xe   :  { %s12674_s8 = sld [smem:[%s15056_s0 + %s12551_s4]]   ;;  %s12560_s28 = smov 17  }
   0xf   :  { %s12679_s14 = sld [smem:[%s15056_s0 + %s12552_s10]]   ;;  %s12577_s10 = smov 34  }
  0x10   :  { %s12684_s19 = sld [smem:[%s15056_s0 + %s12553_s15]]   ;;  %s12558_s15 = smov 15  }
  0x11   :  { %s12689_s24 = sld [smem:[%s15056_s0 + %s12554_s20]]   ;;  %s12578_s16 = smov 35  }
  0x12   :  { %15089 = sst [smem:[#allocation47_spill]] %s12664_s29  ;;  %s12579_s23 = smov 37  }
  0x13   :  { %s12694_s30 = sld [smem:[%s15056_s0 + %s12555_s26]]  }
  0x14   :  { %15090 = sst [smem:[#allocation48_spill]] %s12674_s8 }
  0x15   :  { %15091 = sst [smem:[#allocation49_spill]] %s12679_s14 }
  0x16   :  { %15092 = sst [smem:[#allocation50_spill]] %s12684_s19 }
  0x17   :  { %s12699_s6 = sld [smem:[%s15056_s0 + %s12556_s1]]   ;;  %s12576_s1 = smov 33  }
  0x18   :  { %s12704_s12 = sld [smem:[%s15056_s0 + %s12557_s7]]   ;;  %s12561_s7 = smov 18  }
  0x19   :  { %s12709_s20 = sld [smem:[%s15056_s0 + %s12558_s15]]   ;;  %s12562_s15 = smov 19  }
  0x1a   :  { %s12714_s27 = sld [smem:[%s15056_s0 + %s12559_s22]]   ;;  %s12563_s22 = smov 20  }
  0x1b   :  { %s12719_s4 = sld [smem:[%s15056_s0 + %s12560_s28]]   ;;  %s12564_s28 = smov 21  }
  0x1c   :  { %s12724_s13 = sld [smem:[%s15056_s0 + %s12561_s7]]   ;;  %s12565_s7 = smov 22  }
  0x1d   :  { %s12739_s19 = sld [smem:[%s15056_s0 + %s12564_s28]]   ;;  %s12568_s28 = smov 25  }
  0x1e   :  { %15093 = sst [smem:[#allocation51_spill]] %s12704_s12 }
  0x1f   :  { %s12729_s12 = sld [smem:[%s15056_s0 + %s12562_s15]]   ;;  %s12566_s15 = smov 23  }
  0x20   :  { %15094 = sst [smem:[#allocation52_spill]] %s12714_s27 }
  0x21   :  { %s12734_s27 = sld [smem:[%s15056_s0 + %s12563_s22]]   ;;  %s12567_s22 = smov 24  }
  0x22   :  { %s12744_s14 = sld [smem:[%s15056_s0 + %s12565_s7]]   ;;  %s12569_s7 = smov 26  }
  0x23   :  { %15096 = sst [smem:[#allocation54_spill]] %s12739_s19 }
  0x24   :  { %s12749_s8 = sld [smem:[%s15056_s0 + %s12566_s15]]   ;;  %s12570_s15 = smov 27  }
  0x25   :  { %s12759_s19 = sld [smem:[%s15056_s0 + %s12568_s28]]   ;;  %s12572_s28 = smov 29  }
  0x26   :  { %s12764_s29 = sld [smem:[%s15056_s0 + %s12569_s7]]   ;;  %s12573_s7 = smov 30  }
  0x27   :  { %15095 = sst [smem:[#allocation53_spill]] %s12734_s27 }
  0x28   :  { %s12754_s27 = sld [smem:[%s15056_s0 + %s12567_s22]]   ;;  %s12571_s22 = smov 28  }
  0x29   :  { %s12774_s21 = sld [smem:[%s15056_s0 + %s12571_s22]]   ;;  %s12575_s22 = smov 32  }
  0x2a   :  { %15097 = sst [smem:[#allocation55_spill]] %s12749_s8 }
  0x2b   :  { %15098 = sst [smem:[#allocation56_spill]] %s12759_s19 }
  0x2c   :  { %s12769_s8 = sld [smem:[%s15056_s0 + %s12570_s15]]   ;;  %s12574_s15 = smov 31  }
  0x2d   :  { %s12779_s19 = sld [smem:[%s15056_s0 + %s12572_s28]]   ;;  %s12584_s28 = smov 42  }
  0x2e   :  { %s12784_s5 = sld [smem:[%s15056_s0 + %s12573_s7]]  }
  0x2f   :  { %s8525_s9 = sld [smem:[%s15056_s0 + %s12575_s22]]  }
  0x30   :  { %s12812_s17 = sld [smem:[%s15056_s0 + %s12579_s23]]   ;;  %s12583_s23 = smov 41  }
  0x32   :  { %15099 = sst [smem:[#allocation57_spill]] %s12769_s8 }
  0x33   :  { %15100 = sst [smem:[#allocation58_spill]] %s12779_s19 }
  0x34   :  { %15101 = sst [smem:[#allocation59_spill]] %s12784_s5 }
  0x35   :  { %s12789_s8 = sld [smem:[%s15056_s0 + %s12574_s15]]   ;;  %v101_v0 = vstv %s8525_s9  ;;  %s12585_s9 = smov 43  }
  0x36   :  { %s12797_s19 = sld [smem:[%s15056_s0 + %s12576_s1]]   ;;  %s12580_s1 = smov 38   ;;  %102 = vst [vmem:[#allocation2] sm:$0x1] %v101_v0 }
  0x37   :  { %s12802_s5 = sld [smem:[%s15056_s0 + %s12577_s10]]   ;;  %s12581_s10 = smov 39  }
  0x38   :  { %15106 = sst [smem:[#allocation64_spill]] %s12812_s17 }
  0x39   :  { %s12842_s15 = sld [smem:[%s15056_s0 + %s12585_s9]]   ;;  %s12589_s9 = smov 47  }
  0x3b   :  { %15102 = sst [smem:[#allocation60_spill]] %s12789_s8 }
  0x3c   :  { %15103 = sst [smem:[#allocation61_spill]] %s12797_s19 }
  0x3d   :  { %15104 = sst [smem:[#allocation62_spill]] %s12802_s5 }
  0x3e   :  { %s12807_s8 = sld [smem:[%s15056_s0 + %s12578_s16]]   ;;  %s12582_s16 = smov 40  }
  0x3f   :  { %s12817_s19 = sld [smem:[%s15056_s0 + %s12580_s1]]  }
  0x40   :  { %s12822_s5 = sld [smem:[%s15056_s0 + %s12581_s10]]  }
  0x41   :  { %s12827_s22 = sld [smem:[%s15056_s0 + %s12582_s16]]   ;;  %s12586_s16 = smov 44  }
  0x42   :  { %s12832_s1 = sld [smem:[%s15056_s0 + %s12583_s23]]  }
  0x43   :  { %s12837_s10 = sld [smem:[%s15056_s0 + %s12584_s28]]  }
  0x44   :  { %15105 = sst [smem:[#allocation63_spill]] %s12807_s8  ;;  %s12587_s8 = smov 45  }
  0x45   :  { %15107 = sst [smem:[#allocation65_spill]] %s12817_s19  ;;  %s12588_s19 = smov 46  }
  0x46   :  { %15108 = sst [smem:[#allocation66_spill]] %s12822_s5  ;;  %s12590_s5 = smov 36  }
  0x47   :  { %15111 = sst [smem:[#allocation69_spill]] %s12842_s15 }
  0x48   :  { %15109 = sst [smem:[#allocation67_spill]] %s12832_s1 }
  0x49   :  { %15110 = sst [smem:[#allocation68_spill]] %s12837_s10 }
  0x4a   :  { %s12847_s17 = sld [smem:[%s15056_s0 + %s12586_s16]]  }
  0x4b   :  { %s12852_s1 = sld [smem:[%s15056_s0 + %s12587_s8]]  }
  0x4c   :  { %s12857_s10 = sld [smem:[%s15056_s0 + %s12588_s19]]  }
  0x4d   :  { %s12862_s15 = sld [smem:[%s15056_s0 + %s12589_s9]]  }
  0x50   :  { %15112 = sst [smem:[#allocation70_spill]] %s12847_s17 }
  0x51   :  { %s8529_s17 = sld [smem:[%s15056_s0 + %s12590_s5]]  }
  0x57   :  { %v103_v1 = vstv %s8529_s17 }
  0x58   :  { %104 = vst [vmem:[#allocation3] sm:$0x1] %v103_v1 }
  0x59   :  { %105 = vsyncpa [#allocation5], 0 }
  0x5a   :  { %106 = vsyncpa [#allocation8], 0 }
  0x5b   :  { %107 = vsyncpa [#allocation11], 0 }
  0x5c   :  { %108 = vsyncpa [#allocation14], 0 }
  0x5d   :  { %109 = vsyncpa [#allocation17], 0 }
  0x5e   :  { %110 = vsyncpa [#allocation20], 0 }
  0x5f   :  { %111 = vsyncpa [#allocation23], 0 }
  0x60   :  { %112 = vsyncpa [#allocation26], 0 }
  0x61   :  { %113 = vsyncpa [#allocation6], 0 }
  0x62   :  { %114 = vsyncpa [#allocation30], 0  ;;  %s12591_s8 = smov [#allocation7]   ;;  %s12592_s26 = smov [#allocation10]  }
  0x63   :  { %s145_s23 = sshll.u32 %s12591_s8, 4  ;;  %s170_s19 = sshll.u32 %s12592_s26, 4  ;;  %s146_s23 = int_to_ptr.vmem [resolvable:$true] %s145_s23  ;;  %s12867_s19 = int_to_ptr.vmem [resolvable:$true] %s170_s19 }
  0x64   :  { %s12128_s0 = scalar_lea.hbm %s12669_s3, 48 }
  0x65   :  { %p12129_p0 = scmp.ne.s32.totalorder %s12669_s3, %s12128_s0  ;;  %p12132_p1 = scmp.lt.u32.totalorder %s12128_s0, %s12669_s3 }
  0x67   :  { %p12134_p2 = pnand %p12132_p1, %p12129_p0 }
  0x69   :  { %12137 = shalt.err (!%p12134_p2)
}
  0x6a   :  { %s12138_s17 = scalar_lea.vmem %s146_s23, 48  ;;  %s12142_s28 = scalar_lea.vmem %s146_s23, 64 }
  0x6b   :  { %p12139_p3 = scmp.ne.s32.totalorder %s146_s23, %s12138_s17  ;;  %p12143_p4 = scmp.lt.s32.totalorder %s146_s23, %s146_s23 }
  0x6c   :  { %p12144_p5 = scmp.lt.s32.totalorder %s12142_s28, %s12138_s17 }
  0x6e   :  { %p12145_p6 = por %p12144_p5, %p12143_p4 }
  0x70   :  { %p12146_p7 = pnand %p12145_p6, %p12139_p3 }
  0x72   :  { %12149 = shalt.err (!%p12146_p7)
}
  0x73   :  { %148 = dma.hbm_to_vmem [thread:$0]  %s12669_s3, 48, %s146_s23, [#allocation8]  }
  0x74   :  { %s12150_s2 = scalar_lea.hbm %s12694_s30, 1024 }
  0x75   :  { %p12151_p8 = scmp.ne.s32.totalorder %s12694_s30, %s12150_s2  ;;  %p12154_p9 = scmp.lt.u32.totalorder %s12150_s2, %s12694_s30 }
  0x77   :  { %p12156_p10 = pnand %p12154_p9, %p12151_p8 }
  0x79   :  { %12159 = shalt.err (!%p12156_p10)
}
  0x7a   :  { %s12160_s9 = scalar_lea.vmem %s12867_s19, 1024  ;;  %p12165_p12 = scmp.lt.s32.totalorder %s12867_s19, %s12867_s19 }
  0x7b   :  { %p12161_p11 = scmp.ne.s32.totalorder %s12867_s19, %s12160_s9  ;;  %p12166_p13 = scmp.lt.s32.totalorder %s12160_s9, %s12160_s9 }
  0x7d   :  { %p12167_p0 = por %p12166_p13, %p12165_p12 }
  0x7f   :  { %p12168_p1 = pnand %p12167_p0, %p12161_p11 }
  0x81   :  { %12171 = shalt.err (!%p12168_p1)
}
  0x82   :  { %s12593_s7 = smov 256   ;;  %s12594_s3 = smov 16  }
  0x83   :  { %176 = dma.hbm_to_vmem [thread:$0]  %s12694_s30, 1024, %s12867_s19, [#allocation11], %s12593_s7, %s12593_s7, %s12594_s3  }
  0x84   :  { %s12595_s11 = smov [#allocation13]   ;;  %s12596_s16 = smov [#allocation16]  }
  0x85   :  { %s197_s5 = sshll.u32 %s12595_s11, 4  ;;  %s220_s18 = sshll.u32 %s12596_s16, 4  ;;  %s198_s5 = int_to_ptr.vmem [resolvable:$true] %s197_s5  ;;  %s12885_s18 = int_to_ptr.vmem [resolvable:$true] %s220_s18 }
  0x86   :  { %s12172_s8 = scalar_lea.hbm %s12709_s20, 32 }
  0x87   :  { %p12173_p2 = scmp.ne.s32.totalorder %s12709_s20, %s12172_s8  ;;  %p12176_p3 = scmp.lt.u32.totalorder %s12172_s8, %s12709_s20 }
  0x89   :  { %p12178_p4 = pnand %p12176_p3, %p12173_p2 }
  0x8b   :  { %12181 = shalt.err (!%p12178_p4)
}
  0x8c   :  { %s12182_s23 = scalar_lea.vmem %s198_s5, 32  ;;  %p12187_p6 = scmp.lt.s32.totalorder %s198_s5, %s198_s5 }
  0x8d   :  { %p12183_p5 = scmp.ne.s32.totalorder %s198_s5, %s12182_s23  ;;  %p12188_p7 = scmp.lt.s32.totalorder %s12182_s23, %s12182_s23 }
  0x8f   :  { %p12189_p8 = por %p12188_p7, %p12187_p6 }
  0x91   :  { %p12190_p9 = pnand %p12189_p8, %p12183_p5 }
  0x93   :  { %12193 = shalt.err (!%p12190_p9)
}
  0x94   :  { %200 = dma.hbm_to_vmem [thread:$0]  %s12709_s20, 32, %s198_s5, [#allocation14]  }
  0x95   :  { %s12194_s30 = scalar_lea.hbm %s12724_s13, 2048 }
  0x96   :  { %p12195_p10 = scmp.ne.s32.totalorder %s12724_s13, %s12194_s30  ;;  %p12198_p11 = scmp.lt.u32.totalorder %s12194_s30, %s12724_s13 }
  0x98   :  { %p12200_p12 = pnand %p12198_p11, %p12195_p10 }
  0x9a   :  { %12203 = shalt.err (!%p12200_p12)
}
  0x9b   :  { %s12204_s26 = scalar_lea.vmem %s12885_s18, 2048  ;;  %p12209_p0 = scmp.lt.s32.totalorder %s12885_s18, %s12885_s18 }
  0x9c   :  { %p12205_p13 = scmp.ne.s32.totalorder %s12885_s18, %s12204_s26  ;;  %p12210_p1 = scmp.lt.s32.totalorder %s12204_s26, %s12204_s26 }
  0x9e   :  { %p12211_p2 = por %p12210_p1, %p12209_p0 }
  0xa0   :  { %p12212_p3 = pnand %p12211_p2, %p12205_p13 }
  0xa2   :  { %12215 = shalt.err (!%p12212_p3)
}
  0xa3   :  { %226 = dma.hbm_to_vmem [thread:$0]  %s12724_s13, 2048, %s12885_s18, [#allocation17], %s12593_s7, %s12593_s7, %s12594_s3  }
  0xa4   :  { %s12597_s20 = smov [#allocation19]   ;;  %s12598_s0 = smov [#allocation22]  }
  0xa5   :  { %s247_s19 = sshll.u32 %s12597_s20, 4  ;;  %s271_s17 = sshll.u32 %s12598_s0, 4  ;;  %s248_s19 = int_to_ptr.vmem [resolvable:$true] %s247_s19  ;;  %s272_s17 = int_to_ptr.vmem [resolvable:$true] %s271_s17 }
  0xa6   :  { %s12216_s28 = scalar_lea.hbm %s12744_s14, 16 }
  0xa7   :  { %p12217_p4 = scmp.ne.s32.totalorder %s12744_s14, %s12216_s28  ;;  %p12220_p5 = scmp.lt.u32.totalorder %s12216_s28, %s12744_s14 }
  0xa9   :  { %p12222_p6 = pnand %p12220_p5, %p12217_p4 }
  0xab   :  { %12225 = shalt.err (!%p12222_p6)
}
  0xac   :  { %s12226_s2 = scalar_lea.vmem %s248_s19, 16  ;;  %s12230_s9 = scalar_lea.vmem %s248_s19, 32 }
  0xad   :  { %p12227_p7 = scmp.ne.s32.totalorder %s248_s19, %s12226_s2  ;;  %p12231_p8 = scmp.lt.s32.totalorder %s248_s19, %s248_s19 }
  0xae   :  { %p12232_p9 = scmp.lt.s32.totalorder %s12230_s9, %s12226_s2 }
  0xb0   :  { %p12233_p10 = por %p12232_p9, %p12231_p8 }
  0xb2   :  { %p12234_p11 = pnand %p12233_p10, %p12227_p7 }
  0xb4   :  { %12237 = shalt.err (!%p12234_p11)
}
  0xb5   :  { %250 = dma.hbm_to_vmem [thread:$0]  %s12744_s14, 16, %s248_s19, [#allocation20]  }
  0xb6   :  { %s12238_s13 = scalar_lea.hbm %s12764_s29, 16 }
  0xb7   :  { %p12239_p12 = scmp.ne.s32.totalorder %s12764_s29, %s12238_s13  ;;  %p12242_p13 = scmp.lt.u32.totalorder %s12238_s13, %s12764_s29 }
  0xb9   :  { %p12244_p0 = pnand %p12242_p13, %p12239_p12 }
  0xbb   :  { %12247 = shalt.err (!%p12244_p0)
}
  0xbc   :  { %s12248_s11 = scalar_lea.vmem %s272_s17, 16  ;;  %s12252_s5 = scalar_lea.vmem %s272_s17, 32 }
  0xbd   :  { %p12249_p1 = scmp.ne.s32.totalorder %s272_s17, %s12248_s11  ;;  %p12253_p2 = scmp.lt.s32.totalorder %s272_s17, %s272_s17 }
  0xbe   :  { %p12254_p3 = scmp.lt.s32.totalorder %s12252_s5, %s12248_s11 }
  0xc0   :  { %p12255_p4 = por %p12254_p3, %p12253_p2 }
  0xc2   :  { %p12256_p5 = pnand %p12255_p4, %p12249_p1 }
  0xc4   :  { %12259 = shalt.err (!%p12256_p5)
}
  0xc5   :  { %274 = dma.hbm_to_vmem [thread:$0]  %s12764_s29, 16, %s272_s17, [#allocation23]  }
  0xc6   :  { %s12599_s16 = smov [#allocation25]   ;;  %s12600_s18 = smov [#allocation4]  }
  0xc7   :  { %s315_s14 = sshll.u32 %s12599_s16, 4  ;;  %s130_s8 = sshll.u32 %s12600_s18, 4  ;;  %s316_s14 = int_to_ptr.vmem [resolvable:$true] %s315_s14  ;;  %s12911_s8 = int_to_ptr.vmem [resolvable:$true] %s130_s8 }
  0xc8   :  { %s12260_s23 = scalar_lea.hbm %s12827_s22, 16 }
  0xc9   :  { %p12261_p6 = scmp.ne.s32.totalorder %s12827_s22, %s12260_s23  ;;  %p12264_p7 = scmp.lt.u32.totalorder %s12260_s23, %s12827_s22 }
  0xcb   :  { %p12266_p8 = pnand %p12264_p7, %p12261_p6 }
  0xcd   :  { %12269 = shalt.err (!%p12266_p8)
}
  0xce   :  { %s12270_s30 = scalar_lea.vmem %s316_s14, 16  ;;  %s12274_s26 = scalar_lea.vmem %s316_s14, 32 }
  0xcf   :  { %p12271_p9 = scmp.ne.s32.totalorder %s316_s14, %s12270_s30  ;;  %p12275_p10 = scmp.lt.s32.totalorder %s316_s14, %s316_s14 }
  0xd0   :  { %p12276_p11 = scmp.lt.s32.totalorder %s12274_s26, %s12270_s30 }
  0xd2   :  { %p12277_p12 = por %p12276_p11, %p12275_p10 }
  0xd4   :  { %p12278_p13 = pnand %p12277_p12, %p12271_p9 }
  0xd6   :  { %12281 = shalt.err (!%p12278_p13)
}
  0xd7   :  { %318 = dma.hbm_to_vmem [thread:$0]  %s12827_s22, 16, %s316_s14, [#allocation26]  }
  0xd8   :  { %s12282_s29 = scalar_lea.hbm %s12659_s25, 1536 }
  0xd9   :  { %p12283_p0 = scmp.ne.s32.totalorder %s12659_s25, %s12282_s29  ;;  %p12286_p1 = scmp.lt.u32.totalorder %s12282_s29, %s12659_s25 }
  0xdb   :  { %p12288_p2 = pnand %p12286_p1, %p12283_p0 }
  0xdd   :  { %12291 = shalt.err (!%p12288_p2)
}
  0xde   :  { %s12292_s20 = scalar_lea.vmem %s12911_s8, 1536  ;;  %p12297_p4 = scmp.lt.s32.totalorder %s12911_s8, %s12911_s8 }
  0xdf   :  { %p12293_p3 = scmp.ne.s32.totalorder %s12911_s8, %s12292_s20  ;;  %p12298_p5 = scmp.lt.s32.totalorder %s12292_s20, %s12292_s20 }
  0xe1   :  { %p12299_p6 = por %p12298_p5, %p12297_p4 }
  0xe3   :  { %p12300_p7 = pnand %p12299_p6, %p12293_p3 }
  0xe5   :  { %12303 = shalt.err (!%p12300_p7)
}
  0xe6   :  { %s12601_s19 = smov 384   ;;  %s12602_s22 = smov 24  }
  0xe7   :  { %136 = dma.hbm_to_vmem [thread:$0]  %s12659_s25, 1536, %s12911_s8, [#allocation5], %s12601_s19, %s12601_s19, %s12602_s22  }
  0xe8   :  { %s12603_s0 = smov [#allocation9]   ;;  %s12604_s28 = smov [#allocation12]  }
  0xe9   :  { %s161_s17 = sshll.u32 %s12603_s0, 4  ;;  %s182_s2 = sshll.u32 %s12604_s28, 4  ;;  %s162_s17 = int_to_ptr.vmem [resolvable:$true] %s161_s17  ;;  %s12926_s2 = int_to_ptr.vmem [resolvable:$true] %s182_s2 }
  0xea   :  { %s12304_s9 = scalar_lea.hbm %s12689_s24, 48 }
  0xeb   :  { %p12305_p8 = scmp.ne.s32.totalorder %s12689_s24, %s12304_s9  ;;  %p12308_p9 = scmp.lt.u32.totalorder %s12304_s9, %s12689_s24 }
  0xed   :  { %p12310_p10 = pnand %p12308_p9, %p12305_p8 }
  0xef   :  { %12313 = shalt.err (!%p12310_p10)
}
  0xf0   :  { %s12314_s13 = scalar_lea.vmem %s162_s17, 48  ;;  %s12318_s11 = scalar_lea.vmem %s162_s17, 64 }
  0xf1   :  { %p12315_p11 = scmp.ne.s32.totalorder %s162_s17, %s12314_s13  ;;  %p12319_p12 = scmp.lt.s32.totalorder %s162_s17, %s162_s17 }
  0xf2   :  { %p12320_p13 = scmp.lt.s32.totalorder %s12318_s11, %s12314_s13 }
  0xf4   :  { %p12321_p0 = por %p12320_p13, %p12319_p12 }
  0xf6   :  { %p12322_p1 = pnand %p12321_p0, %p12315_p11 }
  0xf8   :  { %12325 = shalt.err (!%p12322_p1)
}
  0xf9   :  { %164 = dma.hbm_to_vmem [thread:$0]  %s12689_s24, 48, %s162_s17, [#allocation8]  }
  0xfa   :  { %s12326_s25 = scalar_lea.hbm %s12699_s6, 1024 }
  0xfb   :  { %p12327_p2 = scmp.ne.s32.totalorder %s12699_s6, %s12326_s25  ;;  %p12330_p3 = scmp.lt.u32.totalorder %s12326_s25, %s12699_s6 }
  0xfd   :  { %p12332_p4 = pnand %p12330_p3, %p12327_p2 }
  0xff   :  { %12335 = shalt.err (!%p12332_p4)
}
 0x100   :  { %s12336_s5 = scalar_lea.vmem %s12926_s2, 1024  ;;  %p12341_p6 = scmp.lt.s32.totalorder %s12926_s2, %s12926_s2 }
 0x101   :  { %p12337_p5 = scmp.ne.s32.totalorder %s12926_s2, %s12336_s5  ;;  %p12342_p7 = scmp.lt.s32.totalorder %s12336_s5, %s12336_s5 }
 0x103   :  { %p12343_p8 = por %p12342_p7, %p12341_p6 }
 0x105   :  { %p12344_p9 = pnand %p12343_p8, %p12337_p5 }
 0x107   :  { %12347 = shalt.err (!%p12344_p9)
}
 0x108   :  { %188 = dma.hbm_to_vmem [thread:$0]  %s12699_s6, 1024, %s12926_s2, [#allocation11], %s12593_s7, %s12593_s7, %s12594_s3  }
 0x109   :  { %s12605_s24 = smov [#allocation15]   ;;  %s12606_s14 = smov [#allocation18]  }
 0x10a   :  { %s208_s16 = sshll.u32 %s12605_s24, 4  ;;  %s233_s18 = sshll.u32 %s12606_s14, 4  ;;  %s209_s16 = int_to_ptr.vmem [resolvable:$true] %s208_s16  ;;  %s234_s18 = int_to_ptr.vmem [resolvable:$true] %s233_s18 }
 0x10b   :  { %s12348_s8 = scalar_lea.hbm %s12719_s4, 2048 }
 0x10c   :  { %p12349_p10 = scmp.ne.s32.totalorder %s12719_s4, %s12348_s8  ;;  %p12352_p11 = scmp.lt.u32.totalorder %s12348_s8, %s12719_s4 }
 0x10e   :  { %p12354_p12 = pnand %p12352_p11, %p12349_p10 }
 0x110   :  { %12357 = shalt.err (!%p12354_p12)
}
 0x111   :  { %s12358_s23 = scalar_lea.vmem %s209_s16, 2048  ;;  %p12363_p0 = scmp.lt.s32.totalorder %s209_s16, %s209_s16 }
 0x112   :  { %p12359_p13 = scmp.ne.s32.totalorder %s209_s16, %s12358_s23  ;;  %p12364_p1 = scmp.lt.s32.totalorder %s12358_s23, %s12358_s23 }
 0x114   :  { %p12365_p2 = por %p12364_p1, %p12363_p0 }
 0x116   :  { %p12366_p3 = pnand %p12365_p2, %p12359_p13 }
 0x118   :  { %12369 = shalt.err (!%p12366_p3)
}
 0x119   :  { %214 = dma.hbm_to_vmem [thread:$0]  %s12719_s4, 2048, %s209_s16, [#allocation14], %s12593_s7, %s12593_s7, %s12594_s3  }
 0x11a   :  { %s12370_s6 = scalar_lea.hbm %s12729_s12, 32 }
 0x11b   :  { %p12371_p4 = scmp.ne.s32.totalorder %s12729_s12, %s12370_s6  ;;  %p12374_p5 = scmp.lt.u32.totalorder %s12370_s6, %s12729_s12 }
 0x11d   :  { %p12376_p6 = pnand %p12374_p5, %p12371_p4 }
 0x11f   :  { %12379 = shalt.err (!%p12376_p6)
}
 0x120   :  { %s12380_s30 = scalar_lea.vmem %s234_s18, 32  ;;  %p12385_p8 = scmp.lt.s32.totalorder %s234_s18, %s234_s18 }
 0x121   :  { %p12381_p7 = scmp.ne.s32.totalorder %s234_s18, %s12380_s30  ;;  %p12386_p9 = scmp.lt.s32.totalorder %s12380_s30, %s12380_s30 }
 0x123   :  { %p12387_p10 = por %p12386_p9, %p12385_p8 }
 0x125   :  { %p12388_p11 = pnand %p12387_p10, %p12381_p7 }
 0x127   :  { %12391 = shalt.err (!%p12388_p11)
}
 0x128   :  { %236 = dma.hbm_to_vmem [thread:$0]  %s12729_s12, 32, %s234_s18, [#allocation17]  }
 0x129   :  { %s12607_s26 = smov [#allocation21]   ;;  %s12608_s4 = smov [#allocation24]  }
 0x12a   :  { %s259_s29 = sshll.u32 %s12607_s26, 4  ;;  %s283_s7 = sshll.u32 %s12608_s4, 4  ;;  %s260_s29 = int_to_ptr.vmem [resolvable:$true] %s259_s29  ;;  %s284_s7 = int_to_ptr.vmem [resolvable:$true] %s283_s7 }
 0x12b   :  { %s12392_s3 = scalar_lea.hbm %s12754_s27, 16 }
 0x12c   :  { %p12393_p12 = scmp.ne.s32.totalorder %s12754_s27, %s12392_s3  ;;  %p12396_p13 = scmp.lt.u32.totalorder %s12392_s3, %s12754_s27 }
 0x12e   :  { %p12398_p0 = pnand %p12396_p13, %p12393_p12 }
 0x130   :  { %12401 = shalt.err (!%p12398_p0)
}
 0x131   :  { %s12402_s20 = scalar_lea.vmem %s260_s29, 16  ;;  %s12406_s19 = scalar_lea.vmem %s260_s29, 32 }
 0x132   :  { %p12403_p1 = scmp.ne.s32.totalorder %s260_s29, %s12402_s20  ;;  %p12407_p2 = scmp.lt.s32.totalorder %s260_s29, %s260_s29 }
 0x133   :  { %p12408_p3 = scmp.lt.s32.totalorder %s12406_s19, %s12402_s20 }
 0x135   :  { %p12409_p4 = por %p12408_p3, %p12407_p2 }
 0x137   :  { %p12410_p5 = pnand %p12409_p4, %p12403_p1 }
 0x139   :  { %12413 = shalt.err (!%p12410_p5)
}
 0x13a   :  { %262 = dma.hbm_to_vmem [thread:$0]  %s12754_s27, 16, %s260_s29, [#allocation20]  }
 0x13b   :  { %s12414_s12 = scalar_lea.hbm %s12774_s21, 16 }
 0x13c   :  { %p12415_p6 = scmp.ne.s32.totalorder %s12774_s21, %s12414_s12  ;;  %p12418_p7 = scmp.lt.u32.totalorder %s12414_s12, %s12774_s21 }
 0x13e   :  { %p12420_p8 = pnand %p12418_p7, %p12415_p6 }
 0x140   :  { %12423 = shalt.err (!%p12420_p8)
}
 0x141   :  { %s12424_s22 = scalar_lea.vmem %s284_s7, 16  ;;  %s12428_s0 = scalar_lea.vmem %s284_s7, 32 }
 0x142   :  { %p12425_p9 = scmp.ne.s32.totalorder %s284_s7, %s12424_s22  ;;  %p12429_p10 = scmp.lt.s32.totalorder %s284_s7, %s284_s7 }
 0x143   :  { %p12430_p11 = scmp.lt.s32.totalorder %s12428_s0, %s12424_s22 }
 0x145   :  { %p12431_p12 = por %p12430_p11, %p12429_p10 }
 0x147   :  { %p12432_p13 = pnand %p12431_p12, %p12425_p9 }
 0x149   :  { %12435 = shalt.err (!%p12432_p13)
}
 0x14a   :  { %s15113_s17 = sld [smem:[#allocation67_spill]]  ;;  %s12609_s28 = smov [#allocation27]  }
 0x14b   :  { %286 = dma.hbm_to_vmem [thread:$0]  %s12774_s21, 16, %s284_s7, [#allocation23]  }
 0x14c   :  { %s324_s27 = sshll.u32 %s12609_s28, 4  ;;  %s325_s27 = int_to_ptr.vmem [resolvable:$true] %s324_s27 }
 0x150   :  { %s12436_s2 = scalar_lea.hbm %s15113_s17, 1024 }
 0x151   :  { %p12437_p0 = scmp.ne.s32.totalorder %s15113_s17, %s12436_s2  ;;  %p12440_p1 = scmp.lt.u32.totalorder %s12436_s2, %s15113_s17 }
 0x153   :  { %p12442_p2 = pnand %p12440_p1, %p12437_p0 }
 0x155   :  { %12445 = shalt.err (!%p12442_p2)
}
 0x156   :  { %s12446_s9 = scalar_lea.vmem %s325_s27, 1024  ;;  %p12451_p4 = scmp.lt.s32.totalorder %s325_s27, %s325_s27 }
 0x157   :  { %p12447_p3 = scmp.ne.s32.totalorder %s325_s27, %s12446_s9  ;;  %p12452_p5 = scmp.lt.s32.totalorder %s12446_s9, %s12446_s9 }
 0x159   :  { %p12453_p6 = por %p12452_p5, %p12451_p4 }
 0x15b   :  { %p12454_p7 = pnand %p12453_p6, %p12447_p3 }
 0x15d   :  { %12457 = shalt.err (!%p12454_p7)
}
 0x15e   :  { %s12610_s13 = smov 128   ;;  %s12611_s11 = smov 8  }
 0x15f   :  { %330 = dma.hbm_to_vmem [thread:$0]  %s15113_s17, 1024, %s325_s27, [#allocation26], %s12610_s13, %s12610_s13, %s12611_s11  }
 0x160   :  { %12524 = dma.done.wait [#allocation5], 1536  }
 0x161   :  { %12525 = vsyncadd [#allocation5], 4294965760 }
 0x162   :  { %12526 = dma.done.wait [#allocation8], 96  }
 0x163   :  { %12527 = vsyncadd [#allocation8], 4294967200 }
 0x164   :  { %12528 = dma.done.wait [#allocation11], 2048  }
 0x165   :  { %12529 = vsyncadd [#allocation11], 4294965248 }
 0x166   :  { %12530 = dma.done.wait [#allocation14], 2080  }
 0x167   :  { %12531 = vsyncadd [#allocation14], 4294965216 }
 0x168   :  { %12532 = dma.done.wait [#allocation17], 2080  }
 0x169   :  { %12533 = vsyncadd [#allocation17], 4294965216 }
 0x16a   :  { %12534 = dma.done.wait [#allocation20], 32  }
 0x16b   :  { %12535 = vsyncadd [#allocation20], 4294967264 }
 0x16c   :  { %12536 = dma.done.wait [#allocation23], 32  }
 0x16d   :  { %12537 = vsyncadd [#allocation23], 4294967264 }
 0x16e   :  { %12538 = dma.done.wait [#allocation26], 1040  }
 0x16f   :  { %12539 = vsyncadd [#allocation26], 4294966256  ;;  %s15114_s21 = sld [smem:[#allocation45_spill]]  ;;  %s15115_s25 = sld [smem:[#allocation43_spill]]  ;;  %v12612_v2 = vmov 0   ;;  %v12613_v3 = vmov 0.0|0.0   ;;  %v391_v35 = vlaneseq }
 0x170   :  { %s15116_s5 = sld [smem:[#allocation42_spill]]  ;;  %11700 = vset.pattern.permute.xlu1 %v12612_v2  ;;  %11699 = vset.pattern.permute.xlu0 %v12612_v2  ;;  %vm12614_vm0 = vmmov 0   ;;  %v12615_v10 = vmov 0.0   ;;  %s15117_s24 = sld [smem:[#allocation46_spill]]  ;;  %vm412_vm1 = vcmask 1043456   ;;  %vm405_vm2 = vcmask 818176  }
 0x171   :  { %10307 = vmatprep.subr.bf16.mxu1 %v12613_v3  ;;  %9274 = vmatprep.mubr.msk.f32.mxu1 %vm12614_vm0, %v12615_v10  ;;  %v13004_v36 = vand.u32 127, %v391_v35  ;;  %v614_v59 = vld [vmem:[#allocation4 + $0x8] sm:$0xff]  ;;  %v617_v60 = vld [vmem:[#allocation4 + $0x20] sm:$0xff]  ;;  %v615_v62 = vld [vmem:[#allocation4 + $0x10] sm:$0xff]  ;;  %s15118_s16 = sld [smem:[#allocation47_spill]]  ;;  %vm772_vm8 = vcmask 261120  }
 0x172   :  { %v10341_v61 = vpack.c.bf16 %v617_v60, %v614_v59  ;;  %v618_v63 = vld [vmem:[#allocation4 + $0x28] sm:$0xff]  ;;  %s12616_s14 = smov 64   ;;  %vm1290_vm9 = vcmask 523264   ;;  %s12617_s18 = smov 96   ;;  %vm1114_vm10 = vcmask 785408   ;;  %vm2868_vm12 = vcmask 1041408  }
 0x173   :  { %v10349_v0 = vpack.c.bf16 %v618_v63, %v615_v62  ;;  %s15119_s8 = sld [smem:[#allocation48_spill]]  ;;  %s15120_s23 = sld [smem:[#allocation49_spill]]  ;;  %vm771_vm11 = vcmp.lt.s32.totalorder %v13004_v36, 48  ;;  %vm2871_vm13 = vcmask 1045504   ;;  %vm5030_vm14 = vcmp.lt.s32.totalorder %v13004_v36, 32 }
 0x174   :  { %s15121_s6 = sld [smem:[#allocation50_spill]]  ;;  %s15122_s30 = sld [smem:[#allocation51_spill]] }
 0x175   :  { %v491_v4 = vld [vmem:[%s15114_s21] sm:$0xff]  ;;  %v492_v7 = vld [vmem:[%s15114_s21 + $0x8] sm:$0xff]  ;;  %v493_v14 = vld [vmem:[%s15114_s21 + $0x10] sm:$0xff]  ;;  %s15123_s26 = sld [smem:[#allocation52_spill]]  ;;  %s15124_s29 = sld [smem:[#allocation53_spill]] }
 0x176   :  { %v389_v5 = vld [vmem:[%s15115_s25] sm:$0xff]  ;;  %495 = vperm.xlu1 %11700, %v491_v4   ;;  %v390_v8 = vld [vmem:[%s15115_s25 + $0x8] sm:$0xff]  ;;  %v378_v12 = vld [vmem:[%s15116_s5 + $0x10] sm:$0xff]  ;;  %s15125_s4 = sld [smem:[#allocation44_spill]]  ;;  %s15126_s7 = sld [smem:[#allocation54_spill]] }
 0x177   :  { %394 = vperm.xlu0 %11699, %v389_v5   ;;  %v376_v6 = vld [vmem:[%s15116_s5] sm:$0xff]  ;;  %v377_v9 = vld [vmem:[%s15116_s5 + $0x8] sm:$0xff]  ;;  %v379_v13 = vld [vmem:[%s15116_s5 + $0x18] sm:$0xff]  ;;  %s15127_s3 = sld [smem:[#allocation56_spill]]  ;;  %s15128_s20 = sld [smem:[#allocation59_spill]] }
 0x178   :  { %v10283_v11 = vpack.c.bf16 %v377_v9, %v376_v6  ;;  %v10287_v15 = vpack.c.bf16 %v379_v13, %v378_v12  ;;  %v380_v16 = vld [vmem:[%s15116_s5 + $0x20] sm:$0xff]  ;;  %v381_v17 = vld [vmem:[%s15116_s5 + $0x28] sm:$0xff]  ;;  %v382_v19 = vld [vmem:[%s15116_s5 + $0x30] sm:$0xff]  ;;  %s15129_s19 = sld [smem:[#allocation55_spill]]  ;;  %s15130_s12 = sld [smem:[#allocation61_spill]] }
 0x179   :  { %v10291_v18 = vpack.c.bf16 %v381_v17, %v380_v16  ;;  %v383_v20 = vld [vmem:[%s15116_s5 + $0x38] sm:$0xff]  ;;  %v384_v22 = vld [vmem:[%s15116_s5 + $0x40] sm:$0xff]  ;;  %v385_v23 = vld [vmem:[%s15116_s5 + $0x48] sm:$0xff]  ;;  %s15131_s22 = sld [smem:[#allocation64_spill]]  ;;  %s15132_s0 = sld [smem:[#allocation57_spill]] }
 0x17a   :  { %498 = vperm.xlu1 %11700, %v492_v7   ;;  %10309 = vmatpush3.bf16.msra.mxu1 %v10283_v11  ;;  %v10295_v21 = vpack.c.bf16 %v383_v20, %v382_v19  ;;  %v10299_v24 = vpack.c.bf16 %v385_v23, %v384_v22  ;;  %v386_v25 = vld [vmem:[%s15116_s5 + $0x50] sm:$0xff]  ;;  %v387_v26 = vld [vmem:[%s15116_s5 + $0x58] sm:$0xff]  ;;  %v606_v29 = vld [vmem:[%s15117_s24 + $0x28] sm:$0xff]  ;;  %s15133_s17 = sld [smem:[#allocation58_spill]]  ;;  %s15134_s28 = sld [smem:[#allocation60_spill]] }
 0x17b   :  { %397 = vperm.xlu0 %11699, %v390_v8   ;;  %10284 = vmatprep.subr.bf16.mxu0 %v10283_v11  ;;  %v10303_v27 = vpack.c.bf16 %v387_v26, %v386_v25  ;;  %v603_v28 = vld [vmem:[%s15117_s24 + $0x10] sm:$0xff]  ;;  %v602_v30 = vld [vmem:[%s15117_s24 + $0x8] sm:$0xff]  ;;  %v605_v31 = vld [vmem:[%s15117_s24 + $0x20] sm:$0xff]  ;;  %s15135_s27 = sld [smem:[#allocation62_spill]]  ;;  %s15136_s2 = sld [smem:[#allocation63_spill]] }
 0x17c   :  { %10310 = vmatprep.subr.bf16.mxu1 %v12613_v3  ;;  %10286 = vmatpush3.bf16.msra.mxu0 %v10283_v11  ;;  %v388_v32 = vld [vmem:[%s15116_s5 + $0x60] sm:$0xf]  ;;  %v10333_v33 = vpack.c.bf16 %v606_v29, %v603_v28  ;;  %v10325_v34 = vpack.c.bf16 %v605_v31, %v602_v30  ;;  %v612_v38 = vld [vmem:[%s15117_s24 + $0x58] sm:$0xff]  ;;  %v611_v47 = vld [vmem:[%s15117_s24 + $0x50] sm:$0xff]  ;;  %s15137_s9 = sld [smem:[#allocation70_spill]]  ;;  %s15138_s13 = sld [smem:[#allocation65_spill]] }
 0x17d   :  { %10288 = vmatprep.subr.bf16.mxu0 %v10287_v15  ;;  %v609_v37 = vld [vmem:[%s15117_s24 + $0x40] sm:$0xff]  ;;  %v604_v42 = vld [vmem:[%s15117_s24 + $0x18] sm:$0xff]  ;;  %v607_v52 = vld [vmem:[%s15117_s24 + $0x30] sm:$0xff]  ;;  %s15139_s11 = sld [smem:[#allocation66_spill]]  ;;  %s12622_s25 = smov [#allocation28]  }
 0x17e   :  { %10312 = vmatpush3.bf16.msra.mxu1 %v10287_v15  ;;  %v601_v41 = vld [vmem:[%s15117_s24] sm:$0xff]  ;;  %v10337_v43 = vpack.c.bf16 %v612_v38, %v609_v37  ;;  %v608_v46 = vld [vmem:[%s15117_s24 + $0x38] sm:$0xff]  ;;  %v610_v53 = vld [vmem:[%s15117_s24 + $0x48] sm:$0xff]  ;;  %s8437_s5 = sshll.u32 %s12622_s25, 4  ;;  %s8438_s5 = int_to_ptr.vmem [resolvable:$true] %s8437_s5 }
 0x17f   :  { %501 = vperm.xlu0 %11699, %v493_v14   ;;  %10313 = vmatprep.subr.bf16.mxu1 %v12613_v3  ;;  %v10327_v50 = vpack.c.bf16 %v604_v42, %v601_v41  ;;  %v10329_v51 = vpack.c.bf16 %v611_v47, %v608_v46  ;;  %v10331_v57 = vpack.c.bf16 %v610_v53, %v607_v52  ;;  %v613_v4 = vld [vmem:[#allocation4] sm:$0xff]  ;;  %v616_v5 = vld [vmem:[#allocation4 + $0x18] sm:$0xff]  ;;  %v623_v8 = vld [vmem:[#allocation4 + $0x50] sm:$0xff] }
 0x180   :  { %10290 = vmatpush3.bf16.msra.mxu0 %v10287_v15  ;;  %v620_v7 = vld [vmem:[#allocation4 + $0x38] sm:$0xff]  ;;  %v10343_v9 = vpack.c.bf16 %v616_v5, %v613_v4  ;;  %v621_v11 = vld [vmem:[#allocation4 + $0x40] sm:$0xff]  ;;  %v619_v15 = vld [vmem:[#allocation4 + $0x30] sm:$0xff] }
 0x181   :  { %10292 = vmatprep.subr.bf16.mxu0 %v10291_v18  ;;  %v624_v12 = vld [vmem:[#allocation4 + $0x58] sm:$0xff]  ;;  %v622_v16 = vld [vmem:[#allocation4 + $0x48] sm:$0xff]  ;;  %v10345_v19 = vpack.c.bf16 %v623_v8, %v620_v7 }
 0x182   :  { %10315 = vmatpush3.bf16.msra.mxu1 %v10291_v18  ;;  %v626_v20 = vld [vmem:[%s15118_s16 + $0x8] sm:$0xff]  ;;  %v10353_v22 = vpack.c.bf16 %v624_v12, %v621_v11  ;;  %v10347_v23 = vpack.c.bf16 %v622_v16, %v619_v15  ;;  %v625_v26 = vld [vmem:[%s15118_s16] sm:$0xff]  ;;  %v627_v29 = vld [vmem:[%s15118_s16 + $0x10] sm:$0xff] }
 0x183   :  { %10316 = vmatprep.subr.bf16.mxu1 %v12613_v3  ;;  %v630_v30 = vld [vmem:[%s15118_s16 + $0x28] sm:$0xff]  ;;  %v632_v31 = vld [vmem:[%s15118_s16 + $0x38] sm:$0xff]  ;;  %v631_v37 = vld [vmem:[%s15118_s16 + $0x30] sm:$0xff] }
 0x184   :  { %10294 = vmatpush3.bf16.msra.mxu0 %v10291_v18  ;;  %v634_v38 = vld [vmem:[%s15118_s16 + $0x48] sm:$0xff]  ;;  %v636_v41 = vld [vmem:[%s15118_s16 + $0x58] sm:$0xff]  ;;  %v637_v47 = vld [vmem:[%s15118_s16 + $0x60] sm:$0xff] }
 0x185   :  { %10296 = vmatprep.subr.bf16.mxu0 %v10295_v21  ;;  %v638_v42 = vld [vmem:[%s15118_s16 + $0x68] sm:$0xff]  ;;  %v647_v52 = vld [vmem:[%s15118_s16 + $0xb0] sm:$0xff]  ;;  %v648_v59 = vld [vmem:[%s15118_s16 + $0xb8] sm:$0xff] }
 0x186   :  { %10318 = vmatpush3.bf16.msra.mxu1 %v10295_v21  ;;  %v650_v60 = vld [vmem:[%s15118_s16 + $0xc8] sm:$0xff]  ;;  %v649_v4 = vld [vmem:[%s15118_s16 + $0xc0] sm:$0xff]  ;;  %v652_v5 = vld [vmem:[%s15118_s16 + $0xd8] sm:$0xff] }
 0x187   :  { %10319 = vmatprep.subr.bf16.mxu1 %v12613_v3  ;;  %v654_v7 = vld [vmem:[%s15118_s16 + $0xe8] sm:$0xff]  ;;  %v656_v8 = vld [vmem:[%s15118_s16 + $0xf8] sm:$0xff]  ;;  %v13127_v11 = vpack.c.bf16 %v652_v5, %v649_v4  ;;  %v655_v15 = vld [vmem:[%s15118_s16 + $0xf0] sm:$0xff] }
 0x188   :  { %10298 = vmatpush3.bf16.msra.mxu0 %v10295_v21  ;;  %v629_v21 = vld [vmem:[%s15118_s16 + $0x20] sm:$0xff]  ;;  %v658_v16 = vld [vmem:[%s15118_s16 + $0x108] sm:$0xff] }
 0x189   :  { %10300 = vmatprep.subr.bf16.mxu0 %v10299_v24  ;;  %v13046_v25 = vpack.c.bf16 %v629_v21, %v626_v20 }
 0x18a   :  { %10321 = vmatpush3.bf16.msra.mxu1 %v10299_v24 }
 0x18b   :  { %10322 = vmatprep.subr.bf16.mxu1 %v12613_v3 }
 0x18c   :  { %10302 = vmatpush3.bf16.msra.mxu0 %v10299_v24 }
 0x18d   :  { %10304 = vmatprep.subr.bf16.mxu0 %v10303_v27 }
 0x18e   :  { %10324 = vmatpush3.bf16.msra.mxu1 %v10303_v27 }
 0x18f   :  { %9272 = vmatprep.subr.mxu1 %v12615_v10 }
 0x190   :  { %10306 = vmatpush3.bf16.msra.mxu0 %v10303_v27  ;;  %v628_v27 = vld [vmem:[%s15118_s16 + $0x18] sm:$0xff] }
 0x191   :  { %9243 = vmatprep.subr.msk.mxu0 %vm412_vm1, %v388_v32 }
 0x192   :  { %9273 = vmatpush3.msk.msra.mxu1 %vm412_vm1, %v388_v32 }
 0x193   :  { %10334 = vmatprep.subr.bf16.mxu1 %v10333_v33 }
 0x194   :  { %9244 = vmatpush3.msk.msra.mxu0 %vm412_vm1, %v388_v32  ;;  %v635_v32 = vld [vmem:[%s15118_s16 + $0x50] sm:$0xff] }
 0x195   :  { %10326 = vmatprep.subr.bf16.mxu0 %v10325_v34  ;;  %v13060_v34 = vpack.c.bf16 %v630_v30, %v627_v29 }
 0x1f5   :  { %v496_v39 = vpop.permute.xlu1 %495 }
 0x1f6   :  { %v395_v40 = vpop.permute.xlu0 %394  ;;  %vm503_vm3 = vcmp.eq.s32.totalorder %v496_v39, %v13004_v36  ;;  %v633_v39 = vld [vmem:[%s15118_s16 + $0x40] sm:$0xff] }
 0x1f7   :  { %vm399_vm4 = vcmp.eq.s32.totalorder %v395_v40, %v13004_v36  ;;  %v8546_v44 = vsel %vm503_vm3, 1.0, %v12615_v10  ;;  %v13066_v40 = vpack.c.bf16 %v635_v32, %v632_v31  ;;  %v661_v31 = vld [vmem:[#allocation7] sm:$0x7] }
 0x1f8   :  { %v8541_v45 = vsel %vm399_vm4, 1.0, %v12615_v10  ;;  %9275 = vmatmul.mubr.msk.f32.vlgmr.msra.gmra.mrb[0].mxu1 %vm405_vm2, %v8546_v44  ;;  %v13074_v44 = vpack.c.bf16 %v634_v38, %v631_v37 }
 0x1f9   :  { %9245 = vmatprep.mubr.msk.f32.mxu0 %vm405_vm2, %v8541_v45  ;;  %v499_v48 = vpop.permute.xlu1 %498  ;;  %9277 = vmatprep.mubr.msk.f32.mxu1 %vm12614_vm0, %v12615_v10  ;;  %v13078_v45 = vpack.c.bf16 %v636_v41, %v633_v39 }
 0x1fa   :  { %v398_v49 = vpop.permute.xlu0 %397  ;;  %10336 = vmatpush3.bf16.msra.mxu1 %v10333_v33  ;;  %vm504_vm5 = vcmp.eq.s32.totalorder %v499_v48, %v13004_v36  ;;  %v13057_v33 = vpack.c.bf16 %v628_v27, %v625_v26  ;;  %v640_v48 = vld [vmem:[%s15118_s16 + $0x78] sm:$0xff] }
 0x1fb   :  { %vm400_vm6 = vcmp.eq.s32.totalorder %v398_v49, %v13004_v36  ;;  %10338 = vmatprep.subr.bf16.mxu1 %v10337_v43  ;;  %v8547_v54 = vsel %vm504_vm5, 1.0, %v12615_v10  ;;  %v639_v49 = vld [vmem:[%s15118_s16 + $0x70] sm:$0xff]  ;;  %v13094_v53 = vpack.c.bf16 %v640_v48, %v637_v47 }
 0x1fc   :  { %v8542_v55 = vsel %vm400_vm6, 1.0, %v12615_v10  ;;  %9278 = vmatmul.mubr.msk.f32.gmra.mrb[2].mxu1 %vm405_vm2, %v8547_v54 }
 0x1fd   :  { %9246 = vmatmul.mubr.msk.f32.vlgmr.msra.gmra.mrb[0].mxu0 %vm405_vm2, %v8542_v55  ;;  %9280 = vmatprep.mubr.msk.f32.mxu1 %vm12614_vm0, %v12615_v10 }
 0x1fe   :  { %v502_v56 = vpop.permute.xlu0 %501  ;;  %10328 = vmatpush1.bf16.msra.mxu0 %v10327_v50  ;;  %10340 = vmatpush3.bf16.msra.mxu1 %v10337_v43  ;;  %v641_v43 = vld [vmem:[%s15118_s16 + $0x80] sm:$0xff]  ;;  %v642_v50 = vld [vmem:[%s15118_s16 + $0x88] sm:$0xff] }
 0x1ff   :  { %vm505_vm7 = vcmp.eq.s32.totalorder %v502_v56, %v13004_v36  ;;  %10330 = vmatprep.subr.bf16.mxu0 %v10329_v51  ;;  %843 = vmatprep.mubr.f32.mxu0 %v12615_v10  ;;  %v13080_v46 = vpack.c.bf16 %v641_v43, %v638_v42  ;;  %v644_v51 = vld [vmem:[%s15118_s16 + $0x98] sm:$0xff]  ;;  %v13099_v54 = vpack.c.bf16 %v642_v50, %v639_v49  ;;  %v643_v56 = vld [vmem:[%s15118_s16 + $0x90] sm:$0xff] }
 0x200   :  { %v8548_v58 = vsel %vm505_vm7, 1.0, %v12615_v10  ;;  %10350 = vmatprep.subr.bf16.mxu1 %v10349_v0  ;;  %v13101_v55 = vpack.c.bf16 %v647_v52, %v644_v51 }
 0x201   :  { %9281 = vmatmul.mubr.msk.f32.gmra.mrb[4].mxu1 %vm405_vm2, %v8548_v58  ;;  %v645_v58 = vld [vmem:[%s15118_s16 + $0xa0] sm:$0xff] }
 0x202   :  { %10332 = vmatpush1.bf16.msra.mxu0 %v10331_v57  ;;  %v646_v57 = vld [vmem:[%s15118_s16 + $0xa8] sm:$0xff]  ;;  %v13115_v63 = vpack.c.bf16 %v648_v59, %v645_v58 }
 0x203   :  { %10342 = vmatprep.subr.bf16.mxu0 %v10341_v61  ;;  %v653_v61 = vld [vmem:[%s15118_s16 + $0xe0] sm:$0xff]  ;;  %v13111_v62 = vpack.c.bf16 %v646_v57, %v643_v56 }
 0x2cb   :  { %v13034_v1 = vpop.f32.mrb[0].mxu1 }
 0x2cc   :  { %v9276_v6 = vpop.f32.mrb[1].mxu1 }
 0x2cd   :  { %v651_v6 = vld [vmem:[%s15118_s16 + $0xd0] sm:$0xff] }
 0x2ce   :  { %v13131_v12 = vpack.c.bf16 %v654_v7, %v651_v6 }
 0x2cf   :  { %v13036_v14 = vpop.f32.mrb[2].mxu1 }
 0x2d0   :  { %v9247_v13 = vpop.f32.mrb[0].mxu0  ;;  %v9279_v18 = vpop.f32.mrb[3].mxu1 }
 0x2d1   :  { %v482_v17 = vpop.f32.mrb[1].mxu0  ;;  %v660_v18 = vld [vmem:[%s15118_s16 + $0x118] sm:$0xff] }
 0x2d2   :  { %8553 = vmatmul.mubr.msk.f32.vlgmr.msra.gmra.mrb[2].mxu0 %vm772_vm8, %v482_v17  ;;  %9291 = vmatprep.mubr.msk.f32.mxu1 %vm772_vm8, %v482_v17 }
 0x2d3   :  { %10344 = vmatpush1.bf16.msra.mxu0 %v10343_v9  ;;  %9292 = vmatmul.mubr.msk.f32.vlgmr.msra.gmra.mrb[6].mxu1 %vm772_vm8, %v9247_v13  ;;  %v659_v9 = vld [vmem:[%s15118_s16 + $0x110] sm:$0xff] }
 0x2d4   :  { %10352 = vmatpush3.bf16.msra.mxu1 %v10349_v0  ;;  %v13043_v24 = vpop.f32.mrb[4].mxu1  ;;  %9302 = vmatprep.mubr.msk.f32.mxu1 %vm772_vm8, %v482_v17  ;;  %v13117_v0 = vpack.c.bf16 %v653_v61, %v650_v60 }
 0x2d5   :  { %v9282_v28 = vpop.f32.mrb[5].mxu1  ;;  %849 = vmatprep.mubr.f32.mxu0 %v12615_v10  ;;  %10346 = vmatprep.subr.bf16.mxu0 %v10345_v19  ;;  %v13141_v19 = vpack.c.bf16 %v658_v16, %v655_v15 }
 0x2d6   :  { %8554 = vmatmul.mubr.msk.f32.gmra.mrb[4].mxu0 %vm772_vm8, %v9247_v13  ;;  %10354 = vmatprep.subr.bf16.mxu1 %v10353_v22 }
 0x2d7   :  { %10348 = vmatpush1.bf16.msra.mxu0 %v10347_v23  ;;  %995 = vmatprep.mubr.f32.mxu0 %v12615_v10 }
 0x2d8   :  { %10356 = vmatpush3.bf16.msra.mxu1 %v10353_v22  ;;  %10358 = vmatprep.subr.bf16.mxu0 %v13046_v25  ;;  %v13182_v22 = vshrl.u32 %v391_v35, 7 }
 0x2d9   :  { %10381 = vmatprep.subr.bf16.mxu1 %v12613_v3 }
 0x2da   :  { %8557 = vmatmul.mubr.msk.f32.vlgmr.msra.gmra.mrb[6].mxu0 %vm772_vm8, %v482_v17  ;;  %v657_v17 = vld [vmem:[%s15118_s16 + $0x100] sm:$0xff]  ;;  %v13185_v29 = vsub.s32 0, %v13182_v22  ;;  %v13188_v32 = vsub.s32 1, %v13182_v22  ;;  %v1106_v37 = vsub.s32 2, %v13182_v22 }
 0x2db   :  { %9303 = vmatmul.mubr.msk.f32.vlgmr.msra.gmra.mrb[8].mxu1 %vm772_vm8, %v9247_v13  ;;  %10360 = vmatpush1.bf16.msra.mxu0 %v13057_v33  ;;  %v13145_v20 = vpack.c.bf16 %v660_v18, %v657_v17 }
 0x2dc   :  { %10383 = vmatpush3.bf16.msra.mxu1 %v13060_v34  ;;  %1001 = vmatprep.mubr.f32.mxu0 %v12615_v10  ;;  %v1099_v39 = vrot.slane %v661_v31, %v13185_v29  ;;  %v1103_v47 = vrot.slane %v661_v31, %v13188_v32  ;;  %v1107_v48 = vrot.slane %v661_v31, %v1106_v37 }
 0x2dd   :  { %10362 = vmatprep.subr.bf16.mxu0 %v13066_v40  ;;  %10384 = vmatprep.subr.bf16.mxu1 %v12613_v3 }
 0x2de   :  { %8558 = vmatmul.mubr.msk.f32.gmra.mrb[8].mxu0 %vm772_vm8, %v9247_v13  ;;  %9329 = vmatprep.mubr.msk.f32.mxu1 %vm12614_vm0, %v12615_v10  ;;  %v13133_v13 = vpack.c.bf16 %v659_v9, %v656_v8 }
 0x2df   :  { %10364 = vmatpush1.bf16.msra.mxu0 %v13074_v44  ;;  %1182 = vmatprep.mubr.f32.mxu0 %v12615_v10 }
 0x2e0   :  { %10386 = vmatpush3.bf16.msra.mxu1 %v13078_v45  ;;  %10366 = vmatprep.subr.bf16.mxu0 %v13080_v46 }
 0x2e1   :  { %10387 = vmatprep.subr.bf16.mxu1 %v12613_v3 }
 0x2e3   :  { %10368 = vmatpush1.bf16.msra.mxu0 %v13094_v53 }
 0x2e4   :  { %10389 = vmatpush3.bf16.msra.mxu1 %v13099_v54  ;;  %10370 = vmatprep.subr.bf16.mxu0 %v13101_v55 }
 0x2e5   :  { %10390 = vmatprep.subr.bf16.mxu1 %v12613_v3 }
 0x2e7   :  { %10372 = vmatpush1.bf16.msra.mxu0 %v13111_v62 }
 0x2e8   :  { %10392 = vmatpush3.bf16.msra.mxu1 %v13115_v63  ;;  %10374 = vmatprep.subr.bf16.mxu0 %v13117_v0 }
 0x2e9   :  { %10393 = vmatprep.subr.bf16.mxu1 %v12613_v3 }
 0x2eb   :  { %10376 = vmatpush1.bf16.msra.mxu0 %v13127_v11 }
 0x2ec   :  { %10395 = vmatpush3.bf16.msra.mxu1 %v13131_v12  ;;  %10378 = vmatprep.subr.bf16.mxu0 %v13133_v13 }
 0x2ed   :  { %10396 = vmatprep.subr.bf16.mxu1 %v12613_v3 }
 0x2ef   :  { %10380 = vmatpush1.bf16.msra.mxu0 %v13141_v19 }
 0x2f0   :  { %10398 = vmatpush3.bf16.msra.mxu1 %v13145_v20  ;;  %10400 = vmatprep.subr.bf16.mxu0 %v13046_v25 }
 0x2f1   :  { %10423 = vmatprep.subr.bf16.mxu1 %v12613_v3 }
 0x2f2   :  { %1183 = vmatmul.mubr.f32.vlgmr.msra.gmra.mrb[10].mxu0 %v12615_v10 }
 0x2f3   :  { %9330 = vmatmul.mubr.f32.vlgmr.msra.gmra.mrb[10].mxu1 %v12615_v10  ;;  %10402 = vmatpush1.bf16.msra.mxu0 %v13057_v33 }
 0x2f4   :  { %10425 = vmatpush3.bf16.msra.mxu1 %v13060_v34  ;;  %10404 = vmatprep.subr.bf16.mxu0 %v13066_v40 }
 0x2f5   :  { %10426 = vmatprep.subr.bf16.mxu1 %v12613_v3  ;;  %1392 = vmatprep.mubr.f32.mxu0 %v12615_v10 }
 0x2f6   :  { %9356 = vmatprep.mubr.msk.f32.mxu1 %vm12614_vm0, %v12615_v10 }
 0x2f7   :  { %10406 = vmatpush1.bf16.msra.mxu0 %v13074_v44 }
 0x2f8   :  { %10428 = vmatpush3.bf16.msra.mxu1 %v13078_v45  ;;  %10408 = vmatprep.subr.bf16.mxu0 %v13080_v46 }
 0x2f9   :  { %10429 = vmatprep.subr.bf16.mxu1 %v12613_v3 }
 0x2fb   :  { %10410 = vmatpush1.bf16.msra.mxu0 %v13094_v53 }
 0x2fc   :  { %10431 = vmatpush3.bf16.msra.mxu1 %v13099_v54  ;;  %10412 = vmatprep.subr.bf16.mxu0 %v13101_v55 }
 0x2fd   :  { %10432 = vmatprep.subr.bf16.mxu1 %v12613_v3 }
 0x2ff   :  { %10414 = vmatpush1.bf16.msra.mxu0 %v13111_v62 }
 0x300   :  { %10434 = vmatpush3.bf16.msra.mxu1 %v13115_v63  ;;  %10416 = vmatprep.subr.bf16.mxu0 %v13117_v0 }
 0x301   :  { %10435 = vmatprep.subr.bf16.mxu1 %v12613_v3 }
 0x303   :  { %10418 = vmatpush1.bf16.msra.mxu0 %v13127_v11 }
 0x304   :  { %10437 = vmatpush3.bf16.msra.mxu1 %v13131_v12  ;;  %10420 = vmatprep.subr.bf16.mxu0 %v13133_v13 }
 0x305   :  { %10438 = vmatprep.subr.bf16.mxu1 %v12613_v3 }
 0x307   :  { %10422 = vmatpush1.bf16.msra.mxu0 %v13141_v19 }
 0x308   :  { %10440 = vmatpush3.bf16.msra.mxu1 %v13145_v20  ;;  %10442 = vmatprep.subr.bf16.mxu0 %v13046_v25 }
 0x309   :  { %10465 = vmatprep.subr.bf16.mxu1 %v12613_v3 }
 0x3a5   :  { %v845_v21 = vpop.f32.mrb[2].mxu0 }
 0x3a6   :  { %v847_v23 = vpop.f32.mrb[3].mxu0  ;;  %v9293_v26 = vpop.f32.mrb[6].mxu1 }
 0x3a7   :  { %v922_v27 = vpop.f32.mrb[7].mxu1 }
 0x3a9   :  { %v851_v28 = vpop.f32.mrb[4].mxu0 }
 0x3aa   :  { %v853_v30 = vpop.f32.mrb[5].mxu0 }
 0x3ad   :  { %v997_v38 = vpop.f32.mrb[6].mxu0 }
 0x3ae   :  { %v1964_v41 = vrot.slane %v997_v38, 6  ;;  %v2180_v35 = vrot.slane %v997_v38, 2  ;;  %v9304_v42 = vpop.f32.mrb[8].mxu1  ;;  %v999_v43 = vpop.f32.mrb[7].mxu0 }
 0x3af   :  { %v1088_v49 = vrot.slane %v9304_v42, 6  ;;  %v1313_v50 = vrot.slane %v9304_v42, 2  ;;  %v1965_v51 = vrot.slane %v999_v43, 6  ;;  %v2181_v52 = vrot.slane %v999_v43, 2  ;;  %v1074_v56 = vpop.f32.mrb[9].mxu1 }
 0x3b0   :  { %v1970_v57 = vadd.f32 %v1964_v41, %v851_v28  ;;  %v2186_v58 = vadd.f32 %v2180_v35, %v851_v28  ;;  %v1966_v59 = vrot.slane %v1074_v56, 6  ;;  %v2182_v60 = vrot.slane %v1074_v56, 2 }
 0x3b1   :  { %v1094_v61 = vadd.f32 %v1088_v49, %v922_v27  ;;  %v1319_v4 = vadd.f32 %v1313_v50, %v922_v27  ;;  %v1971_v5 = vadd.f32 %v1965_v51, %v853_v30  ;;  %v2187_v6 = vadd.f32 %v2181_v52, %v853_v30  ;;  %v1003_v7 = vpop.f32.mrb[8].mxu0 }
 0x3b2   :  { %v1972_v8 = vadd.f32 %v9293_v26, %v1966_v59  ;;  %v2188_v9 = vadd.f32 %v9293_v26, %v2182_v60  ;;  %v1086_v15 = vrot.slane %v1003_v7, 6  ;;  %v1311_v16 = vrot.slane %v1003_v7, 2  ;;  %v1005_v17 = vpop.f32.mrb[9].mxu0 }
 0x3b3   :  { %v1087_v18 = vrot.slane %v1005_v17, 6  ;;  %v1312_v31 = vrot.slane %v1005_v17, 2  ;;  %v13195_v38 = vadd.f32 %v1319_v4, %v1107_v48  ;;  %v13197_v41 = vadd.f32 %v1970_v57, %v1099_v39 }
 0x3b4   :  { %v1092_v42 = vadd.f32 %v1086_v15, %v845_v21  ;;  %v1317_v43 = vadd.f32 %v1311_v16, %v845_v21  ;;  %v13199_v28 = vadd.f32 %v1972_v8, %v1107_v48  ;;  %v13201_v49 = vadd.f32 %v1971_v5, %v1103_v47 }
 0x3b5   :  { %v1093_v35 = vadd.f32 %v1087_v18, %v847_v23  ;;  %v1318_v27 = vadd.f32 %v1312_v31, %v847_v23  ;;  %v13203_v30 = vadd.f32 %v2186_v58, %v1099_v39  ;;  %v13209_v51 = vadd.f32 %v2188_v9, %v1107_v48 }
 0x3b6   :  { %v13205_v26 = vadd.f32 %v1099_v39, %v1092_v42  ;;  %v13207_v50 = vadd.f32 %v1317_v43, %v1099_v39  ;;  %v13211_v52 = vadd.f32 %v2187_v6, %v1103_v47  ;;  %v13217_v60 = vadd.f32 %v1107_v48, %v1094_v61 }
 0x3b7   :  { %v13213_v56 = vadd.f32 %v1318_v27, %v1103_v47  ;;  %v13215_v57 = vadd.f32 %v1103_v47, %v1093_v35 }
 0x3c5   :  { %v1184_v21 = vpop.f32.mrb[10].mxu0 }
 0x3c6   :  { %v1186_v59 = vpop.f32.mrb[11].mxu0  ;;  %v1255_v23 = vpop.f32.mrb[10].mxu1  ;;  %v1259_v47 = vadd.f32 %v1184_v21, %v13205_v26 }
 0x3c7   :  { %v1260_v58 = vadd.f32 %v1186_v59, %v13215_v57  ;;  %v9331_v4 = vpop.f32.mrb[11].mxu1  ;;  %v1261_v5 = vadd.f32 %v1255_v23, %v13217_v60 }
 0x3c8   :  { %v8561_v7 = vmul.f32 -1.442695, %v1259_v47 }
 0x3c9   :  { %11708 = vtanh.f32 %v1260_v58  ;;  %v8562_v18 = vmul.f32 -1.442695, %v1260_v58  ;;  %v8563_v58 = vmul.f32 -1.442695, %v1261_v5 }
 0x3ca   :  { %11710 = vtanh.f32 %v1261_v5 }
 0x3cb   :  { %11712 = vpow2.f32 %v8561_v7 }
 0x3d3   :  { %v11709_v39 = vpop.eup %11708 }
 0x3d4   :  { %1286 = vrot.lane.b32.xlu1 %v11709_v39, %s12616_s14  ;;  %v11711_v6 = vpop.eup %11710 }
 0x3d5   :  { %1288 = vrot.lane.b32.xlu0 %v11711_v6, %s12616_s14  ;;  %v11713_v48 = vpop.eup %11712 }
 0x3d6   :  { %v1265_v61 = vadd.f32 1.0, %v11713_v48 }
 0x3d8   :  { %11714 = vrcp.f32 %v1265_v61 }
 0x3d9   :  { %11716 = vpow2.f32 %v8562_v18 }
 0x3e2   :  { %v11715_v15 = vpop.eup %11714 }
 0x3e3   :  { %v11717_v31 = vpop.eup %11716  ;;  %v1282_v35 = vmul.f32 0.0, %v11715_v15 }
 0x3e4   :  { %v1271_v42 = vadd.f32 1.0, %v11717_v31 }
 0x3e6   :  { %11718 = vrcp.f32 %v1271_v42 }
 0x3f0   :  { %v11719_v43 = vpop.eup %11718 }
 0x3f1   :  { %v1283_v27 = vmul.f32 0.0, %v11719_v43 }
 0x446   :  { %v1287_v8 = vpop.permute.xlu1 %1286 }
 0x447   :  { %v1289_v9 = vpop.permute.xlu0 %1288 }
 0x448   :  { %v1291_v16 = vsel %vm1290_vm9, %v1287_v8, %v1289_v9 }
 0x449   :  { %v1293_v17 = vmul.f32 %v11715_v15, %v1291_v16 }
 0x44b   :  { %1295 = vrot.lane.b32.xlu1 %v1293_v17, %s12617_s18 }
 0x4bd   :  { %v1296_v21 = vpop.permute.xlu1 %1295 }
 0x4be   :  { %v13226_v59 = vadd.f32 %v1296_v21, %v1282_v35  ;;  %v13228_v23 = vadd.f32 %v1296_v21, %v1283_v27 }
 0x4c0   :  { %11720 = vtanh.f32 %v13226_v59 }
 0x4c1   :  { %11722 = vtanh.f32 %v13228_v23 }
 0x4c2   :  { %11724 = vpow2.f32 %v8563_v58 }
 0x4ca   :  { %v11721_v4 = vpop.eup %11720 }
 0x4cb   :  { %v11723_v39 = vpop.eup %11722  ;;  %1304 = vrot.lane.b32.xlu0 %v11721_v4, %s12616_s14 }
 0x4cc   :  { %1306 = vrot.lane.b32.xlu1 %v11723_v39, %s12616_s14  ;;  %v11725_v6 = vpop.eup %11724 }
 0x4cd   :  { %v1279_v47 = vadd.f32 1.0, %v11725_v6  ;;  %v1504_v6 = vrot.slane %v13228_v23, 6  ;;  %v1503_v23 = vrot.slane %v13226_v59, 6 }
 0x4cf   :  { %11726 = vrcp.f32 %v1279_v47 }
 0x4d9   :  { %v11727_v61 = vpop.eup %11726 }
 0x53d   :  { %v1305_v7 = vpop.permute.xlu0 %1304 }
 0x53e   :  { %v1307_v48 = vpop.permute.xlu1 %1306 }
 0x53f   :  { %v1308_v8 = vsel %vm1290_vm9, %v1305_v7, %v1307_v48 }
 0x540   :  { %v1310_v9 = vmul.f32 %v11727_v61, %v1308_v8 }
 0x542   :  { %1324 = vrot.lane.b32.xlu0 %v1310_v9, %s12617_s18 }
 0x5b4   :  { %v13236_v15 = vpop.permute.xlu0 %1324 }
 0x5b5   :  { %8564 = vmatmul.mubr.msk.f32.vlgmr.msra.gmra.mrb[12].mxu0 %vm1114_vm10, %v13236_v15  ;;  %9357 = vmatmul.mubr.msk.f32.vlgmr.msra.gmra.mrb[12].mxu1 %vm1114_vm10, %v13236_v15 }
 0x5b6   :  { %10444 = vmatpush1.bf16.msra.mxu0 %v13057_v33  ;;  %10467 = vmatpush3.bf16.msra.mxu1 %v13060_v34 }
 0x5b7   :  { %10446 = vmatprep.subr.bf16.mxu0 %v13066_v40  ;;  %10468 = vmatprep.subr.bf16.mxu1 %v12613_v3 }
 0x5b8   :  { %1605 = vmatprep.mubr.f32.mxu0 %v12615_v10  ;;  %9383 = vmatprep.mubr.msk.f32.mxu1 %vm12614_vm0, %v12615_v10 }
 0x5ba   :  { %10448 = vmatpush1.bf16.msra.mxu0 %v13074_v44  ;;  %10470 = vmatpush3.bf16.msra.mxu1 %v13078_v45 }
 0x5bb   :  { %10450 = vmatprep.subr.bf16.mxu0 %v13080_v46  ;;  %10471 = vmatprep.subr.bf16.mxu1 %v12613_v3 }
 0x5be   :  { %10452 = vmatpush1.bf16.msra.mxu0 %v13094_v53  ;;  %10473 = vmatpush3.bf16.msra.mxu1 %v13099_v54 }
 0x5bf   :  { %10454 = vmatprep.subr.bf16.mxu0 %v13101_v55  ;;  %10474 = vmatprep.subr.bf16.mxu1 %v12613_v3 }
 0x5c2   :  { %10456 = vmatpush1.bf16.msra.mxu0 %v13111_v62  ;;  %10476 = vmatpush3.bf16.msra.mxu1 %v13115_v63 }
 0x5c3   :  { %10458 = vmatprep.subr.bf16.mxu0 %v13117_v0  ;;  %10477 = vmatprep.subr.bf16.mxu1 %v12613_v3 }
 0x5c6   :  { %10460 = vmatpush1.bf16.msra.mxu0 %v13127_v11  ;;  %10479 = vmatpush3.bf16.msra.mxu1 %v13131_v12 }
 0x5c7   :  { %10462 = vmatprep.subr.bf16.mxu0 %v13133_v13  ;;  %10480 = vmatprep.subr.bf16.mxu1 %v12613_v3 }
 0x5ca   :  { %10464 = vmatpush1.bf16.msra.mxu0 %v13141_v19  ;;  %10482 = vmatpush3.bf16.msra.mxu1 %v13145_v20 }
 0x5cb   :  { %10484 = vmatprep.subr.bf16.mxu0 %v13046_v25  ;;  %10507 = vmatprep.subr.bf16.mxu1 %v12613_v3 }
 0x688   :  { %v1394_v5 = vpop.f32.mrb[12].mxu0  ;;  %v1465_v16 = vpop.f32.mrb[12].mxu1 }
 0x689   :  { %v1474_v17 = vrot.slane %v1465_v16, 6  ;;  %v1396_v18 = vpop.f32.mrb[13].mxu0  ;;  %v9358_v31 = vpop.f32.mrb[13].mxu1  ;;  %v1472_v48 = vrot.slane %v1394_v5, 6 }
 0x68a   :  { %v1473_v42 = vrot.slane %v1396_v18, 6 }
 0x68b   :  { %v1480_v43 = vadd.f32 %v1474_v17, %v13195_v38  ;;  %v1478_v61 = vadd.f32 %v1472_v48, %v13207_v50 }
 0x68c   :  { %v1479_v35 = vadd.f32 %v1473_v42, %v13213_v56 }
 0x68d   :  { %11728 = vtanh.f32 %v1480_v43  ;;  %v8566_v8 = vmul.f32 -1.442695, %v1478_v61 }
 0x68e   :  { %v8567_v27 = vmul.f32 -1.442695, %v1479_v35  ;;  %11730 = vtanh.f32 %v1479_v35 }
 0x690   :  { %11732 = vpow2.f32 %v8567_v27 }
 0x697   :  { %v11729_v21 = vpop.eup %11728 }
 0x698   :  { %v11731_v4 = vpop.eup %11730  ;;  %1513 = vrot.lane.b32.xlu0 %v11729_v21, %s12616_s14 }
 0x699   :  { %1511 = vrot.lane.b32.xlu1 %v11731_v4, %s12616_s14 }
 0x69a   :  { %v11733_v39 = vpop.eup %11732 }
 0x69b   :  { %v1490_v58 = vadd.f32 1.0, %v11733_v39 }
 0x69d   :  { %11734 = vrcp.f32 %v1490_v58 }
 0x69e   :  { %11736 = vpow2.f32 %v8566_v8 }
 0x6a7   :  { %v11735_v47 = vpop.eup %11734 }
 0x6a8   :  { %v1508_v7 = vmul.f32 %v11735_v47, %v1504_v6  ;;  %v11737_v9 = vpop.eup %11736  ;;  %v8568_v6 = vmul.f32 -1.442695, %v1480_v43 }
 0x6a9   :  { %v1484_v16 = vadd.f32 1.0, %v11737_v9 }
 0x6ab   :  { %11738 = vrcp.f32 %v1484_v16 }
 0x6b5   :  { %v11739_v31 = vpop.eup %11738 }
 0x6b6   :  { %v1507_v27 = vmul.f32 %v11739_v31, %v1503_v23 }
 0x70a   :  { %v1514_v17 = vpop.permute.xlu0 %1513 }
 0x70b   :  { %v1512_v18 = vpop.permute.xlu1 %1511 }
 0x70c   :  { %v1515_v42 = vsel %vm1290_vm9, %v1512_v18, %v1514_v17 }
 0x70d   :  { %v1517_v35 = vmul.f32 %v11739_v31, %v1515_v42 }
 0x70f   :  { %1519 = vrot.lane.b32.xlu1 %v1517_v35, %s12617_s18 }
 0x781   :  { %v1520_v21 = vpop.permute.xlu1 %1519 }
 0x782   :  { %v13278_v5 = vadd.f32 %v1520_v21, %v1507_v27  ;;  %v13280_v4 = vadd.f32 %v1520_v21, %v1508_v7 }
 0x784   :  { %11740 = vtanh.f32 %v13278_v5 }
 0x785   :  { %11742 = vtanh.f32 %v13280_v4 }
 0x786   :  { %11744 = vpow2.f32 %v8568_v6 }
 0x78e   :  { %v11741_v39 = vpop.eup %11740 }
 0x78f   :  { %v11743_v58 = vpop.eup %11742  ;;  %1528 = vrot.lane.b32.xlu0 %v11741_v39, %s12616_s14 }
 0x790   :  { %1530 = vrot.lane.b32.xlu1 %v11743_v58, %s12616_s14  ;;  %v11745_v47 = vpop.eup %11744 }
 0x791   :  { %v1498_v59 = vadd.f32 1.0, %v11745_v47 }
 0x793   :  { %11746 = vrcp.f32 %v1498_v59 }
 0x79d   :  { %v11747_v8 = vpop.eup %11746 }
 0x801   :  { %v1529_v48 = vpop.permute.xlu0 %1528 }
 0x802   :  { %v1531_v61 = vpop.permute.xlu1 %1530 }
 0x803   :  { %v1532_v7 = vsel %vm1290_vm9, %v1529_v48, %v1531_v61  ;;  %v1717_v48 = vrot.slane %v13280_v4, 6  ;;  %v1716_v4 = vrot.slane %v13278_v5, 6 }
 0x804   :  { %v1534_v9 = vmul.f32 %v11747_v8, %v1532_v7 }
 0x806   :  { %v1536_v16 = vrot.slane %v1534_v9, 2 }
 0x808   :  { %1537 = vrot.lane.b32.xlu0 %v1536_v16, %s12617_s18 }
 0x87a   :  { %v13288_v17 = vpop.permute.xlu0 %1537 }
 0x87b   :  { %8569 = vmatmul.mubr.msk.f32.vlgmr.msra.gmra.mrb[14].mxu0 %vm1114_vm10, %v13288_v17  ;;  %9384 = vmatmul.mubr.msk.f32.vlgmr.msra.gmra.mrb[14].mxu1 %vm1114_vm10, %v13288_v17 }
 0x87c   :  { %10486 = vmatpush1.bf16.msra.mxu0 %v13057_v33  ;;  %10509 = vmatpush3.bf16.msra.mxu1 %v13060_v34 }
 0x87d   :  { %10488 = vmatprep.subr.bf16.mxu0 %v13066_v40  ;;  %10510 = vmatprep.subr.bf16.mxu1 %v12613_v3 }
 0x87e   :  { %1818 = vmatprep.mubr.f32.mxu0 %v12615_v10  ;;  %9410 = vmatprep.mubr.msk.f32.mxu1 %vm12614_vm0, %v12615_v10 }
 0x880   :  { %10490 = vmatpush1.bf16.msra.mxu0 %v13074_v44  ;;  %10512 = vmatpush3.bf16.msra.mxu1 %v13078_v45 }
 0x881   :  { %10492 = vmatprep.subr.bf16.mxu0 %v13080_v46  ;;  %10513 = vmatprep.subr.bf16.mxu1 %v12613_v3 }
 0x884   :  { %10494 = vmatpush1.bf16.msra.mxu0 %v13094_v53  ;;  %10515 = vmatpush3.bf16.msra.mxu1 %v13099_v54 }
 0x885   :  { %10496 = vmatprep.subr.bf16.mxu0 %v13101_v55  ;;  %10516 = vmatprep.subr.bf16.mxu1 %v12613_v3 }
 0x888   :  { %10498 = vmatpush1.bf16.msra.mxu0 %v13111_v62  ;;  %10518 = vmatpush3.bf16.msra.mxu1 %v13115_v63 }
 0x889   :  { %10500 = vmatprep.subr.bf16.mxu0 %v13117_v0  ;;  %10519 = vmatprep.subr.bf16.mxu1 %v12613_v3 }
 0x88c   :  { %10502 = vmatpush1.bf16.msra.mxu0 %v13127_v11  ;;  %10521 = vmatpush3.bf16.msra.mxu1 %v13131_v12 }
 0x88d   :  { %10504 = vmatprep.subr.bf16.mxu0 %v13133_v13  ;;  %10522 = vmatprep.subr.bf16.mxu1 %v12613_v3 }
 0x890   :  { %10506 = vmatpush1.bf16.msra.mxu0 %v13141_v19  ;;  %10524 = vmatpush3.bf16.msra.mxu1 %v13145_v20 }
 0x891   :  { %10526 = vmatprep.subr.bf16.mxu0 %v13046_v25  ;;  %10549 = vmatprep.subr.bf16.mxu1 %v12613_v3 }
 0x94e   :  { %v1607_v43 = vpop.f32.mrb[14].mxu0  ;;  %v1678_v18 = vpop.f32.mrb[14].mxu1 }
 0x94f   :  { %v1687_v31 = vrot.slane %v1678_v18, 4  ;;  %v1609_v42 = vpop.f32.mrb[15].mxu0  ;;  %v9385_v35 = vpop.f32.mrb[15].mxu1 }
 0x950   :  { %v1686_v23 = vrot.slane %v1609_v42, 4 }
 0x951   :  { %v1693_v27 = vadd.f32 %v1687_v31, %v13217_v60  ;;  %v1685_v60 = vrot.slane %v1607_v43, 4 }
 0x952   :  { %v1692_v21 = vadd.f32 %v1686_v23, %v13215_v57 }
 0x953   :  { %11748 = vtanh.f32 %v1693_v27  ;;  %v1691_v57 = vadd.f32 %v1685_v60, %v13205_v26 }
 0x954   :  { %v8572_v39 = vmul.f32 -1.442695, %v1692_v21  ;;  %11750 = vtanh.f32 %v1692_v21 }
 0x955   :  { %v8571_v7 = vmul.f32 -1.442695, %v1691_v57 }
 0x956   :  { %11752 = vpow2.f32 %v8572_v39 }
 0x95d   :  { %v11749_v58 = vpop.eup %11748 }
 0x95e   :  { %v11751_v6 = vpop.eup %11750  ;;  %1726 = vrot.lane.b32.xlu0 %v11749_v58, %s12616_s14 }
 0x95f   :  { %1724 = vrot.lane.b32.xlu1 %v11751_v6, %s12616_s14 }
 0x960   :  { %v11753_v47 = vpop.eup %11752 }
 0x961   :  { %v1703_v59 = vadd.f32 1.0, %v11753_v47  ;;  %v8573_v47 = vmul.f32 -1.442695, %v1693_v27 }
 0x963   :  { %11754 = vrcp.f32 %v1703_v59 }
 0x964   :  { %11756 = vpow2.f32 %v8571_v7 }
 0x96d   :  { %v11755_v61 = vpop.eup %11754 }
 0x96e   :  { %v1721_v8 = vmul.f32 %v11755_v61, %v1717_v48  ;;  %v11757_v9 = vpop.eup %11756 }
 0x96f   :  { %v1697_v16 = vadd.f32 1.0, %v11757_v9 }
 0x971   :  { %11758 = vrcp.f32 %v1697_v16 }
 0x97b   :  { %v11759_v42 = vpop.eup %11758 }
 0x97c   :  { %v1720_v21 = vmul.f32 %v11759_v42, %v1716_v4 }
 0x9d0   :  { %v1727_v18 = vpop.permute.xlu0 %1726 }
 0x9d1   :  { %v1725_v31 = vpop.permute.xlu1 %1724 }
 0x9d2   :  { %v1728_v35 = vsel %vm1290_vm9, %v1725_v31, %v1727_v18 }
 0x9d3   :  { %v1730_v23 = vmul.f32 %v11759_v42, %v1728_v35 }
 0x9d5   :  { %1732 = vrot.lane.b32.xlu1 %v1730_v23, %s12617_s18 }
 0xa47   :  { %v1733_v39 = vpop.permute.xlu1 %1732 }
 0xa48   :  { %v13330_v43 = vadd.f32 %v1733_v39, %v1720_v21  ;;  %v13332_v26 = vadd.f32 %v1733_v39, %v1721_v8 }
 0xa4a   :  { %11760 = vtanh.f32 %v13330_v43 }
 0xa4b   :  { %11762 = vtanh.f32 %v13332_v26 }
 0xa4c   :  { %11764 = vpow2.f32 %v8573_v47 }
 0xa54   :  { %v11761_v58 = vpop.eup %11760 }
 0xa55   :  { %v11763_v6 = vpop.eup %11762  ;;  %1741 = vrot.lane.b32.xlu0 %v11761_v58, %s12616_s14 }
 0xa56   :  { %1743 = vrot.lane.b32.xlu1 %v11763_v6, %s12616_s14  ;;  %v11765_v59 = vpop.eup %11764 }
 0xa57   :  { %v1711_v5 = vadd.f32 1.0, %v11765_v59  ;;  %v1930_v59 = vrot.slane %v13332_v26, 6  ;;  %v1929_v26 = vrot.slane %v13330_v43, 6 }
 0xa59   :  { %11766 = vrcp.f32 %v1711_v5 }
 0xa63   :  { %v11767_v60 = vpop.eup %11766 }
 0xac7   :  { %v1742_v48 = vpop.permute.xlu0 %1741 }
 0xac8   :  { %v1744_v61 = vpop.permute.xlu1 %1743 }
 0xac9   :  { %v1745_v8 = vsel %vm1290_vm9, %v1742_v48, %v1744_v61 }
 0xaca   :  { %v1747_v57 = vmul.f32 %v11767_v60, %v1745_v8 }
 0xacc   :  { %v1749_v7 = vrot.slane %v1747_v57, 4 }
 0xace   :  { %1750 = vrot.lane.b32.xlu0 %v1749_v7, %s12617_s18 }
 0xb40   :  { %v13340_v9 = vpop.permute.xlu0 %1750 }
 0xb41   :  { %8574 = vmatmul.mubr.msk.f32.vlgmr.msra.gmra.mrb[16].mxu0 %vm1114_vm10, %v13340_v9  ;;  %9411 = vmatmul.mubr.msk.f32.vlgmr.msra.gmra.mrb[16].mxu1 %vm1114_vm10, %v13340_v9 }
 0xb42   :  { %10528 = vmatpush1.bf16.msra.mxu0 %v13057_v33  ;;  %10551 = vmatpush3.bf16.msra.mxu1 %v13060_v34 }
 0xb43   :  { %10530 = vmatprep.subr.bf16.mxu0 %v13066_v40  ;;  %10552 = vmatprep.subr.bf16.mxu1 %v12613_v3 }
 0xb44   :  { %2046 = vmatprep.mubr.f32.mxu0 %v12615_v10  ;;  %9437 = vmatprep.mubr.msk.f32.mxu1 %vm12614_vm0, %v12615_v10 }
 0xb46   :  { %10532 = vmatpush1.bf16.msra.mxu0 %v13074_v44  ;;  %10554 = vmatpush3.bf16.msra.mxu1 %v13078_v45 }
 0xb47   :  { %10534 = vmatprep.subr.bf16.mxu0 %v13080_v46  ;;  %10555 = vmatprep.subr.bf16.mxu1 %v12613_v3 }
 0xb4a   :  { %10536 = vmatpush1.bf16.msra.mxu0 %v13094_v53  ;;  %10557 = vmatpush3.bf16.msra.mxu1 %v13099_v54 }
 0xb4b   :  { %10538 = vmatprep.subr.bf16.mxu0 %v13101_v55  ;;  %10558 = vmatprep.subr.bf16.mxu1 %v12613_v3 }
 0xb4e   :  { %10540 = vmatpush1.bf16.msra.mxu0 %v13111_v62  ;;  %10560 = vmatpush3.bf16.msra.mxu1 %v13115_v63 }
 0xb4f   :  { %10542 = vmatprep.subr.bf16.mxu0 %v13117_v0  ;;  %10561 = vmatprep.subr.bf16.mxu1 %v12613_v3 }
 0xb52   :  { %10544 = vmatpush1.bf16.msra.mxu0 %v13127_v11  ;;  %10563 = vmatpush3.bf16.msra.mxu1 %v13131_v12 }
 0xb53   :  { %10546 = vmatprep.subr.bf16.mxu0 %v13133_v13  ;;  %10564 = vmatprep.subr.bf16.mxu1 %v12613_v3 }
 0xb56   :  { %10548 = vmatpush1.bf16.msra.mxu0 %v13141_v19  ;;  %10566 = vmatpush3.bf16.msra.mxu1 %v13145_v20 }
 0xb57   :  { %10568 = vmatprep.subr.bf16.mxu0 %v13046_v25  ;;  %10591 = vmatprep.subr.bf16.mxu1 %v12613_v3 }
 0xc14   :  { %v1820_v27 = vpop.f32.mrb[16].mxu0  ;;  %v1891_v16 = vpop.f32.mrb[16].mxu1 }
 0xc15   :  { %v1900_v18 = vrot.slane %v1891_v16, 2  ;;  %v1822_v31 = vpop.f32.mrb[17].mxu0  ;;  %v9412_v42 = vpop.f32.mrb[17].mxu1 }
 0xc16   :  { %v1899_v35 = vrot.slane %v1822_v31, 2 }
 0xc17   :  { %v1906_v23 = vadd.f32 %v1900_v18, %v13195_v38  ;;  %v1898_v38 = vrot.slane %v1820_v27, 2 }
 0xc18   :  { %v1905_v4 = vadd.f32 %v1899_v35, %v13213_v56 }
 0xc19   :  { %11768 = vtanh.f32 %v1906_v23  ;;  %v1904_v56 = vadd.f32 %v1898_v38, %v13207_v50 }
 0xc1a   :  { %v8577_v21 = vmul.f32 -1.442695, %v1905_v4  ;;  %11770 = vtanh.f32 %v1905_v4 }
 0xc1b   :  { %v8576_v61 = vmul.f32 -1.442695, %v1904_v56 }
 0xc1c   :  { %11772 = vpow2.f32 %v8577_v21 }
 0xc23   :  { %v11769_v39 = vpop.eup %11768 }
 0xc24   :  { %v11771_v58 = vpop.eup %11770  ;;  %1939 = vrot.lane.b32.xlu0 %v11769_v39, %s12616_s14  ;;  %v8578_v39 = vmul.f32 -1.442695, %v1906_v23 }
 0xc25   :  { %1937 = vrot.lane.b32.xlu1 %v11771_v58, %s12616_s14 }
 0xc26   :  { %v11773_v6 = vpop.eup %11772 }
 0xc27   :  { %v1916_v47 = vadd.f32 1.0, %v11773_v6 }
 0xc29   :  { %11774 = vrcp.f32 %v1916_v47 }
 0xc2a   :  { %11776 = vpow2.f32 %v8576_v61 }
 0xc33   :  { %v11775_v5 = vpop.eup %11774 }
 0xc34   :  { %v1934_v48 = vmul.f32 %v11775_v5, %v1930_v59  ;;  %v11777_v60 = vpop.eup %11776 }
 0xc35   :  { %v1910_v8 = vadd.f32 1.0, %v11777_v60 }
 0xc37   :  { %11778 = vrcp.f32 %v1910_v8 }
 0xc41   :  { %v11779_v16 = vpop.eup %11778 }
 0xc42   :  { %v1933_v42 = vmul.f32 %v11779_v16, %v1929_v26 }
 0xc96   :  { %v1940_v57 = vpop.permute.xlu0 %1939 }
 0xc97   :  { %v1938_v7 = vpop.permute.xlu1 %1937 }
 0xc98   :  { %v1941_v18 = vsel %vm1290_vm9, %v1938_v7, %v1940_v57 }
 0xc99   :  { %v1943_v31 = vmul.f32 %v11779_v16, %v1941_v18 }
 0xc9b   :  { %1945 = vrot.lane.b32.xlu1 %v1943_v31, %s12617_s18 }
 0xd0d   :  { %v1946_v35 = vpop.permute.xlu1 %1945 }
 0xd0e   :  { %v13382_v27 = vadd.f32 %v1946_v35, %v1933_v42  ;;  %v13384_v50 = vadd.f32 %v1946_v35, %v1934_v48 }
 0xd10   :  { %11780 = vtanh.f32 %v13382_v27  ;;  %v2149_v35 = vrot.slane %v13384_v50, 6 }
 0xd11   :  { %11782 = vtanh.f32 %v13384_v50 }
 0xd12   :  { %11784 = vpow2.f32 %v8578_v39 }
 0xd1a   :  { %v11781_v4 = vpop.eup %11780 }
 0xd1b   :  { %v11783_v21 = vpop.eup %11782  ;;  %1954 = vrot.lane.b32.xlu0 %v11781_v4, %s12616_s14 }
 0xd1c   :  { %1956 = vrot.lane.b32.xlu1 %v11783_v21, %s12616_s14  ;;  %v11785_v58 = vpop.eup %11784 }
 0xd1d   :  { %v1924_v43 = vadd.f32 1.0, %v11785_v58 }
 0xd1f   :  { %11786 = vrcp.f32 %v1924_v43 }
 0xd29   :  { %v11787_v59 = vpop.eup %11786 }
 0xd8d   :  { %v1955_v6 = vpop.permute.xlu0 %1954 }
 0xd8e   :  { %v1957_v47 = vpop.permute.xlu1 %1956 }
 0xd8f   :  { %v1958_v5 = vsel %vm1290_vm9, %v1955_v6, %v1957_v47 }
 0xd90   :  { %v1960_v48 = vmul.f32 %v11787_v59, %v1958_v5 }
 0xd92   :  { %v1977_v38 = vrot.slane %v1960_v48, 6 }
 0xd94   :  { %1978 = vrot.lane.b32.xlu0 %v1977_v38, %s12617_s18 }
 0xe06   :  { %v13392_v56 = vpop.permute.xlu0 %1978 }
 0xe07   :  { %8579 = vmatmul.mubr.msk.f32.vlgmr.msra.gmra.mrb[18].mxu0 %vm1114_vm10, %v13392_v56  ;;  %9438 = vmatmul.mubr.msk.f32.vlgmr.msra.gmra.mrb[18].mxu1 %vm1114_vm10, %v13392_v56 }
 0xe08   :  { %10570 = vmatpush1.bf16.msra.mxu0 %v13057_v33  ;;  %10593 = vmatpush3.bf16.msra.mxu1 %v13060_v34 }
 0xe09   :  { %10572 = vmatprep.subr.bf16.mxu0 %v13066_v40  ;;  %10594 = vmatprep.subr.bf16.mxu1 %v12613_v3 }
 0xe0a   :  { %2261 = vmatprep.mubr.f32.mxu0 %v12615_v10  ;;  %9464 = vmatprep.mubr.msk.f32.mxu1 %vm12614_vm0, %v12615_v10 }
 0xe0c   :  { %10574 = vmatpush1.bf16.msra.mxu0 %v13074_v44  ;;  %10596 = vmatpush3.bf16.msra.mxu1 %v13078_v45 }
 0xe0d   :  { %10576 = vmatprep.subr.bf16.mxu0 %v13080_v46  ;;  %10597 = vmatprep.subr.bf16.mxu1 %v12613_v3 }
 0xe10   :  { %10578 = vmatpush1.bf16.msra.mxu0 %v13094_v53  ;;  %10599 = vmatpush3.bf16.msra.mxu1 %v13099_v54 }
 0xe11   :  { %10580 = vmatprep.subr.bf16.mxu0 %v13101_v55  ;;  %10600 = vmatprep.subr.bf16.mxu1 %v12613_v3 }
 0xe14   :  { %10582 = vmatpush1.bf16.msra.mxu0 %v13111_v62  ;;  %10602 = vmatpush3.bf16.msra.mxu1 %v13115_v63 }
 0xe15   :  { %10584 = vmatprep.subr.bf16.mxu0 %v13117_v0  ;;  %10603 = vmatprep.subr.bf16.mxu1 %v12613_v3 }
 0xe18   :  { %10586 = vmatpush1.bf16.msra.mxu0 %v13127_v11  ;;  %10605 = vmatpush3.bf16.msra.mxu1 %v13131_v12 }
 0xe19   :  { %10588 = vmatprep.subr.bf16.mxu0 %v13133_v13  ;;  %10606 = vmatprep.subr.bf16.mxu1 %v12613_v3 }
 0xe1c   :  { %10590 = vmatpush1.bf16.msra.mxu0 %v13141_v19  ;;  %10608 = vmatpush3.bf16.msra.mxu1 %v13145_v20 }
 0xe1d   :  { %10610 = vmatprep.subr.bf16.mxu0 %v13046_v25  ;;  %10633 = vmatprep.subr.bf16.mxu1 %v12613_v3 }
 0xeda   :  { %v2048_v23 = vpop.f32.mrb[18].mxu0  ;;  %v2119_v61 = vpop.f32.mrb[18].mxu1 }
 0xedb   :  { %v2125_v60 = vadd.f32 %v2119_v61, %v13199_v28  ;;  %v2050_v8 = vpop.f32.mrb[19].mxu0  ;;  %v9439_v57 = vpop.f32.mrb[19].mxu1  ;;  %v2123_v39 = vadd.f32 %v2048_v23, %v13197_v41  ;;  %v2148_v61 = vrot.slane %v13382_v27, 6 }
 0xedc   :  { %v2124_v7 = vadd.f32 %v2050_v8, %v13201_v49 }
 0xedd   :  { %11788 = vtanh.f32 %v2125_v60  ;;  %v8581_v58 = vmul.f32 -1.442695, %v2123_v39 }
 0xede   :  { %v8582_v16 = vmul.f32 -1.442695, %v2124_v7  ;;  %11790 = vtanh.f32 %v2124_v7 }
 0xee0   :  { %11792 = vpow2.f32 %v8582_v16 }
 0xee7   :  { %v11789_v18 = vpop.eup %11788 }
 0xee8   :  { %v11791_v31 = vpop.eup %11790  ;;  %2158 = vrot.lane.b32.xlu0 %v11789_v18, %s12616_s14  ;;  %v8583_v18 = vmul.f32 -1.442695, %v2125_v60 }
 0xee9   :  { %2156 = vrot.lane.b32.xlu1 %v11791_v31, %s12616_s14 }
 0xeea   :  { %v11793_v26 = vpop.eup %11792 }
 0xeeb   :  { %v2135_v42 = vadd.f32 1.0, %v11793_v26 }
 0xeed   :  { %11794 = vrcp.f32 %v2135_v42 }
 0xeee   :  { %11796 = vpow2.f32 %v8581_v58 }
 0xef7   :  { %v11795_v4 = vpop.eup %11794 }
 0xef8   :  { %v2153_v21 = vmul.f32 %v11795_v4, %v2149_v35  ;;  %v11797_v43 = vpop.eup %11796 }
 0xef9   :  { %v2129_v6 = vadd.f32 1.0, %v11797_v43 }
 0xefb   :  { %11798 = vrcp.f32 %v2129_v6 }
 0xf05   :  { %v11799_v5 = vpop.eup %11798 }
 0xf06   :  { %v2152_v50 = vmul.f32 %v11799_v5, %v2148_v61 }
 0xf5a   :  { %v2159_v47 = vpop.permute.xlu0 %2158 }
 0xf5b   :  { %v2157_v59 = vpop.permute.xlu1 %2156 }
 0xf5c   :  { %v2160_v48 = vsel %vm1290_vm9, %v2157_v59, %v2159_v47 }
 0xf5d   :  { %v2162_v38 = vmul.f32 %v11799_v5, %v2160_v48 }
 0xf5f   :  { %2164 = vrot.lane.b32.xlu1 %v2162_v38, %s12617_s18 }
 0xfd1   :  { %v2165_v8 = vpop.permute.xlu1 %2164 }
 0xfd2   :  { %v13434_v57 = vadd.f32 %v2165_v8, %v2152_v50  ;;  %v13436_v23 = vadd.f32 %v2165_v8, %v2153_v21 }
 0xfd4   :  { %11800 = vtanh.f32 %v13434_v57 }
 0xfd5   :  { %11802 = vtanh.f32 %v13436_v23 }
 0xfd6   :  { %11804 = vpow2.f32 %v8583_v18 }
 0xfde   :  { %v11801_v7 = vpop.eup %11800 }
 0xfdf   :  { %v11803_v16 = vpop.eup %11802  ;;  %2173 = vrot.lane.b32.xlu0 %v11801_v7, %s12616_s14  ;;  %v2373_v7 = vrot.slane %v13436_v23, 6  ;;  %v2372_v23 = vrot.slane %v13434_v57, 6 }
 0xfe0   :  { %2175 = vrot.lane.b32.xlu1 %v11803_v16, %s12616_s14  ;;  %v11805_v31 = vpop.eup %11804 }
 0xfe1   :  { %v2143_v27 = vadd.f32 1.0, %v11805_v31 }
 0xfe3   :  { %11806 = vrcp.f32 %v2143_v27 }
 0xfed   :  { %v11807_v35 = vpop.eup %11806 }
0x1051   :  { %v2174_v26 = vpop.permute.xlu0 %2173 }
0x1052   :  { %v2176_v42 = vpop.permute.xlu1 %2175 }
0x1053   :  { %v2177_v4 = vsel %vm1290_vm9, %v2174_v26, %v2176_v42 }
0x1054   :  { %v2179_v21 = vmul.f32 %v11807_v35, %v2177_v4 }
0x1056   :  { %2193 = vrot.lane.b32.xlu0 %v2179_v21, %s12617_s18 }
0x10c8   :  { %v13444_v39 = vpop.permute.xlu0 %2193 }
0x10c9   :  { %8584 = vmatmul.mubr.msk.f32.vlgmr.msra.gmra.mrb[20].mxu0 %vm1114_vm10, %v13444_v39  ;;  %9465 = vmatmul.mubr.msk.f32.vlgmr.msra.gmra.mrb[20].mxu1 %vm1114_vm10, %v13444_v39 }
0x10ca   :  { %10612 = vmatpush1.bf16.msra.mxu0 %v13057_v33  ;;  %10635 = vmatpush3.bf16.msra.mxu1 %v13060_v34 }
0x10cb   :  { %10614 = vmatprep.subr.bf16.mxu0 %v13066_v40  ;;  %10636 = vmatprep.subr.bf16.mxu1 %v12613_v3 }
0x10cc   :  { %2474 = vmatprep.mubr.f32.mxu0 %v12615_v10  ;;  %9491 = vmatprep.mubr.msk.f32.mxu1 %vm12614_vm0, %v12615_v10 }
0x10ce   :  { %10616 = vmatpush1.bf16.msra.mxu0 %v13074_v44  ;;  %10638 = vmatpush3.bf16.msra.mxu1 %v13078_v45 }
0x10cf   :  { %10618 = vmatprep.subr.bf16.mxu0 %v13080_v46  ;;  %10639 = vmatprep.subr.bf16.mxu1 %v12613_v3 }
0x10d2   :  { %10620 = vmatpush1.bf16.msra.mxu0 %v13094_v53  ;;  %10641 = vmatpush3.bf16.msra.mxu1 %v13099_v54 }
0x10d3   :  { %10622 = vmatprep.subr.bf16.mxu0 %v13101_v55  ;;  %10642 = vmatprep.subr.bf16.mxu1 %v12613_v3 }
0x10d6   :  { %10624 = vmatpush1.bf16.msra.mxu0 %v13111_v62  ;;  %10644 = vmatpush3.bf16.msra.mxu1 %v13115_v63 }
0x10d7   :  { %10626 = vmatprep.subr.bf16.mxu0 %v13117_v0  ;;  %10645 = vmatprep.subr.bf16.mxu1 %v12613_v3 }
0x10da   :  { %10628 = vmatpush1.bf16.msra.mxu0 %v13127_v11  ;;  %10647 = vmatpush3.bf16.msra.mxu1 %v13131_v12 }
0x10db   :  { %10630 = vmatprep.subr.bf16.mxu0 %v13133_v13  ;;  %10648 = vmatprep.subr.bf16.mxu1 %v12613_v3 }
0x10de   :  { %10632 = vmatpush1.bf16.msra.mxu0 %v13141_v19  ;;  %10650 = vmatpush3.bf16.msra.mxu1 %v13145_v20 }
0x10df   :  { %10652 = vmatprep.subr.bf16.mxu0 %v13046_v25  ;;  %10675 = vmatprep.subr.bf16.mxu1 %v12613_v3 }
0x119c   :  { %v2263_v60 = vpop.f32.mrb[20].mxu0  ;;  %v2334_v58 = vpop.f32.mrb[20].mxu1 }
0x119d   :  { %v2343_v43 = vrot.slane %v2334_v58, 6  ;;  %v2265_v6 = vpop.f32.mrb[21].mxu0  ;;  %v9466_v47 = vpop.f32.mrb[21].mxu1  ;;  %v2341_v31 = vrot.slane %v2263_v60, 6 }
0x119e   :  { %v2342_v59 = vrot.slane %v2265_v6, 6 }
0x119f   :  { %v2349_v5 = vadd.f32 %v2343_v43, %v13209_v51  ;;  %v2347_v27 = vadd.f32 %v2341_v31, %v13203_v30 }
0x11a0   :  { %v2348_v48 = vadd.f32 %v2342_v59, %v13211_v52 }
0x11a1   :  { %11808 = vtanh.f32 %v2349_v5  ;;  %v8586_v26 = vmul.f32 -1.442695, %v2347_v27 }
0x11a2   :  { %v8587_v38 = vmul.f32 -1.442695, %v2348_v48  ;;  %11810 = vtanh.f32 %v2348_v48 }
0x11a4   :  { %11812 = vpow2.f32 %v8587_v38 }
0x11ab   :  { %v11809_v61 = vpop.eup %11808 }
0x11ac   :  { %v11811_v50 = vpop.eup %11810  ;;  %2382 = vrot.lane.b32.xlu0 %v11809_v61, %s12616_s14 }
0x11ad   :  { %2380 = vrot.lane.b32.xlu1 %v11811_v50, %s12616_s14  ;;  %v8588_v50 = vmul.f32 -1.442695, %v2349_v5 }
0x11ae   :  { %v11813_v25 = vpop.eup %11812 }
0x11af   :  { %v2359_v8 = vadd.f32 1.0, %v11813_v25 }
0x11b1   :  { %11814 = vrcp.f32 %v2359_v8 }
0x11b2   :  { %11816 = vpow2.f32 %v8586_v26 }
0x11bb   :  { %v11815_v16 = vpop.eup %11814 }
0x11bc   :  { %v2377_v18 = vmul.f32 %v11815_v16, %v2373_v7  ;;  %v11817_v42 = vpop.eup %11816 }
0x11bd   :  { %v2353_v35 = vadd.f32 1.0, %v11817_v42 }
0x11bf   :  { %11818 = vrcp.f32 %v2353_v35 }
0x11c9   :  { %v11819_v58 = vpop.eup %11818 }
0x11ca   :  { %v2376_v47 = vmul.f32 %v11819_v58, %v2372_v23 }
0x121e   :  { %v2383_v4 = vpop.permute.xlu0 %2382 }
0x121f   :  { %v2381_v21 = vpop.permute.xlu1 %2380 }
0x1220   :  { %v2384_v43 = vsel %vm1290_vm9, %v2381_v21, %v2383_v4 }
0x1221   :  { %v2386_v6 = vmul.f32 %v11819_v58, %v2384_v43 }
0x1223   :  { %2388 = vrot.lane.b32.xlu1 %v2386_v6, %s12617_s18 }
0x1295   :  { %v2389_v59 = vpop.permute.xlu1 %2388 }
0x1296   :  { %v13486_v60 = vadd.f32 %v2389_v59, %v2376_v47  ;;  %v13488_v48 = vadd.f32 %v2389_v59, %v2377_v18 }
0x1298   :  { %11820 = vtanh.f32 %v13486_v60  ;;  %v2585_v6 = vrot.slane %v13486_v60, 6 }
0x1299   :  { %11822 = vtanh.f32 %v13488_v48 }
0x129a   :  { %11824 = vpow2.f32 %v8588_v50 }
0x12a2   :  { %v11821_v38 = vpop.eup %11820 }
0x12a3   :  { %v11823_v61 = vpop.eup %11822  ;;  %2397 = vrot.lane.b32.xlu0 %v11821_v38, %s12616_s14 }
0x12a4   :  { %2399 = vrot.lane.b32.xlu1 %v11823_v61, %s12616_s14  ;;  %v11825_v25 = vpop.eup %11824 }
0x12a5   :  { %v2367_v57 = vadd.f32 1.0, %v11825_v25 }
0x12a7   :  { %11826 = vrcp.f32 %v2367_v57 }
0x12b1   :  { %v11827_v16 = vpop.eup %11826 }
0x1315   :  { %v2398_v8 = vpop.permute.xlu0 %2397 }
0x1316   :  { %v2400_v7 = vpop.permute.xlu1 %2399 }
0x1317   :  { %v2401_v18 = vsel %vm1290_vm9, %v2398_v8, %v2400_v7 }
0x1318   :  { %v2403_v31 = vmul.f32 %v11827_v16, %v2401_v18 }
0x131a   :  { %v2405_v27 = vrot.slane %v2403_v31, 2 }
0x131c   :  { %2406 = vrot.lane.b32.xlu0 %v2405_v27, %s12617_s18 }
0x138e   :  { %v13496_v26 = vpop.permute.xlu0 %2406 }
0x138f   :  { %8589 = vmatmul.mubr.msk.f32.vlgmr.msra.gmra.mrb[22].mxu0 %vm1114_vm10, %v13496_v26  ;;  %9492 = vmatmul.mubr.msk.f32.vlgmr.msra.gmra.mrb[22].mxu1 %vm1114_vm10, %v13496_v26 }
0x1390   :  { %10654 = vmatpush1.bf16.msra.mxu0 %v13057_v33  ;;  %10677 = vmatpush3.bf16.msra.mxu1 %v13060_v34 }
0x1391   :  { %10656 = vmatprep.subr.bf16.mxu0 %v13066_v40  ;;  %10678 = vmatprep.subr.bf16.mxu1 %v12613_v3 }
0x1392   :  { %2687 = vmatprep.mubr.f32.mxu0 %v12615_v10  ;;  %9518 = vmatprep.mubr.msk.f32.mxu1 %vm12614_vm0, %v12615_v10 }
0x1394   :  { %10658 = vmatpush1.bf16.msra.mxu0 %v13074_v44  ;;  %10680 = vmatpush3.bf16.msra.mxu1 %v13078_v45 }
0x1395   :  { %10660 = vmatprep.subr.bf16.mxu0 %v13080_v46  ;;  %10681 = vmatprep.subr.bf16.mxu1 %v12613_v3 }
0x1398   :  { %10662 = vmatpush1.bf16.msra.mxu0 %v13094_v53  ;;  %10683 = vmatpush3.bf16.msra.mxu1 %v13099_v54 }
0x1399   :  { %10664 = vmatprep.subr.bf16.mxu0 %v13101_v55  ;;  %10684 = vmatprep.subr.bf16.mxu1 %v12613_v3 }
0x139c   :  { %10666 = vmatpush1.bf16.msra.mxu0 %v13111_v62  ;;  %10686 = vmatpush3.bf16.msra.mxu1 %v13115_v63 }
0x139d   :  { %10668 = vmatprep.subr.bf16.mxu0 %v13117_v0  ;;  %10687 = vmatprep.subr.bf16.mxu1 %v12613_v3 }
0x13a0   :  { %10670 = vmatpush1.bf16.msra.mxu0 %v13127_v11  ;;  %10689 = vmatpush3.bf16.msra.mxu1 %v13131_v12  ;;  %v2586_v12 = vrot.slane %v13488_v48, 6 }
0x13a1   :  { %10672 = vmatprep.subr.bf16.mxu0 %v13133_v13  ;;  %10690 = vmatprep.subr.bf16.mxu1 %v12613_v3 }
0x13a4   :  { %10674 = vmatpush1.bf16.msra.mxu0 %v13141_v19  ;;  %10692 = vmatpush3.bf16.msra.mxu1 %v13145_v20 }
0x1462   :  { %v2476_v33 = vpop.f32.mrb[22].mxu0  ;;  %v2547_v34 = vpop.f32.mrb[22].mxu1 }
0x1463   :  { %v2556_v40 = vrot.slane %v2547_v34, 4  ;;  %v2478_v44 = vpop.f32.mrb[23].mxu0  ;;  %v9493_v45 = vpop.f32.mrb[23].mxu1  ;;  %v2554_v20 = vrot.slane %v2476_v33, 4 }
0x1464   :  { %v2555_v46 = vrot.slane %v2478_v44, 4 }
0x1465   :  { %v2562_v53 = vadd.f32 %v2556_v40, %v13199_v28  ;;  %v2560_v28 = vadd.f32 %v2554_v20, %v13197_v41 }
0x1466   :  { %v2561_v54 = vadd.f32 %v2555_v46, %v13201_v49 }
0x1467   :  { %11828 = vtanh.f32 %v2562_v53  ;;  %v8591_v49 = vmul.f32 -1.442695, %v2560_v28  ;;  %v8593_v61 = vmul.f32 -1.442695, %v2562_v53 }
0x1468   :  { %v8592_v55 = vmul.f32 -1.442695, %v2561_v54  ;;  %11830 = vtanh.f32 %v2561_v54 }
0x146a   :  { %11832 = vpow2.f32 %v8592_v55 }
0x1471   :  { %v11829_v62 = vpop.eup %11828 }
0x1472   :  { %v11831_v63 = vpop.eup %11830  ;;  %2595 = vrot.lane.b32.xlu0 %v11829_v62, %s12616_s14 }
0x1473   :  { %2593 = vrot.lane.b32.xlu1 %v11831_v63, %s12616_s14 }
0x1474   :  { %v11833_v0 = vpop.eup %11832 }
0x1475   :  { %v2572_v11 = vadd.f32 1.0, %v11833_v0 }
0x1477   :  { %11834 = vrcp.f32 %v2572_v11 }
0x1478   :  { %11836 = vpow2.f32 %v8591_v49 }
0x1481   :  { %v11835_v13 = vpop.eup %11834 }
0x1482   :  { %v2590_v19 = vmul.f32 %v11835_v13, %v2586_v12  ;;  %v11837_v5 = vpop.eup %11836 }
0x1483   :  { %v2566_v42 = vadd.f32 1.0, %v11837_v5 }
0x1485   :  { %11838 = vrcp.f32 %v2566_v42 }
0x148f   :  { %v11839_v21 = vpop.eup %11838 }
0x1490   :  { %v2589_v23 = vmul.f32 %v11839_v21, %v2585_v6 }
0x14e4   :  { %v2596_v35 = vpop.permute.xlu0 %2595 }
0x14e5   :  { %v2594_v4 = vpop.permute.xlu1 %2593 }
0x14e6   :  { %v2597_v58 = vsel %vm1290_vm9, %v2594_v4, %v2596_v35 }
0x14e7   :  { %v2599_v43 = vmul.f32 %v11839_v21, %v2597_v58 }
0x14e9   :  { %2601 = vrot.lane.b32.xlu1 %v2599_v43, %s12617_s18 }
0x155b   :  { %v2602_v47 = vpop.permute.xlu1 %2601 }
0x155c   :  { %v2604_v59 = vadd.f32 %v2602_v47, %v2589_v23  ;;  %v2605_v48 = vadd.f32 %v2602_v47, %v2590_v19  ;;  %v663_v23 = vld [vmem:[%s15119_s8 + $0x8] sm:$0xff]  ;;  %v666_v47 = vld [vmem:[%s15119_s8 + $0x20] sm:$0xff] }
0x155e   :  { %11840 = vtanh.f32 %v2604_v59  ;;  %v2799_v11 = vrot.slane %v2605_v48, 6 }
0x155f   :  { %11842 = vtanh.f32 %v2605_v48  ;;  %v662_v48 = vld [vmem:[%s15119_s8] sm:$0xff] }
0x1560   :  { %11844 = vpow2.f32 %v8593_v61  ;;  %v664_v61 = vld [vmem:[%s15119_s8 + $0x10] sm:$0xff] }
0x1568   :  { %v11841_v41 = vpop.eup %11840 }
0x1569   :  { %v11843_v38 = vpop.eup %11842  ;;  %2610 = vrot.lane.b32.xlu0 %v11841_v41, %s12616_s14  ;;  %v10693_v41 = vpack.c.bf16 %v666_v47, %v663_v23  ;;  %v693_v47 = vld [vmem:[%s15119_s8 + $0xf8] sm:$0xff] }
0x156a   :  { %2612 = vrot.lane.b32.xlu1 %v11843_v38, %s12616_s14  ;;  %v11845_v50 = vpop.eup %11844  ;;  %v665_v38 = vld [vmem:[%s15119_s8 + $0x18] sm:$0xff] }
0x156b   :  { %v2580_v25 = vadd.f32 1.0, %v11845_v50  ;;  %v10695_v50 = vpack.c.bf16 %v665_v38, %v662_v48  ;;  %10694 = vmatprep.subr.bf16.mxu0 %v10693_v41  ;;  %v696_v48 = vld [vmem:[%s15119_s8 + $0x110] sm:$0xff] }
0x156c   :  { %v10713_v38 = vpack.c.bf16 %v696_v48, %v693_v47 }
0x156d   :  { %11846 = vrcp.f32 %v2580_v25 }
0x1577   :  { %v11847_v60 = vpop.eup %11846 }
0x15db   :  { %v2611_v57 = vpop.permute.xlu0 %2610 }
0x15dc   :  { %v2613_v8 = vpop.permute.xlu1 %2612 }
0x15dd   :  { %v2614_v7 = vsel %vm1290_vm9, %v2611_v57, %v2613_v8  ;;  %v669_v57 = vld [vmem:[%s15119_s8 + $0x38] sm:$0xff]  ;;  %v672_v8 = vld [vmem:[%s15119_s8 + $0x50] sm:$0xff] }
0x15de   :  { %v2616_v16 = vmul.f32 %v11847_v60, %v2614_v7  ;;  %v668_v60 = vld [vmem:[%s15119_s8 + $0x30] sm:$0xff]  ;;  %v10697_v7 = vpack.c.bf16 %v672_v8, %v669_v57  ;;  %v695_v57 = vld [vmem:[%s15119_s8 + $0x108] sm:$0xff]  ;;  %v694_v8 = vld [vmem:[%s15119_s8 + $0x100] sm:$0xff] }
0x15e0   :  { %v2618_v18 = vrot.slane %v2616_v16, 4  ;;  %v671_v16 = vld [vmem:[%s15119_s8 + $0x48] sm:$0xff] }
0x15e2   :  { %2619 = vrot.lane.b32.xlu0 %v2618_v18, %s12617_s18  ;;  %v670_v18 = vld [vmem:[%s15119_s8 + $0x40] sm:$0xff] }
0x1654   :  { %v13540_v31 = vpop.permute.xlu0 %2619 }
0x1655   :  { %8594 = vmatmul.mubr.msk.f32.vlgmr.msra.gmra.mrb[24].mxu0 %vm1114_vm10, %v13540_v31  ;;  %9519 = vmatmul.mubr.msk.f32.vlgmr.msra.gmra.mrb[24].mxu1 %vm1114_vm10, %v13540_v31 }
0x1656   :  { %2946 = vmatprep.mubr.f32.mxu0 %v12615_v10  ;;  %10696 = vmatpush1.bf16.msra.mxu0 %v10695_v50 }
0x1657   :  { %10698 = vmatprep.subr.bf16.mxu0 %v10697_v7  ;;  %v697_v7 = vld [vmem:[%s15119_s8 + $0x118] sm:$0xff] }
0x1728   :  { %v2689_v27 = vpop.f32.mrb[24].mxu0  ;;  %v2760_v33 = vpop.f32.mrb[24].mxu1 }
0x1729   :  { %v2769_v34 = vrot.slane %v2760_v33, 2  ;;  %v2691_v40 = vpop.f32.mrb[25].mxu0  ;;  %v9520_v44 = vpop.f32.mrb[25].mxu1  ;;  %v2767_v13 = vrot.slane %v2689_v27, 2  ;;  %v673_v27 = vld [vmem:[%s15119_s8 + $0x58] sm:$0xff]  ;;  %v10699_v33 = vpack.c.bf16 %v671_v16, %v668_v60  ;;  %v10737_v16 = vpack.c.bf16 %v697_v7, %v694_v8 }
0x172a   :  { %v2768_v45 = vrot.slane %v2691_v40, 2  ;;  %v675_v40 = vld [vmem:[%s15119_s8 + $0x68] sm:$0xff]  ;;  %v678_v44 = vld [vmem:[%s15119_s8 + $0x80] sm:$0xff]  ;;  %v713_v7 = vld [vmem:[%s15120_s23 + $0x78] sm:$0xff] }
0x172b   :  { %v13548_v46 = vadd.f32 %v2769_v34, %v13209_v51  ;;  %v10721_v34 = vpack.c.bf16 %v673_v27, %v670_v18  ;;  %10700 = vmatpush1.bf16.msra.mxu0 %v10699_v33  ;;  %v699_v18 = vld [vmem:[%s15120_s23 + $0x8] sm:$0xff]  ;;  %v702_v27 = vld [vmem:[%s15120_s23 + $0x20] sm:$0xff] }
0x172c   :  { %v2774_v53 = vadd.f32 %v2768_v45, %v13211_v52  ;;  %v2773_v52 = vadd.f32 %v2767_v13, %v13203_v30  ;;  %v2798_v30 = vrot.slane %v2604_v59, 6  ;;  %v667_v59 = vld [vmem:[%s15119_s8 + $0x28] sm:$0xff]  ;;  %v674_v45 = vld [vmem:[%s15119_s8 + $0x60] sm:$0xff]  ;;  %v10741_v33 = vpack.c.bf16 %v702_v27, %v699_v18  ;;  %v717_v18 = vld [vmem:[%s15120_s23 + $0x98] sm:$0xff] }
0x172d   :  { %11848 = vtanh.f32 %v13548_v46  ;;  %v10717_v25 = vpack.c.bf16 %v667_v59, %v664_v61  ;;  %v682_v13 = vld [vmem:[%s15119_s8 + $0xa0] sm:$0xff]  ;;  %v8598_v61 = vmul.f32 -1.442695, %v13548_v46  ;;  %v703_v46 = vld [vmem:[%s15120_s23 + $0x28] sm:$0xff]  ;;  %v720_v27 = vld [vmem:[%s15120_s23 + $0xb0] sm:$0xff] }
0x172e   :  { %v8597_v54 = vmul.f32 -1.442695, %v2774_v53  ;;  %11850 = vtanh.f32 %v2774_v53  ;;  %v8596_v19 = vmul.f32 -1.442695, %v2773_v52  ;;  %v10701_v53 = vpack.c.bf16 %v678_v44, %v675_v40  ;;  %v685_v52 = vld [vmem:[%s15119_s8 + $0xb8] sm:$0xff] }
0x172f   :  { %10718 = vmatprep.subr.bf16.mxu1 %v10717_v25 }
0x1730   :  { %11852 = vpow2.f32 %v8597_v54  ;;  %10720 = vmatpush3.bf16.msra.mxu1 %v10717_v25  ;;  %v677_v54 = vld [vmem:[%s15119_s8 + $0x78] sm:$0xff]  ;;  %10702 = vmatprep.subr.bf16.mxu0 %v10701_v53  ;;  %v692_v25 = vld [vmem:[%s15119_s8 + $0xf0] sm:$0xff] }
0x1731   :  { %10722 = vmatprep.subr.bf16.mxu1 %v10721_v34  ;;  %v10715_v60 = vpack.c.bf16 %v695_v57, %v692_v25  ;;  %v715_v25 = vld [vmem:[%s15120_s23 + $0x88] sm:$0xff] }
0x1734   :  { %10724 = vmatpush3.bf16.msra.mxu1 %v10721_v34  ;;  %v700_v34 = vld [vmem:[%s15120_s23 + $0x10] sm:$0xff] }
0x1735   :  { %v10765_v40 = vpack.c.bf16 %v703_v46, %v700_v34  ;;  %v721_v34 = vld [vmem:[%s15120_s23 + $0xb8] sm:$0xff] }
0x1737   :  { %v11849_v55 = vpop.eup %11848 }
0x1738   :  { %v11851_v62 = vpop.eup %11850  ;;  %2808 = vrot.lane.b32.xlu0 %v11849_v55, %s12616_s14  ;;  %v676_v55 = vld [vmem:[%s15119_s8 + $0x70] sm:$0xff] }
0x1739   :  { %2806 = vrot.lane.b32.xlu1 %v11851_v62, %s12616_s14  ;;  %v679_v62 = vld [vmem:[%s15119_s8 + $0x88] sm:$0xff] }
0x173a   :  { %v11853_v63 = vpop.eup %11852 }
0x173b   :  { %v2785_v0 = vadd.f32 1.0, %v11853_v63 }
0x173d   :  { %11854 = vrcp.f32 %v2785_v0  ;;  %v10725_v0 = vpack.c.bf16 %v679_v62, %v676_v55 }
0x173e   :  { %11856 = vpow2.f32 %v8596_v19  ;;  %v10703_v19 = vpack.c.bf16 %v677_v54, %v674_v45 }
0x173f   :  { %10726 = vmatprep.subr.bf16.mxu1 %v10725_v0 }
0x1740   :  { %10704 = vmatpush1.bf16.msra.mxu0 %v10703_v19  ;;  %10728 = vmatpush3.bf16.msra.mxu1 %v10725_v0  ;;  %v2848_v0 = vsel %vm771_vm11, %v13540_v31, %v13288_v17  ;;  %v698_v19 = vld [vmem:[%s15120_s23] sm:$0xff] }
0x1747   :  { %v11855_v12 = vpop.eup %11854 }
0x1748   :  { %v2803_v51 = vmul.f32 %v11855_v12, %v2799_v11  ;;  %v11857_v20 = vpop.eup %11856  ;;  %v681_v11 = vld [vmem:[%s15119_s8 + $0x98] sm:$0xff]  ;;  %v684_v12 = vld [vmem:[%s15119_s8 + $0xb0] sm:$0xff] }
0x1749   :  { %v2779_v28 = vadd.f32 1.0, %v11857_v20  ;;  %v10705_v20 = vpack.c.bf16 %v684_v12, %v681_v11  ;;  %v2845_v11 = vsel %vm771_vm11, %v13392_v56, %v13444_v39  ;;  %v2839_v12 = vsel %vm771_vm11, %v13288_v17, %v13540_v31 }
0x174a   :  { %v2851_v17 = vrot.slane %v2839_v12, 6  ;;  %v722_v12 = vld [vmem:[%s15120_s23 + $0xc0] sm:$0xff] }
0x174b   :  { %11858 = vrcp.f32 %v2779_v28  ;;  %v680_v28 = vld [vmem:[%s15119_s8 + $0x90] sm:$0xff]  ;;  %10706 = vmatprep.subr.bf16.mxu0 %v10705_v20  ;;  %v701_v20 = vld [vmem:[%s15120_s23 + $0x18] sm:$0xff] }
0x1755   :  { %v11859_v42 = vpop.eup %11858 }
0x1756   :  { %v2802_v21 = vmul.f32 %v11859_v42, %v2798_v30  ;;  %v691_v30 = vld [vmem:[%s15119_s8 + $0xe8] sm:$0xff] }
0x17aa   :  { %v2809_v49 = vpop.permute.xlu0 %2808 }
0x17ab   :  { %v2807_v5 = vpop.permute.xlu1 %2806 }
0x17ac   :  { %v2810_v35 = vsel %vm1290_vm9, %v2807_v5, %v2809_v49  ;;  %v683_v49 = vld [vmem:[%s15119_s8 + $0xa8] sm:$0xff]  ;;  %v10729_v5 = vpack.c.bf16 %v685_v52, %v682_v13  ;;  %v2863_v52 = vrot.slane %v2848_v0, 4 }
0x17ad   :  { %v2812_v4 = vmul.f32 %v11859_v42, %v2810_v35  ;;  %v687_v42 = vld [vmem:[%s15119_s8 + $0xc8] sm:$0xff]  ;;  %v690_v35 = vld [vmem:[%s15119_s8 + $0xe0] sm:$0xff] }
0x17ae   :  { %10730 = vmatprep.subr.bf16.mxu1 %v10729_v5 }
0x17af   :  { %2814 = vrot.lane.b32.xlu1 %v2812_v4, %s12617_s18  ;;  %v688_v4 = vld [vmem:[%s15119_s8 + $0xd0] sm:$0xff]  ;;  %10732 = vmatpush3.bf16.msra.mxu1 %v10729_v5 }
0x17b0   :  { %v10733_v23 = vpack.c.bf16 %v691_v30, %v688_v4  ;;  %v10743_v4 = vpack.c.bf16 %v701_v20, %v698_v19  ;;  %v732_v19 = vld [vmem:[%s15120_s23 + $0x110] sm:$0xff]  ;;  %v730_v20 = vld [vmem:[%s15120_s23 + $0x100] sm:$0xff] }
0x17b2   :  { %10734 = vmatprep.subr.bf16.mxu1 %v10733_v23 }
0x17b3   :  { %10736 = vmatpush3.bf16.msra.mxu1 %v10733_v23  ;;  %v707_v23 = vld [vmem:[%s15120_s23 + $0x48] sm:$0xff] }
0x17b4   :  { %10738 = vmatprep.subr.bf16.mxu1 %v10737_v16 }
0x17b7   :  { %10740 = vmatpush3.bf16.msra.mxu1 %v10737_v16 }
0x17b8   :  { %10766 = vmatprep.subr.bf16.mxu1 %v10765_v40 }
0x1821   :  { %v2815_v58 = vpop.permute.xlu1 %2814 }
0x1822   :  { %v2817_v43 = vadd.f32 %v2815_v58, %v2802_v21  ;;  %v2818_v6 = vadd.f32 %v2815_v58, %v2803_v51  ;;  %v10707_v21 = vpack.c.bf16 %v683_v49, %v680_v28  ;;  %v10709_v58 = vpack.c.bf16 %v690_v35, %v687_v42  ;;  %v705_v42 = vld [vmem:[%s15120_s23 + $0x38] sm:$0xff]  ;;  %v708_v35 = vld [vmem:[%s15120_s23 + $0x50] sm:$0xff] }
0x1823   :  { %v2846_v28 = vsel %vm771_vm11, %v13444_v39, %v13392_v56  ;;  %v2857_v49 = vrot.slane %v2845_v11, 2 }
0x1824   :  { %11860 = vtanh.f32 %v2817_v43  ;;  %v686_v43 = vld [vmem:[%s15119_s8 + $0xc0] sm:$0xff]  ;;  %10708 = vmatpush1.bf16.msra.mxu0 %v10707_v21 }
0x1825   :  { %11862 = vtanh.f32 %v2818_v6  ;;  %v689_v6 = vld [vmem:[%s15119_s8 + $0xd8] sm:$0xff]  ;;  %10710 = vmatprep.subr.bf16.mxu0 %v10709_v58  ;;  %v706_v21 = vld [vmem:[%s15120_s23 + $0x40] sm:$0xff] }
0x1826   :  { %v10711_v41 = vpack.c.bf16 %v689_v6, %v686_v43  ;;  %11864 = vpow2.f32 %v8598_v61  ;;  %v709_v58 = vld [vmem:[%s15120_s23 + $0x58] sm:$0xff]  ;;  %v714_v61 = vld [vmem:[%s15120_s23 + $0x80] sm:$0xff] }
0x1828   :  { %10712 = vmatpush1.bf16.msra.mxu0 %v10711_v41  ;;  %v10745_v41 = vpack.c.bf16 %v708_v35, %v705_v42  ;;  %v738_v42 = vld [vmem:[%s15121_s6 + $0x20] sm:$0xff] }
0x1829   :  { %10714 = vmatprep.subr.bf16.mxu0 %v10713_v38  ;;  %v711_v38 = vld [vmem:[%s15120_s23 + $0x68] sm:$0xff] }
0x182a   :  { %v10749_v8 = vpack.c.bf16 %v714_v61, %v711_v38  ;;  %v742_v38 = vld [vmem:[%s15121_s6 + $0x40] sm:$0xff] }
0x182c   :  { %10716 = vmatpush1.bf16.msra.mxu0 %v10715_v60  ;;  %v710_v60 = vld [vmem:[%s15120_s23 + $0x60] sm:$0xff] }
0x182d   :  { %10742 = vmatprep.subr.bf16.mxu0 %v10741_v33  ;;  %v718_v33 = vld [vmem:[%s15120_s23 + $0xa0] sm:$0xff]  ;;  %v10751_v46 = vpack.c.bf16 %v713_v7, %v710_v60 }
0x182e   :  { %v11861_v63 = vpop.eup %11860  ;;  %v746_v7 = vld [vmem:[%s15121_s6 + $0x60] sm:$0xff] }
0x182f   :  { %v11863_v51 = vpop.eup %11862  ;;  %2823 = vrot.lane.b32.xlu0 %v11861_v63, %s12616_s14  ;;  %v2847_v63 = vsel %vm771_vm11, %v13496_v26, %v13340_v9 }
0x1830   :  { %2825 = vrot.lane.b32.xlu1 %v11863_v51, %s12616_s14  ;;  %v11865_v59 = vpop.eup %11864  ;;  %v2842_v51 = vsel %vm771_vm11, %v13340_v9, %v13496_v26  ;;  %v2860_v13 = vrot.slane %v2847_v63, 6  ;;  %v727_v63 = vld [vmem:[%s15120_s23 + $0xe8] sm:$0xff] }
0x1831   :  { %v2793_v50 = vadd.f32 1.0, %v11865_v59  ;;  %v2854_v5 = vrot.slane %v2842_v51, 4  ;;  %v10769_v59 = vpack.c.bf16 %v709_v58, %v706_v21  ;;  %v725_v51 = vld [vmem:[%s15120_s23 + $0xd8] sm:$0xff]  ;;  %v739_v21 = vld [vmem:[%s15121_s6 + $0x28] sm:$0xff] }
0x1832   :  { %v2873_v30 = vsel %vm2868_vm12, %v2846_v28, %v2860_v13  ;;  %v733_v28 = vld [vmem:[%s15120_s23 + $0x118] sm:$0xff] }
0x1833   :  { %11866 = vrcp.f32 %v2793_v50  ;;  %v2874_v6 = vsel %vm412_vm1, %v2873_v30, %v2863_v52  ;;  %v712_v50 = vld [vmem:[%s15120_s23 + $0x70] sm:$0xff]  ;;  %v729_v52 = vld [vmem:[%s15120_s23 + $0xf8] sm:$0xff] }
0x1834   :  { %v10773_v16 = vpack.c.bf16 %v715_v25, %v712_v50  ;;  %v736_v30 = vld [vmem:[%s15121_s6 + $0x10] sm:$0xff]  ;;  %v741_v58 = vld [vmem:[%s15121_s6 + $0x38] sm:$0xff]  ;;  %v747_v50 = vld [vmem:[%s15121_s6 + $0x68] sm:$0xff] }
0x1835   :  { %v750_v25 = vld [vmem:[%s15121_s6 + $0x80] sm:$0xff] }
0x1836   :  { %v13722_v60 = vpack.c.bf16 %v750_v25, %v747_v50 }
0x183d   :  { %v11867_v53 = vpop.eup %11866 }
0x18a1   :  { %v2824_v44 = vpop.permute.xlu0 %2823 }
0x18a2   :  { %v2826_v45 = vpop.permute.xlu1 %2825 }
0x18a3   :  { %v2827_v54 = vsel %vm1290_vm9, %v2824_v44, %v2826_v45  ;;  %v716_v44 = vld [vmem:[%s15120_s23 + $0x90] sm:$0xff]  ;;  %v719_v45 = vld [vmem:[%s15120_s23 + $0xa8] sm:$0xff] }
0x18a4   :  { %v2829_v55 = vmul.f32 %v11867_v53, %v2827_v54  ;;  %v10777_v53 = vpack.c.bf16 %v721_v34, %v718_v33  ;;  %v723_v54 = vld [vmem:[%s15120_s23 + $0xc8] sm:$0xff]  ;;  %v10755_v0 = vpack.c.bf16 %v719_v45, %v716_v44  ;;  %v756_v33 = vld [vmem:[%s15121_s6 + $0xb0] sm:$0xff]  ;;  %v754_v45 = vld [vmem:[%s15121_s6 + $0xa0] sm:$0xff] }
0x18a5   :  { %v755_v44 = vld [vmem:[%s15121_s6 + $0xa8] sm:$0xff] }
0x18a6   :  { %v2832_v62 = vrot.slane %v2829_v55, 6  ;;  %v726_v55 = vld [vmem:[%s15120_s23 + $0xe0] sm:$0xff] }
0x18a7   :  { %v10757_v11 = vpack.c.bf16 %v726_v55, %v723_v54  ;;  %v759_v54 = vld [vmem:[%s15121_s6 + $0xc8] sm:$0xff]  ;;  %v762_v55 = vld [vmem:[%s15121_s6 + $0xe0] sm:$0xff] }
0x18a8   :  { %2833 = vrot.lane.b32.xlu0 %v2832_v62, %s12617_s18  ;;  %v724_v62 = vld [vmem:[%s15120_s23 + $0xd0] sm:$0xff] }
0x18a9   :  { %v10781_v13 = vpack.c.bf16 %v727_v63, %v724_v62 }
0x191a   :  { %v2834_v31 = vpop.permute.xlu0 %2833 }
0x191b   :  { %v2836_v9 = vsel %vm771_vm11, %v13236_v15, %v2834_v31  ;;  %v2849_v26 = vsel %vm771_vm11, %v2834_v31, %v13236_v15  ;;  %v704_v15 = vld [vmem:[%s15120_s23 + $0x30] sm:$0xff] }
0x191c   :  { %v2866_v56 = vrot.slane %v2849_v26, 2  ;;  %v2869_v39 = vsel %vm2868_vm12, %v2836_v9, %v2851_v17  ;;  %v10747_v57 = vpack.c.bf16 %v707_v23, %v704_v15  ;;  %v10761_v17 = vpack.c.bf16 %v732_v19, %v729_v52  ;;  %v728_v31 = vld [vmem:[%s15120_s23 + $0xf0] sm:$0xff]  ;;  %v735_v26 = vld [vmem:[%s15121_s6 + $0x8] sm:$0xff]  ;;  %v765_v52 = vld [vmem:[%s15121_s6 + $0xf8] sm:$0xff] }
0x191d   :  { %v2870_v43 = vsel %vm412_vm1, %v2869_v39, %v2854_v5  ;;  %v731_v5 = vld [vmem:[%s15120_s23 + $0x108] sm:$0xff]  ;;  %v10785_v9 = vpack.c.bf16 %v733_v28, %v730_v20  ;;  %v734_v39 = vld [vmem:[%s15121_s6] sm:$0xff]  ;;  %v13700_v15 = vpack.c.bf16 %v739_v21, %v736_v30  ;;  %v740_v23 = vld [vmem:[%s15121_s6 + $0x30] sm:$0xff] }
0x191e   :  { %v13646_v47 = vsel %vm2871_vm13, %v2870_v43, %v2857_v49  ;;  %v13649_v48 = vsel %vm2871_vm13, %v2874_v6, %v2866_v56  ;;  %v10759_v49 = vpack.c.bf16 %v725_v51, %v722_v12  ;;  %v10763_v35 = vpack.c.bf16 %v731_v5, %v728_v31  ;;  %v744_v43 = vld [vmem:[%s15121_s6 + $0x50] sm:$0xff]  ;;  %v761_v12 = vld [vmem:[%s15121_s6 + $0xd8] sm:$0xff]  ;;  %v767_v31 = vld [vmem:[%s15121_s6 + $0x108] sm:$0xff] }
0x191f   :  { %8599 = vmatmul.mubr.msk.f32.vlgmr.msra.gmra.mrb[26].mxu0 %vm1114_vm10, %v13646_v47  ;;  %9545 = vmatprep.mubr.msk.f32.mxu1 %vm1114_vm10, %v13646_v47  ;;  %v13689_v56 = vpack.c.bf16 %v738_v42, %v735_v26  ;;  %v13706_v61 = vpack.c.bf16 %v744_v43, %v741_v58  ;;  %v760_v51 = vld [vmem:[%s15121_s6 + $0xd0] sm:$0xff]  ;;  %v766_v5 = vld [vmem:[%s15121_s6 + $0x100] sm:$0xff] }
0x1920   :  { %10744 = vmatpush1.bf16.msra.mxu0 %v10743_v4  ;;  %9546 = vmatmul.mubr.msk.f32.vlgmr.msra.gmra.mrb[26].mxu1 %vm1114_vm10, %v13649_v48  ;;  %v737_v4 = vld [vmem:[%s15121_s6 + $0x18] sm:$0xff]  ;;  %v768_v19 = vld [vmem:[%s15121_s6 + $0x110] sm:$0xff]  ;;  %v770_v43 = vld [vmem:[#allocation9] sm:$0x7] }
0x1921   :  { %10768 = vmatpush3.bf16.msra.mxu1 %v10765_v40  ;;  %9572 = vmatprep.mubr.msk.f32.mxu1 %vm1114_vm10, %v13646_v47  ;;  %v10753_v40 = vpack.c.bf16 %v720_v27, %v717_v18  ;;  %v13697_v6 = vpack.c.bf16 %v737_v4, %v734_v39  ;;  %v748_v18 = vld [vmem:[%s15121_s6 + $0x70] sm:$0xff]  ;;  %v753_v27 = vld [vmem:[%s15121_s6 + $0x98] sm:$0xff] }
0x1922   :  { %2952 = vmatprep.mubr.f32.mxu0 %v12615_v10  ;;  %10746 = vmatprep.subr.bf16.mxu0 %v10745_v41  ;;  %v743_v41 = vld [vmem:[%s15121_s6 + $0x48] sm:$0xff] }
0x1923   :  { %8600 = vmatmul.mubr.msk.f32.gmra.mrb[28].mxu0 %vm1114_vm10, %v13649_v48  ;;  %10770 = vmatprep.subr.bf16.mxu1 %v10769_v59 }
0x1924   :  { %10748 = vmatpush1.bf16.msra.mxu0 %v10747_v57  ;;  %3098 = vmatprep.mubr.f32.mxu0 %v12615_v10  ;;  %v13716_v57 = vpack.c.bf16 %v743_v41, %v740_v23  ;;  %v3202_v41 = vrot.slane %v770_v43, %v13185_v29 }
0x1925   :  { %10772 = vmatpush3.bf16.msra.mxu1 %v10769_v59  ;;  %10750 = vmatprep.subr.bf16.mxu0 %v10749_v8  ;;  %v745_v59 = vld [vmem:[%s15121_s6 + $0x58] sm:$0xff] }
0x1926   :  { %10774 = vmatprep.subr.bf16.mxu1 %v10773_v16  ;;  %v13720_v8 = vpack.c.bf16 %v745_v59, %v742_v38 }
0x1928   :  { %10752 = vmatpush1.bf16.msra.mxu0 %v10751_v46 }
0x1929   :  { %10776 = vmatpush3.bf16.msra.mxu1 %v10773_v16  ;;  %10754 = vmatprep.subr.bf16.mxu0 %v10753_v40  ;;  %v749_v16 = vld [vmem:[%s15121_s6 + $0x78] sm:$0xff]  ;;  %v13744_v40 = vpack.c.bf16 %v756_v33, %v753_v27 }
0x192a   :  { %10778 = vmatprep.subr.bf16.mxu1 %v10777_v53  ;;  %v13737_v34 = vpack.c.bf16 %v749_v16, %v746_v7  ;;  %v3206_v7 = vrot.slane %v770_v43, %v13188_v32  ;;  %v3210_v16 = vrot.slane %v770_v43, %v1106_v37 }
0x192c   :  { %10756 = vmatpush1.bf16.msra.mxu0 %v10755_v0  ;;  %v13760_v0 = vpack.c.bf16 %v762_v55, %v759_v54 }
0x192d   :  { %10780 = vmatpush3.bf16.msra.mxu1 %v10777_v53  ;;  %10758 = vmatprep.subr.bf16.mxu0 %v10757_v11  ;;  %v757_v53 = vld [vmem:[%s15121_s6 + $0xb8] sm:$0xff]  ;;  %v758_v11 = vld [vmem:[%s15121_s6 + $0xc0] sm:$0xff] }
0x192e   :  { %10782 = vmatprep.subr.bf16.mxu1 %v10781_v13  ;;  %v13758_v63 = vpack.c.bf16 %v757_v53, %v754_v45  ;;  %v13770_v20 = vpack.c.bf16 %v761_v12, %v758_v11 }
0x1930   :  { %10760 = vmatpush1.bf16.msra.mxu0 %v10759_v49  ;;  %v13776_v49 = vpack.c.bf16 %v768_v19, %v765_v52 }
0x1931   :  { %10784 = vmatpush3.bf16.msra.mxu1 %v10781_v13  ;;  %10762 = vmatprep.subr.bf16.mxu0 %v10761_v17  ;;  %v763_v13 = vld [vmem:[%s15121_s6 + $0xe8] sm:$0xff]  ;;  %v764_v17 = vld [vmem:[%s15121_s6 + $0xf0] sm:$0xff] }
0x1932   :  { %10786 = vmatprep.subr.bf16.mxu1 %v10785_v9  ;;  %v13774_v28 = vpack.c.bf16 %v763_v13, %v760_v51  ;;  %v13784_v26 = vpack.c.bf16 %v767_v31, %v764_v17 }
0x1934   :  { %10764 = vmatpush1.bf16.msra.mxu0 %v10763_v35 }
0x1935   :  { %10788 = vmatpush3.bf16.msra.mxu1 %v10785_v9  ;;  %10790 = vmatprep.subr.bf16.mxu0 %v13689_v56  ;;  %v769_v9 = vld [vmem:[%s15121_s6 + $0x118] sm:$0xff] }
0x1936   :  { %10813 = vmatprep.subr.bf16.mxu1 %v12613_v3  ;;  %v13788_v42 = vpack.c.bf16 %v769_v9, %v766_v5 }
0x1937   :  { %8603 = vmatmul.mubr.msk.f32.vlgmr.msra.gmra.mrb[30].mxu0 %vm1114_vm10, %v13646_v47  ;;  %v751_v47 = vld [vmem:[%s15121_s6 + $0x88] sm:$0xff] }
0x1938   :  { %9573 = vmatmul.mubr.msk.f32.vlgmr.msra.gmra.mrb[28].mxu1 %vm1114_vm10, %v13649_v48  ;;  %10792 = vmatpush1.bf16.msra.mxu0 %v13697_v6  ;;  %v13742_v46 = vpack.c.bf16 %v751_v47, %v748_v18 }
0x1939   :  { %10815 = vmatpush3.bf16.msra.mxu1 %v13700_v15  ;;  %3104 = vmatprep.mubr.f32.mxu0 %v12615_v10 }
0x193a   :  { %10794 = vmatprep.subr.bf16.mxu0 %v13706_v61  ;;  %10816 = vmatprep.subr.bf16.mxu1 %v12613_v3 }
0x193b   :  { %8604 = vmatmul.mubr.msk.f32.gmra.mrb[32].mxu0 %vm1114_vm10, %v13649_v48  ;;  %9599 = vmatprep.mubr.msk.f32.mxu1 %vm12614_vm0, %v12615_v10  ;;  %v752_v48 = vld [vmem:[%s15121_s6 + $0x90] sm:$0xff] }
0x193c   :  { %10796 = vmatpush1.bf16.msra.mxu0 %v13716_v57  ;;  %3281 = vmatprep.mubr.f32.mxu0 %v12615_v10  ;;  %v13754_v62 = vpack.c.bf16 %v755_v44, %v752_v48 }
0x193d   :  { %10818 = vmatpush3.bf16.msra.mxu1 %v13720_v8  ;;  %10798 = vmatprep.subr.bf16.mxu0 %v13722_v60 }
0x193e   :  { %10819 = vmatprep.subr.bf16.mxu1 %v12613_v3 }
0x1940   :  { %10800 = vmatpush1.bf16.msra.mxu0 %v13737_v34 }
0x1941   :  { %10821 = vmatpush3.bf16.msra.mxu1 %v13742_v46  ;;  %10802 = vmatprep.subr.bf16.mxu0 %v13744_v40 }
0x1942   :  { %10822 = vmatprep.subr.bf16.mxu1 %v12613_v3 }
0x1944   :  { %10804 = vmatpush1.bf16.msra.mxu0 %v13754_v62 }
0x1945   :  { %10824 = vmatpush3.bf16.msra.mxu1 %v13758_v63  ;;  %10806 = vmatprep.subr.bf16.mxu0 %v13760_v0 }
0x1946   :  { %10825 = vmatprep.subr.bf16.mxu1 %v12613_v3 }
0x1948   :  { %10808 = vmatpush1.bf16.msra.mxu0 %v13770_v20 }
0x1949   :  { %10827 = vmatpush3.bf16.msra.mxu1 %v13774_v28  ;;  %10810 = vmatprep.subr.bf16.mxu0 %v13776_v49 }
0x194a   :  { %10828 = vmatprep.subr.bf16.mxu1 %v12613_v3 }
0x194c   :  { %10812 = vmatpush1.bf16.msra.mxu0 %v13784_v26 }
0x194d   :  { %10830 = vmatpush3.bf16.msra.mxu1 %v13788_v42  ;;  %10832 = vmatprep.subr.bf16.mxu0 %v13689_v56 }
0x194e   :  { %10855 = vmatprep.subr.bf16.mxu1 %v12613_v3 }
0x194f   :  { %3282 = vmatmul.mubr.f32.vlgmr.msra.gmra.mrb[34].mxu0 %v12615_v10 }
0x1950   :  { %9600 = vmatmul.mubr.f32.vlgmr.msra.gmra.mrb[30].mxu1 %v12615_v10  ;;  %10834 = vmatpush1.bf16.msra.mxu0 %v13697_v6 }
0x1951   :  { %10857 = vmatpush3.bf16.msra.mxu1 %v13700_v15  ;;  %10836 = vmatprep.subr.bf16.mxu0 %v13706_v61 }
0x1952   :  { %10858 = vmatprep.subr.bf16.mxu1 %v12613_v3  ;;  %3490 = vmatprep.mubr.f32.mxu0 %v12615_v10 }
0x1953   :  { %9626 = vmatprep.mubr.msk.f32.mxu1 %vm12614_vm0, %v12615_v10 }
0x1954   :  { %10838 = vmatpush1.bf16.msra.mxu0 %v13716_v57 }
0x1955   :  { %10860 = vmatpush3.bf16.msra.mxu1 %v13720_v8  ;;  %10840 = vmatprep.subr.bf16.mxu0 %v13722_v60 }
0x1956   :  { %10861 = vmatprep.subr.bf16.mxu1 %v12613_v3 }
0x1958   :  { %10842 = vmatpush1.bf16.msra.mxu0 %v13737_v34 }
0x1959   :  { %10863 = vmatpush3.bf16.msra.mxu1 %v13742_v46  ;;  %10844 = vmatprep.subr.bf16.mxu0 %v13744_v40 }
0x195a   :  { %10864 = vmatprep.subr.bf16.mxu1 %v12613_v3 }
0x195c   :  { %10846 = vmatpush1.bf16.msra.mxu0 %v13754_v62 }
0x195d   :  { %10866 = vmatpush3.bf16.msra.mxu1 %v13758_v63  ;;  %10848 = vmatprep.subr.bf16.mxu0 %v13760_v0 }
0x195e   :  { %10867 = vmatprep.subr.bf16.mxu1 %v12613_v3 }
0x1960   :  { %10850 = vmatpush1.bf16.msra.mxu0 %v13770_v20 }
0x1961   :  { %10869 = vmatpush3.bf16.msra.mxu1 %v13774_v28  ;;  %10852 = vmatprep.subr.bf16.mxu0 %v13776_v49 }
0x1962   :  { %10870 = vmatprep.subr.bf16.mxu1 %v12613_v3 }
0x1964   :  { %10854 = vmatpush1.bf16.msra.mxu0 %v13784_v26 }
0x1965   :  { %10872 = vmatpush3.bf16.msra.mxu1 %v13788_v42  ;;  %10874 = vmatprep.subr.bf16.mxu0 %v13689_v56 }
0x1966   :  { %10897 = vmatprep.subr.bf16.mxu1 %v12613_v3 }
0x19f2   :  { %v2948_v35 = vpop.f32.mrb[26].mxu0 }
0x19f3   :  { %v2950_v39 = vpop.f32.mrb[27].mxu0  ;;  %v9547_v4 = vpop.f32.mrb[26].mxu1 }
0x19f4   :  { %v3025_v30 = vpop.f32.mrb[27].mxu1 }
0x19f6   :  { %v2954_v21 = vpop.f32.mrb[28].mxu0 }
0x19f7   :  { %v2956_v58 = vpop.f32.mrb[29].mxu0 }
0x1a0a   :  { %v3100_v23 = vpop.f32.mrb[30].mxu0 }
0x1a0b   :  { %v4062_v38 = vrot.slane %v3100_v23, 6  ;;  %v4278_v59 = vrot.slane %v3100_v23, 2  ;;  %v3102_v50 = vpop.f32.mrb[31].mxu0  ;;  %v9574_v25 = vpop.f32.mrb[28].mxu1 }
0x1a0c   :  { %v4063_v18 = vrot.slane %v3102_v50, 6  ;;  %v4279_v47 = vrot.slane %v3102_v50, 2  ;;  %v3191_v27 = vrot.slane %v9574_v25, 6  ;;  %v3411_v33 = vrot.slane %v9574_v25, 2  ;;  %v3177_v48 = vpop.f32.mrb[29].mxu1 }
0x1a0d   :  { %v4068_v44 = vadd.f32 %v4062_v38, %v2954_v21  ;;  %v4284_v45 = vadd.f32 %v4278_v59, %v2954_v21  ;;  %v4064_v53 = vrot.slane %v3177_v48, 6  ;;  %v4280_v54 = vrot.slane %v3177_v48, 2 }
0x1a0e   :  { %v4069_v55 = vadd.f32 %v4063_v18, %v2956_v58  ;;  %v4285_v11 = vadd.f32 %v4279_v47, %v2956_v58  ;;  %v3197_v12 = vadd.f32 %v3191_v27, %v3025_v30  ;;  %v3417_v51 = vadd.f32 %v3411_v33, %v3025_v30  ;;  %v3106_v13 = vpop.f32.mrb[32].mxu0 }
0x1a0f   :  { %v4070_v52 = vadd.f32 %v9547_v4, %v4064_v53  ;;  %v4286_v19 = vadd.f32 %v9547_v4, %v4280_v54  ;;  %v3189_v17 = vrot.slane %v3106_v13, 6  ;;  %v3409_v31 = vrot.slane %v3106_v13, 2  ;;  %v3108_v5 = vpop.f32.mrb[33].mxu0 }
0x1a10   :  { %v3190_v37 = vrot.slane %v3108_v5, 6  ;;  %v3410_v9 = vrot.slane %v3108_v5, 2  ;;  %v13828_v43 = vadd.f32 %v3417_v51, %v3210_v16  ;;  %v13830_v38 = vadd.f32 %v4068_v44, %v3202_v41 }
0x1a11   :  { %v3195_v23 = vadd.f32 %v3189_v17, %v2948_v35  ;;  %v3415_v50 = vadd.f32 %v3409_v31, %v2948_v35  ;;  %v13832_v21 = vadd.f32 %v4070_v52, %v3210_v16  ;;  %v13834_v25 = vadd.f32 %v4069_v55, %v3206_v7 }
0x1a12   :  { %v3196_v59 = vadd.f32 %v3190_v37, %v2950_v39  ;;  %v3416_v58 = vadd.f32 %v3410_v9, %v2950_v39  ;;  %v13836_v30 = vadd.f32 %v4284_v45, %v3202_v41  ;;  %v13842_v47 = vadd.f32 %v4286_v19, %v3210_v16 }
0x1a13   :  { %v13838_v4 = vadd.f32 %v3202_v41, %v3195_v23  ;;  %v13840_v18 = vadd.f32 %v3415_v50, %v3202_v41  ;;  %v13844_v27 = vadd.f32 %v4285_v11, %v3206_v7  ;;  %v13850_v53 = vadd.f32 %v3210_v16, %v3197_v12 }
0x1a14   :  { %v13846_v33 = vadd.f32 %v3416_v58, %v3206_v7  ;;  %v13848_v48 = vadd.f32 %v3206_v7, %v3196_v59 }
0x1a22   :  { %v3283_v35 = vpop.f32.mrb[34].mxu0 }
0x1a23   :  { %v3285_v44 = vpop.f32.mrb[35].mxu0  ;;  %v3354_v39 = vpop.f32.mrb[30].mxu1  ;;  %v3358_v7 = vadd.f32 %v3283_v35, %v13838_v4 }
0x1a24   :  { %v3359_v45 = vadd.f32 %v3285_v44, %v13848_v48  ;;  %v9601_v54 = vpop.f32.mrb[31].mxu1  ;;  %v3360_v55 = vadd.f32 %v3354_v39, %v13850_v53 }
0x1a25   :  { %v8607_v51 = vmul.f32 -1.442695, %v3358_v7 }
0x1a26   :  { %11868 = vtanh.f32 %v3359_v45  ;;  %v8608_v5 = vmul.f32 -1.442695, %v3359_v45  ;;  %v8609_v45 = vmul.f32 -1.442695, %v3360_v55 }
0x1a27   :  { %11870 = vtanh.f32 %v3360_v55 }
0x1a28   :  { %11872 = vpow2.f32 %v8607_v51 }
0x1a30   :  { %v11869_v41 = vpop.eup %11868 }
0x1a31   :  { %3385 = vrot.lane.b32.xlu1 %v11869_v41, %s12616_s14  ;;  %v11871_v11 = vpop.eup %11870 }
0x1a32   :  { %3387 = vrot.lane.b32.xlu0 %v11871_v11, %s12616_s14  ;;  %v11873_v16 = vpop.eup %11872 }
0x1a33   :  { %v3364_v12 = vadd.f32 1.0, %v11873_v16 }
0x1a35   :  { %11874 = vrcp.f32 %v3364_v12 }
0x1a36   :  { %11876 = vpow2.f32 %v8608_v5 }
0x1a3f   :  { %v11875_v19 = vpop.eup %11874 }
0x1a40   :  { %v11877_v37 = vpop.eup %11876  ;;  %v3381_v50 = vmul.f32 0.0, %v11875_v19 }
0x1a41   :  { %v3370_v9 = vadd.f32 1.0, %v11877_v37 }
0x1a43   :  { %11878 = vrcp.f32 %v3370_v9 }
0x1a4d   :  { %v11879_v23 = vpop.eup %11878 }
0x1a4e   :  { %v3382_v59 = vmul.f32 0.0, %v11879_v23 }
0x1aa3   :  { %v3386_v13 = vpop.permute.xlu1 %3385 }
0x1aa4   :  { %v3388_v52 = vpop.permute.xlu0 %3387 }
0x1aa5   :  { %v3389_v17 = vsel %vm1290_vm9, %v3386_v13, %v3388_v52 }
0x1aa6   :  { %v3391_v31 = vmul.f32 %v11875_v19, %v3389_v17 }
0x1aa8   :  { %3393 = vrot.lane.b32.xlu1 %v3391_v31, %s12617_s18 }
0x1b1a   :  { %v3394_v58 = vpop.permute.xlu1 %3393 }
0x1b1b   :  { %v13859_v35 = vadd.f32 %v3394_v58, %v3381_v50  ;;  %v13861_v44 = vadd.f32 %v3394_v58, %v3382_v59 }
0x1b1d   :  { %11880 = vtanh.f32 %v13859_v35 }
0x1b1e   :  { %11882 = vtanh.f32 %v13861_v44 }
0x1b1f   :  { %11884 = vpow2.f32 %v8609_v45  ;;  %v3602_v45 = vrot.slane %v13861_v44, 6  ;;  %v3601_v44 = vrot.slane %v13859_v35, 6 }
0x1b27   :  { %v11881_v39 = vpop.eup %11880 }
0x1b28   :  { %v11883_v54 = vpop.eup %11882  ;;  %3402 = vrot.lane.b32.xlu0 %v11881_v39, %s12616_s14 }
0x1b29   :  { %3404 = vrot.lane.b32.xlu1 %v11883_v54, %s12616_s14  ;;  %v11885_v41 = vpop.eup %11884 }
0x1b2a   :  { %v3378_v11 = vadd.f32 1.0, %v11885_v41 }
0x1b2c   :  { %11886 = vrcp.f32 %v3378_v11 }
0x1b36   :  { %v11887_v16 = vpop.eup %11886 }
0x1b9a   :  { %v3403_v7 = vpop.permute.xlu0 %3402 }
0x1b9b   :  { %v3405_v51 = vpop.permute.xlu1 %3404 }
0x1b9c   :  { %v3406_v12 = vsel %vm1290_vm9, %v3403_v7, %v3405_v51 }
0x1b9d   :  { %v3408_v13 = vmul.f32 %v11887_v16, %v3406_v12 }
0x1b9f   :  { %3422 = vrot.lane.b32.xlu0 %v3408_v13, %s12617_s18 }
0x1c11   :  { %v13869_v52 = vpop.permute.xlu0 %3422 }
0x1c12   :  { %8610 = vmatmul.mubr.msk.f32.vlgmr.msra.gmra.mrb[36].mxu0 %vm1114_vm10, %v13869_v52  ;;  %9627 = vmatmul.mubr.msk.f32.vlgmr.msra.gmra.mrb[32].mxu1 %vm1114_vm10, %v13869_v52 }
0x1c13   :  { %10876 = vmatpush1.bf16.msra.mxu0 %v13697_v6  ;;  %10899 = vmatpush3.bf16.msra.mxu1 %v13700_v15 }
0x1c14   :  { %10878 = vmatprep.subr.bf16.mxu0 %v13706_v61  ;;  %10900 = vmatprep.subr.bf16.mxu1 %v12613_v3 }
0x1c15   :  { %3703 = vmatprep.mubr.f32.mxu0 %v12615_v10  ;;  %9653 = vmatprep.mubr.msk.f32.mxu1 %vm12614_vm0, %v12615_v10 }
0x1c17   :  { %10880 = vmatpush1.bf16.msra.mxu0 %v13716_v57  ;;  %10902 = vmatpush3.bf16.msra.mxu1 %v13720_v8 }
0x1c18   :  { %10882 = vmatprep.subr.bf16.mxu0 %v13722_v60  ;;  %10903 = vmatprep.subr.bf16.mxu1 %v12613_v3 }
0x1c1b   :  { %10884 = vmatpush1.bf16.msra.mxu0 %v13737_v34  ;;  %10905 = vmatpush3.bf16.msra.mxu1 %v13742_v46 }
0x1c1c   :  { %10886 = vmatprep.subr.bf16.mxu0 %v13744_v40  ;;  %10906 = vmatprep.subr.bf16.mxu1 %v12613_v3 }
0x1c1f   :  { %10888 = vmatpush1.bf16.msra.mxu0 %v13754_v62  ;;  %10908 = vmatpush3.bf16.msra.mxu1 %v13758_v63 }
0x1c20   :  { %10890 = vmatprep.subr.bf16.mxu0 %v13760_v0  ;;  %10909 = vmatprep.subr.bf16.mxu1 %v12613_v3 }
0x1c23   :  { %10892 = vmatpush1.bf16.msra.mxu0 %v13770_v20  ;;  %10911 = vmatpush3.bf16.msra.mxu1 %v13774_v28 }
0x1c24   :  { %10894 = vmatprep.subr.bf16.mxu0 %v13776_v49  ;;  %10912 = vmatprep.subr.bf16.mxu1 %v12613_v3 }
0x1c27   :  { %10896 = vmatpush1.bf16.msra.mxu0 %v13784_v26  ;;  %10914 = vmatpush3.bf16.msra.mxu1 %v13788_v42 }
0x1c28   :  { %10916 = vmatprep.subr.bf16.mxu0 %v13689_v56  ;;  %10939 = vmatprep.subr.bf16.mxu1 %v12613_v3 }
0x1ce5   :  { %v3492_v55 = vpop.f32.mrb[36].mxu0  ;;  %v3563_v19 = vpop.f32.mrb[32].mxu1 }
0x1ce6   :  { %v3572_v17 = vrot.slane %v3563_v19, 6  ;;  %v3494_v31 = vpop.f32.mrb[37].mxu0  ;;  %v9628_v5 = vpop.f32.mrb[33].mxu1  ;;  %v3570_v7 = vrot.slane %v3492_v55, 6 }
0x1ce7   :  { %v3571_v37 = vrot.slane %v3494_v31, 6 }
0x1ce8   :  { %v3578_v9 = vadd.f32 %v3572_v17, %v13828_v43  ;;  %v3576_v51 = vadd.f32 %v3570_v7, %v13840_v18 }
0x1ce9   :  { %v3577_v23 = vadd.f32 %v3571_v37, %v13846_v33 }
0x1cea   :  { %11888 = vtanh.f32 %v3578_v9  ;;  %v8612_v16 = vmul.f32 -1.442695, %v3576_v51 }
0x1ceb   :  { %v8613_v50 = vmul.f32 -1.442695, %v3577_v23  ;;  %11890 = vtanh.f32 %v3577_v23 }
0x1ced   :  { %11892 = vpow2.f32 %v8613_v50 }
0x1cf4   :  { %v11889_v59 = vpop.eup %11888 }
0x1cf5   :  { %v11891_v58 = vpop.eup %11890  ;;  %3611 = vrot.lane.b32.xlu0 %v11889_v59, %s12616_s14 }
0x1cf6   :  { %3609 = vrot.lane.b32.xlu1 %v11891_v58, %s12616_s14 }
0x1cf7   :  { %v11893_v39 = vpop.eup %11892 }
0x1cf8   :  { %v3588_v54 = vadd.f32 1.0, %v11893_v39 }
0x1cfa   :  { %11894 = vrcp.f32 %v3588_v54  ;;  %v8614_v54 = vmul.f32 -1.442695, %v3578_v9 }
0x1cfb   :  { %11896 = vpow2.f32 %v8612_v16 }
0x1d04   :  { %v11895_v41 = vpop.eup %11894 }
0x1d05   :  { %v3606_v11 = vmul.f32 %v11895_v41, %v3602_v45  ;;  %v11897_v12 = vpop.eup %11896 }
0x1d06   :  { %v3582_v13 = vadd.f32 1.0, %v11897_v12 }
0x1d08   :  { %11898 = vrcp.f32 %v3582_v13 }
0x1d12   :  { %v11899_v31 = vpop.eup %11898 }
0x1d13   :  { %v3605_v23 = vmul.f32 %v11899_v31, %v3601_v44 }
0x1d67   :  { %v3612_v19 = vpop.permute.xlu0 %3611 }
0x1d68   :  { %v3610_v17 = vpop.permute.xlu1 %3609 }
0x1d69   :  { %v3613_v5 = vsel %vm1290_vm9, %v3610_v17, %v3612_v19 }
0x1d6a   :  { %v3615_v37 = vmul.f32 %v11899_v31, %v3613_v5 }
0x1d6c   :  { %3617 = vrot.lane.b32.xlu1 %v3615_v37, %s12617_s18 }
0x1dde   :  { %v3618_v50 = vpop.permute.xlu1 %3617 }
0x1ddf   :  { %v13911_v55 = vadd.f32 %v3618_v50, %v3605_v23  ;;  %v13913_v59 = vadd.f32 %v3618_v50, %v3606_v11 }
0x1de1   :  { %11900 = vtanh.f32 %v13911_v55 }
0x1de2   :  { %11902 = vtanh.f32 %v13913_v59 }
0x1de3   :  { %11904 = vpow2.f32 %v8614_v54 }
0x1deb   :  { %v11901_v58 = vpop.eup %11900 }
0x1dec   :  { %v11903_v39 = vpop.eup %11902  ;;  %3626 = vrot.lane.b32.xlu0 %v11901_v58, %s12616_s14 }
0x1ded   :  { %3628 = vrot.lane.b32.xlu1 %v11903_v39, %s12616_s14  ;;  %v11905_v45 = vpop.eup %11904 }
0x1dee   :  { %v3596_v35 = vadd.f32 1.0, %v11905_v45 }
0x1df0   :  { %11906 = vrcp.f32 %v3596_v35  ;;  %v3815_v35 = vrot.slane %v13913_v59, 6  ;;  %v3814_v59 = vrot.slane %v13911_v55, 6 }
0x1dfa   :  { %v11907_v51 = vpop.eup %11906 }
0x1e5e   :  { %v3627_v41 = vpop.permute.xlu0 %3626 }
0x1e5f   :  { %v3629_v7 = vpop.permute.xlu1 %3628 }
0x1e60   :  { %v3630_v11 = vsel %vm1290_vm9, %v3627_v41, %v3629_v7 }
0x1e61   :  { %v3632_v16 = vmul.f32 %v11907_v51, %v3630_v11 }
0x1e63   :  { %v3634_v12 = vrot.slane %v3632_v16, 2 }
0x1e65   :  { %3635 = vrot.lane.b32.xlu0 %v3634_v12, %s12617_s18 }
0x1ed7   :  { %v13921_v13 = vpop.permute.xlu0 %3635 }
0x1ed8   :  { %8615 = vmatmul.mubr.msk.f32.vlgmr.msra.gmra.mrb[38].mxu0 %vm1114_vm10, %v13921_v13  ;;  %9654 = vmatmul.mubr.msk.f32.vlgmr.msra.gmra.mrb[34].mxu1 %vm1114_vm10, %v13921_v13 }
0x1ed9   :  { %10918 = vmatpush1.bf16.msra.mxu0 %v13697_v6  ;;  %10941 = vmatpush3.bf16.msra.mxu1 %v13700_v15 }
0x1eda   :  { %10920 = vmatprep.subr.bf16.mxu0 %v13706_v61  ;;  %10942 = vmatprep.subr.bf16.mxu1 %v12613_v3 }
0x1edb   :  { %3916 = vmatprep.mubr.f32.mxu0 %v12615_v10  ;;  %9680 = vmatprep.mubr.msk.f32.mxu1 %vm12614_vm0, %v12615_v10 }
0x1edd   :  { %10922 = vmatpush1.bf16.msra.mxu0 %v13716_v57  ;;  %10944 = vmatpush3.bf16.msra.mxu1 %v13720_v8 }
0x1ede   :  { %10924 = vmatprep.subr.bf16.mxu0 %v13722_v60  ;;  %10945 = vmatprep.subr.bf16.mxu1 %v12613_v3 }
0x1ee1   :  { %10926 = vmatpush1.bf16.msra.mxu0 %v13737_v34  ;;  %10947 = vmatpush3.bf16.msra.mxu1 %v13742_v46 }
0x1ee2   :  { %10928 = vmatprep.subr.bf16.mxu0 %v13744_v40  ;;  %10948 = vmatprep.subr.bf16.mxu1 %v12613_v3 }
0x1ee5   :  { %10930 = vmatpush1.bf16.msra.mxu0 %v13754_v62  ;;  %10950 = vmatpush3.bf16.msra.mxu1 %v13758_v63 }
0x1ee6   :  { %10932 = vmatprep.subr.bf16.mxu0 %v13760_v0  ;;  %10951 = vmatprep.subr.bf16.mxu1 %v12613_v3 }
0x1ee9   :  { %10934 = vmatpush1.bf16.msra.mxu0 %v13770_v20  ;;  %10953 = vmatpush3.bf16.msra.mxu1 %v13774_v28 }
0x1eea   :  { %10936 = vmatprep.subr.bf16.mxu0 %v13776_v49  ;;  %10954 = vmatprep.subr.bf16.mxu1 %v12613_v3 }
0x1eed   :  { %10938 = vmatpush1.bf16.msra.mxu0 %v13784_v26  ;;  %10956 = vmatpush3.bf16.msra.mxu1 %v13788_v42 }
0x1eee   :  { %10958 = vmatprep.subr.bf16.mxu0 %v13689_v56  ;;  %10981 = vmatprep.subr.bf16.mxu1 %v12613_v3 }
0x1fab   :  { %v3705_v9 = vpop.f32.mrb[38].mxu0  ;;  %v3776_v19 = vpop.f32.mrb[34].mxu1 }
0x1fac   :  { %v3785_v17 = vrot.slane %v3776_v19, 4  ;;  %v3707_v31 = vpop.f32.mrb[39].mxu0  ;;  %v9655_v5 = vpop.f32.mrb[35].mxu1 }
0x1fad   :  { %v3784_v37 = vrot.slane %v3707_v31, 4 }
0x1fae   :  { %v3791_v44 = vadd.f32 %v3785_v17, %v13850_v53  ;;  %v3783_v53 = vrot.slane %v3705_v9, 4 }
0x1faf   :  { %v3790_v23 = vadd.f32 %v3784_v37, %v13848_v48 }
0x1fb0   :  { %11908 = vtanh.f32 %v3791_v44  ;;  %v3789_v48 = vadd.f32 %v3783_v53, %v13838_v4 }
0x1fb1   :  { %v8618_v50 = vmul.f32 -1.442695, %v3790_v23  ;;  %11910 = vtanh.f32 %v3790_v23 }
0x1fb2   :  { %v8617_v51 = vmul.f32 -1.442695, %v3789_v48 }
0x1fb3   :  { %11912 = vpow2.f32 %v8618_v50 }
0x1fba   :  { %v11909_v58 = vpop.eup %11908 }
0x1fbb   :  { %v11911_v39 = vpop.eup %11910  ;;  %3824 = vrot.lane.b32.xlu0 %v11909_v58, %s12616_s14 }
0x1fbc   :  { %3822 = vrot.lane.b32.xlu1 %v11911_v39, %s12616_s14  ;;  %v8619_v39 = vmul.f32 -1.442695, %v3791_v44 }
0x1fbd   :  { %v11913_v54 = vpop.eup %11912 }
0x1fbe   :  { %v3801_v45 = vadd.f32 1.0, %v11913_v54 }
0x1fc0   :  { %11914 = vrcp.f32 %v3801_v45 }
0x1fc1   :  { %11916 = vpow2.f32 %v8617_v51 }
0x1fca   :  { %v11915_v41 = vpop.eup %11914 }
0x1fcb   :  { %v3819_v7 = vmul.f32 %v11915_v41, %v3815_v35  ;;  %v11917_v11 = vpop.eup %11916 }
0x1fcc   :  { %v3795_v16 = vadd.f32 1.0, %v11917_v11 }
0x1fce   :  { %11918 = vrcp.f32 %v3795_v16 }
0x1fd8   :  { %v11919_v17 = vpop.eup %11918 }
0x1fd9   :  { %v3818_v37 = vmul.f32 %v11919_v17, %v3814_v59 }
0x202d   :  { %v3825_v12 = vpop.permute.xlu0 %3824 }
0x202e   :  { %v3823_v19 = vpop.permute.xlu1 %3822 }
0x202f   :  { %v3826_v31 = vsel %vm1290_vm9, %v3823_v19, %v3825_v12 }
0x2030   :  { %v3828_v5 = vmul.f32 %v11919_v17, %v3826_v31 }
0x2032   :  { %3830 = vrot.lane.b32.xlu1 %v3828_v5, %s12617_s18 }
0x20a4   :  { %v3831_v23 = vpop.permute.xlu1 %3830 }
0x20a5   :  { %v13963_v9 = vadd.f32 %v3831_v23, %v3818_v37  ;;  %v13965_v4 = vadd.f32 %v3831_v23, %v3819_v7 }
0x20a7   :  { %11920 = vtanh.f32 %v13963_v9 }
0x20a8   :  { %11922 = vtanh.f32 %v13965_v4 }
0x20a9   :  { %11924 = vpow2.f32 %v8619_v39  ;;  %v4028_v39 = vrot.slane %v13965_v4, 6  ;;  %v4027_v4 = vrot.slane %v13963_v9, 6 }
0x20b1   :  { %v11921_v50 = vpop.eup %11920 }
0x20b2   :  { %v11923_v58 = vpop.eup %11922  ;;  %3839 = vrot.lane.b32.xlu0 %v11921_v50, %s12616_s14 }
0x20b3   :  { %3841 = vrot.lane.b32.xlu1 %v11923_v58, %s12616_s14  ;;  %v11925_v54 = vpop.eup %11924 }
0x20b4   :  { %v3809_v55 = vadd.f32 1.0, %v11925_v54 }
0x20b6   :  { %11926 = vrcp.f32 %v3809_v55 }
0x20c0   :  { %v11927_v41 = vpop.eup %11926 }
0x2124   :  { %v3840_v45 = vpop.permute.xlu0 %3839 }
0x2125   :  { %v3842_v35 = vpop.permute.xlu1 %3841 }
0x2126   :  { %v3843_v7 = vsel %vm1290_vm9, %v3840_v45, %v3842_v35 }
0x2127   :  { %v3845_v53 = vmul.f32 %v11927_v41, %v3843_v7 }
0x2129   :  { %v3847_v48 = vrot.slane %v3845_v53, 4 }
0x212b   :  { %3848 = vrot.lane.b32.xlu0 %v3847_v48, %s12617_s18 }
0x219d   :  { %v13973_v51 = vpop.permute.xlu0 %3848 }
0x219e   :  { %8620 = vmatmul.mubr.msk.f32.vlgmr.msra.gmra.mrb[40].mxu0 %vm1114_vm10, %v13973_v51  ;;  %9681 = vmatmul.mubr.msk.f32.vlgmr.msra.gmra.mrb[36].mxu1 %vm1114_vm10, %v13973_v51 }
0x219f   :  { %10960 = vmatpush1.bf16.msra.mxu0 %v13697_v6  ;;  %10983 = vmatpush3.bf16.msra.mxu1 %v13700_v15 }
0x21a0   :  { %10962 = vmatprep.subr.bf16.mxu0 %v13706_v61  ;;  %10984 = vmatprep.subr.bf16.mxu1 %v12613_v3 }
0x21a1   :  { %4144 = vmatprep.mubr.f32.mxu0 %v12615_v10  ;;  %9707 = vmatprep.mubr.msk.f32.mxu1 %vm12614_vm0, %v12615_v10 }
0x21a3   :  { %10964 = vmatpush1.bf16.msra.mxu0 %v13716_v57  ;;  %10986 = vmatpush3.bf16.msra.mxu1 %v13720_v8 }
0x21a4   :  { %10966 = vmatprep.subr.bf16.mxu0 %v13722_v60  ;;  %10987 = vmatprep.subr.bf16.mxu1 %v12613_v3 }
0x21a7   :  { %10968 = vmatpush1.bf16.msra.mxu0 %v13737_v34  ;;  %10989 = vmatpush3.bf16.msra.mxu1 %v13742_v46 }
0x21a8   :  { %10970 = vmatprep.subr.bf16.mxu0 %v13744_v40  ;;  %10990 = vmatprep.subr.bf16.mxu1 %v12613_v3 }
0x21ab   :  { %10972 = vmatpush1.bf16.msra.mxu0 %v13754_v62  ;;  %10992 = vmatpush3.bf16.msra.mxu1 %v13758_v63 }
0x21ac   :  { %10974 = vmatprep.subr.bf16.mxu0 %v13760_v0  ;;  %10993 = vmatprep.subr.bf16.mxu1 %v12613_v3 }
0x21af   :  { %10976 = vmatpush1.bf16.msra.mxu0 %v13770_v20  ;;  %10995 = vmatpush3.bf16.msra.mxu1 %v13774_v28 }
0x21b0   :  { %10978 = vmatprep.subr.bf16.mxu0 %v13776_v49  ;;  %10996 = vmatprep.subr.bf16.mxu1 %v12613_v3 }
0x21b3   :  { %10980 = vmatpush1.bf16.msra.mxu0 %v13784_v26  ;;  %10998 = vmatpush3.bf16.msra.mxu1 %v13788_v42 }
0x21b4   :  { %11000 = vmatprep.subr.bf16.mxu0 %v13689_v56  ;;  %11023 = vmatprep.subr.bf16.mxu1 %v12613_v3 }
0x2271   :  { %v3918_v44 = vpop.f32.mrb[40].mxu0  ;;  %v3989_v11 = vpop.f32.mrb[36].mxu1 }
0x2272   :  { %v3998_v16 = vrot.slane %v3989_v11, 2  ;;  %v3920_v12 = vpop.f32.mrb[41].mxu0  ;;  %v9682_v19 = vpop.f32.mrb[37].mxu1 }
0x2273   :  { %v3997_v17 = vrot.slane %v3920_v12, 2 }
0x2274   :  { %v4004_v31 = vadd.f32 %v3998_v16, %v13828_v43  ;;  %v3996_v43 = vrot.slane %v3918_v44, 2 }
0x2275   :  { %v4003_v5 = vadd.f32 %v3997_v17, %v13846_v33 }
0x2276   :  { %11928 = vtanh.f32 %v4004_v31  ;;  %v4002_v33 = vadd.f32 %v3996_v43, %v13840_v18 }
0x2277   :  { %v8623_v59 = vmul.f32 -1.442695, %v4003_v5  ;;  %11930 = vtanh.f32 %v4003_v5 }
0x2278   :  { %v8622_v45 = vmul.f32 -1.442695, %v4002_v33 }
0x2279   :  { %11932 = vpow2.f32 %v8623_v59  ;;  %v8624_v59 = vmul.f32 -1.442695, %v4004_v31 }
0x2280   :  { %v11929_v37 = vpop.eup %11928 }
0x2281   :  { %v11931_v23 = vpop.eup %11930  ;;  %4037 = vrot.lane.b32.xlu0 %v11929_v37, %s12616_s14 }
0x2282   :  { %4035 = vrot.lane.b32.xlu1 %v11931_v23, %s12616_s14 }
0x2283   :  { %v11933_v50 = vpop.eup %11932 }
0x2284   :  { %v4014_v58 = vadd.f32 1.0, %v11933_v50 }
0x2286   :  { %11934 = vrcp.f32 %v4014_v58 }
0x2287   :  { %11936 = vpow2.f32 %v8622_v45 }
0x2290   :  { %v11935_v54 = vpop.eup %11934 }
0x2291   :  { %v4032_v55 = vmul.f32 %v11935_v54, %v4028_v39  ;;  %v11937_v35 = vpop.eup %11936 }
0x2292   :  { %v4008_v41 = vadd.f32 1.0, %v11937_v35 }
0x2294   :  { %11938 = vrcp.f32 %v4008_v41 }
0x229e   :  { %v11939_v48 = vpop.eup %11938 }
0x229f   :  { %v4031_v12 = vmul.f32 %v11939_v48, %v4027_v4 }
0x22f3   :  { %v4038_v7 = vpop.permute.xlu0 %4037 }
0x22f4   :  { %v4036_v53 = vpop.permute.xlu1 %4035 }
0x22f5   :  { %v4039_v11 = vsel %vm1290_vm9, %v4036_v53, %v4038_v7 }
0x22f6   :  { %v4041_v16 = vmul.f32 %v11939_v48, %v4039_v11 }
0x22f8   :  { %4043 = vrot.lane.b32.xlu1 %v4041_v16, %s12617_s18 }
0x236a   :  { %v4044_v19 = vpop.permute.xlu1 %4043 }
0x236b   :  { %v14015_v44 = vadd.f32 %v4044_v19, %v4031_v12  ;;  %v14017_v18 = vadd.f32 %v4044_v19, %v4032_v55 }
0x236d   :  { %11940 = vtanh.f32 %v14015_v44  ;;  %v4247_v12 = vrot.slane %v14017_v18, 6 }
0x236e   :  { %11942 = vtanh.f32 %v14017_v18 }
0x236f   :  { %11944 = vpow2.f32 %v8624_v59 }
0x2377   :  { %v11941_v17 = vpop.eup %11940 }
0x2378   :  { %v11943_v5 = vpop.eup %11942  ;;  %4052 = vrot.lane.b32.xlu0 %v11941_v17, %s12616_s14 }
0x2379   :  { %4054 = vrot.lane.b32.xlu1 %v11943_v5, %s12616_s14  ;;  %v11945_v37 = vpop.eup %11944 }
0x237a   :  { %v4022_v9 = vadd.f32 1.0, %v11945_v37 }
0x237c   :  { %11946 = vrcp.f32 %v4022_v9 }
0x2386   :  { %v11947_v58 = vpop.eup %11946 }
0x23ea   :  { %v4053_v23 = vpop.permute.xlu0 %4052 }
0x23eb   :  { %v4055_v50 = vpop.permute.xlu1 %4054 }
0x23ec   :  { %v4056_v39 = vsel %vm1290_vm9, %v4053_v23, %v4055_v50 }
0x23ed   :  { %v4058_v54 = vmul.f32 %v11947_v58, %v4056_v39 }
0x23ef   :  { %v4075_v55 = vrot.slane %v4058_v54, 6 }
0x23f1   :  { %4076 = vrot.lane.b32.xlu0 %v4075_v55, %s12617_s18  ;;  %v4246_v55 = vrot.slane %v14015_v44, 6 }
0x2463   :  { %v14025_v43 = vpop.permute.xlu0 %4076 }
0x2464   :  { %8625 = vmatmul.mubr.msk.f32.vlgmr.msra.gmra.mrb[42].mxu0 %vm1114_vm10, %v14025_v43  ;;  %9708 = vmatmul.mubr.msk.f32.vlgmr.msra.gmra.mrb[38].mxu1 %vm1114_vm10, %v14025_v43 }
0x2465   :  { %11002 = vmatpush1.bf16.msra.mxu0 %v13697_v6  ;;  %11025 = vmatpush3.bf16.msra.mxu1 %v13700_v15 }
0x2466   :  { %11004 = vmatprep.subr.bf16.mxu0 %v13706_v61  ;;  %11026 = vmatprep.subr.bf16.mxu1 %v12613_v3 }
0x2467   :  { %4359 = vmatprep.mubr.f32.mxu0 %v12615_v10  ;;  %9734 = vmatprep.mubr.msk.f32.mxu1 %vm12614_vm0, %v12615_v10 }
0x2469   :  { %11006 = vmatpush1.bf16.msra.mxu0 %v13716_v57  ;;  %11028 = vmatpush3.bf16.msra.mxu1 %v13720_v8 }
0x246a   :  { %11008 = vmatprep.subr.bf16.mxu0 %v13722_v60  ;;  %11029 = vmatprep.subr.bf16.mxu1 %v12613_v3 }
0x246d   :  { %11010 = vmatpush1.bf16.msra.mxu0 %v13737_v34  ;;  %11031 = vmatpush3.bf16.msra.mxu1 %v13742_v46 }
0x246e   :  { %11012 = vmatprep.subr.bf16.mxu0 %v13744_v40  ;;  %11032 = vmatprep.subr.bf16.mxu1 %v12613_v3 }
0x2471   :  { %11014 = vmatpush1.bf16.msra.mxu0 %v13754_v62  ;;  %11034 = vmatpush3.bf16.msra.mxu1 %v13758_v63 }
0x2472   :  { %11016 = vmatprep.subr.bf16.mxu0 %v13760_v0  ;;  %11035 = vmatprep.subr.bf16.mxu1 %v12613_v3 }
0x2475   :  { %11018 = vmatpush1.bf16.msra.mxu0 %v13770_v20  ;;  %11037 = vmatpush3.bf16.msra.mxu1 %v13774_v28 }
0x2476   :  { %11020 = vmatprep.subr.bf16.mxu0 %v13776_v49  ;;  %11038 = vmatprep.subr.bf16.mxu1 %v12613_v3 }
0x2479   :  { %11022 = vmatpush1.bf16.msra.mxu0 %v13784_v26  ;;  %11040 = vmatpush3.bf16.msra.mxu1 %v13788_v42 }
0x247a   :  { %11042 = vmatprep.subr.bf16.mxu0 %v13689_v56  ;;  %11065 = vmatprep.subr.bf16.mxu1 %v12613_v3 }
0x2537   :  { %v4146_v31 = vpop.f32.mrb[42].mxu0  ;;  %v4217_v33 = vpop.f32.mrb[38].mxu1 }
0x2538   :  { %v4223_v45 = vadd.f32 %v4217_v33, %v13832_v21  ;;  %v4148_v35 = vpop.f32.mrb[43].mxu0  ;;  %v9709_v41 = vpop.f32.mrb[39].mxu1  ;;  %v4221_v5 = vadd.f32 %v4146_v31, %v13830_v38 }
0x2539   :  { %v4222_v7 = vadd.f32 %v4148_v35, %v13834_v25 }
0x253a   :  { %11948 = vtanh.f32 %v4223_v45  ;;  %v8627_v59 = vmul.f32 -1.442695, %v4221_v5 }
0x253b   :  { %v8628_v53 = vmul.f32 -1.442695, %v4222_v7  ;;  %11950 = vtanh.f32 %v4222_v7 }
0x253d   :  { %11952 = vpow2.f32 %v8628_v53  ;;  %v8629_v53 = vmul.f32 -1.442695, %v4223_v45 }
0x2544   :  { %v11949_v48 = vpop.eup %11948 }
0x2545   :  { %v11951_v11 = vpop.eup %11950  ;;  %4256 = vrot.lane.b32.xlu0 %v11949_v48, %s12616_s14 }
0x2546   :  { %4254 = vrot.lane.b32.xlu1 %v11951_v11, %s12616_s14 }
0x2547   :  { %v11953_v16 = vpop.eup %11952 }
0x2548   :  { %v4233_v4 = vadd.f32 1.0, %v11953_v16 }
0x254a   :  { %11954 = vrcp.f32 %v4233_v4 }
0x254b   :  { %11956 = vpow2.f32 %v8627_v59 }
0x2554   :  { %v11955_v19 = vpop.eup %11954 }
0x2555   :  { %v4251_v17 = vmul.f32 %v11955_v19, %v4247_v12  ;;  %v11957_v37 = vpop.eup %11956 }
0x2556   :  { %v4227_v9 = vadd.f32 1.0, %v11957_v37 }
0x2558   :  { %11958 = vrcp.f32 %v4227_v9 }
0x2562   :  { %v11959_v58 = vpop.eup %11958 }
0x2563   :  { %v4250_v18 = vmul.f32 %v11959_v58, %v4246_v55 }
0x25b7   :  { %v4257_v23 = vpop.permute.xlu0 %4256 }
0x25b8   :  { %v4255_v50 = vpop.permute.xlu1 %4254 }
0x25b9   :  { %v4258_v39 = vsel %vm1290_vm9, %v4255_v50, %v4257_v23 }
0x25ba   :  { %v4260_v54 = vmul.f32 %v11959_v58, %v4258_v39 }
0x25bc   :  { %4262 = vrot.lane.b32.xlu1 %v4260_v54, %s12617_s18 }
0x262e   :  { %v4263_v33 = vpop.permute.xlu1 %4262 }
0x262f   :  { %v14067_v35 = vadd.f32 %v4263_v33, %v4250_v18  ;;  %v14069_v31 = vadd.f32 %v4263_v33, %v4251_v17 }
0x2631   :  { %11960 = vtanh.f32 %v14067_v35  ;;  %v4471_v33 = vrot.slane %v14069_v31, 6 }
0x2632   :  { %11962 = vtanh.f32 %v14069_v31  ;;  %v4470_v31 = vrot.slane %v14067_v35, 6 }
0x2633   :  { %11964 = vpow2.f32 %v8629_v53 }
0x263b   :  { %v11961_v41 = vpop.eup %11960 }
0x263c   :  { %v11963_v7 = vpop.eup %11962  ;;  %4271 = vrot.lane.b32.xlu0 %v11961_v41, %s12616_s14 }
0x263d   :  { %4273 = vrot.lane.b32.xlu1 %v11963_v7, %s12616_s14  ;;  %v11965_v48 = vpop.eup %11964 }
0x263e   :  { %v4241_v44 = vadd.f32 1.0, %v11965_v48 }
0x2640   :  { %11966 = vrcp.f32 %v4241_v44 }
0x264a   :  { %v11967_v4 = vpop.eup %11966 }
0x26ae   :  { %v4272_v11 = vpop.permute.xlu0 %4271 }
0x26af   :  { %v4274_v16 = vpop.permute.xlu1 %4273 }
0x26b0   :  { %v4275_v12 = vsel %vm1290_vm9, %v4272_v11, %v4274_v16 }
0x26b1   :  { %v4277_v19 = vmul.f32 %v11967_v4, %v4275_v12 }
0x26b3   :  { %4291 = vrot.lane.b32.xlu0 %v4277_v19, %s12617_s18 }
0x2725   :  { %v14077_v17 = vpop.permute.xlu0 %4291 }
0x2726   :  { %8630 = vmatmul.mubr.msk.f32.vlgmr.msra.gmra.mrb[44].mxu0 %vm1114_vm10, %v14077_v17  ;;  %9735 = vmatmul.mubr.msk.f32.vlgmr.msra.gmra.mrb[40].mxu1 %vm1114_vm10, %v14077_v17 }
0x2727   :  { %11044 = vmatpush1.bf16.msra.mxu0 %v13697_v6  ;;  %11067 = vmatpush3.bf16.msra.mxu1 %v13700_v15 }
0x2728   :  { %11046 = vmatprep.subr.bf16.mxu0 %v13706_v61  ;;  %11068 = vmatprep.subr.bf16.mxu1 %v12613_v3 }
0x2729   :  { %4572 = vmatprep.mubr.f32.mxu0 %v12615_v10  ;;  %9761 = vmatprep.mubr.msk.f32.mxu1 %vm12614_vm0, %v12615_v10 }
0x272b   :  { %11048 = vmatpush1.bf16.msra.mxu0 %v13716_v57  ;;  %11070 = vmatpush3.bf16.msra.mxu1 %v13720_v8 }
0x272c   :  { %11050 = vmatprep.subr.bf16.mxu0 %v13722_v60  ;;  %11071 = vmatprep.subr.bf16.mxu1 %v12613_v3 }
0x272f   :  { %11052 = vmatpush1.bf16.msra.mxu0 %v13737_v34  ;;  %11073 = vmatpush3.bf16.msra.mxu1 %v13742_v46 }
0x2730   :  { %11054 = vmatprep.subr.bf16.mxu0 %v13744_v40  ;;  %11074 = vmatprep.subr.bf16.mxu1 %v12613_v3 }
0x2733   :  { %11056 = vmatpush1.bf16.msra.mxu0 %v13754_v62  ;;  %11076 = vmatpush3.bf16.msra.mxu1 %v13758_v63 }
0x2734   :  { %11058 = vmatprep.subr.bf16.mxu0 %v13760_v0  ;;  %11077 = vmatprep.subr.bf16.mxu1 %v12613_v3 }
0x2737   :  { %11060 = vmatpush1.bf16.msra.mxu0 %v13770_v20  ;;  %11079 = vmatpush3.bf16.msra.mxu1 %v13774_v28 }
0x2738   :  { %11062 = vmatprep.subr.bf16.mxu0 %v13776_v49  ;;  %11080 = vmatprep.subr.bf16.mxu1 %v12613_v3 }
0x273b   :  { %11064 = vmatpush1.bf16.msra.mxu0 %v13784_v26  ;;  %11082 = vmatpush3.bf16.msra.mxu1 %v13788_v42 }
0x273c   :  { %11084 = vmatprep.subr.bf16.mxu0 %v13689_v56  ;;  %11107 = vmatprep.subr.bf16.mxu1 %v12613_v3 }
0x27f9   :  { %v4361_v45 = vpop.f32.mrb[44].mxu0  ;;  %v4432_v5 = vpop.f32.mrb[40].mxu1 }
0x27fa   :  { %v4441_v59 = vrot.slane %v4432_v5, 6  ;;  %v4363_v37 = vpop.f32.mrb[45].mxu0  ;;  %v9736_v9 = vpop.f32.mrb[41].mxu1  ;;  %v4439_v53 = vrot.slane %v4361_v45, 6 }
0x27fb   :  { %v4440_v23 = vrot.slane %v4363_v37, 6 }
0x27fc   :  { %v4447_v50 = vadd.f32 %v4441_v59, %v13842_v47  ;;  %v4445_v48 = vadd.f32 %v4439_v53, %v13836_v30 }
0x27fd   :  { %v4446_v58 = vadd.f32 %v4440_v23, %v13844_v27 }
0x27fe   :  { %11968 = vtanh.f32 %v4447_v50  ;;  %v8632_v44 = vmul.f32 -1.442695, %v4445_v48 }
0x27ff   :  { %v8633_v39 = vmul.f32 -1.442695, %v4446_v58  ;;  %11970 = vtanh.f32 %v4446_v58 }
0x2801   :  { %11972 = vpow2.f32 %v8633_v39 }
0x2808   :  { %v11969_v54 = vpop.eup %11968 }
0x2809   :  { %v11971_v55 = vpop.eup %11970  ;;  %4480 = vrot.lane.b32.xlu0 %v11969_v54, %s12616_s14  ;;  %v8634_v54 = vmul.f32 -1.442695, %v4447_v50 }
0x280a   :  { %4478 = vrot.lane.b32.xlu1 %v11971_v55, %s12616_s14 }
0x280b   :  { %v11973_v56 = vpop.eup %11972 }
0x280c   :  { %v4457_v18 = vadd.f32 1.0, %v11973_v56 }
0x280e   :  { %11974 = vrcp.f32 %v4457_v18 }
0x280f   :  { %11976 = vpow2.f32 %v8632_v44 }
0x2818   :  { %v11975_v41 = vpop.eup %11974 }
0x2819   :  { %v4475_v7 = vmul.f32 %v11975_v41, %v4471_v33  ;;  %v11977_v11 = vpop.eup %11976 }
0x281a   :  { %v4451_v16 = vadd.f32 1.0, %v11977_v11 }
0x281c   :  { %11978 = vrcp.f32 %v4451_v16 }
0x2826   :  { %v11979_v19 = vpop.eup %11978 }
0x2827   :  { %v4474_v37 = vmul.f32 %v11979_v19, %v4470_v31 }
0x287b   :  { %v4481_v4 = vpop.permute.xlu0 %4480 }
0x287c   :  { %v4479_v12 = vpop.permute.xlu1 %4478 }
0x287d   :  { %v4482_v5 = vsel %vm1290_vm9, %v4479_v12, %v4481_v4 }
0x287e   :  { %v4484_v59 = vmul.f32 %v11979_v19, %v4482_v5 }
0x2880   :  { %4486 = vrot.lane.b32.xlu1 %v4484_v59, %s12617_s18 }
0x28f2   :  { %v4487_v9 = vpop.permute.xlu1 %4486 }
0x28f3   :  { %v14119_v45 = vadd.f32 %v4487_v9, %v4474_v37  ;;  %v14121_v23 = vadd.f32 %v4487_v9, %v4475_v7  ;;  %v4949_v9 = vld [vmem:[#allocation10 + $0x8] sm:$0xff] }
0x28f5   :  { %11980 = vtanh.f32 %v14119_v45  ;;  %v4683_v5 = vrot.slane %v14119_v45, 6 }
0x28f6   :  { %11982 = vtanh.f32 %v14121_v23 }
0x28f7   :  { %11984 = vpow2.f32 %v8634_v54 }
0x28ff   :  { %v11981_v58 = vpop.eup %11980 }
0x2900   :  { %v11983_v39 = vpop.eup %11982  ;;  %4495 = vrot.lane.b32.xlu0 %v11981_v58, %s12616_s14 }
0x2901   :  { %4497 = vrot.lane.b32.xlu1 %v11983_v39, %s12616_s14  ;;  %v11985_v55 = vpop.eup %11984 }
0x2902   :  { %v4465_v35 = vadd.f32 1.0, %v11985_v55 }
0x2904   :  { %11986 = vrcp.f32 %v4465_v35 }
0x290e   :  { %v11987_v33 = vpop.eup %11986 }
0x2972   :  { %v4496_v56 = vpop.permute.xlu0 %4495 }
0x2973   :  { %v4498_v18 = vpop.permute.xlu1 %4497 }
0x2974   :  { %v4499_v41 = vsel %vm1290_vm9, %v4496_v56, %v4498_v18 }
0x2975   :  { %v4501_v7 = vmul.f32 %v11987_v33, %v4499_v41 }
0x2977   :  { %v4503_v53 = vrot.slane %v4501_v7, 2 }
0x2979   :  { %4504 = vrot.lane.b32.xlu0 %v4503_v53, %s12617_s18 }
0x29eb   :  { %v14129_v48 = vpop.permute.xlu0 %4504 }
0x29ec   :  { %8635 = vmatmul.mubr.msk.f32.vlgmr.msra.gmra.mrb[46].mxu0 %vm1114_vm10, %v14129_v48  ;;  %9762 = vmatmul.mubr.msk.f32.vlgmr.msra.gmra.mrb[42].mxu1 %vm1114_vm10, %v14129_v48 }
0x29ed   :  { %11086 = vmatpush1.bf16.msra.mxu0 %v13697_v6  ;;  %11109 = vmatpush3.bf16.msra.mxu1 %v13700_v15 }
0x29ee   :  { %11088 = vmatprep.subr.bf16.mxu0 %v13706_v61  ;;  %11110 = vmatprep.subr.bf16.mxu1 %v12613_v3 }
0x29ef   :  { %4785 = vmatprep.mubr.f32.mxu0 %v12615_v10  ;;  %9788 = vmatprep.mubr.msk.f32.mxu1 %vm12614_vm0, %v12615_v10 }
0x29f1   :  { %11090 = vmatpush1.bf16.msra.mxu0 %v13716_v57  ;;  %11112 = vmatpush3.bf16.msra.mxu1 %v13720_v8 }
0x29f2   :  { %11092 = vmatprep.subr.bf16.mxu0 %v13722_v60  ;;  %11113 = vmatprep.subr.bf16.mxu1 %v12613_v3 }
0x29f5   :  { %11094 = vmatpush1.bf16.msra.mxu0 %v13737_v34  ;;  %11115 = vmatpush3.bf16.msra.mxu1 %v13742_v46 }
0x29f6   :  { %11096 = vmatprep.subr.bf16.mxu0 %v13744_v40  ;;  %11116 = vmatprep.subr.bf16.mxu1 %v12613_v3 }
0x29f9   :  { %11098 = vmatpush1.bf16.msra.mxu0 %v13754_v62  ;;  %11118 = vmatpush3.bf16.msra.mxu1 %v13758_v63 }
0x29fa   :  { %11100 = vmatprep.subr.bf16.mxu0 %v13760_v0  ;;  %11119 = vmatprep.subr.bf16.mxu1 %v12613_v3 }
0x29fd   :  { %11102 = vmatpush1.bf16.msra.mxu0 %v13770_v20  ;;  %11121 = vmatpush3.bf16.msra.mxu1 %v13774_v28  ;;  %v4684_v28 = vrot.slane %v14121_v23, 6  ;;  %v4951_v23 = vld [vmem:[#allocation10 + $0x18] sm:$0xff] }
0x29fe   :  { %11104 = vmatprep.subr.bf16.mxu0 %v13776_v49  ;;  %11122 = vmatprep.subr.bf16.mxu1 %v12613_v3  ;;  %v11125_v58 = vpack.c.bf16 %v4951_v23, %v4949_v9 }
0x2a01   :  { %11106 = vmatpush1.bf16.msra.mxu0 %v13784_v26  ;;  %11124 = vmatpush3.bf16.msra.mxu1 %v13788_v42 }
0x2a02   :  { %11126 = vmatprep.subr.bf16.mxu0 %v11125_v58  ;;  %v4968_v58 = vld [vmem:[%s15122_s30 + $0x20] sm:$0xff] }
0x2abf   :  { %v4574_v6 = vpop.f32.mrb[46].mxu0  ;;  %v4645_v15 = vpop.f32.mrb[42].mxu1 }
0x2ac0   :  { %v4654_v61 = vrot.slane %v4645_v15, 4  ;;  %v4576_v57 = vpop.f32.mrb[47].mxu0  ;;  %v9763_v8 = vpop.f32.mrb[43].mxu1  ;;  %v4652_v42 = vrot.slane %v4574_v6, 4  ;;  %v4948_v6 = vld [vmem:[#allocation10] sm:$0xff]  ;;  %v4950_v15 = vld [vmem:[#allocation10 + $0x10] sm:$0xff] }
0x2ac1   :  { %v4653_v60 = vrot.slane %v4576_v57, 4  ;;  %v4955_v57 = vld [vmem:[#allocation10 + $0x38] sm:$0xff]  ;;  %v11127_v8 = vpack.c.bf16 %v4950_v15, %v4948_v6  ;;  %v4978_v6 = vld [vmem:[%s15122_s30 + $0x70] sm:$0xff] }
0x2ac2   :  { %v4660_v34 = vadd.f32 %v4654_v61, %v13832_v21  ;;  %v4658_v21 = vadd.f32 %v4652_v42, %v13830_v38  ;;  %v4953_v61 = vld [vmem:[#allocation10 + $0x28] sm:$0xff]  ;;  %v4963_v42 = vld [vmem:[#allocation12 + $0x38] sm:$0xff] }
0x2ac3   :  { %v4659_v46 = vadd.f32 %v4653_v60, %v13834_v25  ;;  %v11129_v60 = vpack.c.bf16 %v4955_v57, %v4953_v61 }
0x2ac4   :  { %11988 = vtanh.f32 %v4660_v34  ;;  %v8637_v25 = vmul.f32 -1.442695, %v4658_v21  ;;  %v8639_v45 = vmul.f32 -1.442695, %v4660_v34  ;;  %v4952_v34 = vld [vmem:[#allocation10 + $0x20] sm:$0xff] }
0x2ac5   :  { %v8638_v40 = vmul.f32 -1.442695, %v4659_v46  ;;  %11990 = vtanh.f32 %v4659_v46  ;;  %v4954_v46 = vld [vmem:[#allocation10 + $0x30] sm:$0xff] }
0x2ac7   :  { %11992 = vpow2.f32 %v8638_v40 }
0x2ace   :  { %v11989_v62 = vpop.eup %11988 }
0x2acf   :  { %v11991_v63 = vpop.eup %11990  ;;  %4693 = vrot.lane.b32.xlu0 %v11989_v62, %s12616_s14  ;;  %v4957_v62 = vld [vmem:[#allocation12 + $0x8] sm:$0xff] }
0x2ad0   :  { %4691 = vrot.lane.b32.xlu1 %v11991_v63, %s12616_s14  ;;  %v4959_v63 = vld [vmem:[#allocation12 + $0x18] sm:$0xff] }
0x2ad1   :  { %v11993_v0 = vpop.eup %11992 }
0x2ad2   :  { %v4670_v20 = vadd.f32 1.0, %v11993_v0  ;;  %v11131_v0 = vpack.c.bf16 %v4954_v46, %v4952_v34 }
0x2ad4   :  { %11994 = vrcp.f32 %v4670_v20  ;;  %v11133_v20 = vpack.c.bf16 %v4959_v63, %v4957_v62 }
0x2ad5   :  { %11996 = vpow2.f32 %v8637_v25 }
0x2ade   :  { %v11995_v49 = vpop.eup %11994 }
0x2adf   :  { %v4688_v26 = vmul.f32 %v11995_v49, %v4684_v28  ;;  %v11997_v50 = vpop.eup %11996  ;;  %v4956_v28 = vld [vmem:[#allocation12] sm:$0xff]  ;;  %v4958_v49 = vld [vmem:[#allocation12 + $0x10] sm:$0xff] }
0x2ae0   :  { %v4664_v44 = vadd.f32 1.0, %v11997_v50  ;;  %v11135_v21 = vpack.c.bf16 %v4958_v49, %v4956_v28  ;;  %v4960_v50 = vld [vmem:[#allocation12 + $0x20] sm:$0xff] }
0x2ae1   :  { %v4980_v28 = vld [vmem:[#allocation13] sm:$0x3] }
0x2ae2   :  { %11998 = vrcp.f32 %v4664_v44  ;;  %v4962_v44 = vld [vmem:[#allocation12 + $0x30] sm:$0xff]  ;;  %v14263_v49 = vrot.slane %v4980_v28, %v13185_v29 }
0x2aec   :  { %v11999_v4 = vpop.eup %11998 }
0x2aed   :  { %v4687_v59 = vmul.f32 %v11999_v4, %v4683_v5  ;;  %v4966_v5 = vld [vmem:[%s15122_s30 + $0x10] sm:$0xff] }
0x2b41   :  { %v4694_v11 = vpop.permute.xlu0 %4693 }
0x2b42   :  { %v4692_v16 = vpop.permute.xlu1 %4691 }
0x2b43   :  { %v4695_v12 = vsel %vm1290_vm9, %v4692_v16, %v4694_v11  ;;  %v4965_v11 = vld [vmem:[%s15122_s30 + $0x8] sm:$0xff]  ;;  %v4967_v16 = vld [vmem:[%s15122_s30 + $0x18] sm:$0xff] }
0x2b44   :  { %v4697_v19 = vmul.f32 %v11999_v4, %v4695_v12  ;;  %v11139_v4 = vpack.c.bf16 %v4962_v44, %v4960_v50  ;;  %v11141_v12 = vpack.c.bf16 %v4967_v16, %v4965_v11 }
0x2b46   :  { %4699 = vrot.lane.b32.xlu1 %v4697_v19, %s12617_s18  ;;  %v4964_v19 = vld [vmem:[%s15122_s30] sm:$0xff] }
0x2b47   :  { %v14202_v9 = vpack.c.bf16 %v4966_v5, %v4964_v19 }
0x2bb8   :  { %v4700_v31 = vpop.permute.xlu1 %4699 }
0x2bb9   :  { %v14169_v37 = vadd.f32 %v4700_v31, %v4687_v59  ;;  %v14171_v38 = vadd.f32 %v4700_v31, %v4688_v26  ;;  %v4961_v26 = vld [vmem:[#allocation12 + $0x28] sm:$0xff]  ;;  %v4969_v59 = vld [vmem:[%s15122_s30 + $0x28] sm:$0xff] }
0x2bba   :  { %v11137_v25 = vpack.c.bf16 %v4963_v42, %v4961_v26  ;;  %v4971_v31 = vld [vmem:[%s15122_s30 + $0x38] sm:$0xff] }
0x2bbb   :  { %12000 = vtanh.f32 %v14169_v37  ;;  %v14204_v23 = vpack.c.bf16 %v4971_v31, %v4969_v59  ;;  %v4897_v63 = vrot.slane %v14171_v38, 6 }
0x2bbc   :  { %12002 = vtanh.f32 %v14171_v38 }
0x2bbd   :  { %12004 = vpow2.f32 %v8639_v45  ;;  %v4975_v45 = vld [vmem:[%s15122_s30 + $0x58] sm:$0xff] }
0x2bc5   :  { %v12001_v39 = vpop.eup %12000 }
0x2bc6   :  { %v12003_v54 = vpop.eup %12002  ;;  %4708 = vrot.lane.b32.xlu0 %v12001_v39, %s12616_s14  ;;  %v4970_v39 = vld [vmem:[%s15122_s30 + $0x30] sm:$0xff] }
0x2bc7   :  { %4710 = vrot.lane.b32.xlu1 %v12003_v54, %s12616_s14  ;;  %v12005_v55 = vpop.eup %12004  ;;  %v4973_v54 = vld [vmem:[%s15122_s30 + $0x48] sm:$0xff] }
0x2bc8   :  { %v4678_v35 = vadd.f32 1.0, %v12005_v55  ;;  %v14214_v55 = vpack.c.bf16 %v4970_v39, %v4968_v58 }
0x2bca   :  { %12006 = vrcp.f32 %v4678_v35  ;;  %v14217_v35 = vpack.c.bf16 %v4975_v45, %v4973_v54 }
0x2bd4   :  { %v12007_v33 = vpop.eup %12006 }
0x2c38   :  { %v4709_v56 = vpop.permute.xlu0 %4708 }
0x2c39   :  { %v4711_v18 = vpop.permute.xlu1 %4710 }
0x2c3a   :  { %v4712_v41 = vsel %vm1290_vm9, %v4709_v56, %v4711_v18  ;;  %v4972_v56 = vld [vmem:[%s15122_s30 + $0x40] sm:$0xff]  ;;  %v4974_v18 = vld [vmem:[%s15122_s30 + $0x50] sm:$0xff] }
0x2c3b   :  { %v4714_v7 = vmul.f32 %v12007_v33, %v4712_v41  ;;  %v4977_v33 = vld [vmem:[%s15122_s30 + $0x68] sm:$0xff]  ;;  %v4979_v41 = vld [vmem:[%s15122_s30 + $0x78] sm:$0xff] }
0x2c3d   :  { %v4716_v53 = vrot.slane %v4714_v7, 4  ;;  %v14230_v7 = vpack.c.bf16 %v4979_v41, %v4977_v33 }
0x2c3f   :  { %4717 = vrot.lane.b32.xlu0 %v4716_v53, %s12617_s18  ;;  %v4976_v53 = vld [vmem:[%s15122_s30 + $0x60] sm:$0xff] }
0x2c40   :  { %v14237_v15 = vpack.c.bf16 %v4978_v6, %v4976_v53 }
0x2cb1   :  { %v14179_v40 = vpop.permute.xlu0 %4717 }
0x2cb2   :  { %8640 = vmatmul.mubr.msk.f32.vlgmr.msra.gmra.mrb[48].mxu0 %vm1114_vm10, %v14179_v40  ;;  %9789 = vmatmul.mubr.msk.f32.vlgmr.msra.gmra.mrb[44].mxu1 %vm1114_vm10, %v14179_v40 }
0x2cb3   :  { %11128 = vmatpush1.bf16.msra.mxu0 %v11127_v8  ;;  %5104 = vmatprep.mubr.f32.mxu0 %v12615_v10 }
0x2cb4   :  { %11130 = vmatprep.subr.bf16.mxu0 %v11129_v60  ;;  %5603 = vmatprep.mubr.f32.mxu1 %v12615_v10 }
0x2cb7   :  { %11132 = vmatpush1.bf16.msra.mxu0 %v11131_v0 }
0x2cb8   :  { %11134 = vmatprep.subr.bf16.mxu0 %v11133_v20 }
0x2cba   :  { %8645 = vmatmul.mubr.msk.f32.vlgmr.msra.gmra.mrb[50].mxu0 %vm772_vm8, %v13034_v1 }
0x2cbb   :  { %11136 = vmatpush1.bf16.msra.mxu0 %v11135_v21  ;;  %5110 = vmatprep.mubr.f32.mxu0 %v12615_v10 }
0x2cbc   :  { %11138 = vmatprep.subr.bf16.mxu0 %v11137_v25  ;;  %v14267_v25 = vrot.slane %v4980_v28, %v13188_v32 }
0x2cbe   :  { %8646 = vmatmul.mubr.msk.f32.gmra.mrb[52].mxu0 %vm772_vm8, %v13036_v14 }
0x2cbf   :  { %5116 = vmatprep.mubr.f32.mxu0 %v12615_v10  ;;  %11140 = vmatpush1.bf16.msra.mxu0 %v11139_v4 }
0x2cc0   :  { %11142 = vmatprep.subr.bf16.mxu0 %v11141_v12 }
0x2cc2   :  { %8647 = vmatmul.mubr.msk.f32.gmra.mrb[54].mxu0 %vm772_vm8, %v13043_v24 }
0x2cc3   :  { %5187 = vmatprep.mubr.f32.mxu0 %v12615_v10 }
0x2cca   :  { %8648 = vmatmul.mubr.msk.f32.vlgmr.msra.gmra.mrb[54].mxu0 %vm772_vm8, %v13034_v1  ;;  %v14227_v1 = vpack.c.bf16 %v4974_v18, %v4972_v56 }
0x2ccb   :  { %11144 = vmatpush1.bf16.msra.mxu0 %v14202_v9  ;;  %5193 = vmatprep.mubr.f32.mxu0 %v12615_v10 }
0x2ccc   :  { %11146 = vmatprep.subr.bf16.mxu0 %v14204_v23 }
0x2cce   :  { %8649 = vmatmul.mubr.msk.f32.gmra.mrb[52].mxu0 %vm772_vm8, %v13036_v14 }
0x2ccf   :  { %11148 = vmatpush1.bf16.msra.mxu0 %v14214_v55  ;;  %5199 = vmatprep.mubr.f32.mxu0 %v12615_v10 }
0x2cd0   :  { %11150 = vmatprep.subr.bf16.mxu0 %v14217_v35 }
0x2cd2   :  { %8650 = vmatmul.mubr.msk.f32.gmra.mrb[50].mxu0 %vm772_vm8, %v13043_v24 }
0x2cd3   :  { %11152 = vmatpush1.bf16.msra.mxu0 %v14227_v1  ;;  %5287 = vmatprep.mubr.f32.mxu0 %v12615_v10 }
0x2cd4   :  { %11154 = vmatprep.subr.bf16.mxu0 %v14230_v7 }
0x2cd7   :  { %11156 = vmatpush1.bf16.msra.mxu0 %v14237_v15 }
0x2cd8   :  { %11158 = vmatprep.subr.bf16.mxu0 %v11141_v12 }
0x2cda   :  { %5288 = vmatmul.mubr.f32.vlgmr.msra.gmra.mrb[50].mxu0 %v12615_v10 }
0x2cdb   :  { %11160 = vmatpush1.bf16.msra.mxu0 %v14202_v9  ;;  %5391 = vmatprep.mubr.f32.mxu0 %v12615_v10 }
0x2cdc   :  { %11162 = vmatprep.subr.bf16.mxu0 %v14204_v23 }
0x2cdf   :  { %11164 = vmatpush1.bf16.msra.mxu0 %v14214_v55 }
0x2ce0   :  { %11166 = vmatprep.subr.bf16.mxu0 %v14217_v35 }
0x2ce3   :  { %11168 = vmatpush1.bf16.msra.mxu0 %v14227_v1 }
0x2ce4   :  { %11170 = vmatprep.subr.bf16.mxu0 %v14230_v7 }
0x2ce7   :  { %11172 = vmatpush1.bf16.msra.mxu0 %v14237_v15 }
0x2ce8   :  { %11174 = vmatprep.subr.bf16.mxu0 %v11141_v12 }
0x2d85   :  { %v14251_v14 = vpop.f32.mrb[48].mxu0  ;;  %v14253_v24 = vpop.f32.mrb[44].mxu1 }
0x2d86   :  { %v4789_v61 = vpop.f32.mrb[49].mxu0  ;;  %v9790_v57 = vpop.f32.mrb[45].mxu1 }
0x2d87   :  { %v4866_v8 = vrot.slane %v4789_v61, 2 }
0x2d89   :  { %v14256_v60 = vadd.f32 %v4866_v8, %v13844_v27 }
0x2d8b   :  { %v8643_v34 = vmul.f32 -1.442695, %v14256_v60 }
0x2d8d   :  { %12008 = vpow2.f32 %v8643_v34 }
0x2d97   :  { %v12009_v46 = vpop.eup %12008 }
0x2d98   :  { %v4883_v62 = vadd.f32 1.0, %v12009_v46 }
0x2d9a   :  { %12010 = vrcp.f32 %v4883_v62 }
0x2da4   :  { %v12011_v0 = vpop.eup %12010 }
0x2da5   :  { %v14260_v20 = vmul.f32 %v12011_v0, %v4897_v63 }
0x2dad   :  { %v5289_v26 = vpop.f32.mrb[50].mxu0 }
0x2dae   :  { %v11581_v42 = vadd.f32 %v5289_v26, %v14263_v49  ;;  %v5291_v27 = vpop.f32.mrb[51].mxu0 }
0x2daf   :  { %v11582_v50 = vadd.f32 %v5291_v27, %v14267_v25 }
0x2db0   :  { %v8651_v21 = vmul.f32 -1.442695, %v11581_v42 }
0x2db1   :  { %v8652_v12 = vmul.f32 -1.442695, %v11582_v50 }
0x2db2   :  { %12012 = vpow2.f32 %v8651_v21 }
0x2db3   :  { %12014 = vtanh.f32 %v11582_v50 }
0x2dbc   :  { %v12013_v44 = vpop.eup %12012 }
0x2dbd   :  { %v5299_v38 = vadd.f32 1.0, %v12013_v44  ;;  %v12015_v11 = vpop.eup %12014 }
0x2dbf   :  { %12016 = vrcp.f32 %v5299_v38 }
0x2dc0   :  { %12018 = vpow2.f32 %v8652_v12  ;;  %v4981_v12 = vld [vmem:[%s15123_s26] sm:$0xff] }
0x2dc9   :  { %v12017_v16 = vpop.eup %12016 }
0x2dca   :  { %v5310_v4 = vmul.f32 %v12017_v16, %v12015_v11  ;;  %v12019_v19 = vpop.eup %12018  ;;  %v5309_v59 = vmul.f32 0.0, %v12017_v16 }
0x2dcb   :  { %v5306_v5 = vadd.f32 1.0, %v12019_v19 }
0x2dcc   :  { %5312 = vrot.lane.b32.xlu1 %v5310_v4, %s12616_s14  ;;  %v4984_v4 = vld [vmem:[%s15123_s26 + $0x18] sm:$0xff] }
0x2dcd   :  { %12020 = vrcp.f32 %v5306_v5  ;;  %v4986_v5 = vld [vmem:[%s15123_s26 + $0x28] sm:$0xff] }
0x2dd7   :  { %v12021_v39 = vpop.eup %12020 }
0x2e3e   :  { %v5313_v31 = vpop.permute.xlu1 %5312 }
0x2e3f   :  { %v5315_v58 = vadd.f32 %v5313_v31, %v5309_v59  ;;  %v4988_v59 = vld [vmem:[%s15123_s26 + $0x38] sm:$0xff] }
0x2e41   :  { %12022 = vtanh.f32 %v5315_v58 }
0x2e4b   :  { %v12023_v54 = vpop.eup %12022 }
0x2e4c   :  { %v5317_v45 = vmul.f32 %v12023_v54, %v12021_v39  ;;  %v4985_v39 = vld [vmem:[%s15123_s26 + $0x20] sm:$0xff]  ;;  %v4987_v54 = vld [vmem:[%s15123_s26 + $0x30] sm:$0xff] }
0x2e4e   :  { %5323 = vrot.lane.b32.xlu0 %v5317_v45, %s12616_s14  ;;  %v4990_v45 = vld [vmem:[%s15123_s26 + $0x48] sm:$0xff] }
0x2ec0   :  { %v14272_v56 = vpop.permute.xlu0 %5323 }
0x2ec1   :  { %8653 = vmatmul.mubr.msk.f32.vlgmr.msra.gmra.mrb[52].mxu0 %vm1290_vm9, %v14272_v56 }
0x2ec2   :  { %11176 = vmatpush1.bf16.msra.mxu0 %v14202_v9  ;;  %5495 = vmatprep.mubr.f32.mxu0 %v12615_v10 }
0x2ec3   :  { %11178 = vmatprep.subr.bf16.mxu0 %v14204_v23 }
0x2ec6   :  { %11180 = vmatpush1.bf16.msra.mxu0 %v14214_v55 }
0x2ec7   :  { %11182 = vmatprep.subr.bf16.mxu0 %v14217_v35 }
0x2eca   :  { %11184 = vmatpush1.bf16.msra.mxu0 %v14227_v1 }
0x2ecb   :  { %11186 = vmatprep.subr.bf16.mxu0 %v14230_v7 }
0x2ece   :  { %11188 = vmatpush1.bf16.msra.mxu0 %v14237_v15 }
0x2ecf   :  { %11269 = vmatprep.subr.bf16.mxu0 %v12613_v3 }
0x2f94   :  { %v5393_v18 = vpop.f32.mrb[52].mxu0 }
0x2f95   :  { %v11583_v33 = vadd.f32 %v5393_v18, %v14263_v49  ;;  %v5395_v9 = vpop.f32.mrb[53].mxu0  ;;  %v4992_v18 = vld [vmem:[%s15123_s26 + $0x58] sm:$0xff] }
0x2f96   :  { %v11584_v23 = vadd.f32 %v5395_v9, %v14267_v25  ;;  %v11197_v9 = vpack.c.bf16 %v4992_v18, %v4990_v45  ;;  %v5010_v45 = vld [vmem:[#allocation15 + $0x68] sm:$0xff]  ;;  %v5012_v18 = vld [vmem:[#allocation15 + $0x78] sm:$0xff] }
0x2f97   :  { %v8654_v41 = vmul.f32 -1.442695, %v11583_v33  ;;  %v11195_v33 = vpack.c.bf16 %v4987_v54, %v4985_v39  ;;  %v5005_v39 = vld [vmem:[#allocation15 + $0x40] sm:$0xff]  ;;  %v5007_v54 = vld [vmem:[#allocation15 + $0x50] sm:$0xff] }
0x2f98   :  { %v8655_v7 = vmul.f32 -1.442695, %v11584_v23 }
0x2f99   :  { %12024 = vpow2.f32 %v8654_v41  ;;  %v4989_v41 = vld [vmem:[%s15123_s26 + $0x40] sm:$0xff] }
0x2f9a   :  { %12026 = vtanh.f32 %v11584_v23  ;;  %v4991_v23 = vld [vmem:[%s15123_s26 + $0x50] sm:$0xff] }
0x2fa3   :  { %v12025_v53 = vpop.eup %12024 }
0x2fa4   :  { %v5403_v55 = vadd.f32 1.0, %v12025_v53  ;;  %v12027_v35 = vpop.eup %12026  ;;  %v4994_v53 = vld [vmem:[%s15123_s26 + $0x68] sm:$0xff] }
0x2fa6   :  { %12028 = vrcp.f32 %v5403_v55  ;;  %v4996_v55 = vld [vmem:[%s15123_s26 + $0x78] sm:$0xff] }
0x2fa7   :  { %12030 = vpow2.f32 %v8655_v7  ;;  %v4995_v7 = vld [vmem:[%s15123_s26 + $0x70] sm:$0xff] }
0x2fb0   :  { %v12029_v1 = vpop.eup %12028 }
0x2fb1   :  { %v5414_v6 = vmul.f32 %v12029_v1, %v12027_v35  ;;  %v12031_v15 = vpop.eup %12030  ;;  %v5413_v57 = vmul.f32 %v12029_v1, %v5315_v58  ;;  %v11193_v58 = vpack.c.bf16 %v4988_v59, %v4986_v5  ;;  %v11199_v35 = vpack.c.bf16 %v4991_v23, %v4989_v41  ;;  %v5006_v5 = vld [vmem:[#allocation15 + $0x48] sm:$0xff]  ;;  %v5008_v59 = vld [vmem:[#allocation15 + $0x58] sm:$0xff]  ;;  %v5009_v41 = vld [vmem:[#allocation15 + $0x60] sm:$0xff] }
0x2fb2   :  { %v5410_v61 = vadd.f32 1.0, %v12031_v15  ;;  %v11201_v1 = vpack.c.bf16 %v4996_v55, %v4994_v53  ;;  %v5011_v23 = vld [vmem:[#allocation15 + $0x70] sm:$0xff]  ;;  %v5014_v55 = vld [vmem:[#allocation16 + $0x8] sm:$0xff] }
0x2fb3   :  { %5416 = vrot.lane.b32.xlu1 %v5414_v6, %s12616_s14  ;;  %v4993_v6 = vld [vmem:[%s15123_s26 + $0x60] sm:$0xff] }
0x2fb4   :  { %12032 = vrcp.f32 %v5410_v61  ;;  %v11203_v15 = vpack.c.bf16 %v4995_v7, %v4993_v6  ;;  %v5013_v7 = vld [vmem:[#allocation16] sm:$0xff] }
0x2fbe   :  { %v12033_v46 = vpop.eup %12032 }
0x3025   :  { %v5417_v8 = vpop.permute.xlu1 %5416 }
0x3026   :  { %v5419_v34 = vadd.f32 %v5417_v8, %v5413_v57 }
0x3028   :  { %12034 = vtanh.f32 %v5419_v34 }
0x3032   :  { %v12035_v62 = vpop.eup %12034 }
0x3033   :  { %v5421_v63 = vmul.f32 %v12035_v62, %v12033_v46 }
0x3035   :  { %5427 = vrot.lane.b32.xlu0 %v5421_v63, %s12616_s14 }
0x30a7   :  { %v14289_v0 = vpop.permute.xlu0 %5427 }
0x30a8   :  { %8656 = vmatmul.mubr.msk.f32.vlgmr.msra.gmra.mrb[54].mxu0 %vm1290_vm9, %v14289_v0 }
0x30a9   :  { %9815 = vmatprep.mubr.msk.f32.mxu0 %vm12614_vm0, %v12615_v10 }
0x317b   :  { %v5497_v28 = vpop.f32.mrb[54].mxu0 }
0x317c   :  { %v11585_v26 = vadd.f32 %v5497_v28, %v14263_v49  ;;  %v5499_v42 = vpop.f32.mrb[55].mxu0  ;;  %v4982_v49 = vld [vmem:[%s15123_s26 + $0x8] sm:$0xff]  ;;  %v4998_v28 = vld [vmem:[#allocation15 + $0x8] sm:$0xff] }
0x317d   :  { %v11586_v21 = vadd.f32 %v5499_v42, %v14267_v25  ;;  %v11189_v19 = vpack.c.bf16 %v4984_v4, %v4982_v49  ;;  %v4983_v25 = vld [vmem:[%s15123_s26 + $0x10] sm:$0xff]  ;;  %v5004_v49 = vld [vmem:[#allocation15 + $0x38] sm:$0xff] }
0x317e   :  { %v8657_v27 = vmul.f32 -1.442695, %v11585_v26  ;;  %v11191_v31 = vpack.c.bf16 %v4983_v25, %v4981_v12  ;;  %v5000_v26 = vld [vmem:[#allocation15 + $0x18] sm:$0xff]  ;;  %v5001_v12 = vld [vmem:[#allocation15 + $0x20] sm:$0xff] }
0x317f   :  { %11190 = vmatprep.subr.bf16.mxu1 %v11189_v19  ;;  %v8658_v61 = vmul.f32 -1.442695, %v11586_v21  ;;  %v11205_v42 = vpack.c.bf16 %v5000_v26, %v4998_v28  ;;  %v5003_v19 = vld [vmem:[#allocation15 + $0x30] sm:$0xff]  ;;  %v5024_v28 = vld [vmem:[#allocation16 + $0x58] sm:$0xff] }
0x3180   :  { %12036 = vpow2.f32 %v8657_v27  ;;  %11192 = vmatpush1.bf16.msra.mxu1 %v11191_v31  ;;  %v11211_v31 = vpack.c.bf16 %v5003_v19, %v5001_v12 }
0x3181   :  { %12038 = vtanh.f32 %v11586_v21  ;;  %11194 = vmatprep.subr.bf16.mxu1 %v11193_v58  ;;  %v5002_v21 = vld [vmem:[#allocation15 + $0x28] sm:$0xff]  ;;  %v11213_v58 = vpack.c.bf16 %v5008_v59, %v5006_v5 }
0x3182   :  { %v11209_v4 = vpack.c.bf16 %v5004_v49, %v5002_v21  ;;  %v5025_v49 = vld [vmem:[#allocation16 + $0x60] sm:$0xff] }
0x3184   :  { %11196 = vmatpush1.bf16.msra.mxu1 %v11195_v33  ;;  %v11215_v33 = vpack.c.bf16 %v5007_v54, %v5005_v39 }
0x3185   :  { %11198 = vmatprep.subr.bf16.mxu1 %v11197_v9  ;;  %v11217_v9 = vpack.c.bf16 %v5012_v18, %v5010_v45 }
0x3188   :  { %11200 = vmatpush1.bf16.msra.mxu1 %v11199_v35  ;;  %v5016_v35 = vld [vmem:[#allocation16 + $0x18] sm:$0xff] }
0x3189   :  { %11202 = vmatprep.subr.bf16.mxu1 %v11201_v1  ;;  %v11219_v1 = vpack.c.bf16 %v5011_v23, %v5009_v41  ;;  %v11221_v6 = vpack.c.bf16 %v5016_v35, %v5014_v55  ;;  %v4867_v35 = vrot.slane %v14253_v24, 2  ;;  %v4865_v24 = vrot.slane %v14251_v14, 2 }
0x318a   :  { %v12037_v50 = vpop.eup %12036 }
0x318b   :  { %v5507_v44 = vadd.f32 1.0, %v12037_v50  ;;  %v12039_v38 = vpop.eup %12038 }
0x318c   :  { %11204 = vmatpush1.bf16.msra.mxu1 %v11203_v15  ;;  %v5015_v15 = vld [vmem:[#allocation16 + $0x10] sm:$0xff] }
0x318d   :  { %12040 = vrcp.f32 %v5507_v44  ;;  %11206 = vmatprep.subr.bf16.mxu1 %v11205_v42 }
0x318e   :  { %12042 = vpow2.f32 %v8658_v61  ;;  %v5018_v61 = vld [vmem:[#allocation16 + $0x28] sm:$0xff] }
0x3197   :  { %v12041_v11 = vpop.eup %12040 }
0x3198   :  { %v5518_v16 = vmul.f32 %v12041_v11, %v12039_v38  ;;  %v12043_v57 = vpop.eup %12042  ;;  %v5517_v46 = vmul.f32 %v12041_v11, %v5419_v34  ;;  %v4997_v38 = vld [vmem:[#allocation15] sm:$0xff] }
0x3199   :  { %v5514_v8 = vadd.f32 1.0, %v12043_v57  ;;  %v5020_v57 = vld [vmem:[#allocation16 + $0x38] sm:$0xff] }
0x319a   :  { %5520 = vrot.lane.b32.xlu1 %v5518_v16, %s12616_s14  ;;  %v4999_v16 = vld [vmem:[#allocation15 + $0x10] sm:$0xff] }
0x319b   :  { %12044 = vrcp.f32 %v5514_v8  ;;  %v11207_v34 = vpack.c.bf16 %v4999_v16, %v4997_v38  ;;  %v14329_v8 = vpack.c.bf16 %v5015_v15, %v5013_v7  ;;  %v5028_v38 = vld [vmem:[#allocation16 + $0x78] sm:$0xff] }
0x31a5   :  { %v12045_v27 = vpop.eup %12044 }
0x320c   :  { %v5521_v62 = vpop.permute.xlu1 %5520 }
0x320d   :  { %v5523_v63 = vadd.f32 %v5521_v62, %v5517_v46  ;;  %v14331_v46 = vpack.c.bf16 %v5020_v57, %v5018_v61  ;;  %v5019_v62 = vld [vmem:[#allocation16 + $0x30] sm:$0xff]  ;;  %v4871_v57 = vadd.f32 %v4865_v24, %v13836_v30 }
0x320f   :  { %12046 = vtanh.f32 %v5523_v63  ;;  %v5022_v63 = vld [vmem:[#allocation16 + $0x48] sm:$0xff] }
0x3210   :  { %v14339_v42 = vpack.c.bf16 %v5024_v28, %v5022_v63 }
0x3219   :  { %v12047_v50 = vpop.eup %12046 }
0x321a   :  { %v5525_v44 = vmul.f32 %v12047_v50, %v12045_v27  ;;  %v5021_v27 = vld [vmem:[#allocation16 + $0x40] sm:$0xff]  ;;  %v5023_v50 = vld [vmem:[#allocation16 + $0x50] sm:$0xff] }
0x321b   :  { %v14345_v16 = vpack.c.bf16 %v5023_v50, %v5021_v27 }
0x321c   :  { %5528 = vrot.lane.b32.xlu0 %v5525_v44, %s12616_s14  ;;  %v5026_v44 = vld [vmem:[#allocation16 + $0x68] sm:$0xff] }
0x321d   :  { %v14348_v21 = vpack.c.bf16 %v5028_v38, %v5026_v44 }
0x328e   :  { %v5529_v11 = vpop.permute.xlu0 %5528 }
0x328f   :  { %v5531_v25 = vsel %vm5030_vm14, %v14272_v56, %v5529_v11  ;;  %v5532_v53 = vsel %vm5030_vm14, %v5529_v11, %v14272_v56  ;;  %v5017_v56 = vld [vmem:[#allocation16 + $0x20] sm:$0xff] }
0x3290   :  { %8659 = vmatmul.mubr.msk.f32.vlgmr.msra.gmra.mrb[46].mxu1 %vm1290_vm9, %v5531_v25  ;;  %v14336_v26 = vpack.c.bf16 %v5019_v62, %v5017_v56  ;;  %v8642_v56 = vmul.f32 -1.442695, %v4871_v57 }
0x3291   :  { %11208 = vmatpush1.bf16.msra.mxu1 %v11207_v34  ;;  %5609 = vmatprep.mubr.f32.mxu1 %v12615_v10  ;;  %v5027_v34 = vld [vmem:[#allocation16 + $0x70] sm:$0xff] }
0x3292   :  { %11210 = vmatprep.subr.bf16.mxu1 %v11209_v4  ;;  %v14352_v11 = vpack.c.bf16 %v5027_v34, %v5025_v49 }
0x3294   :  { %8660 = vmatmul.mubr.msk.f32.gmra.mrb[48].mxu1 %vm1290_vm9, %v14289_v0 }
0x3295   :  { %11212 = vmatpush1.bf16.msra.mxu1 %v11211_v31  ;;  %5615 = vmatprep.mubr.f32.mxu1 %v12615_v10 }
0x3296   :  { %11214 = vmatprep.subr.bf16.mxu1 %v11213_v58 }
0x3298   :  { %8661 = vmatmul.mubr.msk.f32.gmra.mrb[50].mxu1 %vm1290_vm9, %v5532_v53 }
0x3299   :  { %11216 = vmatpush1.bf16.msra.mxu1 %v11215_v33  ;;  %5686 = vmatprep.mubr.f32.mxu1 %v12615_v10 }
0x329a   :  { %11218 = vmatprep.subr.bf16.mxu1 %v11217_v9 }
0x329d   :  { %11220 = vmatpush1.bf16.msra.mxu1 %v11219_v1 }
0x329e   :  { %11222 = vmatprep.subr.bf16.mxu1 %v11221_v6 }
0x32a0   :  { %8662 = vmatmul.mubr.msk.f32.vlgmr.msra.gmra.mrb[50].mxu1 %vm1290_vm9, %v5531_v25 }
0x32a1   :  { %11224 = vmatpush1.bf16.msra.mxu1 %v14329_v8  ;;  %5692 = vmatprep.mubr.f32.mxu1 %v12615_v10 }
0x32a2   :  { %11226 = vmatprep.subr.bf16.mxu1 %v14331_v46 }
0x32a4   :  { %8663 = vmatmul.mubr.msk.f32.gmra.mrb[48].mxu1 %vm1290_vm9, %v14289_v0  ;;  %v5029_v0 = vld [vmem:[#allocation18] sm:$0x3] }
0x32a5   :  { %11228 = vmatpush1.bf16.msra.mxu1 %v14336_v26  ;;  %5698 = vmatprep.mubr.f32.mxu1 %v12615_v10  ;;  %v14367_v4 = vrot.slane %v5029_v0, %v13185_v29  ;;  %v14371_v59 = vrot.slane %v5029_v0, %v13188_v32 }
0x32a6   :  { %11230 = vmatprep.subr.bf16.mxu1 %v14339_v42 }
0x32a8   :  { %8664 = vmatmul.mubr.msk.f32.gmra.mrb[46].mxu1 %vm1290_vm9, %v5532_v53 }
0x32a9   :  { %11232 = vmatpush1.bf16.msra.mxu1 %v14345_v16  ;;  %5784 = vmatprep.mubr.f32.mxu1 %v12615_v10 }
0x32aa   :  { %11234 = vmatprep.subr.bf16.mxu1 %v14348_v21 }
0x32ad   :  { %11236 = vmatpush1.bf16.msra.mxu1 %v14352_v11 }
0x32ae   :  { %11238 = vmatprep.subr.bf16.mxu1 %v11221_v6 }
0x32b0   :  { %5785 = vmatmul.mubr.f32.vlgmr.msra.gmra.mrb[46].mxu1 %v12615_v10 }
0x32b1   :  { %11240 = vmatpush1.bf16.msra.mxu1 %v14329_v8  ;;  %5888 = vmatprep.mubr.f32.mxu1 %v12615_v10 }
0x32b2   :  { %11242 = vmatprep.subr.bf16.mxu1 %v14331_v46 }
0x32b5   :  { %11244 = vmatpush1.bf16.msra.mxu1 %v14336_v26 }
0x32b6   :  { %11246 = vmatprep.subr.bf16.mxu1 %v14339_v42 }
0x32b9   :  { %11248 = vmatpush1.bf16.msra.mxu1 %v14345_v16 }
0x32ba   :  { %11250 = vmatprep.subr.bf16.mxu1 %v14348_v21 }
0x32bd   :  { %11252 = vmatpush1.bf16.msra.mxu1 %v14352_v11 }
0x32be   :  { %11254 = vmatprep.subr.bf16.mxu1 %v11221_v6 }
0x3383   :  { %v5786_v12 = vpop.f32.mrb[46].mxu1 }
0x3384   :  { %v11587_v19 = vadd.f32 %v5786_v12, %v14367_v4  ;;  %v5788_v25 = vpop.f32.mrb[47].mxu1 }
0x3385   :  { %v11588_v31 = vadd.f32 %v5788_v25, %v14371_v59 }
0x3386   :  { %v8665_v5 = vmul.f32 -1.442695, %v11587_v19 }
0x3387   :  { %v8666_v9 = vmul.f32 -1.442695, %v11588_v31 }
0x3388   :  { %12048 = vpow2.f32 %v8665_v5 }
0x3389   :  { %12050 = vtanh.f32 %v11588_v31  ;;  %v6030_v31 = vld [vmem:[%s15124_s29] sm:$0xff] }
0x3392   :  { %v12049_v58 = vpop.eup %12048 }
0x3393   :  { %v5796_v39 = vadd.f32 1.0, %v12049_v58  ;;  %v12051_v54 = vpop.eup %12050  ;;  %v6031_v58 = vld [vmem:[%s15124_s29 + $0x8] sm:$0xff] }
0x3395   :  { %12052 = vrcp.f32 %v5796_v39  ;;  %v6032_v39 = vld [vmem:[%s15124_s29 + $0x10] sm:$0xff] }
0x3396   :  { %12054 = vtanh.f32 %v14256_v60  ;;  %v14382_v60 = vadd.f32 %v4867_v35, %v13842_v47  ;;  %v6039_v35 = vld [vmem:[%s15124_s29 + $0x48] sm:$0xff] }
0x3397   :  { %12056 = vpow2.f32 %v8666_v9 }
0x3398   :  { %v8644_v24 = vmul.f32 -1.442695, %v14382_v60 }
0x339f   :  { %v12053_v45 = vpop.eup %12052 }
0x33a0   :  { %v5807_v18 = vmul.f32 %v12053_v45, %v12051_v54  ;;  %v12055_v33 = vpop.eup %12054  ;;  %v5806_v53 = vmul.f32 0.0, %v12053_v45  ;;  %v14414_v54 = vpack.c.bf16 %v6031_v58, %v6030_v31  ;;  %v14514_v58 = vsel %vm771_vm11, %v13973_v51, %v14129_v48 }
0x33a1   :  { %v12057_v41 = vpop.eup %12056 }
0x33a2   :  { %5809 = vrot.lane.b32.xlu1 %v5807_v18, %s12616_s14  ;;  %v5803_v23 = vadd.f32 1.0, %v12057_v41  ;;  %11271 = vmatpush3.bf16.msra.mxu0 %v14414_v54  ;;  %v6034_v18 = vld [vmem:[%s15124_s29 + $0x20] sm:$0xff]  ;;  %v6036_v41 = vld [vmem:[%s15124_s29 + $0x30] sm:$0xff] }
0x33a3   :  { %11272 = vmatprep.subr.bf16.mxu0 %v12613_v3 }
0x33a4   :  { %12058 = vrcp.f32 %v5803_v23  ;;  %v6037_v23 = vld [vmem:[%s15124_s29 + $0x38] sm:$0xff] }
0x33a6   :  { %4904 = vrot.lane.b32.xlu1 %v12055_v33, %s12616_s14  ;;  %v6035_v33 = vld [vmem:[%s15124_s29 + $0x28] sm:$0xff] }
0x33a7   :  { %v14424_v9 = vpack.c.bf16 %v6035_v33, %v6034_v18  ;;  %v14573_v18 = vsel %vm771_vm11, %v14025_v43, %v14077_v17 }
0x33ae   :  { %v12059_v6 = vpop.eup %12058 }
0x3414   :  { %v5810_v55 = vpop.permute.xlu1 %5809 }
0x3415   :  { %v14378_v1 = vadd.f32 %v5810_v55, %v5806_v53  ;;  %v14430_v53 = vpack.c.bf16 %v6037_v23, %v6036_v41  ;;  %v6038_v55 = vld [vmem:[%s15124_s29 + $0x40] sm:$0xff] }
0x3417   :  { %12060 = vtanh.f32 %v14378_v1 }
0x3418   :  { %12062 = vtanh.f32 %v14382_v60  ;;  %v4905_v28 = vpop.permute.xlu1 %4904 }
0x3419   :  { %12064 = vpow2.f32 %v8642_v56 }
0x3421   :  { %v12061_v7 = vpop.eup %12060 }
0x3422   :  { %v5814_v15 = vmul.f32 %v12061_v7, %v12059_v6  ;;  %v12063_v61 = vpop.eup %12062  ;;  %v14436_v6 = vpack.c.bf16 %v6039_v35, %v6038_v55  ;;  %v6040_v7 = vld [vmem:[%s15124_s29 + $0x50] sm:$0xff] }
0x3423   :  { %v12065_v62 = vpop.eup %12064 }
0x3424   :  { %5820 = vrot.lane.b32.xlu0 %v5814_v15, %s12616_s14  ;;  %v4877_v63 = vadd.f32 1.0, %v12065_v62  ;;  %v6041_v15 = vld [vmem:[%s15124_s29 + $0x58] sm:$0xff] }
0x3426   :  { %12066 = vrcp.f32 %v4877_v63 }
0x3428   :  { %4906 = vrot.lane.b32.xlu0 %v12063_v61, %s12616_s14  ;;  %v14442_v61 = vpack.c.bf16 %v6041_v15, %v6040_v7 }
0x3430   :  { %v12067_v27 = vpop.eup %12066 }
0x3496   :  { %v14389_v47 = vpop.permute.xlu0 %5820 }
0x3497   :  { %8667 = vmatmul.mubr.msk.f32.vlgmr.msra.gmra.mrb[48].mxu1 %vm1290_vm9, %v14389_v47 }
0x3498   :  { %11256 = vmatpush1.bf16.msra.mxu1 %v14329_v8  ;;  %5992 = vmatprep.mubr.f32.mxu1 %v12615_v10  ;;  %v4896_v8 = vrot.slane %v14169_v37, 6 }
0x3499   :  { %11258 = vmatprep.subr.bf16.mxu1 %v14331_v46 }
0x349a   :  { %v4907_v14 = vpop.permute.xlu0 %4906  ;;  %v4900_v46 = vmul.f32 %v12067_v27, %v4896_v8 }
0x349b   :  { %v4908_v30 = vsel %vm1290_vm9, %v4905_v28, %v4907_v14 }
0x349c   :  { %v4910_v50 = vmul.f32 %v12067_v27, %v4908_v30  ;;  %11260 = vmatpush1.bf16.msra.mxu1 %v14336_v26 }
0x349d   :  { %11262 = vmatprep.subr.bf16.mxu1 %v14339_v42 }
0x349e   :  { %4912 = vrot.lane.b32.xlu1 %v4910_v50, %s12617_s18 }
0x34a0   :  { %11264 = vmatpush1.bf16.msra.mxu1 %v14345_v16 }
0x34a1   :  { %11266 = vmatprep.subr.bf16.mxu1 %v14348_v21 }
0x34a4   :  { %11268 = vmatpush1.bf16.msra.mxu1 %v14352_v11 }
0x34a5   :  { %11287 = vmatprep.subr.bf16.mxu1 %v12613_v3 }
0x3510   :  { %v4913_v44 = vpop.permute.xlu1 %4912 }
0x3511   :  { %v4915_v38 = vadd.f32 %v4913_v44, %v4900_v46  ;;  %v4916_v0 = vadd.f32 %v4913_v44, %v14260_v20  ;;  %v6033_v20 = vld [vmem:[%s15124_s29 + $0x18] sm:$0xff]  ;;  %v14454_v44 = vld [vmem:[%s15125_s4] sm:$0x3] }
0x3512   :  { %v14418_v45 = vpack.c.bf16 %v6033_v20, %v6032_v39  ;;  %vm6627_vm15 = vcmp.gt.s32.totalorder %v14454_v44, 1  ;;  %vm6629_vm2 = vcmp.gt.s32.totalorder %v14454_v44, 3  ;;  %vm6626_vm3 = vcmp.gt.s32.totalorder %v14454_v44, 0 }
0x3513   :  { %12068 = vtanh.f32 %v4915_v38  ;;  %vm6631_vm4 = vcmp.gt.s32.totalorder %v14454_v44, 5  ;;  %vm6628_vm5 = vcmp.gt.s32.totalorder %v14454_v44, 2  ;;  %vm6633_vm6 = vcmp.gt.s32.totalorder %v14454_v44, 7 }
0x3514   :  { %11274 = vmatpush3.bf16.msra.mxu0 %v14418_v45  ;;  %vm6630_vm7 = vcmp.gt.s32.totalorder %v14454_v44, 4  ;;  %v14529_v39 = vsel %vm771_vm11, %v13921_v13, %v14179_v40  ;;  %v14558_v20 = vsel %vm771_vm11, %v14077_v17, %v14025_v43  ;;  %v14602_v43 = vsel %vm771_vm11, %v14179_v40, %v13921_v13 }
0x3515   :  { %11275 = vmatprep.subr.bf16.mxu0 %v12613_v3  ;;  %v14615_v17 = vsel %vm771_vm11, %v14129_v48, %v13973_v51 }
0x3518   :  { %11277 = vmatpush3.bf16.msra.mxu0 %v14424_v9 }
0x3519   :  { %11278 = vmatprep.subr.bf16.mxu0 %v12613_v3 }
0x351c   :  { %11280 = vmatpush3.bf16.msra.mxu0 %v14430_v53 }
0x351d   :  { %v12069_v49 = vpop.eup %12068  ;;  %11281 = vmatprep.subr.bf16.mxu0 %v12613_v3 }
0x351e   :  { %4921 = vrot.lane.b32.xlu1 %v12069_v49, %s12616_s14 }
0x3520   :  { %11283 = vmatpush3.bf16.msra.mxu0 %v14436_v6 }
0x3521   :  { %11284 = vmatprep.subr.bf16.mxu0 %v12613_v3 }
0x3524   :  { %11286 = vmatpush3.bf16.msra.mxu0 %v14442_v61 }
0x3525   :  { %11305 = vmatprep.subr.bf16.mxu0 %v12613_v3 }
0x356a   :  { %v5890_v26 = vpop.f32.mrb[48].mxu1 }
0x356b   :  { %v11589_v42 = vadd.f32 %v5890_v26, %v14367_v4  ;;  %v5892_v34 = vpop.f32.mrb[49].mxu1 }
0x356c   :  { %v11590_v21 = vadd.f32 %v5892_v34, %v14371_v59 }
0x356d   :  { %v8668_v16 = vmul.f32 -1.442695, %v11589_v42 }
0x356e   :  { %v8669_v57 = vmul.f32 -1.442695, %v11590_v21 }
0x356f   :  { %12070 = vpow2.f32 %v8668_v16  ;;  %v6637_v16 = vsel %vm6629_vm2, 1, %v12612_v2  ;;  %vm6682_vm2 = vcmask 25600  }
0x3570   :  { %12072 = vtanh.f32 %v11590_v21  ;;  %v6634_v21 = vsel %vm6626_vm3, 1, %v12612_v2 }
0x3579   :  { %v12071_v11 = vpop.eup %12070 }
0x357a   :  { %v5900_v37 = vadd.f32 1.0, %v12071_v11  ;;  %v12073_v12 = vpop.eup %12072  ;;  %v6639_v11 = vsel %vm6631_vm4, 1, %v12612_v2 }
0x357c   :  { %12074 = vrcp.f32 %v5900_v37  ;;  %v6636_v37 = vsel %vm6628_vm5, 1, %v12612_v2 }
0x357d   :  { %12076 = vtanh.f32 %v4916_v0  ;;  %v6641_v0 = vsel %vm6633_vm6, 1, %v12612_v2 }
0x357e   :  { %12078 = vpow2.f32 %v8644_v24 }
0x357f   :  { %12080 = vpow2.f32 %v8669_v57 }
0x3586   :  { %v12075_v19 = vpop.eup %12074 }
0x3587   :  { %v5911_v25 = vmul.f32 %v12075_v19, %v12073_v12  ;;  %v12077_v5 = vpop.eup %12076  ;;  %v5910_v14 = vmul.f32 %v12075_v19, %v14378_v1  ;;  %v6635_v1 = vsel %vm6627_vm15, 1, %v12612_v2  ;;  %v6638_v12 = vsel %vm6630_vm7, 1, %v12612_v2 }
0x3588   :  { %v12079_v56 = vpop.eup %12078  ;;  %vm6632_vm15 = vcmp.gt.s32.totalorder %v14454_v44, 6 }
0x3589   :  { %5913 = vrot.lane.b32.xlu0 %v5911_v25, %s12616_s14  ;;  %v4891_v62 = vadd.f32 1.0, %v12079_v56  ;;  %v12081_v63 = vpop.eup %12080  ;;  %v6640_v19 = vsel %vm6632_vm15, 1, %v12612_v2 }
0x358a   :  { %v5907_v28 = vadd.f32 1.0, %v12081_v63 }
0x358b   :  { %12082 = vrcp.f32 %v4891_v62 }
0x358c   :  { %12084 = vrcp.f32 %v5907_v28 }
0x358d   :  { %4923 = vrot.lane.b32.xlu0 %v12077_v5, %s12616_s14 }
0x3590   :  { %v4922_v50 = vpop.permute.xlu1 %4921 }
0x3595   :  { %v12083_v60 = vpop.eup %12082 }
0x3596   :  { %v12085_v26 = vpop.eup %12084 }
0x35fb   :  { %v5914_v27 = vpop.permute.xlu0 %5913 }
0x35fc   :  { %v14449_v30 = vadd.f32 %v5914_v27, %v5910_v14 }
0x35fe   :  { %12086 = vtanh.f32 %v14449_v30 }
0x35ff   :  { %v4924_v8 = vpop.permute.xlu0 %4923 }
0x3600   :  { %v4925_v46 = vsel %vm1290_vm9, %v4922_v50, %v4924_v8 }
0x3601   :  { %v4927_v38 = vmul.f32 %v12083_v60, %v4925_v46 }
0x3603   :  { %v4930_v49 = vrot.slane %v4927_v38, 6 }
0x3605   :  { %4931 = vrot.lane.b32.xlu0 %v4930_v49, %s12617_s18 }
0x3608   :  { %v12087_v42 = vpop.eup %12086 }
0x3609   :  { %6646 = vperm.xlu0 %11699, %v6635_v1   ;;  %v5918_v34 = vmul.f32 %v12087_v42, %v12085_v26 }
0x360b   :  { %5924 = vrot.lane.b32.xlu1 %v5918_v34, %s12616_s14 }
0x360d   :  { %6652 = vperm.xlu0 %11699, %v6637_v16  }
0x360f   :  { %6643 = vperm.xlu1 %11700, %v6634_v21  }
0x3611   :  { %6658 = vperm.xlu0 %11699, %v6639_v11  }
0x3613   :  { %6649 = vperm.xlu1 %11700, %v6636_v37  }
0x3615   :  { %6664 = vperm.xlu0 %11699, %v6641_v0  }
0x3617   :  { %6655 = vperm.xlu1 %11700, %v6638_v12  }
0x361b   :  { %6661 = vperm.xlu1 %11700, %v6640_v19  }
0x3677   :  { %v14474_v25 = vpop.permute.xlu0 %4931 }
0x3678   :  { %v14480_v5 = vsel %vm771_vm11, %v13869_v52, %v14474_v25  ;;  %v14637_v13 = vsel %vm771_vm11, %v14474_v25, %v13869_v52 }
0x3679   :  { %9816 = vmatmul.mubr.msk.f32.vlgmr.msra.gmra.mrb[56].mxu0 %vm1114_vm10, %v14480_v5 }
0x367a   :  { %11307 = vmatpush3.bf16.msra.mxu0 %v14414_v54  ;;  %9869 = vmatprep.mubr.msk.f32.mxu0 %vm12614_vm0, %v12615_v10 }
0x367b   :  { %11308 = vmatprep.subr.bf16.mxu0 %v12613_v3 }
0x367d   :  { %v5925_v31 = vpop.permute.xlu1 %5924 }
0x367e   :  { %11310 = vmatpush3.bf16.msra.mxu0 %v14418_v45  ;;  %8670 = vmatmul.mubr.msk.f32.vlgmr.msra.gmra.mrb[50].mxu1 %vm1290_vm9, %v5925_v31 }
0x367f   :  { %11289 = vmatpush3.bf16.msra.mxu1 %v14414_v54  ;;  %11311 = vmatprep.subr.bf16.mxu0 %v12613_v3 }
0x3680   :  { %11290 = vmatprep.subr.bf16.mxu1 %v12613_v3  ;;  %9842 = vmatprep.mubr.msk.f32.mxu1 %vm12614_vm0, %v12615_v10 }
0x3682   :  { %11313 = vmatpush3.bf16.msra.mxu0 %v14424_v9 }
0x3683   :  { %11292 = vmatpush3.bf16.msra.mxu1 %v14418_v45  ;;  %11314 = vmatprep.subr.bf16.mxu0 %v12613_v3 }
0x3684   :  { %11293 = vmatprep.subr.bf16.mxu1 %v12613_v3 }
0x3686   :  { %11316 = vmatpush3.bf16.msra.mxu0 %v14430_v53 }
0x3687   :  { %11295 = vmatpush3.bf16.msra.mxu1 %v14424_v9  ;;  %11317 = vmatprep.subr.bf16.mxu0 %v12613_v3 }
0x3688   :  { %11296 = vmatprep.subr.bf16.mxu1 %v12613_v3  ;;  %v6647_v8 = vpop.permute.xlu0 %6646 }
0x3689   :  { %vm6667_vm6 = vcmp.eq.s32.totalorder %v6647_v8, 1 }
0x368a   :  { %11319 = vmatpush3.bf16.msra.mxu0 %v14436_v6 }
0x368b   :  { %11298 = vmatpush3.bf16.msra.mxu1 %v14430_v53  ;;  %11320 = vmatprep.subr.bf16.mxu0 %v12613_v3 }
0x368c   :  { %11299 = vmatprep.subr.bf16.mxu1 %v12613_v3  ;;  %v6653_v60 = vpop.permute.xlu0 %6652 }
0x368d   :  { %vm6669_vm15 = vcmp.eq.s32.totalorder %v6653_v60, 1 }
0x368e   :  { %11322 = vmatpush3.bf16.msra.mxu0 %v14442_v61  ;;  %v6644_v15 = vpop.permute.xlu1 %6643 }
0x368f   :  { %11301 = vmatpush3.bf16.msra.mxu1 %v14436_v6  ;;  %11341 = vmatprep.subr.bf16.mxu0 %v12613_v3  ;;  %vm6666_vm11 = vcmp.eq.s32.totalorder %v6644_v15, 1 }
0x3690   :  { %11302 = vmatprep.subr.bf16.mxu1 %v12613_v3  ;;  %v6659_v42 = vpop.permute.xlu0 %6658 }
0x3691   :  { %9870 = vmatmul.mubr.msk.f32.vlgmr.msra.gmra.mrb[58].mxu0 %vm1114_vm10, %v14514_v58  ;;  %vm6671_vm7 = vcmp.eq.s32.totalorder %v6659_v42, 1 }
0x3692   :  { %11343 = vmatpush3.bf16.msra.mxu0 %v14414_v54  ;;  %9923 = vmatprep.mubr.msk.f32.mxu0 %vm12614_vm0, %v12615_v10 }
0x3693   :  { %11304 = vmatpush3.bf16.msra.mxu1 %v14442_v61  ;;  %11344 = vmatprep.subr.bf16.mxu0 %v12613_v3 }
0x3694   :  { %11323 = vmatprep.subr.bf16.mxu1 %v12613_v3 }
0x3696   :  { %9843 = vmatmul.mubr.msk.f32.vlgmr.msra.gmra.mrb[52].mxu1 %vm1114_vm10, %v14529_v39  ;;  %11346 = vmatpush3.bf16.msra.mxu0 %v14418_v45 }
0x3697   :  { %11325 = vmatpush3.bf16.msra.mxu1 %v14414_v54  ;;  %11347 = vmatprep.subr.bf16.mxu0 %v12613_v3 }
0x3698   :  { %11326 = vmatprep.subr.bf16.mxu1 %v12613_v3  ;;  %9896 = vmatprep.mubr.msk.f32.mxu1 %vm12614_vm0, %v12615_v10 }
0x369a   :  { %11349 = vmatpush3.bf16.msra.mxu0 %v14424_v9 }
0x369b   :  { %11328 = vmatpush3.bf16.msra.mxu1 %v14418_v45  ;;  %11350 = vmatprep.subr.bf16.mxu0 %v12613_v3 }
0x369c   :  { %11329 = vmatprep.subr.bf16.mxu1 %v12613_v3 }
0x369e   :  { %11352 = vmatpush3.bf16.msra.mxu0 %v14430_v53 }
0x369f   :  { %11331 = vmatpush3.bf16.msra.mxu1 %v14424_v9  ;;  %11353 = vmatprep.subr.bf16.mxu0 %v12613_v3 }
0x36a0   :  { %11332 = vmatprep.subr.bf16.mxu1 %v12613_v3 }
0x36a2   :  { %11355 = vmatpush3.bf16.msra.mxu0 %v14436_v6 }
0x36a3   :  { %11334 = vmatpush3.bf16.msra.mxu1 %v14430_v53  ;;  %11356 = vmatprep.subr.bf16.mxu0 %v12613_v3 }
0x36a4   :  { %11335 = vmatprep.subr.bf16.mxu1 %v12613_v3 }
0x36a6   :  { %11358 = vmatpush3.bf16.msra.mxu0 %v14442_v61 }
0x36a7   :  { %11337 = vmatpush3.bf16.msra.mxu1 %v14436_v6  ;;  %11377 = vmatprep.subr.bf16.mxu0 %v12613_v3 }
0x36a8   :  { %11338 = vmatprep.subr.bf16.mxu1 %v12613_v3 }
0x36a9   :  { %9924 = vmatmul.mubr.msk.f32.vlgmr.msra.gmra.mrb[60].mxu0 %vm1114_vm10, %v14558_v20 }
0x36aa   :  { %11379 = vmatpush3.bf16.msra.mxu0 %v14414_v54  ;;  %9977 = vmatprep.mubr.msk.f32.mxu0 %vm12614_vm0, %v12615_v10 }
0x36ab   :  { %11340 = vmatpush3.bf16.msra.mxu1 %v14442_v61  ;;  %11380 = vmatprep.subr.bf16.mxu0 %v12613_v3 }
0x36ac   :  { %11359 = vmatprep.subr.bf16.mxu1 %v12613_v3 }
0x36ae   :  { %9897 = vmatmul.mubr.msk.f32.vlgmr.msra.gmra.mrb[54].mxu1 %vm1114_vm10, %v14573_v18  ;;  %11382 = vmatpush3.bf16.msra.mxu0 %v14418_v45 }
0x36af   :  { %11361 = vmatpush3.bf16.msra.mxu1 %v14414_v54  ;;  %11383 = vmatprep.subr.bf16.mxu0 %v12613_v3 }
0x36b0   :  { %11362 = vmatprep.subr.bf16.mxu1 %v12613_v3  ;;  %9950 = vmatprep.mubr.msk.f32.mxu1 %vm12614_vm0, %v12615_v10 }
0x36b2   :  { %11385 = vmatpush3.bf16.msra.mxu0 %v14424_v9 }
0x36b3   :  { %11364 = vmatpush3.bf16.msra.mxu1 %v14418_v45  ;;  %11386 = vmatprep.subr.bf16.mxu0 %v12613_v3 }
0x36b4   :  { %11365 = vmatprep.subr.bf16.mxu1 %v12613_v3 }
0x36b6   :  { %11388 = vmatpush3.bf16.msra.mxu0 %v14430_v53 }
0x36b7   :  { %11367 = vmatpush3.bf16.msra.mxu1 %v14424_v9  ;;  %11389 = vmatprep.subr.bf16.mxu0 %v12613_v3 }
0x36b8   :  { %11368 = vmatprep.subr.bf16.mxu1 %v12613_v3 }
0x36ba   :  { %11391 = vmatpush3.bf16.msra.mxu0 %v14436_v6 }
0x36bb   :  { %11370 = vmatpush3.bf16.msra.mxu1 %v14430_v53  ;;  %11392 = vmatprep.subr.bf16.mxu0 %v12613_v3 }
0x36bc   :  { %11371 = vmatprep.subr.bf16.mxu1 %v12613_v3 }
0x36be   :  { %11394 = vmatpush3.bf16.msra.mxu0 %v14442_v61 }
0x36bf   :  { %11373 = vmatpush3.bf16.msra.mxu1 %v14436_v6  ;;  %11413 = vmatprep.subr.bf16.mxu0 %v12613_v3 }
0x36c0   :  { %11374 = vmatprep.subr.bf16.mxu1 %v12613_v3 }
0x36c1   :  { %9978 = vmatmul.mubr.msk.f32.vlgmr.msra.gmra.mrb[62].mxu0 %vm1114_vm10, %v14602_v43 }
0x36c2   :  { %10031 = vmatprep.mubr.msk.f32.mxu0 %vm12614_vm0, %v12615_v10 }
0x36c3   :  { %11376 = vmatpush3.bf16.msra.mxu1 %v14442_v61 }
0x36c4   :  { %11395 = vmatprep.subr.bf16.mxu1 %v12613_v3 }
0x36c6   :  { %9951 = vmatmul.mubr.msk.f32.vlgmr.msra.gmra.mrb[56].mxu1 %vm1114_vm10, %v14615_v17 }
0x36c7   :  { %11397 = vmatpush3.bf16.msra.mxu1 %v14414_v54  ;;  %10004 = vmatprep.mubr.msk.f32.mxu1 %vm12614_vm0, %v12615_v10 }
0x36c8   :  { %11398 = vmatprep.subr.bf16.mxu1 %v12613_v3 }
0x36cb   :  { %11400 = vmatpush3.bf16.msra.mxu1 %v14418_v45 }
0x36cc   :  { %11401 = vmatprep.subr.bf16.mxu1 %v12613_v3 }
0x36cf   :  { %11403 = vmatpush3.bf16.msra.mxu1 %v14424_v9 }
0x36d0   :  { %11404 = vmatprep.subr.bf16.mxu1 %v12613_v3 }
0x36d3   :  { %11406 = vmatpush3.bf16.msra.mxu1 %v14430_v53 }
0x36d4   :  { %11407 = vmatprep.subr.bf16.mxu1 %v12613_v3 }
0x36d7   :  { %11409 = vmatpush3.bf16.msra.mxu1 %v14436_v6 }
0x36d8   :  { %11410 = vmatprep.subr.bf16.mxu1 %v12613_v3 }
0x36db   :  { %11412 = vmatpush3.bf16.msra.mxu1 %v14442_v61  ;;  %v6650_v61 = vpop.permute.xlu1 %6649 }
0x36dc   :  { %11431 = vmatprep.subr.bf16.mxu1 %v12613_v3  ;;  %vm6668_vm4 = vcmp.eq.s32.totalorder %v6650_v61, 1 }
0x36de   :  { %10005 = vmatmul.mubr.msk.f32.vlgmr.msra.gmra.mrb[58].mxu1 %vm1114_vm10, %v14637_v13 }
0x36df   :  { %10042 = vmatprep.mubr.msk.f32.mxu1 %vm12614_vm0, %v12615_v10  ;;  %v6656_v24 = vpop.permute.xlu1 %6655 }
0x36e0   :  { %vm6670_vm3 = vcmp.eq.s32.totalorder %v6656_v24, 1 }
0x36e3   :  { %v6662_v46 = vpop.permute.xlu1 %6661 }
0x36e4   :  { %vm6672_vm5 = vcmp.eq.s32.totalorder %v6662_v46, 1 }
0x374c   :  { %v6111_v51 = vpop.f32.mrb[56].mxu0 }
0x374d   :  { %v9817_v48 = vpop.f32.mrb[57].mxu0 }
0x374e   :  { %v6665_v48 = vpop.permute.xlu0 %6664 }
0x3751   :  { %v5994_v40 = vpop.f32.mrb[50].mxu1 }
0x3752   :  { %v11591_v54 = vadd.f32 %v5994_v40, %v14367_v4  ;;  %v5996_v45 = vpop.f32.mrb[51].mxu1 }
0x3753   :  { %v14645_v9 = vadd.f32 %v5996_v45, %v14371_v59  ;;  %v14653_v59 = vsel %vm6666_vm11, %v6111_v51, -1e+09  ;;  %vm6673_vm11 = vcmp.eq.s32.totalorder %v6665_v48, 1  ;;  %v6975_v45 = vld [vmem:[%s15126_s7] sm:$0xff] }
0x3754   :  { %v8671_v33 = vmul.f32 -1.442695, %v11591_v54  ;;  %v6683_v63 = vsel %vm6682_vm2, %v14653_v59, -inf }
0x3756   :  { %12088 = vpow2.f32 %v8671_v33  ;;  %v6976_v33 = vld [vmem:[%s15126_s7 + $0x8] sm:$0xff] }
0x3757   :  { %12090 = vtanh.f32 %v14645_v9 }
0x3760   :  { %v12089_v41 = vpop.eup %12088 }
0x3761   :  { %v6004_v52 = vadd.f32 1.0, %v12089_v41  ;;  %v12091_v6 = vpop.eup %12090  ;;  %v6977_v41 = vld [vmem:[%s15126_s7 + $0x10] sm:$0xff] }
0x3763   :  { %12092 = vrcp.f32 %v6004_v52 }
0x3764   :  { %v6257_v23 = vpop.f32.mrb[58].mxu0 }
0x3765   :  { %v9871_v53 = vpop.f32.mrb[59].mxu0  ;;  %v6676_v38 = vsel %vm6668_vm4, %v6257_v23, -1e+09  ;;  %vm7593_vm4 = vcmask 7168  }
0x3766   :  { %v6685_v34 = vsel %vm6682_vm2, %v6676_v38, -inf  ;;  %v11414_v53 = vpack.c.bf16 %v6976_v33, %v6975_v45 }
0x3768   :  { %11415 = vmatpush3.bf16.msra.mxu0 %v11414_v53 }
0x3769   :  { %v6184_v55 = vpop.f32.mrb[52].mxu1  ;;  %11416 = vmatprep.subr.bf16.mxu0 %v12613_v3 }
0x376a   :  { %v9844_v35 = vpop.f32.mrb[53].mxu1  ;;  %v6675_v11 = vsel %vm6667_vm6, %v6184_v55, -1e+09  ;;  %v6978_v55 = vld [vmem:[%s15126_s7 + $0x18] sm:$0xff]  ;;  %vm8207_vm6 = vcmask 1044480  }
0x376b   :  { %v6684_v19 = vsel %vm6682_vm2, %v6675_v11, -inf  ;;  %v11417_v61 = vpack.c.bf16 %v6978_v55, %v6977_v41 }
0x376d   :  { %v14648_v7 = vpop.eup %12092  ;;  %11418 = vmatpush3.bf16.msra.mxu0 %v11417_v61 }
0x376e   :  { %v14651_v4 = vmul.f32 %v14648_v7, %v12091_v6  ;;  %11419 = vmatprep.subr.bf16.mxu0 %v12613_v3 }
0x377c   :  { %v6403_v57 = vpop.f32.mrb[60].mxu0 }
0x377d   :  { %v14655_v56 = vsel %vm6670_vm3, %v6403_v57, -1e+09  ;;  %v9925_v62 = vpop.f32.mrb[61].mxu0  ;;  %vm7331_vm3 = vcmask 33792  }
0x377e   :  { %v6687_v28 = vsel %vm6682_vm2, %v14655_v56, -inf }
0x377f   :  { %v6688_v14 = vmax.f32 %v6683_v63, %v6687_v28 }
0x3781   :  { %v6330_v27 = vpop.f32.mrb[54].mxu1 }
0x3782   :  { %v9898_v50 = vpop.f32.mrb[55].mxu1  ;;  %v6677_v40 = vsel %vm6669_vm15, %v6330_v27, -1e+09 }
0x3783   :  { %v6686_v35 = vsel %vm6682_vm2, %v6677_v40, -inf }
0x3794   :  { %v6549_v49 = vpop.f32.mrb[62].mxu0 }
0x3795   :  { %v6680_v1 = vsel %vm6672_vm5, %v6549_v49, -1e+09  ;;  %v9979_v26 = vpop.f32.mrb[63].mxu0  ;;  %vm8204_vm5 = vcmask 1042432  }
0x3796   :  { %v6691_v16 = vsel %vm6682_vm2, %v6680_v1, -inf }
0x3797   :  { %v6692_v21 = vmax.f32 %v6685_v34, %v6691_v16 }
0x3799   :  { %v6476_v37 = vpop.f32.mrb[56].mxu1 }
0x379a   :  { %v6679_v0 = vsel %vm6671_vm7, %v6476_v37, -1e+09  ;;  %v9952_v12 = vpop.f32.mrb[57].mxu1 }
0x379b   :  { %v6689_v25 = vsel %vm6682_vm2, %v6679_v0, -inf }
0x379c   :  { %v6690_v31 = vmax.f32 %v6684_v19, %v6689_v25 }
0x379e   :  { %v6695_v51 = vmax.f32 %v6688_v14, %v6690_v31 }
0x37b1   :  { %v6622_v54 = vpop.f32.mrb[58].mxu1 }
0x37b2   :  { %v6681_v52 = vsel %vm6673_vm11, %v6622_v54, -1e+09  ;;  %v10006_v23 = vpop.f32.mrb[59].mxu1 }
0x37b3   :  { %v6693_v6 = vsel %vm6682_vm2, %v6681_v52, -inf }
0x37b4   :  { %v6694_v15 = vmax.f32 %v6686_v35, %v6693_v6 }
0x37b6   :  { %v6696_v24 = vmax.f32 %v6692_v21, %v6694_v15 }
0x37b8   :  { %v6697_v57 = vmax.f32 %v6695_v51, %v6696_v24 }
0x37ba   :  { %v6698_v62 = vsub.f32 %v14653_v59, %v6697_v57  ;;  %v6699_v63 = vsub.f32 %v6675_v11, %v6697_v57  ;;  %v6700_v28 = vsub.f32 %v6676_v38, %v6697_v57  ;;  %v6701_v14 = vsub.f32 %v6677_v40, %v6697_v57 }
0x37bb   :  { %v6702_v27 = vsub.f32 %v14655_v56, %v6697_v57  ;;  %v6703_v50 = vsub.f32 %v6679_v0, %v6697_v57  ;;  %v6704_v8 = vsub.f32 %v6680_v1, %v6697_v57  ;;  %v6705_v60 = vsub.f32 %v6681_v52, %v6697_v57 }
0x37bc   :  { %v6706_v46 = vmul.f32 1.442695, %v6698_v62  ;;  %v6708_v49 = vmul.f32 1.442695, %v6699_v63  ;;  %v6710_v26 = vmul.f32 1.442695, %v6700_v28 }
0x37bd   :  { %v6712_v42 = vmul.f32 1.442695, %v6701_v14  ;;  %v6714_v34 = vmul.f32 1.442695, %v6702_v27  ;;  %v6716_v16 = vmul.f32 1.442695, %v6703_v50 }
0x37be   :  { %12094 = vpow2.f32 %v6706_v46  ;;  %v6718_v59 = vmul.f32 1.442695, %v6704_v8  ;;  %v6720_v38 = vmul.f32 1.442695, %v6705_v60  ;;  %v6979_v50 = vld [vmem:[%s15126_s7 + $0x20] sm:$0xff]  ;;  %v6980_v8 = vld [vmem:[%s15126_s7 + $0x28] sm:$0xff] }
0x37bf   :  { %12096 = vpow2.f32 %v6708_v49  ;;  %v11420_v60 = vpack.c.bf16 %v6980_v8, %v6979_v50  ;;  %v6981_v46 = vld [vmem:[%s15126_s7 + $0x30] sm:$0xff]  ;;  %v6982_v49 = vld [vmem:[%s15126_s7 + $0x38] sm:$0xff] }
0x37c0   :  { %12098 = vpow2.f32 %v6710_v26  ;;  %v11423_v26 = vpack.c.bf16 %v6982_v49, %v6981_v46  ;;  %v7155_v46 = vld [vmem:[%s15127_s3 + $0x8] sm:$0xff] }
0x37c1   :  { %12100 = vpow2.f32 %v6712_v42  ;;  %11421 = vmatpush3.bf16.msra.mxu0 %v11420_v60  ;;  %v6983_v42 = vld [vmem:[%s15126_s7 + $0x40] sm:$0xff] }
0x37c2   :  { %12102 = vpow2.f32 %v6714_v34  ;;  %11422 = vmatprep.subr.bf16.mxu0 %v12613_v3  ;;  %v6984_v34 = vld [vmem:[%s15126_s7 + $0x48] sm:$0xff]  ;;  %v7154_v60 = vld [vmem:[%s15127_s3] sm:$0xff] }
0x37c3   :  { %12104 = vpow2.f32 %v6716_v16  ;;  %v11426_v16 = vpack.c.bf16 %v6984_v34, %v6983_v42 }
0x37c4   :  { %12106 = vpow2.f32 %v6718_v59  ;;  %v12618_v59 = vmov 1  }
0x37c5   :  { %12108 = vpow2.f32 %v6720_v38  ;;  %11424 = vmatpush3.bf16.msra.mxu0 %v11423_v26  ;;  %v6985_v38 = vld [vmem:[%s15126_s7 + $0x50] sm:$0xff] }
0x37c6   :  { %11425 = vmatprep.subr.bf16.mxu0 %v12613_v3 }
0x37c8   :  { %v12095_v21 = vpop.eup %12094 }
0x37c9   :  { %v12097_v56 = vpop.eup %12096  ;;  %v6722_v1 = vsel %vm6682_vm2, %v12095_v21, 0.0  ;;  %11427 = vmatpush3.bf16.msra.mxu0 %v11426_v16  ;;  %v11438_v16 = vpack.c.bf16 %v7155_v46, %v7154_v60  ;;  %v7162_v60 = vld [vmem:[%s15127_s3 + $0x40] sm:$0xff]  ;;  %v7163_v46 = vld [vmem:[%s15127_s3 + $0x48] sm:$0xff] }
0x37ca   :  { %v12099_v11 = vpop.eup %12098  ;;  %v6723_v37 = vsel %vm6682_vm2, %v12097_v56, 0.0  ;;  %11428 = vmatprep.subr.bf16.mxu0 %v12613_v3 }
0x37cb   :  { %v12101_v0 = vpop.eup %12100  ;;  %v6724_v12 = vadd.f32 %v6723_v37, %v6722_v1  ;;  %v6725_v19 = vsel %vm6682_vm2, %v12099_v11, 0.0  ;;  %v12619_v1 = vmov 3  }
0x37cc   :  { %v12103_v25 = vpop.eup %12102  ;;  %v6727_v51 = vsel %vm6682_vm2, %v12101_v0, 0.0 }
0x37cd   :  { %v6726_v31 = vadd.f32 %v6725_v19, %v6724_v12  ;;  %v12105_v48 = vpop.eup %12104  ;;  %v6729_v54 = vsel %vm6682_vm2, %v12103_v25, 0.0 }
0x37ce   :  { %v12107_v45 = vpop.eup %12106  ;;  %v6731_v41 = vsel %vm6682_vm2, %v12105_v48, 0.0 }
0x37cf   :  { %v6728_v40 = vadd.f32 %v6727_v51, %v6726_v31  ;;  %v12109_v52 = vpop.eup %12108  ;;  %v6733_v53 = vsel %vm6682_vm2, %v12107_v45, 0.0 }
0x37d0   :  { %v6735_v35 = vsel %vm6682_vm2, %v12109_v52, 0.0  ;;  %vm6794_vm2 = vcmask 779264  }
0x37d1   :  { %v6730_v33 = vadd.f32 %v6729_v54, %v6728_v40 }
0x37d3   :  { %v6732_v23 = vadd.f32 %v6731_v41, %v6730_v33 }
0x37d5   :  { %v6734_v55 = vadd.f32 %v6733_v53, %v6732_v23 }
0x37d7   :  { %v6736_v6 = vadd.f32 %v6735_v35, %v6734_v55  ;;  %v8672_v35 = vmul.f32 -1.442695, %v14645_v9 }
0x37d9   :  { %12110 = vrcp.f32 %v6736_v6 }
0x37da   :  { %12112 = vpow2.f32 %v8672_v35 }
0x37e3   :  { %v12111_v15 = vpop.eup %12110 }
0x37e4   :  { %v14683_v61 = vmul.f32 %v12111_v15, %v12097_v56  ;;  %v6738_v24 = vmul.f32 %v12111_v15, %v12095_v21  ;;  %v6741_v57 = vmul.f32 %v12111_v15, %v12101_v0  ;;  %v6740_v62 = vmul.f32 %v12111_v15, %v12099_v11  ;;  %v6986_v21 = vld [vmem:[%s15126_s7 + $0x58] sm:$0xff] }
0x37e5   :  { %v6743_v63 = vmul.f32 %v12111_v15, %v12105_v48  ;;  %v14685_v28 = vmul.f32 %v12111_v15, %v12103_v25  ;;  %v6745_v14 = vmul.f32 %v12111_v15, %v12109_v52  ;;  %v14687_v27 = vmul.f32 %v12111_v15, %v12107_v45 }
0x37e6   :  { %6753 = vperm.xlu0 %11699, %v14683_v61   ;;  %6748 = vperm.xlu1 %11700, %v6738_v24   ;;  %v11429_v56 = vpack.c.bf16 %v6986_v21, %v6985_v38  ;;  %v12620_v11 = vmov 2  }
0x37e8   :  { %11430 = vmatpush3.bf16.msra.mxu0 %v11429_v56  ;;  %v7156_v56 = vld [vmem:[%s15127_s3 + $0x10] sm:$0xff] }
0x37e9   :  { %11437 = vmatprep.subr.bf16.mxu0 %v12613_v3 }
0x37ea   :  { %6763 = vperm.xlu0 %11699, %v6741_v57   ;;  %6758 = vperm.xlu1 %11700, %v6740_v62  }
0x37ee   :  { %6773 = vperm.xlu0 %11699, %v6743_v63   ;;  %6768 = vperm.xlu1 %11700, %v14685_v28  }
0x37f2   :  { %6783 = vperm.xlu0 %11699, %v6745_v14   ;;  %6778 = vperm.xlu1 %11700, %v14687_v27  }
0x37f6   :  { %11702 = vset.pattern.permute.xlu0 %v12618_v59  ;;  %11701 = vset.pattern.permute.xlu1 %v12618_v59 }
0x37f7   :  { %6815 = vperm.xlu0 %11702, %v14683_v61   ;;  %6811 = vperm.xlu1 %11701, %v6738_v24  }
0x37fb   :  { %6827 = vperm.xlu0 %11702, %v14685_v28   ;;  %6819 = vperm.xlu1 %11701, %v6740_v62  }
0x37ff   :  { %6835 = vperm.xlu0 %11702, %v14687_v27   ;;  %6823 = vperm.xlu1 %11701, %v6741_v57  }
0x3803   :  { %6017 = vrot.lane.b32.xlu0 %v14651_v4, %s12616_s14  ;;  %6831 = vperm.xlu1 %11701, %v6743_v63  }
0x3804   :  { %11704 = vset.pattern.permute.xlu0 %v12619_v1 }
0x3807   :  { %6925 = vperm.xlu0 %11704, %v14683_v61   ;;  %6839 = vperm.xlu1 %11701, %v6745_v14  }
0x380b   :  { %6937 = vperm.xlu0 %11704, %v14685_v28   ;;  %11703 = vset.pattern.permute.xlu1 %v12619_v1  ;;  %v7157_v1 = vld [vmem:[%s15127_s3 + $0x18] sm:$0xff] }
0x380c   :  { %6921 = vperm.xlu1 %11703, %v6738_v24  }
0x380f   :  { %6945 = vperm.xlu0 %11704, %v14687_v27  }
0x3810   :  { %6929 = vperm.xlu1 %11703, %v6740_v62  }
0x3813   :  { %11706 = vset.pattern.permute.xlu0 %v12620_v11 }
0x3814   :  { %6933 = vperm.xlu1 %11703, %v6741_v57  }
0x3818   :  { %6941 = vperm.xlu1 %11703, %v6743_v63  }
0x381c   :  { %6949 = vperm.xlu1 %11703, %v6745_v14  }
0x3820   :  { %11705 = vset.pattern.permute.xlu1 %v12620_v11 }
0x3821   :  { %6866 = vperm.xlu1 %11705, %v6738_v24  }
0x3825   :  { %6874 = vperm.xlu1 %11705, %v6740_v62  }
0x3829   :  { %6878 = vperm.xlu1 %11705, %v6741_v57  }
0x382d   :  { %6886 = vperm.xlu1 %11705, %v6743_v63  }
0x3831   :  { %6894 = vperm.xlu1 %11705, %v6745_v14  }
0x3865   :  { %v6754_v4 = vpop.permute.xlu0 %6753  ;;  %v6749_v37 = vpop.permute.xlu1 %6748 }
0x3866   :  { %v6787_v0 = vmul.f32 %v6754_v4, %v14529_v39  ;;  %v6786_v12 = vmul.f32 %v6749_v37, %v14480_v5  ;;  %v11441_v37 = vpack.c.bf16 %v7157_v1, %v7156_v56 }
0x3868   :  { %v6796_v19 = vsel %vm6794_vm2, %v6787_v0, 0.0  ;;  %v6795_v25 = vsel %vm6794_vm2, %v6786_v12, 0.0 }
0x3869   :  { %v6764_v31 = vpop.permute.xlu0 %6763  ;;  %v6759_v51 = vpop.permute.xlu1 %6758  ;;  %v6797_v54 = vadd.f32 %v6796_v19, %v6795_v25  ;;  %v7158_v25 = vld [vmem:[%s15127_s3 + $0x20] sm:$0xff] }
0x386a   :  { %v6789_v48 = vmul.f32 %v6764_v31, %v14573_v18  ;;  %v6788_v40 = vmul.f32 %v6759_v51, %v14514_v58  ;;  %v7159_v31 = vld [vmem:[%s15127_s3 + $0x28] sm:$0xff]  ;;  %v12113_v51 = vpop.eup %12112 }
0x386c   :  { %v6798_v45 = vsel %vm6794_vm2, %v6788_v40, 0.0  ;;  %v6800_v23 = vsel %vm6794_vm2, %v6789_v48, 0.0 }
0x386d   :  { %v6799_v33 = vadd.f32 %v6798_v45, %v6797_v54  ;;  %v6774_v41 = vpop.permute.xlu0 %6773  ;;  %v6769_v52 = vpop.permute.xlu1 %6768 }
0x386e   :  { %v6791_v53 = vmul.f32 %v6774_v41, %v14615_v17  ;;  %v6790_v55 = vmul.f32 %v6769_v52, %v14558_v20 }
0x386f   :  { %v6801_v6 = vadd.f32 %v6800_v23, %v6799_v33  ;;  %v11444_v33 = vpack.c.bf16 %v7159_v31, %v7158_v25  ;;  %v7160_v23 = vld [vmem:[%s15127_s3 + $0x30] sm:$0xff] }
0x3870   :  { %v6802_v15 = vsel %vm6794_vm2, %v6790_v55, 0.0  ;;  %v6804_v63 = vsel %vm6794_vm2, %v6791_v53, 0.0  ;;  %v7161_v53 = vld [vmem:[%s15127_s3 + $0x38] sm:$0xff]  ;;  %v6011_v55 = vadd.f32 1.0, %v12113_v51 }
0x3871   :  { %v6803_v24 = vadd.f32 %v6802_v15, %v6801_v6  ;;  %v6784_v57 = vpop.permute.xlu0 %6783  ;;  %v6779_v62 = vpop.permute.xlu1 %6778  ;;  %v6014_v15 = vmul.f32 %v14648_v7, %v14449_v30 }
0x3872   :  { %v6793_v14 = vmul.f32 %v6784_v57, %v14637_v13  ;;  %v6792_v50 = vmul.f32 %v6779_v62, %v14602_v43  ;;  %12114 = vrcp.f32 %v6011_v55 }
0x3873   :  { %v6805_v8 = vadd.f32 %v6804_v63, %v6803_v24  ;;  %v11447_v63 = vpack.c.bf16 %v7161_v53, %v7160_v23  ;;  %v7348_v23 = vld [vmem:[%s15128_s20 + $0x18] sm:$0xff] }
0x3874   :  { %v6806_v9 = vsel %vm6794_vm2, %v6792_v50, 0.0  ;;  %v6808_v26 = vsel %vm6794_vm2, %v6793_v14, 0.0 }
0x3875   :  { %v6807_v49 = vadd.f32 %v6806_v9, %v6805_v8 }
0x3876   :  { %v6816_v42 = vpop.permute.xlu0 %6815  ;;  %v6812_v34 = vpop.permute.xlu1 %6811 }
0x3877   :  { %v6809_v59 = vadd.f32 %v6808_v26, %v6807_v49  ;;  %v6843_v38 = vmul.f32 %v6816_v42, %v14529_v39  ;;  %v6842_v21 = vmul.f32 %v6812_v34, %v14480_v5  ;;  %v11450_v26 = vpack.c.bf16 %v7163_v46, %v7162_v60 }
0x3879   :  { %10032 = vmatmul.mubr.msk.f32.vlgmr.msra.gmra.mrb[64].mxu0 %vm1114_vm10, %v6809_v59  ;;  %v6851_v0 = vsel %vm6794_vm2, %v6843_v38, 0.0  ;;  %v6850_v12 = vsel %vm6794_vm2, %v6842_v21, 0.0  ;;  %v7165_v59 = vld [vmem:[%s15127_s3 + $0x58] sm:$0xff] }
0x387a   :  { %11439 = vmatpush3.bf16.msra.mxu0 %v11438_v16  ;;  %v6828_v11 = vpop.permute.xlu0 %6827  ;;  %v6820_v4 = vpop.permute.xlu1 %6819  ;;  %10069 = vmatprep.mubr.msk.f32.mxu0 %vm12614_vm0, %v12615_v10  ;;  %v6852_v40 = vadd.f32 %v6851_v0, %v6850_v12  ;;  %v7164_v16 = vld [vmem:[%s15127_s3 + $0x50] sm:$0xff]  ;;  %v7346_v0 = vld [vmem:[%s15128_s20 + $0x8] sm:$0xff] }
0x387b   :  { %v6844_v19 = vmul.f32 %v6820_v4, %v14514_v58  ;;  %11440 = vmatprep.subr.bf16.mxu0 %v12613_v3  ;;  %v6846_v41 = vmul.f32 %v6828_v11, %v14558_v20  ;;  %v11453_v1 = vpack.c.bf16 %v7165_v59, %v7164_v16 }
0x387c   :  { %v12115_v25 = vpop.eup %12114 }
0x387d   :  { %v6853_v48 = vsel %vm6794_vm2, %v6844_v19, 0.0  ;;  %v6857_v14 = vsel %vm6794_vm2, %v6846_v41, 0.0 }
0x387e   :  { %11442 = vmatpush3.bf16.msra.mxu0 %v11441_v37  ;;  %v6836_v54 = vpop.permute.xlu0 %6835  ;;  %v6824_v45 = vpop.permute.xlu1 %6823  ;;  %v6854_v35 = vadd.f32 %v6853_v48, %v6852_v40  ;;  %v7345_v37 = vld [vmem:[%s15128_s20] sm:$0xff] }
0x387f   :  { %v6845_v52 = vmul.f32 %v6824_v45, %v14573_v18  ;;  %11443 = vmatprep.subr.bf16.mxu0 %v12613_v3  ;;  %v6848_v7 = vmul.f32 %v6836_v54, %v14602_v43  ;;  %v11480_v48 = vpack.c.bf16 %v7346_v0, %v7345_v37  ;;  %v6989_v37 = vld [vmem:[%s15129_s19 + $0x8] sm:$0xff]  ;;  %v6990_v0 = vld [vmem:[%s15129_s19 + $0x10] sm:$0xff] }
0x3881   :  { %v6855_v6 = vsel %vm6794_vm2, %v6845_v52, 0.0  ;;  %v6861_v21 = vsel %vm6794_vm2, %v6848_v7, 0.0  ;;  %v7347_v52 = vld [vmem:[%s15128_s20 + $0x10] sm:$0xff]  ;;  %v7352_v7 = vld [vmem:[%s15128_s20 + $0x38] sm:$0xff] }
0x3882   :  { %v6856_v24 = vadd.f32 %v6855_v6, %v6854_v35  ;;  %11445 = vmatpush3.bf16.msra.mxu0 %v11444_v33  ;;  %v6018_v57 = vpop.permute.xlu0 %6017  ;;  %v6832_v62 = vpop.permute.xlu1 %6831  ;;  %v11483_v6 = vpack.c.bf16 %v7348_v23, %v7347_v52  ;;  %v7600_v52 = vld [vmem:[%s15130_s12 + $0x28] sm:$0xff] }
0x3883   :  { %v6020_v50 = vadd.f32 %v6018_v57, %v6014_v15  ;;  %v6847_v8 = vmul.f32 %v6832_v62, %v14615_v17  ;;  %11446 = vmatprep.subr.bf16.mxu0 %v12613_v3  ;;  %v7349_v57 = vld [vmem:[%s15128_s20 + $0x20] sm:$0xff]  ;;  %v7350_v62 = vld [vmem:[%s15128_s20 + $0x28] sm:$0xff] }
0x3884   :  { %v6858_v9 = vadd.f32 %v6857_v14, %v6856_v24  ;;  %v11486_v60 = vpack.c.bf16 %v7350_v62, %v7349_v57 }
0x3885   :  { %12116 = vtanh.f32 %v6020_v50  ;;  %v6859_v30 = vsel %vm6794_vm2, %v6847_v8, 0.0 }
0x3886   :  { %11448 = vmatpush3.bf16.msra.mxu0 %v11447_v63  ;;  %v6840_v49 = vpop.permute.xlu1 %6839  ;;  %v6860_v42 = vadd.f32 %v6859_v30, %v6858_v9  ;;  %v6926_v34 = vpop.permute.xlu0 %6925  ;;  %v7351_v30 = vld [vmem:[%s15128_s20 + $0x30] sm:$0xff] }
0x3887   :  { %11449 = vmatprep.subr.bf16.mxu0 %v12613_v3  ;;  %v6849_v38 = vmul.f32 %v6840_v49, %v14637_v13  ;;  %v6953_v56 = vmul.f32 %v6926_v34, %v14529_v39 }
0x3888   :  { %v6862_v11 = vadd.f32 %v6861_v21, %v6860_v42 }
0x3889   :  { %v6863_v12 = vsel %vm6794_vm2, %v6849_v38, 0.0  ;;  %v6961_v31 = vsel %vm6794_vm2, %v6953_v56, 0.0 }
0x388a   :  { %11451 = vmatpush3.bf16.msra.mxu0 %v11450_v26  ;;  %v6864_v54 = vadd.f32 %v6863_v12, %v6862_v11  ;;  %v6938_v45 = vpop.permute.xlu0 %6937 }
0x388b   :  { %v6922_v4 = vpop.permute.xlu1 %6921  ;;  %11452 = vmatprep.subr.bf16.mxu0 %v12613_v3  ;;  %v6956_v63 = vmul.f32 %v6938_v45, %v14558_v20 }
0x388c   :  { %v6952_v19 = vmul.f32 %v6922_v4, %v14480_v5  ;;  %v6988_v4 = vld [vmem:[%s15129_s19] sm:$0xff] }
0x388d   :  { %v6967_v49 = vsel %vm6794_vm2, %v6956_v63, 0.0  ;;  %v11432_v12 = vpack.c.bf16 %v6989_v37, %v6988_v4  ;;  %v7605_v63 = vld [vmem:[%s15130_s12 + $0x50] sm:$0xff] }
0x388e   :  { %v6960_v51 = vsel %vm6794_vm2, %v6952_v19, 0.0  ;;  %11454 = vmatpush3.bf16.msra.mxu0 %v11453_v1  ;;  %v6946_v50 = vpop.permute.xlu0 %6945  ;;  %v6991_v19 = vld [vmem:[%s15129_s19 + $0x18] sm:$0xff] }
0x388f   :  { %v12117_v40 = vpop.eup %12116  ;;  %v6962_v33 = vadd.f32 %v6961_v31, %v6960_v51  ;;  %v6930_v41 = vpop.permute.xlu1 %6929  ;;  %11479 = vmatprep.subr.bf16.mxu0 %v12613_v3  ;;  %v6958_v26 = vmul.f32 %v6946_v50, %v14602_v43  ;;  %11433 = vmatpush3.bf16.msra.mxu1 %v11432_v12  ;;  %v7596_v31 = vld [vmem:[%s15130_s12 + $0x8] sm:$0xff] }
0x3890   :  { %v6954_v53 = vmul.f32 %v6930_v41, %v14514_v58  ;;  %v6022_v55 = vmul.f32 %v12117_v40, %v12115_v25  ;;  %11434 = vmatprep.subr.bf16.mxu1 %v12613_v3  ;;  %v7595_v25 = vld [vmem:[%s15130_s12] sm:$0xff]  ;;  %v7598_v40 = vld [vmem:[%s15130_s12 + $0x18] sm:$0xff] }
0x3891   :  { %10070 = vmatmul.mubr.msk.f32.vlgmr.msra.gmra.mrb[66].mxu0 %vm1114_vm10, %v6864_v54  ;;  %v6971_v21 = vsel %vm6794_vm2, %v6958_v26, 0.0  ;;  %v11498_v51 = vpack.c.bf16 %v7596_v31, %v7595_v25  ;;  %v7599_v41 = vld [vmem:[%s15130_s12 + $0x20] sm:$0xff]  ;;  %v7854_v25 = vld [vmem:[%s15131_s22 + $0x8] sm:$0xff] }
0x3892   :  { %v6963_v35 = vsel %vm6794_vm2, %v6954_v53, 0.0  ;;  %6024 = vrot.lane.b32.xlu0 %v6022_v55, %s12616_s14  ;;  %11481 = vmatpush3.bf16.msra.mxu0 %v11480_v48  ;;  %v7601_v53 = vld [vmem:[%s15130_s12 + $0x30] sm:$0xff]  ;;  %v7602_v55 = vld [vmem:[%s15130_s12 + $0x38] sm:$0xff] }
0x3893   :  { %v6964_v15 = vadd.f32 %v6963_v35, %v6962_v33  ;;  %v6934_v24 = vpop.permute.xlu1 %6933  ;;  %11482 = vmatprep.subr.bf16.mxu0 %v12613_v3  ;;  %10126 = vmatprep.mubr.msk.f32.mxu0 %vm12614_vm0, %v12615_v10  ;;  %v11507_v35 = vpack.c.bf16 %v7602_v55, %v7601_v53  ;;  %v7859_v53 = vld [vmem:[%s15131_s22 + $0x30] sm:$0xff]  ;;  %v7860_v55 = vld [vmem:[%s15131_s22 + $0x38] sm:$0xff] }
0x3894   :  { %v6955_v14 = vmul.f32 %v6934_v24, %v14573_v18 }
0x3896   :  { %v6965_v8 = vsel %vm6794_vm2, %v6955_v14, 0.0  ;;  %6870 = vperm.xlu0 %11706, %v14683_v61   ;;  %11484 = vmatpush3.bf16.msra.mxu0 %v11483_v6  ;;  %v11489_v61 = vpack.c.bf16 %v7352_v7, %v7351_v30  ;;  %v7603_v6 = vld [vmem:[%s15130_s12 + $0x40] sm:$0xff]  ;;  %v7606_v14 = vld [vmem:[%s15130_s12 + $0x58] sm:$0xff] }
0x3897   :  { %v6966_v46 = vadd.f32 %v6965_v8, %v6964_v15  ;;  %v6942_v9 = vpop.permute.xlu1 %6941  ;;  %11485 = vmatprep.subr.bf16.mxu0 %v12613_v3  ;;  %v7604_v15 = vld [vmem:[%s15130_s12 + $0x48] sm:$0xff] }
0x3898   :  { %v6957_v42 = vmul.f32 %v6942_v9, %v14615_v17  ;;  %v11510_v57 = vpack.c.bf16 %v7604_v15, %v7603_v6  ;;  %v11513_v9 = vpack.c.bf16 %v7606_v14, %v7605_v63  ;;  %v7861_v6 = vld [vmem:[%s15131_s22 + $0x40] sm:$0xff]  ;;  %v7862_v15 = vld [vmem:[%s15131_s22 + $0x48] sm:$0xff]  ;;  %v8109_v14 = vld [vmem:[#allocation27] sm:$0xff] }
0x3899   :  { %v6968_v34 = vadd.f32 %v6967_v49, %v6966_v46 }
0x389a   :  { %v6969_v16 = vsel %vm6794_vm2, %v6957_v42, 0.0  ;;  %6882 = vperm.xlu0 %11706, %v14685_v28   ;;  %11487 = vmatpush3.bf16.msra.mxu0 %v11486_v60 }
0x389b   :  { %v6970_v59 = vadd.f32 %v6969_v16, %v6968_v34  ;;  %v6950_v38 = vpop.permute.xlu1 %6949  ;;  %11488 = vmatprep.subr.bf16.mxu0 %v12613_v3 }
0x389c   :  { %v6959_v56 = vmul.f32 %v6950_v38, %v14637_v13 }
0x389d   :  { %v6972_v1 = vadd.f32 %v6971_v21, %v6970_v59 }
0x389e   :  { %v6973_v11 = vsel %vm6794_vm2, %v6959_v56, 0.0  ;;  %6890 = vperm.xlu0 %11706, %v14687_v27   ;;  %11490 = vmatpush3.bf16.msra.mxu0 %v11489_v61  ;;  %v11435_v27 = vpack.c.bf16 %v6991_v19, %v6990_v0 }
0x389f   :  { %v14802_v28 = vadd.f32 %v6973_v11, %v6972_v1  ;;  %11497 = vmatprep.subr.bf16.mxu0 %v12613_v3 }
0x38a0   :  { %11436 = vmatpush3.bf16.msra.mxu1 %v11435_v27  ;;  %v6867_v54 = vpop.permute.xlu1 %6866  ;;  %v7853_v27 = vld [vmem:[%s15131_s22] sm:$0xff] }
0x38a1   :  { %11455 = vmatprep.subr.bf16.mxu1 %v12613_v3  ;;  %v6897_v62 = vmul.f32 %v6867_v54, %v14480_v5  ;;  %v7855_v54 = vld [vmem:[%s15131_s22 + $0x10] sm:$0xff] }
0x38a2   :  { %11707 = vset.pattern.permute.xlu0 %v12612_v2 }
0x38a3   :  { %8386 = vperm.xlu0 %11707, %v14454_v44   ;;  %v7597_v44 = vld [vmem:[%s15130_s12 + $0x10] sm:$0xff]  ;;  %v6905_v30 = vsel %vm6794_vm2, %v6897_v62, 0.0  ;;  %v7864_v62 = vld [vmem:[%s15131_s22 + $0x58] sm:$0xff] }
0x38a4   :  { %v11501_v33 = vpack.c.bf16 %v7598_v40, %v7597_v44  ;;  %v6875_v23 = vpop.permute.xlu1 %6874  ;;  %v11534_v44 = vpack.c.bf16 %v7854_v25, %v7853_v27 }
0x38a5   :  { %v6899_v8 = vmul.f32 %v6875_v23, %v14514_v58  ;;  %v7858_v23 = vld [vmem:[%s15131_s22 + $0x28] sm:$0xff] }
0x38a7   :  { %v6908_v34 = vsel %vm6794_vm2, %v6899_v8, 0.0 }
0x38a8   :  { %v6879_v24 = vpop.permute.xlu1 %6878 }
0x38a9   :  { %v6900_v7 = vmul.f32 %v6879_v24, %v14573_v18  ;;  %v11546_v24 = vpack.c.bf16 %v7862_v15, %v7861_v6  ;;  %v7342_v6 = vld [vmem:[%s15133_s17 + $0x48] sm:$0xff] }
0x38ab   :  { %v6910_v59 = vsel %vm6794_vm2, %v6900_v7, 0.0  ;;  %v8114_v7 = vld [vmem:[#allocation27 + $0x28] sm:$0xff] }
0x38ac   :  { %v6887_v46 = vpop.permute.xlu1 %6886 }
0x38ad   :  { %v6902_v38 = vmul.f32 %v6887_v46, %v14615_v17  ;;  %v8112_v46 = vld [vmem:[#allocation27 + $0x18] sm:$0xff] }
0x38af   :  { %v6914_v0 = vsel %vm6794_vm2, %v6902_v38, 0.0 }
0x38b0   :  { %v6895_v21 = vpop.permute.xlu1 %6894 }
0x38b1   :  { %v6904_v12 = vmul.f32 %v6895_v21, %v14637_v13  ;;  %v7167_v21 = vld [vmem:[%s15132_s0] sm:$0xff] }
0x3904   :  { %v6025_v48 = vpop.permute.xlu0 %6024 }
0x3905   :  { %v14820_v45 = vsel %vm5030_vm14, %v6025_v48, %v14389_v47  ;;  %v11504_v47 = vpack.c.bf16 %v7600_v52, %v7599_v41  ;;  %v6918_v48 = vsel %vm6794_vm2, %v6904_v12, 0.0  ;;  %v7857_v52 = vld [vmem:[%s15131_s22 + $0x20] sm:$0xff]  ;;  %v8685_v12 = vld [vmem:[#allocation22] ss:$0 sm:$0xff]  ;;  %vm7152_vm14 = vcmask 41984  }
0x3906   :  { %10127 = vmatmul.mubr.msk.f32.vlgmr.msra.gmra.mrb[68].mxu0 %vm1290_vm9, %v14820_v45 }
0x3907   :  { %11499 = vmatpush3.bf16.msra.mxu0 %v11498_v51  ;;  %10164 = vmatprep.mubr.msk.f32.mxu0 %vm12614_vm0, %v12615_v10 }
0x3908   :  { %11500 = vmatprep.subr.bf16.mxu0 %v12613_v3 }
0x390b   :  { %11502 = vmatpush3.bf16.msra.mxu0 %v11501_v33  ;;  %v7856_v33 = vld [vmem:[%s15131_s22 + $0x18] sm:$0xff] }
0x390c   :  { %11503 = vmatprep.subr.bf16.mxu0 %v12613_v3  ;;  %v11537_v41 = vpack.c.bf16 %v7856_v33, %v7855_v54 }
0x390f   :  { %11505 = vmatpush3.bf16.msra.mxu0 %v11504_v47  ;;  %v11540_v47 = vpack.c.bf16 %v7858_v23, %v7857_v52  ;;  %v7338_v52 = vld [vmem:[%s15133_s17 + $0x28] sm:$0xff] }
0x3910   :  { %11506 = vmatprep.subr.bf16.mxu0 %v12613_v3 }
0x3913   :  { %11508 = vmatpush3.bf16.msra.mxu0 %v11507_v35  ;;  %v11543_v35 = vpack.c.bf16 %v7860_v55, %v7859_v53  ;;  %v7340_v53 = vld [vmem:[%s15133_s17 + $0x38] sm:$0xff] }
0x3914   :  { %11509 = vmatprep.subr.bf16.mxu0 %v12613_v3 }
0x3915   :  { %v6871_v50 = vpop.permute.xlu0 %6870 }
0x3916   :  { %v6898_v60 = vmul.f32 %v6871_v50, %v14529_v39  ;;  %v8110_v50 = vld [vmem:[#allocation27 + $0x8] sm:$0xff] }
0x3917   :  { %11511 = vmatpush3.bf16.msra.mxu0 %v11510_v57  ;;  %v7863_v57 = vld [vmem:[%s15131_s22 + $0x50] sm:$0xff]  ;;  %v11570_v8 = vpack.c.bf16 %v8110_v50, %v8109_v14  ;;  %v7353_v50 = vld [vmem:[%s15134_s28] sm:$0xff] }
0x3918   :  { %v6906_v49 = vsel %vm6794_vm2, %v6898_v60, 0.0  ;;  %11512 = vmatprep.subr.bf16.mxu0 %v12613_v3  ;;  %v11549_v63 = vpack.c.bf16 %v7864_v62, %v7863_v57  ;;  %v8111_v60 = vld [vmem:[#allocation27 + $0x10] sm:$0xff]  ;;  %v7344_v57 = vld [vmem:[%s15133_s17 + $0x58] sm:$0xff] }
0x3919   :  { %v6907_v26 = vadd.f32 %v6906_v49, %v6905_v30  ;;  %v6883_v42 = vpop.permute.xlu0 %6882  ;;  %v8113_v30 = vld [vmem:[#allocation27 + $0x20] sm:$0xff] }
0x391a   :  { %v6901_v16 = vmul.f32 %v6883_v42, %v14558_v20  ;;  %v11576_v49 = vpack.c.bf16 %v8114_v7, %v8113_v30  ;;  %v8116_v42 = vld [vmem:[#allocation27 + $0x38] sm:$0xff] }
0x391b   :  { %v6909_v61 = vadd.f32 %v6908_v34, %v6907_v26  ;;  %11514 = vmatpush3.bf16.msra.mxu0 %v11513_v9  ;;  %v11573_v9 = vpack.c.bf16 %v8112_v46, %v8111_v60  ;;  %v8115_v26 = vld [vmem:[#allocation27 + $0x30] sm:$0xff]  ;;  %v7355_v60 = vld [vmem:[%s15134_s28 + $0x10] sm:$0xff] }
0x391c   :  { %11533 = vmatprep.subr.bf16.mxu0 %v12613_v3  ;;  %v6912_v11 = vsel %vm6794_vm2, %v6901_v16, 0.0  ;;  %v11579_v34 = vpack.c.bf16 %v8116_v42, %v8115_v26  ;;  %v8681_v16 = vld [vmem:[#allocation19] ss:$0 sm:$0xff] }
0x391d   :  { %v6911_v56 = vadd.f32 %v6910_v59, %v6909_v61  ;;  %v6891_v1 = vpop.permute.xlu0 %6890 }
0x391e   :  { %v6903_v4 = vmul.f32 %v6891_v1, %v14602_v43 }
0x391f   :  { %v6913_v37 = vadd.f32 %v6912_v11, %v6911_v56  ;;  %v7168_v56 = vld [vmem:[%s15132_s0 + $0x8] sm:$0xff]  ;;  %v7169_v11 = vld [vmem:[%s15132_s0 + $0x10] sm:$0xff] }
0x3920   :  { %v6916_v31 = vsel %vm6794_vm2, %v6903_v4, 0.0  ;;  %v11456_v1 = vpack.c.bf16 %v7168_v56, %v7167_v21  ;;  %v7170_v4 = vld [vmem:[%s15132_s0 + $0x18] sm:$0xff]  ;;  %v8687_v21 = vld [vmem:[#allocation24] ss:$0 sm:$0xff] }
0x3921   :  { %v6915_v19 = vadd.f32 %v6914_v0, %v6913_v37  ;;  %v11459_v0 = vpack.c.bf16 %v7170_v4, %v7169_v11 }
0x3923   :  { %v6917_v51 = vadd.f32 %v6916_v31, %v6915_v19  ;;  %v7333_v31 = vld [vmem:[%s15133_s17] sm:$0xff] }
0x3925   :  { %v6919_v40 = vadd.f32 %v6918_v48, %v6917_v51  ;;  %v7334_v51 = vld [vmem:[%s15133_s17 + $0x8] sm:$0xff] }
0x3926   :  { %v11462_v48 = vpack.c.bf16 %v7334_v51, %v7333_v31  ;;  %v7608_v31 = vld [vmem:[%s15135_s27 + $0x8] sm:$0xff] }
0x3927   :  { %10165 = vmatmul.mubr.msk.f32.vlgmr.msra.gmra.mrb[70].mxu0 %vm1114_vm10, %v6919_v40 }
0x3928   :  { %11535 = vmatpush3.bf16.msra.mxu0 %v11534_v44  ;;  %10221 = vmatprep.mubr.msk.f32.mxu0 %vm12614_vm0, %v12615_v10  ;;  %v7335_v44 = vld [vmem:[%s15133_s17 + $0x10] sm:$0xff] }
0x3929   :  { %11536 = vmatprep.subr.bf16.mxu0 %v12613_v3 }
0x392c   :  { %11538 = vmatpush3.bf16.msra.mxu0 %v11537_v41  ;;  %v7337_v41 = vld [vmem:[%s15133_s17 + $0x20] sm:$0xff] }
0x392d   :  { %11539 = vmatprep.subr.bf16.mxu0 %v12613_v3  ;;  %v11468_v23 = vpack.c.bf16 %v7338_v52, %v7337_v41  ;;  %v7612_v41 = vld [vmem:[%s15135_s27 + $0x28] sm:$0xff] }
0x3930   :  { %11541 = vmatpush3.bf16.msra.mxu0 %v11540_v47  ;;  %v7339_v47 = vld [vmem:[%s15133_s17 + $0x30] sm:$0xff] }
0x3931   :  { %11542 = vmatprep.subr.bf16.mxu0 %v12613_v3  ;;  %v11471_v55 = vpack.c.bf16 %v7340_v53, %v7339_v47  ;;  %v7614_v47 = vld [vmem:[%s15135_s27 + $0x38] sm:$0xff] }
0x3934   :  { %11544 = vmatpush3.bf16.msra.mxu0 %v11543_v35  ;;  %v7341_v35 = vld [vmem:[%s15133_s17 + $0x40] sm:$0xff] }
0x3935   :  { %11545 = vmatprep.subr.bf16.mxu0 %v12613_v3  ;;  %v11474_v15 = vpack.c.bf16 %v7342_v6, %v7341_v35  ;;  %v7616_v35 = vld [vmem:[%s15136_s2 + $0x8] sm:$0xff]  ;;  %v7617_v6 = vld [vmem:[%s15136_s2 + $0x10] sm:$0xff] }
0x3938   :  { %11547 = vmatpush3.bf16.msra.mxu0 %v11546_v24  ;;  %v7343_v24 = vld [vmem:[%s15133_s17 + $0x50] sm:$0xff] }
0x3939   :  { %11548 = vmatprep.subr.bf16.mxu0 %v12613_v3  ;;  %v11477_v62 = vpack.c.bf16 %v7344_v57, %v7343_v24  ;;  %v7618_v24 = vld [vmem:[%s15136_s2 + $0x18] sm:$0xff] }
0x393a   :  { %v11531_v57 = vpack.c.bf16 %v7618_v24, %v7617_v6 }
0x393c   :  { %11550 = vmatpush3.bf16.msra.mxu0 %v11549_v63 }
0x393d   :  { %11569 = vmatprep.subr.bf16.mxu0 %v12613_v3 }
0x393f   :  { %10222 = vmatmul.mubr.msk.f32.vlgmr.msra.gmra.mrb[72].mxu0 %vm1114_vm10, %v6919_v40  ;;  %v7336_v40 = vld [vmem:[%s15133_s17 + $0x18] sm:$0xff] }
0x3940   :  { %11571 = vmatpush3.bf16.msra.mxu0 %v11570_v8  ;;  %10270 = vmatprep.mubr.msk.f32.mxu0 %vm12614_vm0, %v12615_v10  ;;  %v11465_v33 = vpack.c.bf16 %v7336_v40, %v7335_v44  ;;  %v7354_v8 = vld [vmem:[%s15134_s28 + $0x8] sm:$0xff]  ;;  %v7610_v44 = vld [vmem:[%s15135_s27 + $0x18] sm:$0xff] }
0x3941   :  { %11572 = vmatprep.subr.bf16.mxu0 %v12613_v3  ;;  %v11492_v46 = vpack.c.bf16 %v7354_v8, %v7353_v50 }
0x3944   :  { %11574 = vmatpush3.bf16.msra.mxu0 %v11573_v9  ;;  %v7356_v9 = vld [vmem:[%s15134_s28 + $0x18] sm:$0xff] }
0x3945   :  { %11575 = vmatprep.subr.bf16.mxu0 %v12613_v3  ;;  %v11495_v30 = vpack.c.bf16 %v7356_v9, %v7355_v60 }
0x3948   :  { %11577 = vmatpush3.bf16.msra.mxu0 %v11576_v49 }
0x3949   :  { %11578 = vmatprep.subr.bf16.mxu0 %v12613_v3 }
0x394c   :  { %11580 = vmatpush3.bf16.msra.mxu0 %v11579_v34  ;;  %v7068_v61 = vpop.f32.mrb[64].mxu0 }
0x394d   :  { %v7069_v59 = vadd.f32 %v8681_v16, %v7068_v61  ;;  %v10033_v38 = vpop.f32.mrb[65].mxu0  ;;  %v8683_v16 = vld [vmem:[#allocation21] ss:$0 sm:$0xff] }
0x394f   :  { %12118 = vtanh.f32 %v7069_v59  ;;  %10271 = vmatmul.mubr.msk.f32.vlgmr.msra.gmra.mrb[74].mxu0 %vm1290_vm9, %v14820_v45 }
0x3959   :  { %v12119_v37 = vpop.eup %12118 }
0x395a   :  { %10043 = vmatmul.mubr.msk.f32.vlgmr.msra.gmra.mrb[60].mxu1 %vm772_vm8, %v12119_v37 }
0x395b   :  { %11457 = vmatpush3.bf16.msra.mxu1 %v11456_v1  ;;  %10080 = vmatprep.mubr.msk.f32.mxu1 %vm12614_vm0, %v12615_v10 }
0x395c   :  { %11458 = vmatprep.subr.bf16.mxu1 %v12613_v3 }
0x395f   :  { %11460 = vmatpush3.bf16.msra.mxu1 %v11459_v0 }
0x3960   :  { %11461 = vmatprep.subr.bf16.mxu1 %v12613_v3 }
0x3964   :  { %v7247_v19 = vpop.f32.mrb[66].mxu0 }
0x3965   :  { %v7248_v27 = vadd.f32 %v8685_v12, %v7247_v19  ;;  %v10071_v25 = vpop.f32.mrb[67].mxu0 }
0x3966   :  { %v7607_v25 = vld [vmem:[%s15135_s27] sm:$0xff] }
0x3967   :  { %12120 = vtanh.f32 %v7248_v27  ;;  %v11516_v51 = vpack.c.bf16 %v7608_v31, %v7607_v25  ;;  %v7876_v25 = vld [vmem:[%s15139_s11 + $0x18] sm:$0xff] }
0x3971   :  { %v12121_v54 = vpop.eup %12120 }
0x3972   :  { %10081 = vmatmul.mubr.msk.f32.vlgmr.msra.gmra.mrb[62].mxu1 %vm772_vm8, %v12121_v54 }
0x3973   :  { %11463 = vmatpush3.bf16.msra.mxu1 %v11462_v48  ;;  %10107 = vmatprep.mubr.msk.f32.mxu1 %vm12614_vm0, %v12615_v10  ;;  %v7609_v48 = vld [vmem:[%s15135_s27 + $0x10] sm:$0xff] }
0x3974   :  { %11464 = vmatprep.subr.bf16.mxu1 %v12613_v3  ;;  %v11519_v54 = vpack.c.bf16 %v7610_v44, %v7609_v48 }
0x3977   :  { %11466 = vmatpush3.bf16.msra.mxu1 %v11465_v33  ;;  %v7611_v33 = vld [vmem:[%s15135_s27 + $0x20] sm:$0xff] }
0x3978   :  { %11467 = vmatprep.subr.bf16.mxu1 %v12613_v3  ;;  %v11522_v52 = vpack.c.bf16 %v7612_v41, %v7611_v33  ;;  %v8212_v33 = vrot.slane %v14480_v5, 1 }
0x397b   :  { %11469 = vmatpush3.bf16.msra.mxu1 %v11468_v23  ;;  %v7613_v23 = vld [vmem:[%s15135_s27 + $0x30] sm:$0xff] }
0x397c   :  { %11470 = vmatprep.subr.bf16.mxu1 %v12613_v3  ;;  %v11525_v53 = vpack.c.bf16 %v7614_v47, %v7613_v23  ;;  %v8191_v47 = vrot.slane %v14573_v18, 5 }
0x397f   :  { %11472 = vmatpush3.bf16.msra.mxu1 %v11471_v55  ;;  %v7615_v55 = vld [vmem:[%s15136_s2] sm:$0xff] }
0x3980   :  { %11473 = vmatprep.subr.bf16.mxu1 %v12613_v3 }
0x3983   :  { %11475 = vmatpush3.bf16.msra.mxu1 %v11474_v15  ;;  %v11528_v15 = vpack.c.bf16 %v7616_v35, %v7615_v55 }
0x3984   :  { %11476 = vmatprep.subr.bf16.mxu1 %v12613_v3 }
0x3987   :  { %11478 = vmatpush3.bf16.msra.mxu1 %v11477_v62  ;;  %v8691_v62 = vld [vmem:[#allocation2] ss:$0 sm:$0xff] }
0x3988   :  { %11491 = vmatprep.subr.bf16.mxu1 %v12613_v3 }
0x398a   :  { %10108 = vmatmul.mubr.msk.f32.vlgmr.msra.gmra.mrb[64].mxu1 %vm1114_vm10, %v14802_v28 }
0x398b   :  { %10137 = vmatprep.mubr.msk.f32.mxu1 %vm12614_vm0, %v12615_v10  ;;  %11493 = vmatpush3.bf16.msra.mxu1 %v11492_v46 }
0x398c   :  { %11494 = vmatprep.subr.bf16.mxu1 %v12613_v3 }
0x398f   :  { %11496 = vmatpush3.bf16.msra.mxu1 %v11495_v30 }
0x3990   :  { %11515 = vmatprep.subr.bf16.mxu1 %v12613_v3 }
0x39d9   :  { %v7509_v63 = vpop.f32.mrb[68].mxu0 }
0x39da   :  { %v10128_v14 = vpop.f32.mrb[69].mxu0 }
0x39fa   :  { %v14925_v7 = vpop.f32.mrb[70].mxu0 }
0x39fb   :  { %v10166_v28 = vpop.f32.mrb[71].mxu0  ;;  %v7696_v8 = vrot.slane %v14925_v7, %v13185_v29  ;;  %v7700_v60 = vrot.slane %v14925_v7, %v13188_v32 }
0x39fd   :  { %v7701_v46 = vsel %vm412_vm1, %v7696_v8, %v7700_v60  ;;  %v8220_v60 = vrot.slane %v14615_v17, 4 }
0x3a12   :  { %v14927_v49 = vpop.f32.mrb[72].mxu0 }
0x3a13   :  { %v10223_v26 = vpop.f32.mrb[73].mxu0  ;;  %v7955_v41 = vrot.slane %v14927_v49, %v13188_v32 }
0x3a14   :  { %v7865_v26 = vld [vmem:[%s15138_s13] sm:$0xff] }
0x3a22   :  { %v14929_v42 = vpop.f32.mrb[74].mxu0 }
0x3a23   :  { %v10272_v34 = vpop.f32.mrb[75].mxu0 }
0x3a24   :  { %v7866_v34 = vld [vmem:[%s15138_s13 + $0x8] sm:$0xff] }
0x3a2d   :  { %v7148_v61 = vpop.f32.mrb[60].mxu1 }
0x3a2e   :  { %v7149_v59 = vadd.f32 %v8683_v16, %v7148_v61  ;;  %v10044_v38 = vpop.f32.mrb[61].mxu1  ;;  %v11552_v16 = vpack.c.bf16 %v7866_v34, %v7865_v26  ;;  %v7867_v61 = vld [vmem:[%s15138_s13 + $0x10] sm:$0xff] }
0x3a30   :  { %7153 = vst.msk [vmem:[#allocation28] sm:$0x3] %vm7152_vm14, %v7149_v59  ;;  %v7868_v59 = vld [vmem:[%s15138_s13 + $0x18] sm:$0xff] }
0x3a31   :  { %v11555_v7 = vpack.c.bf16 %v7868_v59, %v7867_v61 }
0x3a45   :  { %v7327_v56 = vpop.f32.mrb[62].mxu1 }
0x3a46   :  { %v7328_v1 = vadd.f32 %v8687_v21, %v7327_v56  ;;  %v10082_v11 = vpop.f32.mrb[63].mxu1  ;;  %v7869_v21 = vld [vmem:[%s15138_s13 + $0x20] sm:$0xff]  ;;  %v7870_v56 = vld [vmem:[%s15138_s13 + $0x28] sm:$0xff] }
0x3a47   :  { %v7871_v11 = vld [vmem:[%s15138_s13 + $0x30] sm:$0xff] }
0x3a48   :  { %7332 = vst.msk [vmem:[#allocation29] sm:$0x3] %vm7331_vm3, %v7328_v1  ;;  %v11558_v1 = vpack.c.bf16 %v7870_v56, %v7869_v21 }
0x3a5d   :  { %v7427_v4 = vpop.f32.mrb[64].mxu1 }
0x3a5e   :  { %v7434_v37 = vrot.slane %v7427_v4, %v13185_v29  ;;  %v7438_v0 = vrot.slane %v7427_v4, %v13188_v32  ;;  %v10109_v12 = vpop.f32.mrb[65].mxu1  ;;  %v7872_v4 = vld [vmem:[%s15138_s13 + $0x38] sm:$0xff]  ;;  %v8193_v32 = vrot.slane %v14558_v20, 4 }
0x3a5f   :  { %v7874_v12 = vld [vmem:[%s15139_s11 + $0x8] sm:$0xff] }
0x3a60   :  { %v7439_v19 = vsel %vm412_vm1, %v7434_v37, %v7438_v0  ;;  %v11561_v37 = vpack.c.bf16 %v7872_v4, %v7871_v11  ;;  %v7873_v0 = vld [vmem:[%s15139_s11] sm:$0xff] }
0x3a61   :  { %v7510_v27 = vadd.f32 %v7509_v63, %v7439_v19  ;;  %v11564_v19 = vpack.c.bf16 %v7874_v12, %v7873_v0 }
0x3a63   :  { %12122 = vtanh.f32 %v7510_v27  ;;  %v7875_v27 = vld [vmem:[%s15139_s11 + $0x10] sm:$0xff] }
0x3a64   :  { %v11567_v31 = vpack.c.bf16 %v7876_v25, %v7875_v27 }
0x3a6d   :  { %v12123_v40 = vpop.eup %12122 }
0x3a6e   :  { %10138 = vmatmul.mubr.msk.f32.vlgmr.msra.gmra.mrb[66].mxu1 %vm772_vm8, %v12123_v40  ;;  %v8187_v40 = vrot.slane %v14529_v39, 7 }
0x3a6f   :  { %11517 = vmatpush3.bf16.msra.mxu1 %v11516_v51  ;;  %10183 = vmatprep.mubr.msk.f32.mxu1 %vm12614_vm0, %v12615_v10  ;;  %v8695_v51 = vld [vmem:[#allocation3] ss:$0 sm:$0xff] }
0x3a70   :  { %11518 = vmatprep.subr.bf16.mxu1 %v12613_v3 }
0x3a73   :  { %11520 = vmatpush3.bf16.msra.mxu1 %v11519_v54 }
0x3a74   :  { %11521 = vmatprep.subr.bf16.mxu1 %v12613_v3 }
0x3a77   :  { %11523 = vmatpush3.bf16.msra.mxu1 %v11522_v52  ;;  %v8189_v52 = vrot.slane %v14514_v58, 6 }
0x3a78   :  { %11524 = vmatprep.subr.bf16.mxu1 %v12613_v3 }
0x3a7b   :  { %11526 = vmatpush3.bf16.msra.mxu1 %v11525_v53 }
0x3a7c   :  { %11527 = vmatprep.subr.bf16.mxu1 %v12613_v3 }
0x3a7e   :  { %10184 = vmatmul.mubr.msk.f32.vlgmr.msra.gmra.mrb[68].mxu1 %vm1290_vm9, %v14820_v45 }
0x3a7f   :  { %10194 = vmatprep.mubr.msk.f32.mxu1 %vm12614_vm0, %v12615_v10  ;;  %11529 = vmatpush3.bf16.msra.mxu1 %v11528_v15 }
0x3a80   :  { %11530 = vmatprep.subr.bf16.mxu1 %v12613_v3 }
0x3a83   :  { %11532 = vmatpush3.bf16.msra.mxu1 %v11531_v57  ;;  %v8216_v57 = vrot.slane %v14573_v18, 6  ;;  %v8199_v18 = vrot.slane %v14637_v13, 1 }
0x3a84   :  { %11551 = vmatprep.subr.bf16.mxu1 %v12613_v3 }
0x3b41   :  { %v7589_v63 = vpop.f32.mrb[66].mxu1 }
0x3b42   :  { %v7590_v14 = vadd.f32 %v8691_v62, %v7589_v63  ;;  %v10139_v50 = vpop.f32.mrb[67].mxu1 }
0x3b43   :  { %v8197_v50 = vrot.slane %v14602_v43, 2 }
0x3b44   :  { %7594 = vst.msk [vmem:[%s15137_s9] sm:$0xff] %vm7593_vm4, %v7590_v14 }
0x3b51   :  { %v7768_v9 = vpop.f32.mrb[68].mxu1 }
0x3b52   :  { %v7769_v30 = vadd.f32 %v7768_v9, %v7701_v46  ;;  %v10185_v28 = vpop.f32.mrb[69].mxu1 }
0x3b53   :  { %v8222_v28 = vrot.slane %v14602_v43, 3  ;;  %v8309_v43 = vrot.slane %v14929_v42, 4 }
0x3b54   :  { %12124 = vtanh.f32 %v7769_v30 }
0x3b5e   :  { %v12125_v38 = vpop.eup %12124 }
0x3b5f   :  { %10195 = vmatmul.mubr.msk.f32.vlgmr.msra.gmra.mrb[70].mxu1 %vm772_vm8, %v12125_v38 }
0x3b60   :  { %11553 = vmatpush3.bf16.msra.mxu1 %v11552_v16  ;;  %10240 = vmatprep.mubr.msk.f32.mxu1 %vm12614_vm0, %v12615_v10 }
0x3b61   :  { %11554 = vmatprep.subr.bf16.mxu1 %v12613_v3 }
0x3b64   :  { %11556 = vmatpush3.bf16.msra.mxu1 %v11555_v7 }
0x3b65   :  { %11557 = vmatprep.subr.bf16.mxu1 %v12613_v3 }
0x3b68   :  { %11559 = vmatpush3.bf16.msra.mxu1 %v11558_v1 }
0x3b69   :  { %11560 = vmatprep.subr.bf16.mxu1 %v12613_v3 }
0x3b6c   :  { %11562 = vmatpush3.bf16.msra.mxu1 %v11561_v37 }
0x3b6d   :  { %11563 = vmatprep.subr.bf16.mxu1 %v12613_v3 }
0x3b6f   :  { %10241 = vmatmul.mubr.msk.f32.vlgmr.msra.gmra.mrb[72].mxu1 %vm1290_vm9, %v14820_v45  ;;  %vm8201_vm9 = vcmask 1040384  }
0x3b70   :  { %10251 = vmatprep.mubr.msk.f32.mxu1 %vm12614_vm0, %v12615_v10  ;;  %11565 = vmatpush3.bf16.msra.mxu1 %v11564_v19  ;;  %v8202_v54 = vsel %vm8201_vm9, %v14480_v5, %v8187_v40  ;;  %v8226_v53 = vsel %vm8201_vm9, %v8212_v33, %v14529_v39  ;;  %v8214_v5 = vrot.slane %v14514_v58, 7  ;;  %v8195_v39 = vrot.slane %v14615_v17, 3 }
0x3b71   :  { %11566 = vmatprep.subr.bf16.mxu1 %v12613_v3  ;;  %v7951_v3 = vrot.slane %v14927_v49, %v13185_v29  ;;  %v8203_v23 = vsel %vm2868_vm12, %v8202_v54, %v8189_v52  ;;  %v8218_v58 = vrot.slane %v14558_v20, 5  ;;  %v8224_v17 = vrot.slane %v14637_v13, 2 }
0x3b72   :  { %v8205_v24 = vsel %vm8204_vm5, %v8203_v23, %v8191_v47  ;;  %v8227_v49 = vsel %vm2868_vm12, %v8226_v53, %v8214_v5  ;;  %vm8210_vm12 = vcmask 1046528  }
0x3b73   :  { %v7956_v55 = vsel %vm412_vm1, %v7951_v3, %v7955_v41  ;;  %v8206_v62 = vsel %vm412_vm1, %v8205_v24, %v8193_v32  ;;  %v8228_v63 = vsel %vm8204_vm5, %v8227_v49, %v8216_v57 }
0x3b74   :  { %11568 = vmatpush3.bf16.msra.mxu1 %v11567_v31  ;;  %v8208_v14 = vsel %vm8207_vm6, %v8206_v62, %v8195_v39  ;;  %v8229_v8 = vsel %vm412_vm1, %v8228_v63, %v8218_v58 }
0x3b75   :  { %10273 = vmatprep.subr.mxu1 %v12615_v10  ;;  %v8209_v46 = vsel %vm2871_vm13, %v8208_v14, %v8197_v50  ;;  %v8230_v9 = vsel %vm8207_vm6, %v8229_v8, %v8220_v60 }
0x3b76   :  { %v8211_v26 = vsel %vm8210_vm12, %v8209_v46, %v8199_v18  ;;  %v8231_v20 = vsel %vm2871_vm13, %v8230_v9, %v8222_v28 }
0x3b77   :  { %v8232_v34 = vsel %vm8210_vm12, %v8231_v20, %v8224_v17 }
0x3c32   :  { %v7848_v48 = vpop.f32.mrb[70].mxu1 }
0x3c33   :  { %v7849_v44 = vadd.f32 %v8695_v51, %v7848_v48  ;;  %v10196_v45 = vpop.f32.mrb[71].mxu1 }
0x3c35   :  { %7852 = vst.msk [vmem:[%s12852_s1] sm:$0xff] %vm7593_vm4, %v7849_v44  ;;  %s12621_s1 = smov [#allocation29]  }
0x3c36   :  { %s8447_s21 = sshll.u32 %s12621_s1, 4  ;;  %s8448_s21 = int_to_ptr.vmem [resolvable:$true] %s8447_s21 }
0x3c37   :  { %s12458_s24 = scalar_lea.vmem %s8448_s21, 32  ;;  %p12463_p9 = scmp.lt.s32.totalorder %s8448_s21, %s8448_s21 }
0x3c38   :  { %p12459_p8 = scmp.ne.s32.totalorder %s8448_s21, %s12458_s24  ;;  %p12464_p10 = scmp.lt.s32.totalorder %s12458_s24, %s12458_s24 }
0x3c3a   :  { %p12465_p11 = por %p12464_p10, %p12463_p9 }
0x3c3c   :  { %p12466_p12 = pnand %p12465_p11, %p12459_p8 }
0x3c42   :  { %v8023_v35 = vpop.f32.mrb[72].mxu1 }
0x3c43   :  { %v8024_v6 = vadd.f32 %v8023_v35, %v7956_v55  ;;  %v10242_v15 = vpop.f32.mrb[73].mxu1 }
0x3c45   :  { %12126 = vtanh.f32 %v8024_v6 }
0x3c4f   :  { %v12127_v30 = vpop.eup %12126 }
0x3c50   :  { %10252 = vmatmul.mubr.msk.f32.vlgmr.msra.gmra.mrb[74].mxu1 %vm772_vm8, %v12127_v30 }
0x3c51   :  { %10274 = vmatpush3.xpose.msk.msra.mxu1 %vm1114_vm10, %v8211_v26  ;;  %10275 = vmatprep.mubr.msk.f32.mxu1 %vm12614_vm0, %v12615_v10 }
0x3c52   :  { %10278 = vmatprep.subr.mxu1 %v12615_v10 }
0x3c54   :  { %10276 = vmatmul.mubr.msk.f32.vlgmr.msra.gmra.mrb[76].mxu1 %vm1114_vm10, %v14929_v42 }
0x3c55   :  { %10279 = vmatpush3.xpose.msk.msra.mxu1 %vm1114_vm10, %v8232_v34  ;;  %10280 = vmatprep.mubr.msk.f32.mxu1 %vm12614_vm0, %v12615_v10 }
0x3c58   :  { %10281 = vmatmul.mubr.msk.f32.vlgmr.msra.gmra.mrb[78].mxu1 %vm1114_vm10, %v8309_v43 }
0x3c59   :  { %12469 = shalt.err (!%p12466_p12)
}
0x3c5a   :  { %s15140_s16 = sld [smem:[#allocation69_spill]] }
0x3c60   :  { %s12470_s18 = scalar_lea.hbm %s15140_s16, 32 }
0x3c61   :  { %p12471_p13 = scmp.ne.s32.totalorder %s15140_s16, %s12470_s18  ;;  %p12474_p0 = scmp.lt.u32.totalorder %s12470_s18, %s15140_s16 }
0x3c63   :  { %p12476_p1 = pnand %p12474_p0, %p12471_p13 }
0x3c65   :  { %12479 = shalt.err (!%p12476_p1)
}
0x3c66   :  { %8450 = dma.vmem_to_hbm [thread:$0]  %s8448_s21, 32, %s15140_s16, [#allocation30]  }
0x3c67   :  { %s12480_s8 = scalar_lea.vmem %s8438_s5, 32  ;;  %p12485_p3 = scmp.lt.s32.totalorder %s8438_s5, %s8438_s5 }
0x3c68   :  { %p12481_p2 = scmp.ne.s32.totalorder %s8438_s5, %s12480_s8  ;;  %p12486_p4 = scmp.lt.s32.totalorder %s12480_s8, %s12480_s8 }
0x3c6a   :  { %p12487_p5 = por %p12486_p4, %p12485_p3 }
0x3c6c   :  { %p12488_p6 = pnand %p12487_p5, %p12481_p2 }
0x3c6e   :  { %12491 = shalt.err (!%p12488_p6)
}
0x3c6f   :  { %s15141_s23 = sld [smem:[#allocation68_spill]] }
0x3c75   :  { %s12492_s6 = scalar_lea.hbm %s15141_s23, 32 }
0x3c76   :  { %p12493_p7 = scmp.ne.s32.totalorder %s15141_s23, %s12492_s6  ;;  %p12496_p8 = scmp.lt.u32.totalorder %s12492_s6, %s15141_s23 }
0x3c78   :  { %p12498_p9 = pnand %p12496_p8, %p12493_p7 }
0x3c7a   :  { %12501 = shalt.err (!%p12498_p9)
}
0x3c7b   :  { %8440 = dma.vmem_to_hbm [thread:$0]  %s8438_s5, 32, %s15141_s23, [#allocation6]   ;;  %v12623_v10 = vmov 1966171168   ;;  %v8387_v42 = vpop.permute.xlu0 %8386  ;;  %v8699_v11 = vld [vmem:[#allocation25] ss:$0 sm:$0xff] }
0x3c7c   :  { %v8391_v13 = vunpack.c.l.s4 %v12623_v10  ;;  %vm8388_vm0 = vcmp.lt.s32.totalorder %v13004_v36, %v8387_v42  ;;  %vm8107_vm10 = vcmask 23552   ;;  %vm8428_vm7 = vcmask 60416   ;;  %s12624_s30 = smov [#allocation31]  }
0x3c7d   :  { %v8389_v59 = vsel %vm8388_vm0, 1, %v12612_v2  ;;  %s8462_s26 = sshll.u32 %s12624_s30, 4  ;;  %s8463_s26 = int_to_ptr.vmem [resolvable:$true] %s8462_s26 }
0x3c7e   :  { %v8392_v16 = vunpack.c.0.s8 %v8391_v13  ;;  %s12502_s29 = scalar_lea.vmem %s8463_s26, 128  ;;  %p12507_p11 = scmp.lt.s32.totalorder %s8463_s26, %s8463_s26 }
0x3c7f   :  { %p12503_p10 = scmp.ne.s32.totalorder %s8463_s26, %s12502_s29  ;;  %p12508_p12 = scmp.lt.s32.totalorder %s12502_s29, %s12502_s29 }
0x3c80   :  { %v8395_v61 = vsub.s32 %v8392_v16, %v13182_v22 }
0x3c81   :  { %p12509_p13 = por %p12508_p12, %p12507_p11 }
0x3c82   :  { %v8396_v38 = vrot.slane %v8389_v59, %v8395_v61 }
0x3c83   :  { %p12510_p0 = pnand %p12509_p13, %p12503_p10 }
0x3c84   :  { %v8397_v7 = vcombine.high %v8396_v38, %v8396_v38  ;;  %v8404_v21 = vrot.slane %v8396_v38, %v8395_v61 }
0x3c86   :  { %vm8412_vm1 = vcmp.ne.s32.totalorder %v8404_v21, 0  ;;  %v8411_v56 = vrot.slane %v8397_v7, %v8395_v61 }
0x3c87   :  { %v8414_v1 = vsel %vm8412_vm1, 1, %v12612_v2 }
0x3c88   :  { %vm8413_vm8 = vcmp.ne.s32.totalorder %v8411_v56, 0  ;;  %v8419_v4 = vrot.slane %v8414_v1, %v13185_v29 }
0x3c89   :  { %v8415_v37 = vsel %vm8413_vm8, 1, %v12612_v2 }
0x3c8a   :  { %vm8424_vm13 = vcmp.eq.s32.totalorder %v8419_v4, 1  ;;  %v8423_v12 = vrot.slane %v8415_v37, %v13185_v29 }
0x3c8c   :  { %vm8425_vm15 = vcmp.eq.s32.totalorder %v8423_v12, 1 }
0x3d23   :  { %v8103_v0 = vpop.f32.mrb[74].mxu1 }
0x3d24   :  { %v8104_v36 = vadd.f32 %v8699_v11, %v8103_v0  ;;  %v10253_v22 = vpop.f32.mrb[75].mxu1 }
0x3d26   :  { %8108 = vst.msk [vmem:[%s12857_s10] sm:$0xff] %vm8107_vm10, %v8104_v36 }
0x3d27   :  { %v8305_v19 = vpop.f32.mrb[76].mxu1 }
0x3d28   :  { %v8426_v27 = vsel %vm8424_vm13, %v8305_v19, -1e+09  ;;  %v10277_v25 = vpop.f32.mrb[77].mxu1 }
0x3d29   :  { %8429 = vst.msk [vmem:[#allocation31] sm:$0xf] %vm8428_vm7, %v8426_v27 }
0x3d2b   :  { %v8381_v31 = vpop.f32.mrb[78].mxu1 }
0x3d2c   :  { %v8427_v51 = vsel %vm8425_vm15, %v8381_v31, -1e+09  ;;  %v10282_v2 = vpop.f32.mrb[79].mxu1 }
0x3d2d   :  { %8430 = vst.msk [vmem:[#allocation31 + $0x4] sm:$0xf] %vm8428_vm7, %v8427_v51 }
0x3d2e   :  { %12513 = shalt.err (!%p12510_p0)
}
0x3d2f   :  { %s12514_s10 = scalar_lea.hbm %s12862_s15, 128 }
0x3d30   :  { %p12515_p1 = scmp.ne.s32.totalorder %s12862_s15, %s12514_s10  ;;  %p12518_p2 = scmp.lt.u32.totalorder %s12514_s10, %s12862_s15 }
0x3d32   :  { %p12520_p3 = pnand %p12518_p2, %p12515_p1 }
0x3d34   :  { %12523 = shalt.err (!%p12520_p3)
}
0x3d35   :  { %s12625_s4 = smov 4  }
0x3d36   :  { %8468 = dma.vmem_to_hbm [thread:$0]  %s8463_s26, 128, %s12862_s15, [#allocation30], %s12616_s14, %s12616_s14, %s12625_s4  }
0x3d37   :  { %12540 = dma.done.wait [#allocation6], 32  }
0x3d38   :  { %12541 = vsyncadd [#allocation6], 4294967264 }
0x3d39   :  { %12542 = dma.done.wait [#allocation30], 160  }
0x3d3a   :  { %12543 = vsyncadd [#allocation30], 4294967136 }
0x3d3b   :  { %8484 = vsyncpa [#allocation5], 1 }
0x3d3c   :  { %8485 = vsyncpa [#allocation8], 1 }
0x3d3d   :  { %8486 = vsyncpa [#allocation11], 1 }
0x3d3e   :  { %8487 = vsyncpa [#allocation14], 1 }
0x3d3f   :  { %8488 = vsyncpa [#allocation17], 1 }
0x3d40   :  { %8489 = vsyncpa [#allocation20], 1 }
0x3d41   :  { %8490 = vsyncpa [#allocation23], 1 }
0x3d42   :  { %8491 = vsyncpa [#allocation26], 1 }
0x3d43   :  { %8492 = vsyncpa [#allocation6], 1 }
0x3d44   :  { %8493 = vsyncpa [#allocation30], 1 }

</bundles_post_ra>
